<compile_context>
chip_gen: v6e
topology: v6e:2x2x1
jax: 0.10.0
libtpu: 0.0.40
codegen_flags: <defaults>
</compile_context>

<pallas_src>
import jax
import jax.numpy as jnp
from jax import lax
from jax.experimental import pallas as pl
from jax.experimental.pallas import tpu as pltpu

# ---------------- configuration (scaled-down stand-in for densenet widths) ----
BATCH     = 2
IMG       = 224            # module hardcodes roi scale = 14/224, so keep 224 input
PATCH     = 16             # patchify stride of the features stand-in
PATCH_K   = PATCH * PATCH * 3
FEAT_HW   = 14             # spatial size of `features` output (stride 16)
C_FEAT    = 128            # stand-in for the 1024-ch denseblock3 output
C_NEXT    = 128            # stand-in for fc_in = 1024
NUM_ROIS  = 8              # llayer in_features = 1024*8*4  =>  8 ROIs pooled to 2x2
ROI_OUT   = 256
ROI_SCALE = 14.0 / 224.0
LIST_ATTR = [7, 3, 3, 4, 6, 3]          # TODO(synk): not defined in the source
HEADS_PAD = 128            # pad sum(LIST_ATTR)=26 head outputs to a full 128-lane tile


# ------------------------------- fused Pallas kernel --------------------------
def densenet_roi_fused_kernel(
        centers_ref,                                  # SMEM (B*NUM_ROIS*2,) int32
        p_ref,                                        # VMEM (1, 196, 768) bf16
        w_feat_ref, b_feat_ref,                       # (768,128) bf16, (1,128) f32
        w_next_ref, b_next_ref,                       # (128,128) bf16, (1,128) f32
        w_l_ref, b_l_ref,                             # (4096,256) bf16, (1,256) f32
        w_hg_ref, w_hl_ref, b_h_ref,                  # (128,128), (256,128) bf16, (1,128) f32
        o_ref,                                        # VMEM (1, 8, 128) f32
        feat_ref,                                     # scratch VMEM (14,14,128) bf16
        lx_ref):                                      # scratch VMEM (1, 4096) bf16
    b = pl.program_id(0)

    # ---- self.features stand-in: one (196,768)x(768,128) MXU matmul + ReLU ----
    feat = jnp.dot(p_ref[0], w_feat_ref[...], preferred_element_type=jnp.float32)
    feat = jnp.maximum(feat + b_feat_ref[...], 0.0)                      # (196, 128) f32
    feat_bf = feat.astype(jnp.bfloat16)

    # ---- self.layer_next stand-in (1x1 conv + ReLU) + adaptive avg pool -------
    # Computed while feat is still live; gx never leaves the kernel.
    z = jnp.dot(feat_bf, w_next_ref[...], preferred_element_type=jnp.float32)
    z = jnp.maximum(z + b_next_ref[...], 0.0)                            # (196, 128) f32
    gx = jnp.sum(z, axis=0, keepdims=True) * (1.0 / float(FEAT_HW * FEAT_HW))  # (1,128)

    # ---- stash feat as (H, W, C) so ROI pooling slices H on a leading (non-tiled)
    #      dim: pure address math, no sublane-unaligned dynamic slices. -----------
    for h in range(FEAT_HW):
        feat_ref[h] = feat_bf[h * FEAT_HW:(h + 1) * FEAT_HW, :]

    # ---- ROI max-pool (bf16 end-to-end), written at static 128-lane offsets ----
    neg = jnp.array(-jnp.inf, dtype=jnp.bfloat16)
    for r in range(NUM_ROIS):                        # static unroll
        base = (b * NUM_ROIS + r) * 2
        cy = centers_ref[base]
        cx = centers_ref[base + 1]
        win = feat_ref[pl.ds(cy - 1, 3), :, :]                           # (3, 14, 128) bf16
        widx = lax.broadcasted_iota(jnp.int32, win.shape, 1)
        c0 = jnp.max(jnp.where((widx >= cx - 1) & (widx <= cx), win, neg), axis=1)  # (3,128)
        c1 = jnp.max(jnp.where((widx >= cx) & (widx <= cx + 1), win, neg), axis=1)  # (3,128)
        lane = r * 4 * C_FEAT
        # adaptive 3->2 row bins {0,1} and {1,2}; flatten order (by, bx) row-major.
        lx_ref[:, lane + 0 * C_FEAT:lane + 1 * C_FEAT] = jnp.maximum(c0[0:1], c0[1:2])
        lx_ref[:, lane + 1 * C_FEAT:lane + 2 * C_FEAT] = jnp.maximum(c1[0:1], c1[1:2])
        lx_ref[:, lane + 2 * C_FEAT:lane + 3 * C_FEAT] = jnp.maximum(c0[1:2], c0[2:3])
        lx_ref[:, lane + 3 * C_FEAT:lane + 4 * C_FEAT] = jnp.maximum(c1[1:2], c1[2:3])

    # ---- lx = lact(llayer(flatten(roi_pool)));  lact assumed ReLU --------------
    lx = jnp.dot(lx_ref[...], w_l_ref[...], preferred_element_type=jnp.float32)
    lx = jnp.maximum(lx + b_l_ref[...], 0.0)                             # (1, 256) f32

    # ---- fusion + fc0..fc5 folded into two matmuls ------------------------------
    heads = (jnp.dot(gx.astype(jnp.bfloat16), w_hg_ref[...],
                     preferred_element_type=jnp.float32)
             + jnp.dot(lx.astype(jnp.bfloat16), w_hl_ref[...],
                       preferred_element_type=jnp.float32)
             + b_h_ref[...])                                             # (1, 128) f32
    o_ref[0] = jnp.broadcast_to(heads, (8, HEADS_PAD))


# ------------------------------- glue / wrapper --------------------------------
def _resident_spec(shape):
    """Full-array block with a constant index_map (weight stays VMEM-resident)."""
    zeros = (0,) * len(shape)
    return pl.BlockSpec(shape, lambda bi, ctr, _z=zeros: _z)


def roi_centers(lm):
    """lm: (B, NUM_ROIS, 2) landmark (x, y) pixel coords -> flat int32 feature coords."""
    c = jnp.round(lm * ROI_SCALE).astype(jnp.int32)
    cx = jnp.clip(c[..., 0], 1, FEAT_HW - 2)
    cy = jnp.clip(c[..., 1], 1, FEAT_HW - 2)
    return jnp.stack([cy, cx], axis=-1).reshape(-1)   # (B*NUM_ROIS*2,) [row, col] per ROI


def init_params(key):
    ks = jax.random.split(key, 5)
    nattr = sum(LIST_ATTR)

    def lin(k, fan_in, fan_out):
        return jax.random.normal(k, (fan_in, fan_out), jnp.float32) / jnp.sqrt(float(fan_in))

    w_feat  = lin(ks[0], PATCH_K, C_FEAT)                 # features stand-in
    w_next  = lin(ks[1], C_FEAT, C_NEXT)                  # layer_next stand-in (1x1 conv)
    w_l     = lin(ks[2], NUM_ROIS * 4 * C_FEAT, ROI_OUT)  # self.llayer
    w_fus   = lin(ks[3], C_NEXT + ROI_OUT, C_NEXT)        # self.fusion
    w_heads = lin(ks[4], C_NEXT, nattr)                   # fc0..fc5 concatenated
    b_fus   = jnp.zeros((1, C_NEXT), jnp.float32)
    b_heads = jnp.zeros((1, nattr), jnp.float32)

    # Fold fusion into the heads (no activation between them in the original forward;
    # Dropout is identity at inference).  Fold in fp32, then cast / pad to 128 lanes.
    w_fh = jnp.pad(w_fus @ w_heads, ((0, 0), (0, HEADS_PAD - nattr)))          # (384, 128)
    b_fh = jnp.pad(b_fus @ w_heads + b_heads, ((0, 0), (0, HEADS_PAD - nattr)))  # (1, 128)

    return dict(
        w_feat=w_feat.astype(jnp.bfloat16), b_feat=jnp.zeros((1, C_FEAT), jnp.float32),
        w_next=w_next.astype(jnp.bfloat16), b_next=jnp.zeros((1, C_NEXT), jnp.float32),
        w_l=w_l.astype(jnp.bfloat16),       b_l=jnp.zeros((1, ROI_OUT), jnp.float32),
        w_hg=w_fh[:C_NEXT].astype(jnp.bfloat16),      # gx rows of folded fusion@heads
        w_hl=w_fh[C_NEXT:].astype(jnp.bfloat16),      # lx rows of folded fusion@heads
        b_h=b_fh)


def densenet_roi_forward(params, x_nchw, lm):
    b = x_nchw.shape[0]
    nattr = sum(LIST_ATTR)

    # Single fused XLA relayout: NCHW -> (B, 14*14 patches, 16*16*3 patch feats), bf16.
    p = x_nchw.reshape(b, 3, FEAT_HW, PATCH, FEAT_HW, PATCH)
    p = p.transpose(0, 2, 4, 3, 5, 1).reshape(b, FEAT_HW * FEAT_HW, PATCH_K)
    p = p.astype(jnp.bfloat16)

    centers = roi_centers(lm)                            # flat 1-D int32 -> compact SMEM

    flops = 2 * b * (FEAT_HW * FEAT_HW * PATCH_K * C_FEAT
                     + FEAT_HW * FEAT_HW * C_FEAT * C_NEXT
                     + NUM_ROIS * 4 * C_FEAT * ROI_OUT
                     + C_NEXT * HEADS_PAD + ROI_OUT * HEADS_PAD)
    bytes_accessed = int(p.size * 2 + centers.size * 4 + b * 8 * HEADS_PAD * 4
                         + sum(int(v.size) * v.dtype.itemsize for v in params.values()))

    out = pl.pallas_call(
        densenet_roi_fused_kernel,
        out_shape=jax.ShapeDtypeStruct((b, 8, HEADS_PAD), jnp.float32),
        grid_spec=pltpu.PrefetchScalarGridSpec(
            num_scalar_prefetch=1,
            grid=(b,),
            in_specs=[
                pl.BlockSpec((1, FEAT_HW * FEAT_HW, PATCH_K), lambda bi, ctr: (bi, 0, 0)),
                _resident_spec((PATCH_K, C_FEAT)),
                _resident_spec((1, C_FEAT)),
                _resident_spec((C_FEAT, C_NEXT)),
                _resident_spec((1, C_NEXT)),
                _resident_spec((NUM_ROIS * 4 * C_FEAT, ROI_OUT)),
                _resident_spec((1, ROI_OUT)),
                _resident_spec((C_NEXT, HEADS_PAD)),
                _resident_spec((ROI_OUT, HEADS_PAD)),
                _resident_spec((1, HEADS_PAD)),
            ],
            out_specs=pl.BlockSpec((1, 8, HEADS_PAD), lambda bi, ctr: (bi, 0, 0)),
            scratch_shapes=[
                pltpu.VMEM((FEAT_HW, FEAT_HW, C_FEAT), jnp.bfloat16),   # feat map
                pltpu.VMEM((1, NUM_ROIS * 4 * C_FEAT), jnp.bfloat16),   # flat ROI pool
            ]),
        compiler_params=pltpu.CompilerParams(
            dimension_semantics=("parallel",),       # batch axis -> both v7x TensorCores
            vmem_limit_bytes=32 * 1024 * 1024),
        cost_estimate=pl.CostEstimate(flops=flops, transcendentals=0,
                                      bytes_accessed=bytes_accessed),
    )(centers, p, params["w_feat"], params["b_feat"], params["w_next"], params["b_next"],
      params["w_l"], params["b_l"], params["w_hg"], params["w_hl"], params["b_h"])

    heads = out[:, 0, :nattr]
    outputs, off = [], 0
    for n in LIST_ATTR:
        outputs.append(heads[:, off:off + n])
        off += n
    return outputs


if __name__ == "__main__":
    key = jax.random.PRNGKey(0)
    kx, klm, kp = jax.random.split(key, 3)
    x = jax.random.normal(kx, (BATCH, 3, IMG, IMG), jnp.float32)
    lm = jax.random.uniform(klm, (BATCH, NUM_ROIS, 2), jnp.float32,
                            minval=0.0, maxval=float(IMG))
    params = init_params(kp)

    fwd = jax.jit(densenet_roi_forward)
    outputs = jax.block_until_ready(fwd(params, x, lm))

    assert [tuple(o.shape) for o in outputs] == [(BATCH, n) for n in LIST_ATTR]
    assert all(bool(jnp.all(jnp.isfinite(o))) for o in outputs)
    print("KERNEL_OK")
</pallas_src>

<mosaic_0001>
module attributes {stable_mosaic.version = 11 : i64} {
  func.func @densenet_roi_fused_kernel(%arg0: i32, %arg1: memref<32xi32, #tpu.memory_space<smem>>, %arg2: memref<1x196x768xbf16, #tpu.memory_space<vmem>>, %arg3: memref<768x128xbf16, #tpu.memory_space<vmem>>, %arg4: memref<1x128xf32, #tpu.memory_space<vmem>>, %arg5: memref<128x128xbf16, #tpu.memory_space<vmem>>, %arg6: memref<1x128xf32, #tpu.memory_space<vmem>>, %arg7: memref<4096x256xbf16, #tpu.memory_space<vmem>>, %arg8: memref<1x256xf32, #tpu.memory_space<vmem>>, %arg9: memref<128x128xbf16, #tpu.memory_space<vmem>>, %arg10: memref<256x128xbf16, #tpu.memory_space<vmem>>, %arg11: memref<1x128xf32, #tpu.memory_space<vmem>>, %arg12: memref<1x8x128xf32, #tpu.memory_space<vmem>>, %arg13: memref<14x14x128xbf16, #tpu.memory_space<vmem>>, %arg14: memref<1x4096xbf16, #tpu.memory_space<vmem>>) attributes {dimension_semantics = [#tpu.dimension_semantics<parallel>], iteration_bounds = array<i64: 2>, scalar_prefetch = 1 : i64, scratch_operands = 2 : i64, tpu.core_type = #tpu.core_type<tc>, window_params = [{transform_indices = @transform_0, window_bounds = array<i64: 1, 196, 768>}, {pipeline_mode = #tpu.pipeline_mode<synchronous>, transform_indices = @transform_1, window_bounds = array<i64: 768, 128>}, {pipeline_mode = #tpu.pipeline_mode<synchronous>, transform_indices = @transform_2, window_bounds = array<i64: 1, 128>}, {pipeline_mode = #tpu.pipeline_mode<synchronous>, transform_indices = @transform_3, window_bounds = array<i64: 128, 128>}, {pipeline_mode = #tpu.pipeline_mode<synchronous>, transform_indices = @transform_4, window_bounds = array<i64: 1, 128>}, {pipeline_mode = #tpu.pipeline_mode<synchronous>, transform_indices = @transform_5, window_bounds = array<i64: 4096, 256>}, {pipeline_mode = #tpu.pipeline_mode<synchronous>, transform_indices = @transform_6, window_bounds = array<i64: 1, 256>}, {pipeline_mode = #tpu.pipeline_mode<synchronous>, transform_indices = @transform_7, window_bounds = array<i64: 128, 128>}, {pipeline_mode = #tpu.pipeline_mode<synchronous>, transform_indices = @transform_8, window_bounds = array<i64: 256, 128>}, {pipeline_mode = #tpu.pipeline_mode<synchronous>, transform_indices = @transform_9, window_bounds = array<i64: 1, 128>}, {transform_indices = @transform_10, window_bounds = array<i64: 1, 8, 128>}]} {
    %c0 = arith.constant 0 : index
    %c0_0 = arith.constant 0 : index
    %c0_1 = arith.constant 0 : index
    %0 = vector.load %arg2[%c0, %c0_0, %c0_1] : memref<1x196x768xbf16, #tpu.memory_space<vmem>>, vector<1x196x768xbf16>
    %1 = vector.shape_cast %0 : vector<1x196x768xbf16> to vector<196x768xbf16>
    %c0_2 = arith.constant 0 : index
    %c0_3 = arith.constant 0 : index
    %2 = vector.load %arg3[%c0_2, %c0_3] : memref<768x128xbf16, #tpu.memory_space<vmem>>, vector<768x128xbf16>
    %cst = arith.constant dense<0.000000e+00> : vector<196x128xf32>
    %3 = tpu.matmul %1, %2, %cst {dimension_numbers = #tpu.dot_dimension_numbers<[1], [0], [0], [1], [0, 0, 1, 1], [], []>} : vector<196x768xbf16>, vector<768x128xbf16>, vector<196x128xf32> -> vector<196x128xf32>
    %c0_4 = arith.constant 0 : index
    %c0_5 = arith.constant 0 : index
    %4 = vector.load %arg4[%c0_4, %c0_5] : memref<1x128xf32, #tpu.memory_space<vmem>>, vector<1x128xf32>
    %5 = vector.broadcast %4 : vector<1x128xf32> to vector<196x128xf32>
    %6 = arith.addf %3, %5 : vector<196x128xf32>
    %cst_6 = arith.constant 0.000000e+00 : f32
    %7 = vector.broadcast %cst_6 : f32 to vector<196x128xf32>
    %8 = arith.maximumf %6, %7 : vector<196x128xf32>
    %9 = arith.truncf %8 : vector<196x128xf32> to vector<196x128xbf16>
    %c0_7 = arith.constant 0 : index
    %c0_8 = arith.constant 0 : index
    %10 = vector.load %arg5[%c0_7, %c0_8] : memref<128x128xbf16, #tpu.memory_space<vmem>>, vector<128x128xbf16>
    %cst_9 = arith.constant dense<0.000000e+00> : vector<196x128xf32>
    %11 = tpu.matmul %9, %10, %cst_9 {dimension_numbers = #tpu.dot_dimension_numbers<[1], [0], [0], [1], [0, 0, 1, 1], [], []>} : vector<196x128xbf16>, vector<128x128xbf16>, vector<196x128xf32> -> vector<196x128xf32>
    %c0_10 = arith.constant 0 : index
    %c0_11 = arith.constant 0 : index
    %12 = vector.load %arg6[%c0_10, %c0_11] : memref<1x128xf32, #tpu.memory_space<vmem>>, vector<1x128xf32>
    %13 = vector.broadcast %12 : vector<1x128xf32> to vector<196x128xf32>
    %14 = arith.addf %11, %13 : vector<196x128xf32>
    %cst_12 = arith.constant 0.000000e+00 : f32
    %15 = vector.broadcast %cst_12 : f32 to vector<196x128xf32>
    %16 = arith.maximumf %14, %15 : vector<196x128xf32>
    %cst_13 = arith.constant dense<0.000000e+00> : vector<128xf32>
    %17 = vector.multi_reduction <add>, %16, %cst_13 [0] : vector<196x128xf32> to vector<128xf32>
    %18 = vector.shape_cast %17 : vector<128xf32> to vector<1x128xf32>
    %cst_14 = arith.constant 0.00510204071 : f32
    %19 = vector.broadcast %cst_14 : f32 to vector<1x128xf32>
    %20 = arith.mulf %18, %19 : vector<1x128xf32>
    %21 = vector.extract_strided_slice %9 {offsets = [0, 0], sizes = [14, 128], strides = [1, 1]} : vector<196x128xbf16> to vector<14x128xbf16>
    %c0_15 = arith.constant 0 : index
    %c0_16 = arith.constant 0 : index
    %c0_17 = arith.constant 0 : index
    %22 = vector.load %arg13[%c0_15, %c0_16, %c0_17] : memref<14x14x128xbf16, #tpu.memory_space<vmem>>, vector<1x14x128xbf16>
    %23 = vector.shape_cast %22 : vector<1x14x128xbf16> to vector<14x128xbf16>
    %24 = vector.shape_cast %21 : vector<14x128xbf16> to vector<1x14x128xbf16>
    tpu.vector_store %arg13[%c0_15, %c0_16, %c0_17], %24 {strides = array<i32>} : memref<14x14x128xbf16, #tpu.memory_space<vmem>>, vector<1x14x128xbf16>,
    %25 = vector.extract_strided_slice %9 {offsets = [14, 0], sizes = [14, 128], strides = [1, 1]} : vector<196x128xbf16> to vector<14x128xbf16>
    %c1 = arith.constant 1 : index
    %c0_18 = arith.constant 0 : index
    %c0_19 = arith.constant 0 : index
    %26 = vector.load %arg13[%c1, %c0_18, %c0_19] : memref<14x14x128xbf16, #tpu.memory_space<vmem>>, vector<1x14x128xbf16>
    %27 = vector.shape_cast %26 : vector<1x14x128xbf16> to vector<14x128xbf16>
    %28 = vector.shape_cast %25 : vector<14x128xbf16> to vector<1x14x128xbf16>
    tpu.vector_store %arg13[%c1, %c0_18, %c0_19], %28 {strides = array<i32>} : memref<14x14x128xbf16, #tpu.memory_space<vmem>>, vector<1x14x128xbf16>,
    %29 = vector.extract_strided_slice %9 {offsets = [28, 0], sizes = [14, 128], strides = [1, 1]} : vector<196x128xbf16> to vector<14x128xbf16>
    %c2 = arith.constant 2 : index
    %c0_20 = arith.constant 0 : index
    %c0_21 = arith.constant 0 : index
    %30 = vector.load %arg13[%c2, %c0_20, %c0_21] : memref<14x14x128xbf16, #tpu.memory_space<vmem>>, vector<1x14x128xbf16>
    %31 = vector.shape_cast %30 : vector<1x14x128xbf16> to vector<14x128xbf16>
    %32 = vector.shape_cast %29 : vector<14x128xbf16> to vector<1x14x128xbf16>
    tpu.vector_store %arg13[%c2, %c0_20, %c0_21], %32 {strides = array<i32>} : memref<14x14x128xbf16, #tpu.memory_space<vmem>>, vector<1x14x128xbf16>,
    %33 = vector.extract_strided_slice %9 {offsets = [42, 0], sizes = [14, 128], strides = [1, 1]} : vector<196x128xbf16> to vector<14x128xbf16>
    %c3 = arith.constant 3 : index
    %c0_22 = arith.constant 0 : index
    %c0_23 = arith.constant 0 : index
    %34 = vector.load %arg13[%c3, %c0_22, %c0_23] : memref<14x14x128xbf16, #tpu.memory_space<vmem>>, vector<1x14x128xbf16>
    %35 = vector.shape_cast %34 : vector<1x14x128xbf16> to vector<14x128xbf16>
    %36 = vector.shape_cast %33 : vector<14x128xbf16> to vector<1x14x128xbf16>
    tpu.vector_store %arg13[%c3, %c0_22, %c0_23], %36 {strides = array<i32>} : memref<14x14x128xbf16, #tpu.memory_space<vmem>>, vector<1x14x128xbf16>,
    %37 = vector.extract_strided_slice %9 {offsets = [56, 0], sizes = [14, 128], strides = [1, 1]} : vector<196x128xbf16> to vector<14x128xbf16>
    %c4 = arith.constant 4 : index
    %c0_24 = arith.constant 0 : index
    %c0_25 = arith.constant 0 : index
    %38 = vector.load %arg13[%c4, %c0_24, %c0_25] : memref<14x14x128xbf16, #tpu.memory_space<vmem>>, vector<1x14x128xbf16>
    %39 = vector.shape_cast %38 : vector<1x14x128xbf16> to vector<14x128xbf16>
    %40 = vector.shape_cast %37 : vector<14x128xbf16> to vector<1x14x128xbf16>
    tpu.vector_store %arg13[%c4, %c0_24, %c0_25], %40 {strides = array<i32>} : memref<14x14x128xbf16, #tpu.memory_space<vmem>>, vector<1x14x128xbf16>,
    %41 = vector.extract_strided_slice %9 {offsets = [70, 0], sizes = [14, 128], strides = [1, 1]} : vector<196x128xbf16> to vector<14x128xbf16>
    %c5 = arith.constant 5 : index
    %c0_26 = arith.constant 0 : index
    %c0_27 = arith.constant 0 : index
    %42 = vector.load %arg13[%c5, %c0_26, %c0_27] : memref<14x14x128xbf16, #tpu.memory_space<vmem>>, vector<1x14x128xbf16>
    %43 = vector.shape_cast %42 : vector<1x14x128xbf16> to vector<14x128xbf16>
    %44 = vector.shape_cast %41 : vector<14x128xbf16> to vector<1x14x128xbf16>
    tpu.vector_store %arg13[%c5, %c0_26, %c0_27], %44 {strides = array<i32>} : memref<14x14x128xbf16, #tpu.memory_space<vmem>>, vector<1x14x128xbf16>,
    %45 = vector.extract_strided_slice %9 {offsets = [84, 0], sizes = [14, 128], strides = [1, 1]} : vector<196x128xbf16> to vector<14x128xbf16>
    %c6 = arith.constant 6 : index
    %c0_28 = arith.constant 0 : index
    %c0_29 = arith.constant 0 : index
    %46 = vector.load %arg13[%c6, %c0_28, %c0_29] : memref<14x14x128xbf16, #tpu.memory_space<vmem>>, vector<1x14x128xbf16>
    %47 = vector.shape_cast %46 : vector<1x14x128xbf16> to vector<14x128xbf16>
    %48 = vector.shape_cast %45 : vector<14x128xbf16> to vector<1x14x128xbf16>
    tpu.vector_store %arg13[%c6, %c0_28, %c0_29], %48 {strides = array<i32>} : memref<14x14x128xbf16, #tpu.memory_space<vmem>>, vector<1x14x128xbf16>,
    %49 = vector.extract_strided_slice %9 {offsets = [98, 0], sizes = [14, 128], strides = [1, 1]} : vector<196x128xbf16> to vector<14x128xbf16>
    %c7 = arith.constant 7 : index
    %c0_30 = arith.constant 0 : index
    %c0_31 = arith.constant 0 : index
    %50 = vector.load %arg13[%c7, %c0_30, %c0_31] : memref<14x14x128xbf16, #tpu.memory_space<vmem>>, vector<1x14x128xbf16>
    %51 = vector.shape_cast %50 : vector<1x14x128xbf16> to vector<14x128xbf16>
    %52 = vector.shape_cast %49 : vector<14x128xbf16> to vector<1x14x128xbf16>
    tpu.vector_store %arg13[%c7, %c0_30, %c0_31], %52 {strides = array<i32>} : memref<14x14x128xbf16, #tpu.memory_space<vmem>>, vector<1x14x128xbf16>,
    %53 = vector.extract_strided_slice %9 {offsets = [112, 0], sizes = [14, 128], strides = [1, 1]} : vector<196x128xbf16> to vector<14x128xbf16>
    %c8 = arith.constant 8 : index
    %c0_32 = arith.constant 0 : index
    %c0_33 = arith.constant 0 : index
    %54 = vector.load %arg13[%c8, %c0_32, %c0_33] : memref<14x14x128xbf16, #tpu.memory_space<vmem>>, vector<1x14x128xbf16>
    %55 = vector.shape_cast %54 : vector<1x14x128xbf16> to vector<14x128xbf16>
    %56 = vector.shape_cast %53 : vector<14x128xbf16> to vector<1x14x128xbf16>
    tpu.vector_store %arg13[%c8, %c0_32, %c0_33], %56 {strides = array<i32>} : memref<14x14x128xbf16, #tpu.memory_space<vmem>>, vector<1x14x128xbf16>,
    %57 = vector.extract_strided_slice %9 {offsets = [126, 0], sizes = [14, 128], strides = [1, 1]} : vector<196x128xbf16> to vector<14x128xbf16>
    %c9 = arith.constant 9 : index
    %c0_34 = arith.constant 0 : index
    %c0_35 = arith.constant 0 : index
    %58 = vector.load %arg13[%c9, %c0_34, %c0_35] : memref<14x14x128xbf16, #tpu.memory_space<vmem>>, vector<1x14x128xbf16>
    %59 = vector.shape_cast %58 : vector<1x14x128xbf16> to vector<14x128xbf16>
    %60 = vector.shape_cast %57 : vector<14x128xbf16> to vector<1x14x128xbf16>
    tpu.vector_store %arg13[%c9, %c0_34, %c0_35], %60 {strides = array<i32>} : memref<14x14x128xbf16, #tpu.memory_space<vmem>>, vector<1x14x128xbf16>,
    %61 = vector.extract_strided_slice %9 {offsets = [140, 0], sizes = [14, 128], strides = [1, 1]} : vector<196x128xbf16> to vector<14x128xbf16>
    %c10 = arith.constant 10 : index
    %c0_36 = arith.constant 0 : index
    %c0_37 = arith.constant 0 : index
    %62 = vector.load %arg13[%c10, %c0_36, %c0_37] : memref<14x14x128xbf16, #tpu.memory_space<vmem>>, vector<1x14x128xbf16>
    %63 = vector.shape_cast %62 : vector<1x14x128xbf16> to vector<14x128xbf16>
    %64 = vector.shape_cast %61 : vector<14x128xbf16> to vector<1x14x128xbf16>
    tpu.vector_store %arg13[%c10, %c0_36, %c0_37], %64 {strides = array<i32>} : memref<14x14x128xbf16, #tpu.memory_space<vmem>>, vector<1x14x128xbf16>,
    %65 = vector.extract_strided_slice %9 {offsets = [154, 0], sizes = [14, 128], strides = [1, 1]} : vector<196x128xbf16> to vector<14x128xbf16>
    %c11 = arith.constant 11 : index
    %c0_38 = arith.constant 0 : index
    %c0_39 = arith.constant 0 : index
    %66 = vector.load %arg13[%c11, %c0_38, %c0_39] : memref<14x14x128xbf16, #tpu.memory_space<vmem>>, vector<1x14x128xbf16>
    %67 = vector.shape_cast %66 : vector<1x14x128xbf16> to vector<14x128xbf16>
    %68 = vector.shape_cast %65 : vector<14x128xbf16> to vector<1x14x128xbf16>
    tpu.vector_store %arg13[%c11, %c0_38, %c0_39], %68 {strides = array<i32>} : memref<14x14x128xbf16, #tpu.memory_space<vmem>>, vector<1x14x128xbf16>,
    %69 = vector.extract_strided_slice %9 {offsets = [168, 0], sizes = [14, 128], strides = [1, 1]} : vector<196x128xbf16> to vector<14x128xbf16>
    %c12 = arith.constant 12 : index
    %c0_40 = arith.constant 0 : index
    %c0_41 = arith.constant 0 : index
    %70 = vector.load %arg13[%c12, %c0_40, %c0_41] : memref<14x14x128xbf16, #tpu.memory_space<vmem>>, vector<1x14x128xbf16>
    %71 = vector.shape_cast %70 : vector<1x14x128xbf16> to vector<14x128xbf16>
    %72 = vector.shape_cast %69 : vector<14x128xbf16> to vector<1x14x128xbf16>
    tpu.vector_store %arg13[%c12, %c0_40, %c0_41], %72 {strides = array<i32>} : memref<14x14x128xbf16, #tpu.memory_space<vmem>>, vector<1x14x128xbf16>,
    %73 = vector.extract_strided_slice %9 {offsets = [182, 0], sizes = [14, 128], strides = [1, 1]} : vector<196x128xbf16> to vector<14x128xbf16>
    %c13 = arith.constant 13 : index
    %c0_42 = arith.constant 0 : index
    %c0_43 = arith.constant 0 : index
    %74 = vector.load %arg13[%c13, %c0_42, %c0_43] : memref<14x14x128xbf16, #tpu.memory_space<vmem>>, vector<1x14x128xbf16>
    %75 = vector.shape_cast %74 : vector<1x14x128xbf16> to vector<14x128xbf16>
    %76 = vector.shape_cast %73 : vector<14x128xbf16> to vector<1x14x128xbf16>
    tpu.vector_store %arg13[%c13, %c0_42, %c0_43], %76 {strides = array<i32>} : memref<14x14x128xbf16, #tpu.memory_space<vmem>>, vector<1x14x128xbf16>,
    %c8_i32 = arith.constant 8 : i32
    %77 = arith.muli %arg0, %c8_i32 : i32
    %c0_i32 = arith.constant 0 : i32
    %78 = arith.addi %77, %c0_i32 : i32
    %c2_i32 = arith.constant 2 : i32
    %79 = arith.muli %78, %c2_i32 : i32
    %80 = arith.index_cast %79 : i32 to index
    %81 = memref.load %arg1[%80] : memref<32xi32, #tpu.memory_space<smem>>
    %c1_i32 = arith.constant 1 : i32
    %82 = arith.addi %79, %c1_i32 : i32
    %83 = arith.index_cast %82 : i32 to index
    %84 = memref.load %arg1[%83] : memref<32xi32, #tpu.memory_space<smem>>
    %c1_i32_44 = arith.constant 1 : i32
    %85 = arith.subi %81, %c1_i32_44 : i32
    %86 = arith.index_cast %85 : i32 to index
    %c0_45 = arith.constant 0 : index
    %c0_46 = arith.constant 0 : index
    %87 = vector.load %arg13[%86, %c0_45, %c0_46] : memref<14x14x128xbf16, #tpu.memory_space<vmem>>, vector<3x14x128xbf16>
    %88 = tpu.iota {dimensions = array<i32: 1>} : vector<3x14x128xi32>
    %c1_i32_47 = arith.constant 1 : i32
    %89 = arith.subi %84, %c1_i32_47 : i32
    %90 = vector.broadcast %89 : i32 to vector<3x14x128xi32>
    %91 = arith.cmpi sge, %88, %90 : vector<3x14x128xi32>
    %92 = vector.broadcast %84 : i32 to vector<3x14x128xi32>
    %93 = arith.cmpi sle, %88, %92 : vector<3x14x128xi32>
    %94 = arith.andi %91, %93 : vector<3x14x128xi1>
    %cst_48 = arith.constant 0xFF80 : bf16
    %95 = vector.broadcast %cst_48 : bf16 to vector<3x14x128xbf16>
    %96 = arith.select %94, %87, %95 : vector<3x14x128xi1>, vector<3x14x128xbf16>
    %cst_49 = arith.constant dense<0xFF80> : vector<3x128xbf16>
    %97 = vector.multi_reduction <maximumf>, %96, %cst_49 [1] : vector<3x14x128xbf16> to vector<3x128xbf16>
    %98 = vector.broadcast %84 : i32 to vector<3x14x128xi32>
    %99 = arith.cmpi sge, %88, %98 : vector<3x14x128xi32>
    %c1_i32_50 = arith.constant 1 : i32
    %100 = arith.addi %84, %c1_i32_50 : i32
    %101 = vector.broadcast %100 : i32 to vector<3x14x128xi32>
    %102 = arith.cmpi sle, %88, %101 : vector<3x14x128xi32>
    %103 = arith.andi %99, %102 : vector<3x14x128xi1>
    %cst_51 = arith.constant 0xFF80 : bf16
    %104 = vector.broadcast %cst_51 : bf16 to vector<3x14x128xbf16>
    %105 = arith.select %103, %87, %104 : vector<3x14x128xi1>, vector<3x14x128xbf16>
    %cst_52 = arith.constant dense<0xFF80> : vector<3x128xbf16>
    %106 = vector.multi_reduction <maximumf>, %105, %cst_52 [1] : vector<3x14x128xbf16> to vector<3x128xbf16>
    %107 = vector.extract_strided_slice %97 {offsets = [0, 0], sizes = [1, 128], strides = [1, 1]} : vector<3x128xbf16> to vector<1x128xbf16>
    %108 = vector.extract_strided_slice %97 {offsets = [1, 0], sizes = [1, 128], strides = [1, 1]} : vector<3x128xbf16> to vector<1x128xbf16>
    %109 = arith.maximumf %107, %108 : vector<1x128xbf16>
    %c0_53 = arith.constant 0 : index
    %c0_54 = arith.constant 0 : index
    %110 = vector.load %arg14[%c0_53, %c0_54] : memref<1x4096xbf16, #tpu.memory_space<vmem>>, vector<1x128xbf16>
    tpu.vector_store %arg14[%c0_53, %c0_54], %109 {strides = array<i32>} : memref<1x4096xbf16, #tpu.memory_space<vmem>>, vector<1x128xbf16>,
    %111 = vector.extract_strided_slice %106 {offsets = [0, 0], sizes = [1, 128], strides = [1, 1]} : vector<3x128xbf16> to vector<1x128xbf16>
    %112 = vector.extract_strided_slice %106 {offsets = [1, 0], sizes = [1, 128], strides = [1, 1]} : vector<3x128xbf16> to vector<1x128xbf16>
    %113 = arith.maximumf %111, %112 : vector<1x128xbf16>
    %c0_55 = arith.constant 0 : index
    %c128 = arith.constant 128 : index
    %114 = vector.load %arg14[%c0_55, %c128] : memref<1x4096xbf16, #tpu.memory_space<vmem>>, vector<1x128xbf16>
    tpu.vector_store %arg14[%c0_55, %c128], %113 {strides = array<i32>} : memref<1x4096xbf16, #tpu.memory_space<vmem>>, vector<1x128xbf16>,
    %115 = vector.extract_strided_slice %97 {offsets = [1, 0], sizes = [1, 128], strides = [1, 1]} : vector<3x128xbf16> to vector<1x128xbf16>
    %116 = vector.extract_strided_slice %97 {offsets = [2, 0], sizes = [1, 128], strides = [1, 1]} : vector<3x128xbf16> to vector<1x128xbf16>
    %117 = arith.maximumf %115, %116 : vector<1x128xbf16>
    %c0_56 = arith.constant 0 : index
    %c256 = arith.constant 256 : index
    %118 = vector.load %arg14[%c0_56, %c256] : memref<1x4096xbf16, #tpu.memory_space<vmem>>, vector<1x128xbf16>
    tpu.vector_store %arg14[%c0_56, %c256], %117 {strides = array<i32>} : memref<1x4096xbf16, #tpu.memory_space<vmem>>, vector<1x128xbf16>,
    %119 = vector.extract_strided_slice %106 {offsets = [1, 0], sizes = [1, 128], strides = [1, 1]} : vector<3x128xbf16> to vector<1x128xbf16>
    %120 = vector.extract_strided_slice %106 {offsets = [2, 0], sizes = [1, 128], strides = [1, 1]} : vector<3x128xbf16> to vector<1x128xbf16>
    %121 = arith.maximumf %119, %120 : vector<1x128xbf16>
    %c0_57 = arith.constant 0 : index
    %c384 = arith.constant 384 : index
    %122 = vector.load %arg14[%c0_57, %c384] : memref<1x4096xbf16, #tpu.memory_space<vmem>>, vector<1x128xbf16>
    tpu.vector_store %arg14[%c0_57, %c384], %121 {strides = array<i32>} : memref<1x4096xbf16, #tpu.memory_space<vmem>>, vector<1x128xbf16>,
    %c8_i32_58 = arith.constant 8 : i32
    %123 = arith.muli %arg0, %c8_i32_58 : i32
    %c1_i32_59 = arith.constant 1 : i32
    %124 = arith.addi %123, %c1_i32_59 : i32
    %c2_i32_60 = arith.constant 2 : i32
    %125 = arith.muli %124, %c2_i32_60 : i32
    %126 = arith.index_cast %125 : i32 to index
    %127 = memref.load %arg1[%126] : memref<32xi32, #tpu.memory_space<smem>>
    %c1_i32_61 = arith.constant 1 : i32
    %128 = arith.addi %125, %c1_i32_61 : i32
    %129 = arith.index_cast %128 : i32 to index
    %130 = memref.load %arg1[%129] : memref<32xi32, #tpu.memory_space<smem>>
    %c1_i32_62 = arith.constant 1 : i32
    %131 = arith.subi %127, %c1_i32_62 : i32
    %132 = arith.index_cast %131 : i32 to index
    %c0_63 = arith.constant 0 : index
    %c0_64 = arith.constant 0 : index
    %133 = vector.load %arg13[%132, %c0_63, %c0_64] : memref<14x14x128xbf16, #tpu.memory_space<vmem>>, vector<3x14x128xbf16>
    %134 = tpu.iota {dimensions = array<i32: 1>} : vector<3x14x128xi32>
    %c1_i32_65 = arith.constant 1 : i32
    %135 = arith.subi %130, %c1_i32_65 : i32
    %136 = vector.broadcast %135 : i32 to vector<3x14x128xi32>
    %137 = arith.cmpi sge, %134, %136 : vector<3x14x128xi32>
    %138 = vector.broadcast %130 : i32 to vector<3x14x128xi32>
    %139 = arith.cmpi sle, %134, %138 : vector<3x14x128xi32>
    %140 = arith.andi %137, %139 : vector<3x14x128xi1>
    %cst_66 = arith.constant 0xFF80 : bf16
    %141 = vector.broadcast %cst_66 : bf16 to vector<3x14x128xbf16>
    %142 = arith.select %140, %133, %141 : vector<3x14x128xi1>, vector<3x14x128xbf16>
    %cst_67 = arith.constant dense<0xFF80> : vector<3x128xbf16>
    %143 = vector.multi_reduction <maximumf>, %142, %cst_67 [1] : vector<3x14x128xbf16> to vector<3x128xbf16>
    %144 = vector.broadcast %130 : i32 to vector<3x14x128xi32>
    %145 = arith.cmpi sge, %134, %144 : vector<3x14x128xi32>
    %c1_i32_68 = arith.constant 1 : i32
    %146 = arith.addi %130, %c1_i32_68 : i32
    %147 = vector.broadcast %146 : i32 to vector<3x14x128xi32>
    %148 = arith.cmpi sle, %134, %147 : vector<3x14x128xi32>
    %149 = arith.andi %145, %148 : vector<3x14x128xi1>
    %cst_69 = arith.constant 0xFF80 : bf16
    %150 = vector.broadcast %cst_69 : bf16 to vector<3x14x128xbf16>
    %151 = arith.select %149, %133, %150 : vector<3x14x128xi1>, vector<3x14x128xbf16>
    %cst_70 = arith.constant dense<0xFF80> : vector<3x128xbf16>
    %152 = vector.multi_reduction <maximumf>, %151, %cst_70 [1] : vector<3x14x128xbf16> to vector<3x128xbf16>
    %153 = vector.extract_strided_slice %143 {offsets = [0, 0], sizes = [1, 128], strides = [1, 1]} : vector<3x128xbf16> to vector<1x128xbf16>
    %154 = vector.extract_strided_slice %143 {offsets = [1, 0], sizes = [1, 128], strides = [1, 1]} : vector<3x128xbf16> to vector<1x128xbf16>
    %155 = arith.maximumf %153, %154 : vector<1x128xbf16>
    %c0_71 = arith.constant 0 : index
    %c512 = arith.constant 512 : index
    %156 = vector.load %arg14[%c0_71, %c512] : memref<1x4096xbf16, #tpu.memory_space<vmem>>, vector<1x128xbf16>
    tpu.vector_store %arg14[%c0_71, %c512], %155 {strides = array<i32>} : memref<1x4096xbf16, #tpu.memory_space<vmem>>, vector<1x128xbf16>,
    %157 = vector.extract_strided_slice %152 {offsets = [0, 0], sizes = [1, 128], strides = [1, 1]} : vector<3x128xbf16> to vector<1x128xbf16>
    %158 = vector.extract_strided_slice %152 {offsets = [1, 0], sizes = [1, 128], strides = [1, 1]} : vector<3x128xbf16> to vector<1x128xbf16>
    %159 = arith.maximumf %157, %158 : vector<1x128xbf16>
    %c0_72 = arith.constant 0 : index
    %c640 = arith.constant 640 : index
    %160 = vector.load %arg14[%c0_72, %c640] : memref<1x4096xbf16, #tpu.memory_space<vmem>>, vector<1x128xbf16>
    tpu.vector_store %arg14[%c0_72, %c640], %159 {strides = array<i32>} : memref<1x4096xbf16, #tpu.memory_space<vmem>>, vector<1x128xbf16>,
    %161 = vector.extract_strided_slice %143 {offsets = [1, 0], sizes = [1, 128], strides = [1, 1]} : vector<3x128xbf16> to vector<1x128xbf16>
    %162 = vector.extract_strided_slice %143 {offsets = [2, 0], sizes = [1, 128], strides = [1, 1]} : vector<3x128xbf16> to vector<1x128xbf16>
    %163 = arith.maximumf %161, %162 : vector<1x128xbf16>
    %c0_73 = arith.constant 0 : index
    %c768 = arith.constant 768 : index
    %164 = vector.load %arg14[%c0_73, %c768] : memref<1x4096xbf16, #tpu.memory_space<vmem>>, vector<1x128xbf16>
    tpu.vector_store %arg14[%c0_73, %c768], %163 {strides = array<i32>} : memref<1x4096xbf16, #tpu.memory_space<vmem>>, vector<1x128xbf16>,
    %165 = vector.extract_strided_slice %152 {offsets = [1, 0], sizes = [1, 128], strides = [1, 1]} : vector<3x128xbf16> to vector<1x128xbf16>
    %166 = vector.extract_strided_slice %152 {offsets = [2, 0], sizes = [1, 128], strides = [1, 1]} : vector<3x128xbf16> to vector<1x128xbf16>
    %167 = arith.maximumf %165, %166 : vector<1x128xbf16>
    %c0_74 = arith.constant 0 : index
    %c896 = arith.constant 896 : index
    %168 = vector.load %arg14[%c0_74, %c896] : memref<1x4096xbf16, #tpu.memory_space<vmem>>, vector<1x128xbf16>
    tpu.vector_store %arg14[%c0_74, %c896], %167 {strides = array<i32>} : memref<1x4096xbf16, #tpu.memory_space<vmem>>, vector<1x128xbf16>,
    %c8_i32_75 = arith.constant 8 : i32
    %169 = arith.muli %arg0, %c8_i32_75 : i32
    %c2_i32_76 = arith.constant 2 : i32
    %170 = arith.addi %169, %c2_i32_76 : i32
    %c2_i32_77 = arith.constant 2 : i32
    %171 = arith.muli %170, %c2_i32_77 : i32
    %172 = arith.index_cast %171 : i32 to index
    %173 = memref.load %arg1[%172] : memref<32xi32, #tpu.memory_space<smem>>
    %c1_i32_78 = arith.constant 1 : i32
    %174 = arith.addi %171, %c1_i32_78 : i32
    %175 = arith.index_cast %174 : i32 to index
    %176 = memref.load %arg1[%175] : memref<32xi32, #tpu.memory_space<smem>>
    %c1_i32_79 = arith.constant 1 : i32
    %177 = arith.subi %173, %c1_i32_79 : i32
    %178 = arith.index_cast %177 : i32 to index
    %c0_80 = arith.constant 0 : index
    %c0_81 = arith.constant 0 : index
    %179 = vector.load %arg13[%178, %c0_80, %c0_81] : memref<14x14x128xbf16, #tpu.memory_space<vmem>>, vector<3x14x128xbf16>
    %180 = tpu.iota {dimensions = array<i32: 1>} : vector<3x14x128xi32>
    %c1_i32_82 = arith.constant 1 : i32
    %181 = arith.subi %176, %c1_i32_82 : i32
    %182 = vector.broadcast %181 : i32 to vector<3x14x128xi32>
    %183 = arith.cmpi sge, %180, %182 : vector<3x14x128xi32>
    %184 = vector.broadcast %176 : i32 to vector<3x14x128xi32>
    %185 = arith.cmpi sle, %180, %184 : vector<3x14x128xi32>
    %186 = arith.andi %183, %185 : vector<3x14x128xi1>
    %cst_83 = arith.constant 0xFF80 : bf16
    %187 = vector.broadcast %cst_83 : bf16 to vector<3x14x128xbf16>
    %188 = arith.select %186, %179, %187 : vector<3x14x128xi1>, vector<3x14x128xbf16>
    %cst_84 = arith.constant dense<0xFF80> : vector<3x128xbf16>
    %189 = vector.multi_reduction <maximumf>, %188, %cst_84 [1] : vector<3x14x128xbf16> to vector<3x128xbf16>
    %190 = vector.broadcast %176 : i32 to vector<3x14x128xi32>
    %191 = arith.cmpi sge, %180, %190 : vector<3x14x128xi32>
    %c1_i32_85 = arith.constant 1 : i32
    %192 = arith.addi %176, %c1_i32_85 : i32
    %193 = vector.broadcast %192 : i32 to vector<3x14x128xi32>
    %194 = arith.cmpi sle, %180, %193 : vector<3x14x128xi32>
    %195 = arith.andi %191, %194 : vector<3x14x128xi1>
    %cst_86 = arith.constant 0xFF80 : bf16
    %196 = vector.broadcast %cst_86 : bf16 to vector<3x14x128xbf16>
    %197 = arith.select %195, %179, %196 : vector<3x14x128xi1>, vector<3x14x128xbf16>
    %cst_87 = arith.constant dense<0xFF80> : vector<3x128xbf16>
    %198 = vector.multi_reduction <maximumf>, %197, %cst_87 [1] : vector<3x14x128xbf16> to vector<3x128xbf16>
    %199 = vector.extract_strided_slice %189 {offsets = [0, 0], sizes = [1, 128], strides = [1, 1]} : vector<3x128xbf16> to vector<1x128xbf16>
    %200 = vector.extract_strided_slice %189 {offsets = [1, 0], sizes = [1, 128], strides = [1, 1]} : vector<3x128xbf16> to vector<1x128xbf16>
    %201 = arith.maximumf %199, %200 : vector<1x128xbf16>
    %c0_88 = arith.constant 0 : index
    %c1024 = arith.constant 1024 : index
    %202 = vector.load %arg14[%c0_88, %c1024] : memref<1x4096xbf16, #tpu.memory_space<vmem>>, vector<1x128xbf16>
    tpu.vector_store %arg14[%c0_88, %c1024], %201 {strides = array<i32>} : memref<1x4096xbf16, #tpu.memory_space<vmem>>, vector<1x128xbf16>,
    %203 = vector.extract_strided_slice %198 {offsets = [0, 0], sizes = [1, 128], strides = [1, 1]} : vector<3x128xbf16> to vector<1x128xbf16>
    %204 = vector.extract_strided_slice %198 {offsets = [1, 0], sizes = [1, 128], strides = [1, 1]} : vector<3x128xbf16> to vector<1x128xbf16>
    %205 = arith.maximumf %203, %204 : vector<1x128xbf16>
    %c0_89 = arith.constant 0 : index
    %c1152 = arith.constant 1152 : index
    %206 = vector.load %arg14[%c0_89, %c1152] : memref<1x4096xbf16, #tpu.memory_space<vmem>>, vector<1x128xbf16>
    tpu.vector_store %arg14[%c0_89, %c1152], %205 {strides = array<i32>} : memref<1x4096xbf16, #tpu.memory_space<vmem>>, vector<1x128xbf16>,
    %207 = vector.extract_strided_slice %189 {offsets = [1, 0], sizes = [1, 128], strides = [1, 1]} : vector<3x128xbf16> to vector<1x128xbf16>
    %208 = vector.extract_strided_slice %189 {offsets = [2, 0], sizes = [1, 128], strides = [1, 1]} : vector<3x128xbf16> to vector<1x128xbf16>
    %209 = arith.maximumf %207, %208 : vector<1x128xbf16>
    %c0_90 = arith.constant 0 : index
    %c1280 = arith.constant 1280 : index
    %210 = vector.load %arg14[%c0_90, %c1280] : memref<1x4096xbf16, #tpu.memory_space<vmem>>, vector<1x128xbf16>
    tpu.vector_store %arg14[%c0_90, %c1280], %209 {strides = array<i32>} : memref<1x4096xbf16, #tpu.memory_space<vmem>>, vector<1x128xbf16>,
    %211 = vector.extract_strided_slice %198 {offsets = [1, 0], sizes = [1, 128], strides = [1, 1]} : vector<3x128xbf16> to vector<1x128xbf16>
    %212 = vector.extract_strided_slice %198 {offsets = [2, 0], sizes = [1, 128], strides = [1, 1]} : vector<3x128xbf16> to vector<1x128xbf16>
    %213 = arith.maximumf %211, %212 : vector<1x128xbf16>
    %c0_91 = arith.constant 0 : index
    %c1408 = arith.constant 1408 : index
    %214 = vector.load %arg14[%c0_91, %c1408] : memref<1x4096xbf16, #tpu.memory_space<vmem>>, vector<1x128xbf16>
    tpu.vector_store %arg14[%c0_91, %c1408], %213 {strides = array<i32>} : memref<1x4096xbf16, #tpu.memory_space<vmem>>, vector<1x128xbf16>,
    %c8_i32_92 = arith.constant 8 : i32
    %215 = arith.muli %arg0, %c8_i32_92 : i32
    %c3_i32 = arith.constant 3 : i32
    %216 = arith.addi %215, %c3_i32 : i32
    %c2_i32_93 = arith.constant 2 : i32
    %217 = arith.muli %216, %c2_i32_93 : i32
    %218 = arith.index_cast %217 : i32 to index
    %219 = memref.load %arg1[%218] : memref<32xi32, #tpu.memory_space<smem>>
    %c1_i32_94 = arith.constant 1 : i32
    %220 = arith.addi %217, %c1_i32_94 : i32
    %221 = arith.index_cast %220 : i32 to index
    %222 = memref.load %arg1[%221] : memref<32xi32, #tpu.memory_space<smem>>
    %c1_i32_95 = arith.constant 1 : i32
    %223 = arith.subi %219, %c1_i32_95 : i32
    %224 = arith.index_cast %223 : i32 to index
    %c0_96 = arith.constant 0 : index
    %c0_97 = arith.constant 0 : index
    %225 = vector.load %arg13[%224, %c0_96, %c0_97] : memref<14x14x128xbf16, #tpu.memory_space<vmem>>, vector<3x14x128xbf16>
    %226 = tpu.iota {dimensions = array<i32: 1>} : vector<3x14x128xi32>
    %c1_i32_98 = arith.constant 1 : i32
    %227 = arith.subi %222, %c1_i32_98 : i32
    %228 = vector.broadcast %227 : i32 to vector<3x14x128xi32>
    %229 = arith.cmpi sge, %226, %228 : vector<3x14x128xi32>
    %230 = vector.broadcast %222 : i32 to vector<3x14x128xi32>
    %231 = arith.cmpi sle, %226, %230 : vector<3x14x128xi32>
    %232 = arith.andi %229, %231 : vector<3x14x128xi1>
    %cst_99 = arith.constant 0xFF80 : bf16
    %233 = vector.broadcast %cst_99 : bf16 to vector<3x14x128xbf16>
    %234 = arith.select %232, %225, %233 : vector<3x14x128xi1>, vector<3x14x128xbf16>
    %cst_100 = arith.constant dense<0xFF80> : vector<3x128xbf16>
    %235 = vector.multi_reduction <maximumf>, %234, %cst_100 [1] : vector<3x14x128xbf16> to vector<3x128xbf16>
    %236 = vector.broadcast %222 : i32 to vector<3x14x128xi32>
    %237 = arith.cmpi sge, %226, %236 : vector<3x14x128xi32>
    %c1_i32_101 = arith.constant 1 : i32
    %238 = arith.addi %222, %c1_i32_101 : i32
    %239 = vector.broadcast %238 : i32 to vector<3x14x128xi32>
    %240 = arith.cmpi sle, %226, %239 : vector<3x14x128xi32>
    %241 = arith.andi %237, %240 : vector<3x14x128xi1>
    %cst_102 = arith.constant 0xFF80 : bf16
    %242 = vector.broadcast %cst_102 : bf16 to vector<3x14x128xbf16>
    %243 = arith.select %241, %225, %242 : vector<3x14x128xi1>, vector<3x14x128xbf16>
    %cst_103 = arith.constant dense<0xFF80> : vector<3x128xbf16>
    %244 = vector.multi_reduction <maximumf>, %243, %cst_103 [1] : vector<3x14x128xbf16> to vector<3x128xbf16>
    %245 = vector.extract_strided_slice %235 {offsets = [0, 0], sizes = [1, 128], strides = [1, 1]} : vector<3x128xbf16> to vector<1x128xbf16>
    %246 = vector.extract_strided_slice %235 {offsets = [1, 0], sizes = [1, 128], strides = [1, 1]} : vector<3x128xbf16> to vector<1x128xbf16>
    %247 = arith.maximumf %245, %246 : vector<1x128xbf16>
    %c0_104 = arith.constant 0 : index
    %c1536 = arith.constant 1536 : index
    %248 = vector.load %arg14[%c0_104, %c1536] : memref<1x4096xbf16, #tpu.memory_space<vmem>>, vector<1x128xbf16>
    tpu.vector_store %arg14[%c0_104, %c1536], %247 {strides = array<i32>} : memref<1x4096xbf16, #tpu.memory_space<vmem>>, vector<1x128xbf16>,
    %249 = vector.extract_strided_slice %244 {offsets = [0, 0], sizes = [1, 128], strides = [1, 1]} : vector<3x128xbf16> to vector<1x128xbf16>
    %250 = vector.extract_strided_slice %244 {offsets = [1, 0], sizes = [1, 128], strides = [1, 1]} : vector<3x128xbf16> to vector<1x128xbf16>
    %251 = arith.maximumf %249, %250 : vector<1x128xbf16>
    %c0_105 = arith.constant 0 : index
    %c1664 = arith.constant 1664 : index
    %252 = vector.load %arg14[%c0_105, %c1664] : memref<1x4096xbf16, #tpu.memory_space<vmem>>, vector<1x128xbf16>
    tpu.vector_store %arg14[%c0_105, %c1664], %251 {strides = array<i32>} : memref<1x4096xbf16, #tpu.memory_space<vmem>>, vector<1x128xbf16>,
    %253 = vector.extract_strided_slice %235 {offsets = [1, 0], sizes = [1, 128], strides = [1, 1]} : vector<3x128xbf16> to vector<1x128xbf16>
    %254 = vector.extract_strided_slice %235 {offsets = [2, 0], sizes = [1, 128], strides = [1, 1]} : vector<3x128xbf16> to vector<1x128xbf16>
    %255 = arith.maximumf %253, %254 : vector<1x128xbf16>
    %c0_106 = arith.constant 0 : index
    %c1792 = arith.constant 1792 : index
    %256 = vector.load %arg14[%c0_106, %c1792] : memref<1x4096xbf16, #tpu.memory_space<vmem>>, vector<1x128xbf16>
    tpu.vector_store %arg14[%c0_106, %c1792], %255 {strides = array<i32>} : memref<1x4096xbf16, #tpu.memory_space<vmem>>, vector<1x128xbf16>,
    %257 = vector.extract_strided_slice %244 {offsets = [1, 0], sizes = [1, 128], strides = [1, 1]} : vector<3x128xbf16> to vector<1x128xbf16>
    %258 = vector.extract_strided_slice %244 {offsets = [2, 0], sizes = [1, 128], strides = [1, 1]} : vector<3x128xbf16> to vector<1x128xbf16>
    %259 = arith.maximumf %257, %258 : vector<1x128xbf16>
    %c0_107 = arith.constant 0 : index
    %c1920 = arith.constant 1920 : index
    %260 = vector.load %arg14[%c0_107, %c1920] : memref<1x4096xbf16, #tpu.memory_space<vmem>>, vector<1x128xbf16>
    tpu.vector_store %arg14[%c0_107, %c1920], %259 {strides = array<i32>} : memref<1x4096xbf16, #tpu.memory_space<vmem>>, vector<1x128xbf16>,
    %c8_i32_108 = arith.constant 8 : i32
    %261 = arith.muli %arg0, %c8_i32_108 : i32
    %c4_i32 = arith.constant 4 : i32
    %262 = arith.addi %261, %c4_i32 : i32
    %c2_i32_109 = arith.constant 2 : i32
    %263 = arith.muli %262, %c2_i32_109 : i32
    %264 = arith.index_cast %263 : i32 to index
    %265 = memref.load %arg1[%264] : memref<32xi32, #tpu.memory_space<smem>>
    %c1_i32_110 = arith.constant 1 : i32
    %266 = arith.addi %263, %c1_i32_110 : i32
    %267 = arith.index_cast %266 : i32 to index
    %268 = memref.load %arg1[%267] : memref<32xi32, #tpu.memory_space<smem>>
    %c1_i32_111 = arith.constant 1 : i32
    %269 = arith.subi %265, %c1_i32_111 : i32
    %270 = arith.index_cast %269 : i32 to index
    %c0_112 = arith.constant 0 : index
    %c0_113 = arith.constant 0 : index
    %271 = vector.load %arg13[%270, %c0_112, %c0_113] : memref<14x14x128xbf16, #tpu.memory_space<vmem>>, vector<3x14x128xbf16>
    %272 = tpu.iota {dimensions = array<i32: 1>} : vector<3x14x128xi32>
    %c1_i32_114 = arith.constant 1 : i32
    %273 = arith.subi %268, %c1_i32_114 : i32
    %274 = vector.broadcast %273 : i32 to vector<3x14x128xi32>
    %275 = arith.cmpi sge, %272, %274 : vector<3x14x128xi32>
    %276 = vector.broadcast %268 : i32 to vector<3x14x128xi32>
    %277 = arith.cmpi sle, %272, %276 : vector<3x14x128xi32>
    %278 = arith.andi %275, %277 : vector<3x14x128xi1>
    %cst_115 = arith.constant 0xFF80 : bf16
    %279 = vector.broadcast %cst_115 : bf16 to vector<3x14x128xbf16>
    %280 = arith.select %278, %271, %279 : vector<3x14x128xi1>, vector<3x14x128xbf16>
    %cst_116 = arith.constant dense<0xFF80> : vector<3x128xbf16>
    %281 = vector.multi_reduction <maximumf>, %280, %cst_116 [1] : vector<3x14x128xbf16> to vector<3x128xbf16>
    %282 = vector.broadcast %268 : i32 to vector<3x14x128xi32>
    %283 = arith.cmpi sge, %272, %282 : vector<3x14x128xi32>
    %c1_i32_117 = arith.constant 1 : i32
    %284 = arith.addi %268, %c1_i32_117 : i32
    %285 = vector.broadcast %284 : i32 to vector<3x14x128xi32>
    %286 = arith.cmpi sle, %272, %285 : vector<3x14x128xi32>
    %287 = arith.andi %283, %286 : vector<3x14x128xi1>
    %cst_118 = arith.constant 0xFF80 : bf16
    %288 = vector.broadcast %cst_118 : bf16 to vector<3x14x128xbf16>
    %289 = arith.select %287, %271, %288 : vector<3x14x128xi1>, vector<3x14x128xbf16>
    %cst_119 = arith.constant dense<0xFF80> : vector<3x128xbf16>
    %290 = vector.multi_reduction <maximumf>, %289, %cst_119 [1] : vector<3x14x128xbf16> to vector<3x128xbf16>
    %291 = vector.extract_strided_slice %281 {offsets = [0, 0], sizes = [1, 128], strides = [1, 1]} : vector<3x128xbf16> to vector<1x128xbf16>
    %292 = vector.extract_strided_slice %281 {offsets = [1, 0], sizes = [1, 128], strides = [1, 1]} : vector<3x128xbf16> to vector<1x128xbf16>
    %293 = arith.maximumf %291, %292 : vector<1x128xbf16>
    %c0_120 = arith.constant 0 : index
    %c2048 = arith.constant 2048 : index
    %294 = vector.load %arg14[%c0_120, %c2048] : memref<1x4096xbf16, #tpu.memory_space<vmem>>, vector<1x128xbf16>
    tpu.vector_store %arg14[%c0_120, %c2048], %293 {strides = array<i32>} : memref<1x4096xbf16, #tpu.memory_space<vmem>>, vector<1x128xbf16>,
    %295 = vector.extract_strided_slice %290 {offsets = [0, 0], sizes = [1, 128], strides = [1, 1]} : vector<3x128xbf16> to vector<1x128xbf16>
    %296 = vector.extract_strided_slice %290 {offsets = [1, 0], sizes = [1, 128], strides = [1, 1]} : vector<3x128xbf16> to vector<1x128xbf16>
    %297 = arith.maximumf %295, %296 : vector<1x128xbf16>
    %c0_121 = arith.constant 0 : index
    %c2176 = arith.constant 2176 : index
    %298 = vector.load %arg14[%c0_121, %c2176] : memref<1x4096xbf16, #tpu.memory_space<vmem>>, vector<1x128xbf16>
    tpu.vector_store %arg14[%c0_121, %c2176], %297 {strides = array<i32>} : memref<1x4096xbf16, #tpu.memory_space<vmem>>, vector<1x128xbf16>,
    %299 = vector.extract_strided_slice %281 {offsets = [1, 0], sizes = [1, 128], strides = [1, 1]} : vector<3x128xbf16> to vector<1x128xbf16>
    %300 = vector.extract_strided_slice %281 {offsets = [2, 0], sizes = [1, 128], strides = [1, 1]} : vector<3x128xbf16> to vector<1x128xbf16>
    %301 = arith.maximumf %299, %300 : vector<1x128xbf16>
    %c0_122 = arith.constant 0 : index
    %c2304 = arith.constant 2304 : index
    %302 = vector.load %arg14[%c0_122, %c2304] : memref<1x4096xbf16, #tpu.memory_space<vmem>>, vector<1x128xbf16>
    tpu.vector_store %arg14[%c0_122, %c2304], %301 {strides = array<i32>} : memref<1x4096xbf16, #tpu.memory_space<vmem>>, vector<1x128xbf16>,
    %303 = vector.extract_strided_slice %290 {offsets = [1, 0], sizes = [1, 128], strides = [1, 1]} : vector<3x128xbf16> to vector<1x128xbf16>
    %304 = vector.extract_strided_slice %290 {offsets = [2, 0], sizes = [1, 128], strides = [1, 1]} : vector<3x128xbf16> to vector<1x128xbf16>
    %305 = arith.maximumf %303, %304 : vector<1x128xbf16>
    %c0_123 = arith.constant 0 : index
    %c2432 = arith.constant 2432 : index
    %306 = vector.load %arg14[%c0_123, %c2432] : memref<1x4096xbf16, #tpu.memory_space<vmem>>, vector<1x128xbf16>
    tpu.vector_store %arg14[%c0_123, %c2432], %305 {strides = array<i32>} : memref<1x4096xbf16, #tpu.memory_space<vmem>>, vector<1x128xbf16>,
    %c8_i32_124 = arith.constant 8 : i32
    %307 = arith.muli %arg0, %c8_i32_124 : i32
    %c5_i32 = arith.constant 5 : i32
    %308 = arith.addi %307, %c5_i32 : i32
    %c2_i32_125 = arith.constant 2 : i32
    %309 = arith.muli %308, %c2_i32_125 : i32
    %310 = arith.index_cast %309 : i32 to index
    %311 = memref.load %arg1[%310] : memref<32xi32, #tpu.memory_space<smem>>
    %c1_i32_126 = arith.constant 1 : i32
    %312 = arith.addi %309, %c1_i32_126 : i32
    %313 = arith.index_cast %312 : i32 to index
    %314 = memref.load %arg1[%313] : memref<32xi32, #tpu.memory_space<smem>>
    %c1_i32_127 = arith.constant 1 : i32
    %315 = arith.subi %311, %c1_i32_127 : i32
    %316 = arith.index_cast %315 : i32 to index
    %c0_128 = arith.constant 0 : index
    %c0_129 = arith.constant 0 : index
    %317 = vector.load %arg13[%316, %c0_128, %c0_129] : memref<14x14x128xbf16, #tpu.memory_space<vmem>>, vector<3x14x128xbf16>
    %318 = tpu.iota {dimensions = array<i32: 1>} : vector<3x14x128xi32>
    %c1_i32_130 = arith.constant 1 : i32
    %319 = arith.subi %314, %c1_i32_130 : i32
    %320 = vector.broadcast %319 : i32 to vector<3x14x128xi32>
    %321 = arith.cmpi sge, %318, %320 : vector<3x14x128xi32>
    %322 = vector.broadcast %314 : i32 to vector<3x14x128xi32>
    %323 = arith.cmpi sle, %318, %322 : vector<3x14x128xi32>
    %324 = arith.andi %321, %323 : vector<3x14x128xi1>
    %cst_131 = arith.constant 0xFF80 : bf16
    %325 = vector.broadcast %cst_131 : bf16 to vector<3x14x128xbf16>
    %326 = arith.select %324, %317, %325 : vector<3x14x128xi1>, vector<3x14x128xbf16>
    %cst_132 = arith.constant dense<0xFF80> : vector<3x128xbf16>
    %327 = vector.multi_reduction <maximumf>, %326, %cst_132 [1] : vector<3x14x128xbf16> to vector<3x128xbf16>
    %328 = vector.broadcast %314 : i32 to vector<3x14x128xi32>
    %329 = arith.cmpi sge, %318, %328 : vector<3x14x128xi32>
    %c1_i32_133 = arith.constant 1 : i32
    %330 = arith.addi %314, %c1_i32_133 : i32
    %331 = vector.broadcast %330 : i32 to vector<3x14x128xi32>
    %332 = arith.cmpi sle, %318, %331 : vector<3x14x128xi32>
    %333 = arith.andi %329, %332 : vector<3x14x128xi1>
    %cst_134 = arith.constant 0xFF80 : bf16
    %334 = vector.broadcast %cst_134 : bf16 to vector<3x14x128xbf16>
    %335 = arith.select %333, %317, %334 : vector<3x14x128xi1>, vector<3x14x128xbf16>
    %cst_135 = arith.constant dense<0xFF80> : vector<3x128xbf16>
    %336 = vector.multi_reduction <maximumf>, %335, %cst_135 [1] : vector<3x14x128xbf16> to vector<3x128xbf16>
    %337 = vector.extract_strided_slice %327 {offsets = [0, 0], sizes = [1, 128], strides = [1, 1]} : vector<3x128xbf16> to vector<1x128xbf16>
    %338 = vector.extract_strided_slice %327 {offsets = [1, 0], sizes = [1, 128], strides = [1, 1]} : vector<3x128xbf16> to vector<1x128xbf16>
    %339 = arith.maximumf %337, %338 : vector<1x128xbf16>
    %c0_136 = arith.constant 0 : index
    %c2560 = arith.constant 2560 : index
    %340 = vector.load %arg14[%c0_136, %c2560] : memref<1x4096xbf16, #tpu.memory_space<vmem>>, vector<1x128xbf16>
    tpu.vector_store %arg14[%c0_136, %c2560], %339 {strides = array<i32>} : memref<1x4096xbf16, #tpu.memory_space<vmem>>, vector<1x128xbf16>,
    %341 = vector.extract_strided_slice %336 {offsets = [0, 0], sizes = [1, 128], strides = [1, 1]} : vector<3x128xbf16> to vector<1x128xbf16>
    %342 = vector.extract_strided_slice %336 {offsets = [1, 0], sizes = [1, 128], strides = [1, 1]} : vector<3x128xbf16> to vector<1x128xbf16>
    %343 = arith.maximumf %341, %342 : vector<1x128xbf16>
    %c0_137 = arith.constant 0 : index
    %c2688 = arith.constant 2688 : index
    %344 = vector.load %arg14[%c0_137, %c2688] : memref<1x4096xbf16, #tpu.memory_space<vmem>>, vector<1x128xbf16>
    tpu.vector_store %arg14[%c0_137, %c2688], %343 {strides = array<i32>} : memref<1x4096xbf16, #tpu.memory_space<vmem>>, vector<1x128xbf16>,
    %345 = vector.extract_strided_slice %327 {offsets = [1, 0], sizes = [1, 128], strides = [1, 1]} : vector<3x128xbf16> to vector<1x128xbf16>
    %346 = vector.extract_strided_slice %327 {offsets = [2, 0], sizes = [1, 128], strides = [1, 1]} : vector<3x128xbf16> to vector<1x128xbf16>
    %347 = arith.maximumf %345, %346 : vector<1x128xbf16>
    %c0_138 = arith.constant 0 : index
    %c2816 = arith.constant 2816 : index
    %348 = vector.load %arg14[%c0_138, %c2816] : memref<1x4096xbf16, #tpu.memory_space<vmem>>, vector<1x128xbf16>
    tpu.vector_store %arg14[%c0_138, %c2816], %347 {strides = array<i32>} : memref<1x4096xbf16, #tpu.memory_space<vmem>>, vector<1x128xbf16>,
    %349 = vector.extract_strided_slice %336 {offsets = [1, 0], sizes = [1, 128], strides = [1, 1]} : vector<3x128xbf16> to vector<1x128xbf16>
    %350 = vector.extract_strided_slice %336 {offsets = [2, 0], sizes = [1, 128], strides = [1, 1]} : vector<3x128xbf16> to vector<1x128xbf16>
    %351 = arith.maximumf %349, %350 : vector<1x128xbf16>
    %c0_139 = arith.constant 0 : index
    %c2944 = arith.constant 2944 : index
    %352 = vector.load %arg14[%c0_139, %c2944] : memref<1x4096xbf16, #tpu.memory_space<vmem>>, vector<1x128xbf16>
    tpu.vector_store %arg14[%c0_139, %c2944], %351 {strides = array<i32>} : memref<1x4096xbf16, #tpu.memory_space<vmem>>, vector<1x128xbf16>,
    %c8_i32_140 = arith.constant 8 : i32
    %353 = arith.muli %arg0, %c8_i32_140 : i32
    %c6_i32 = arith.constant 6 : i32
    %354 = arith.addi %353, %c6_i32 : i32
    %c2_i32_141 = arith.constant 2 : i32
    %355 = arith.muli %354, %c2_i32_141 : i32
    %356 = arith.index_cast %355 : i32 to index
    %357 = memref.load %arg1[%356] : memref<32xi32, #tpu.memory_space<smem>>
    %c1_i32_142 = arith.constant 1 : i32
    %358 = arith.addi %355, %c1_i32_142 : i32
    %359 = arith.index_cast %358 : i32 to index
    %360 = memref.load %arg1[%359] : memref<32xi32, #tpu.memory_space<smem>>
    %c1_i32_143 = arith.constant 1 : i32
    %361 = arith.subi %357, %c1_i32_143 : i32
    %362 = arith.index_cast %361 : i32 to index
    %c0_144 = arith.constant 0 : index
    %c0_145 = arith.constant 0 : index
    %363 = vector.load %arg13[%362, %c0_144, %c0_145] : memref<14x14x128xbf16, #tpu.memory_space<vmem>>, vector<3x14x128xbf16>
    %364 = tpu.iota {dimensions = array<i32: 1>} : vector<3x14x128xi32>
    %c1_i32_146 = arith.constant 1 : i32
    %365 = arith.subi %360, %c1_i32_146 : i32
    %366 = vector.broadcast %365 : i32 to vector<3x14x128xi32>
    %367 = arith.cmpi sge, %364, %366 : vector<3x14x128xi32>
    %368 = vector.broadcast %360 : i32 to vector<3x14x128xi32>
    %369 = arith.cmpi sle, %364, %368 : vector<3x14x128xi32>
    %370 = arith.andi %367, %369 : vector<3x14x128xi1>
    %cst_147 = arith.constant 0xFF80 : bf16
    %371 = vector.broadcast %cst_147 : bf16 to vector<3x14x128xbf16>
    %372 = arith.select %370, %363, %371 : vector<3x14x128xi1>, vector<3x14x128xbf16>
    %cst_148 = arith.constant dense<0xFF80> : vector<3x128xbf16>
    %373 = vector.multi_reduction <maximumf>, %372, %cst_148 [1] : vector<3x14x128xbf16> to vector<3x128xbf16>
    %374 = vector.broadcast %360 : i32 to vector<3x14x128xi32>
    %375 = arith.cmpi sge, %364, %374 : vector<3x14x128xi32>
    %c1_i32_149 = arith.constant 1 : i32
    %376 = arith.addi %360, %c1_i32_149 : i32
    %377 = vector.broadcast %376 : i32 to vector<3x14x128xi32>
    %378 = arith.cmpi sle, %364, %377 : vector<3x14x128xi32>
    %379 = arith.andi %375, %378 : vector<3x14x128xi1>
    %cst_150 = arith.constant 0xFF80 : bf16
    %380 = vector.broadcast %cst_150 : bf16 to vector<3x14x128xbf16>
    %381 = arith.select %379, %363, %380 : vector<3x14x128xi1>, vector<3x14x128xbf16>
    %cst_151 = arith.constant dense<0xFF80> : vector<3x128xbf16>
    %382 = vector.multi_reduction <maximumf>, %381, %cst_151 [1] : vector<3x14x128xbf16> to vector<3x128xbf16>
    %383 = vector.extract_strided_slice %373 {offsets = [0, 0], sizes = [1, 128], strides = [1, 1]} : vector<3x128xbf16> to vector<1x128xbf16>
    %384 = vector.extract_strided_slice %373 {offsets = [1, 0], sizes = [1, 128], strides = [1, 1]} : vector<3x128xbf16> to vector<1x128xbf16>
    %385 = arith.maximumf %383, %384 : vector<1x128xbf16>
    %c0_152 = arith.constant 0 : index
    %c3072 = arith.constant 3072 : index
    %386 = vector.load %arg14[%c0_152, %c3072] : memref<1x4096xbf16, #tpu.memory_space<vmem>>, vector<1x128xbf16>
    tpu.vector_store %arg14[%c0_152, %c3072], %385 {strides = array<i32>} : memref<1x4096xbf16, #tpu.memory_space<vmem>>, vector<1x128xbf16>,
    %387 = vector.extract_strided_slice %382 {offsets = [0, 0], sizes = [1, 128], strides = [1, 1]} : vector<3x128xbf16> to vector<1x128xbf16>
    %388 = vector.extract_strided_slice %382 {offsets = [1, 0], sizes = [1, 128], strides = [1, 1]} : vector<3x128xbf16> to vector<1x128xbf16>
    %389 = arith.maximumf %387, %388 : vector<1x128xbf16>
    %c0_153 = arith.constant 0 : index
    %c3200 = arith.constant 3200 : index
    %390 = vector.load %arg14[%c0_153, %c3200] : memref<1x4096xbf16, #tpu.memory_space<vmem>>, vector<1x128xbf16>
    tpu.vector_store %arg14[%c0_153, %c3200], %389 {strides = array<i32>} : memref<1x4096xbf16, #tpu.memory_space<vmem>>, vector<1x128xbf16>,
    %391 = vector.extract_strided_slice %373 {offsets = [1, 0], sizes = [1, 128], strides = [1, 1]} : vector<3x128xbf16> to vector<1x128xbf16>
    %392 = vector.extract_strided_slice %373 {offsets = [2, 0], sizes = [1, 128], strides = [1, 1]} : vector<3x128xbf16> to vector<1x128xbf16>
    %393 = arith.maximumf %391, %392 : vector<1x128xbf16>
    %c0_154 = arith.constant 0 : index
    %c3328 = arith.constant 3328 : index
    %394 = vector.load %arg14[%c0_154, %c3328] : memref<1x4096xbf16, #tpu.memory_space<vmem>>, vector<1x128xbf16>
    tpu.vector_store %arg14[%c0_154, %c3328], %393 {strides = array<i32>} : memref<1x4096xbf16, #tpu.memory_space<vmem>>, vector<1x128xbf16>,
    %395 = vector.extract_strided_slice %382 {offsets = [1, 0], sizes = [1, 128], strides = [1, 1]} : vector<3x128xbf16> to vector<1x128xbf16>
    %396 = vector.extract_strided_slice %382 {offsets = [2, 0], sizes = [1, 128], strides = [1, 1]} : vector<3x128xbf16> to vector<1x128xbf16>
    %397 = arith.maximumf %395, %396 : vector<1x128xbf16>
    %c0_155 = arith.constant 0 : index
    %c3456 = arith.constant 3456 : index
    %398 = vector.load %arg14[%c0_155, %c3456] : memref<1x4096xbf16, #tpu.memory_space<vmem>>, vector<1x128xbf16>
    tpu.vector_store %arg14[%c0_155, %c3456], %397 {strides = array<i32>} : memref<1x4096xbf16, #tpu.memory_space<vmem>>, vector<1x128xbf16>,
    %c8_i32_156 = arith.constant 8 : i32
    %399 = arith.muli %arg0, %c8_i32_156 : i32
    %c7_i32 = arith.constant 7 : i32
    %400 = arith.addi %399, %c7_i32 : i32
    %c2_i32_157 = arith.constant 2 : i32
    %401 = arith.muli %400, %c2_i32_157 : i32
    %402 = arith.index_cast %401 : i32 to index
    %403 = memref.load %arg1[%402] : memref<32xi32, #tpu.memory_space<smem>>
    %c1_i32_158 = arith.constant 1 : i32
    %404 = arith.addi %401, %c1_i32_158 : i32
    %405 = arith.index_cast %404 : i32 to index
    %406 = memref.load %arg1[%405] : memref<32xi32, #tpu.memory_space<smem>>
    %c1_i32_159 = arith.constant 1 : i32
    %407 = arith.subi %403, %c1_i32_159 : i32
    %408 = arith.index_cast %407 : i32 to index
    %c0_160 = arith.constant 0 : index
    %c0_161 = arith.constant 0 : index
    %409 = vector.load %arg13[%408, %c0_160, %c0_161] : memref<14x14x128xbf16, #tpu.memory_space<vmem>>, vector<3x14x128xbf16>
    %410 = tpu.iota {dimensions = array<i32: 1>} : vector<3x14x128xi32>
    %c1_i32_162 = arith.constant 1 : i32
    %411 = arith.subi %406, %c1_i32_162 : i32
    %412 = vector.broadcast %411 : i32 to vector<3x14x128xi32>
    %413 = arith.cmpi sge, %410, %412 : vector<3x14x128xi32>
    %414 = vector.broadcast %406 : i32 to vector<3x14x128xi32>
    %415 = arith.cmpi sle, %410, %414 : vector<3x14x128xi32>
    %416 = arith.andi %413, %415 : vector<3x14x128xi1>
    %cst_163 = arith.constant 0xFF80 : bf16
    %417 = vector.broadcast %cst_163 : bf16 to vector<3x14x128xbf16>
    %418 = arith.select %416, %409, %417 : vector<3x14x128xi1>, vector<3x14x128xbf16>
    %cst_164 = arith.constant dense<0xFF80> : vector<3x128xbf16>
    %419 = vector.multi_reduction <maximumf>, %418, %cst_164 [1] : vector<3x14x128xbf16> to vector<3x128xbf16>
    %420 = vector.broadcast %406 : i32 to vector<3x14x128xi32>
    %421 = arith.cmpi sge, %410, %420 : vector<3x14x128xi32>
    %c1_i32_165 = arith.constant 1 : i32
    %422 = arith.addi %406, %c1_i32_165 : i32
    %423 = vector.broadcast %422 : i32 to vector<3x14x128xi32>
    %424 = arith.cmpi sle, %410, %423 : vector<3x14x128xi32>
    %425 = arith.andi %421, %424 : vector<3x14x128xi1>
    %cst_166 = arith.constant 0xFF80 : bf16
    %426 = vector.broadcast %cst_166 : bf16 to vector<3x14x128xbf16>
    %427 = arith.select %425, %409, %426 : vector<3x14x128xi1>, vector<3x14x128xbf16>
    %cst_167 = arith.constant dense<0xFF80> : vector<3x128xbf16>
    %428 = vector.multi_reduction <maximumf>, %427, %cst_167 [1] : vector<3x14x128xbf16> to vector<3x128xbf16>
    %429 = vector.extract_strided_slice %419 {offsets = [0, 0], sizes = [1, 128], strides = [1, 1]} : vector<3x128xbf16> to vector<1x128xbf16>
    %430 = vector.extract_strided_slice %419 {offsets = [1, 0], sizes = [1, 128], strides = [1, 1]} : vector<3x128xbf16> to vector<1x128xbf16>
    %431 = arith.maximumf %429, %430 : vector<1x128xbf16>
    %c0_168 = arith.constant 0 : index
    %c3584 = arith.constant 3584 : index
    %432 = vector.load %arg14[%c0_168, %c3584] : memref<1x4096xbf16, #tpu.memory_space<vmem>>, vector<1x128xbf16>
    tpu.vector_store %arg14[%c0_168, %c3584], %431 {strides = array<i32>} : memref<1x4096xbf16, #tpu.memory_space<vmem>>, vector<1x128xbf16>,
    %433 = vector.extract_strided_slice %428 {offsets = [0, 0], sizes = [1, 128], strides = [1, 1]} : vector<3x128xbf16> to vector<1x128xbf16>
    %434 = vector.extract_strided_slice %428 {offsets = [1, 0], sizes = [1, 128], strides = [1, 1]} : vector<3x128xbf16> to vector<1x128xbf16>
    %435 = arith.maximumf %433, %434 : vector<1x128xbf16>
    %c0_169 = arith.constant 0 : index
    %c3712 = arith.constant 3712 : index
    %436 = vector.load %arg14[%c0_169, %c3712] : memref<1x4096xbf16, #tpu.memory_space<vmem>>, vector<1x128xbf16>
    tpu.vector_store %arg14[%c0_169, %c3712], %435 {strides = array<i32>} : memref<1x4096xbf16, #tpu.memory_space<vmem>>, vector<1x128xbf16>,
    %437 = vector.extract_strided_slice %419 {offsets = [1, 0], sizes = [1, 128], strides = [1, 1]} : vector<3x128xbf16> to vector<1x128xbf16>
    %438 = vector.extract_strided_slice %419 {offsets = [2, 0], sizes = [1, 128], strides = [1, 1]} : vector<3x128xbf16> to vector<1x128xbf16>
    %439 = arith.maximumf %437, %438 : vector<1x128xbf16>
    %c0_170 = arith.constant 0 : index
    %c3840 = arith.constant 3840 : index
    %440 = vector.load %arg14[%c0_170, %c3840] : memref<1x4096xbf16, #tpu.memory_space<vmem>>, vector<1x128xbf16>
    tpu.vector_store %arg14[%c0_170, %c3840], %439 {strides = array<i32>} : memref<1x4096xbf16, #tpu.memory_space<vmem>>, vector<1x128xbf16>,
    %441 = vector.extract_strided_slice %428 {offsets = [1, 0], sizes = [1, 128], strides = [1, 1]} : vector<3x128xbf16> to vector<1x128xbf16>
    %442 = vector.extract_strided_slice %428 {offsets = [2, 0], sizes = [1, 128], strides = [1, 1]} : vector<3x128xbf16> to vector<1x128xbf16>
    %443 = arith.maximumf %441, %442 : vector<1x128xbf16>
    %c0_171 = arith.constant 0 : index
    %c3968 = arith.constant 3968 : index
    %444 = vector.load %arg14[%c0_171, %c3968] : memref<1x4096xbf16, #tpu.memory_space<vmem>>, vector<1x128xbf16>
    tpu.vector_store %arg14[%c0_171, %c3968], %443 {strides = array<i32>} : memref<1x4096xbf16, #tpu.memory_space<vmem>>, vector<1x128xbf16>,
    %c0_172 = arith.constant 0 : index
    %c0_173 = arith.constant 0 : index
    %445 = vector.load %arg14[%c0_172, %c0_173] : memref<1x4096xbf16, #tpu.memory_space<vmem>>, vector<1x4096xbf16>
    %c0_174 = arith.constant 0 : index
    %c0_175 = arith.constant 0 : index
    %446 = vector.load %arg7[%c0_174, %c0_175] : memref<4096x256xbf16, #tpu.memory_space<vmem>>, vector<4096x256xbf16>
    %cst_176 = arith.constant dense<0.000000e+00> : vector<1x256xf32>
    %447 = tpu.matmul %445, %446, %cst_176 {dimension_numbers = #tpu.dot_dimension_numbers<[1], [0], [0], [1], [0, 0, 1, 1], [], []>} : vector<1x4096xbf16>, vector<4096x256xbf16>, vector<1x256xf32> -> vector<1x256xf32>
    %c0_177 = arith.constant 0 : index
    %c0_178 = arith.constant 0 : index
    %448 = vector.load %arg8[%c0_177, %c0_178] : memref<1x256xf32, #tpu.memory_space<vmem>>, vector<1x256xf32>
    %449 = arith.addf %447, %448 : vector<1x256xf32>
    %cst_179 = arith.constant 0.000000e+00 : f32
    %450 = vector.broadcast %cst_179 : f32 to vector<1x256xf32>
    %451 = arith.maximumf %449, %450 : vector<1x256xf32>
    %452 = arith.truncf %20 : vector<1x128xf32> to vector<1x128xbf16>
    %c0_180 = arith.constant 0 : index
    %c0_181 = arith.constant 0 : index
    %453 = vector.load %arg9[%c0_180, %c0_181] : memref<128x128xbf16, #tpu.memory_space<vmem>>, vector<128x128xbf16>
    %cst_182 = arith.constant dense<0.000000e+00> : vector<1x128xf32>
    %454 = tpu.matmul %452, %453, %cst_182 {dimension_numbers = #tpu.dot_dimension_numbers<[1], [0], [0], [1], [0, 0, 1, 1], [], []>} : vector<1x128xbf16>, vector<128x128xbf16>, vector<1x128xf32> -> vector<1x128xf32>
    %455 = arith.truncf %451 : vector<1x256xf32> to vector<1x256xbf16>
    %c0_183 = arith.constant 0 : index
    %c0_184 = arith.constant 0 : index
    %456 = vector.load %arg10[%c0_183, %c0_184] : memref<256x128xbf16, #tpu.memory_space<vmem>>, vector<256x128xbf16>
    %cst_185 = arith.constant dense<0.000000e+00> : vector<1x128xf32>
    %457 = tpu.matmul %455, %456, %cst_185 {dimension_numbers = #tpu.dot_dimension_numbers<[1], [0], [0], [1], [0, 0, 1, 1], [], []>} : vector<1x256xbf16>, vector<256x128xbf16>, vector<1x128xf32> -> vector<1x128xf32>
    %458 = arith.addf %454, %457 : vector<1x128xf32>
    %c0_186 = arith.constant 0 : index
    %c0_187 = arith.constant 0 : index
    %459 = vector.load %arg11[%c0_186, %c0_187] : memref<1x128xf32, #tpu.memory_space<vmem>>, vector<1x128xf32>
    %460 = arith.addf %458, %459 : vector<1x128xf32>
    %461 = vector.shape_cast %460 : vector<1x128xf32> to vector<1x128xf32>
    %462 = vector.broadcast %461 : vector<1x128xf32> to vector<8x128xf32>
    %c0_188 = arith.constant 0 : index
    %c0_189 = arith.constant 0 : index
    %c0_190 = arith.constant 0 : index
    %463 = vector.load %arg12[%c0_188, %c0_189, %c0_190] : memref<1x8x128xf32, #tpu.memory_space<vmem>>, vector<1x8x128xf32>
    %464 = vector.shape_cast %463 : vector<1x8x128xf32> to vector<8x128xf32>
    %465 = vector.shape_cast %462 : vector<8x128xf32> to vector<1x8x128xf32>
    tpu.vector_store %arg12[%c0_188, %c0_189, %c0_190], %465 {strides = array<i32>} : memref<1x8x128xf32, #tpu.memory_space<vmem>>, vector<1x8x128xf32>,
    return
  }
  func.func @transform_0(%arg0: i32, %arg1: memref<32xi32, #tpu.memory_space<smem>>) -> (i32, i32, i32) {
    %c0_i32 = arith.constant 0 : i32
    %c0_i32_0 = arith.constant 0 : i32
    %c0_i32_1 = arith.constant 0 : i32
    return %arg0, %c0_i32, %c0_i32_0 : i32, i32, i32
  }
  func.func @transform_1(%arg0: i32, %arg1: memref<32xi32, #tpu.memory_space<smem>>) -> (i32, i32) {
    %c0_i32 = arith.constant 0 : i32
    %c0_i32_0 = arith.constant 0 : i32
    %c0_i32_1 = arith.constant 0 : i32
    return %c0_i32, %c0_i32_0 : i32, i32
  }
  func.func @transform_2(%arg0: i32, %arg1: memref<32xi32, #tpu.memory_space<smem>>) -> (i32, i32) {
    %c0_i32 = arith.constant 0 : i32
    %c0_i32_0 = arith.constant 0 : i32
    %c0_i32_1 = arith.constant 0 : i32
    return %c0_i32, %c0_i32_0 : i32, i32
  }
  func.func @transform_3(%arg0: i32, %arg1: memref<32xi32, #tpu.memory_space<smem>>) -> (i32, i32) {
    %c0_i32 = arith.constant 0 : i32
    %c0_i32_0 = arith.constant 0 : i32
    %c0_i32_1 = arith.constant 0 : i32
    return %c0_i32, %c0_i32_0 : i32, i32
  }
  func.func @transform_4(%arg0: i32, %arg1: memref<32xi32, #tpu.memory_space<smem>>) -> (i32, i32) {
    %c0_i32 = arith.constant 0 : i32
    %c0_i32_0 = arith.constant 0 : i32
    %c0_i32_1 = arith.constant 0 : i32
    return %c0_i32, %c0_i32_0 : i32, i32
  }
  func.func @transform_5(%arg0: i32, %arg1: memref<32xi32, #tpu.memory_space<smem>>) -> (i32, i32) {
    %c0_i32 = arith.constant 0 : i32
    %c0_i32_0 = arith.constant 0 : i32
    %c0_i32_1 = arith.constant 0 : i32
    return %c0_i32, %c0_i32_0 : i32, i32
  }
  func.func @transform_6(%arg0: i32, %arg1: memref<32xi32, #tpu.memory_space<smem>>) -> (i32, i32) {
    %c0_i32 = arith.constant 0 : i32
    %c0_i32_0 = arith.constant 0 : i32
    %c0_i32_1 = arith.constant 0 : i32
    return %c0_i32, %c0_i32_0 : i32, i32
  }
  func.func @transform_7(%arg0: i32, %arg1: memref<32xi32, #tpu.memory_space<smem>>) -> (i32, i32) {
    %c0_i32 = arith.constant 0 : i32
    %c0_i32_0 = arith.constant 0 : i32
    %c0_i32_1 = arith.constant 0 : i32
    return %c0_i32, %c0_i32_0 : i32, i32
  }
  func.func @transform_8(%arg0: i32, %arg1: memref<32xi32, #tpu.memory_space<smem>>) -> (i32, i32) {
    %c0_i32 = arith.constant 0 : i32
    %c0_i32_0 = arith.constant 0 : i32
    %c0_i32_1 = arith.constant 0 : i32
    return %c0_i32, %c0_i32_0 : i32, i32
  }
  func.func @transform_9(%arg0: i32, %arg1: memref<32xi32, #tpu.memory_space<smem>>) -> (i32, i32) {
    %c0_i32 = arith.constant 0 : i32
    %c0_i32_0 = arith.constant 0 : i32
    %c0_i32_1 = arith.constant 0 : i32
    return %c0_i32, %c0_i32_0 : i32, i32
  }
  func.func @transform_10(%arg0: i32, %arg1: memref<32xi32, #tpu.memory_space<smem>>) -> (i32, i32, i32) {
    %c0_i32 = arith.constant 0 : i32
    %c0_i32_0 = arith.constant 0 : i32
    %c0_i32_1 = arith.constant 0 : i32
    return %arg0, %c0_i32, %c0_i32_0 : i32, i32, i32
  }
}

</mosaic_0001>

<bundles_post_ra>
// kernel: densenet_roi_forward.1
= control target key start
LH: loop header
LB: loop body
LE: loop exit
PB: predicated region body
PF: predicated region fallthrough
CT: control target
= control target key end

     0   :  { %s13741_s0 = inlined_call_operand.vmem [shape: s32[32], index: 0, kind: input, shape index: {}]   ;;  %s13742_s1 = inlined_call_operand.vmem [shape: bf16[2,196,768], index: 1, kind: input, shape index: {}]   ;;  %s13743_s2 = inlined_call_operand.vmem [shape: bf16[768,128], index: 2, kind: input, shape index: {}]   ;;  %s13744_s3 = inlined_call_operand.vmem [shape: f32[1,128], index: 3, kind: input, shape index: {}]   ;;  %s13745_s4 = inlined_call_operand.vmem [shape: bf16[128,128], index: 4, kind: input, shape index: {}]   ;;  %s13746_s5 = inlined_call_operand.vmem [shape: f32[1,128], index: 5, kind: input, shape index: {}]   ;;  %s13747_s6 = inlined_call_operand.vmem [shape: bf16[4096,256], index: 6, kind: input, shape index: {}]   ;;  %s13748_s7 = inlined_call_operand.vmem [shape: f32[1,256], index: 7, kind: input, shape index: {}]   ;;  %s13749_s8 = inlined_call_operand.vmem [shape: bf16[128,128], index: 8, kind: input, shape index: {}]   ;;  %s13750_s9 = inlined_call_operand.vmem [shape: bf16[256,128], index: 9, kind: input, shape index: {}]   ;;  %s13751_s10 = inlined_call_operand.vmem [shape: f32[1,128], index: 10, kind: input, shape index: {}]   ;;  %s13752_s11 = inlined_call_operand.vmem [shape: f32[2,8,128], index: 11, kind: output, shape index: {}]  }
   0x1   :  { %s16_s19 = sshll.u32 %s13741_s0, 4  ;;  %s17_s19 = int_to_ptr.vmem [resolvable:$true] %s16_s19 }
   0x2   :  { %s10103_s20 = scalar_lea.vmem %s17_s19, 16  ;;  %p10108_p1 = scmp.lt.s32.totalorder %s17_s19, %s17_s19 }
   0x3   :  { %p10104_p0 = scmp.ne.s32.totalorder %s17_s19, %s10103_s20  ;;  %p10109_p2 = scmp.lt.s32.totalorder %s10103_s20, %s10103_s20 }
   0x5   :  { %p10110_p3 = por %p10109_p2, %p10108_p1 }
   0x7   :  { %p10111_p4 = pnand %p10110_p3, %p10104_p0 }
   0x9   :  { %10114 = shalt.err (!%p10111_p4)  }
   0xa   :  { %s10125_s21 = smov [#allocation5]  }
   0xb   :  { %19 = dma.vmem_to_smem %s17_s19, 16, %s10125_s21, [#allocation4] }
   0xc   :  { %10119 = dma.done.wait [#allocation4], 16 }
   0xd   :  { %10120 = vsyncadd [#allocation4], 4294967280 }
   0xe   :  { %21 = sfence }
   0xf   :  { %s10192_s22 = smov 0  }
  0x10 LB: > { %s10198_s0 = sadd.s32 4294967295, %s10123_s22   ;;  %p7846_p5 = scmp.ge.s32.totalorder %s10123_s22, 1  ;;  %s10123_s22 = sphi %s10192_s22, %s27_s22  }
  0x11   : > { %p319_p6 = scmp.lt.s32.totalorder %s10123_s22, 3 }
  0x13   : > { %p320_p7 = pnand %p7846_p5, %p319_p6 }
  0x14   : > { %p356_p8 = scmp.lt.s32.totalorder (!%p320_p7), %s10198_s0, 1  ;;  %s10823_s18 = sshll.u32 (!%p320_p7), %s10198_s0, 4 }
  0x15   : > { %323 = sbr.rel (%p320_p7) target bundleno = 1406 (0x57e), region = 60  ;;  %s8674_s20 = sadd.s32 (!%p320_p7), 2, %s10823_s18 }
  0x16   : > { %s10846_s23 = sld [smem:[#allocation5 + %s10823_s18]] (!%p320_p7)  ;;  %s8680_s24 = sadd.s32 (!%p320_p7), 6, %s10823_s18 }
  0x17   : > { %s2312_s25 = sadd.s32 (!%p320_p7), 1, %s8674_s20  ;;  %s8683_s27 = sadd.s32 (!%p320_p7), 8, %s10823_s18 }
  0x18   : > { %s10856_s28 = sld [smem:[#allocation5 + %s8674_s20]] (!%p320_p7)  ;;  %s2656_s30 = sadd.s32 (!%p320_p7), 1, %s8680_s24 }
  0x19   : > { %s10861_s14 = sld [smem:[#allocation5 + %s2312_s25]] (!%p320_p7)  ;;  %s2828_s16 = sadd.s32 (!%p320_p7), 1, %s8683_s27 }
  0x1a   : > { %v9136_v0 = vld [vmem:[%s13743_s2 + $0x78] sm:$0xff]   ;;  %v9140_v4 = vld [vmem:[%s13743_s2 + $0x70] sm:$0xff]   ;;  %v9144_v8 = vld [vmem:[%s13743_s2 + $0x68] sm:$0xff]   ;;  %s10267_s29 = scalar_select %p356_p8, %s10198_s0, 1  ;;  %vm10127_vm0 = vmmov 0   ;;  %vm1939_vm1 = vcmask 1040384  }
  0x1b   : > { %v9137_v1 = vld [vmem:[%s13743_s2 + $0x38] sm:$0xff]   ;;  %8701 = vmatprep.subr.bf16.mxu0 %v9136_v0  ;;  %v9141_v5 = vld [vmem:[%s13743_s2 + $0x30] sm:$0xff]   ;;  %v9145_v9 = vld [vmem:[%s13743_s2 + $0x28] sm:$0xff]   ;;  %vm1940_vm2 = vcmask 1044484   ;;  %vm1959_vm4 = vcmask 1041408   ;;  %vm1960_vm5 = vcmask 1045508  }
  0x1c   : > { %v9138_v2 = vld [vmem:[%s13743_s2 + $0xf8] sm:$0xff]   ;;  %8702 = vmatpush3.bf16.msra.mxu0 %v9137_v1  ;;  %v9142_v6 = vld [vmem:[%s13743_s2 + $0xf0] sm:$0xff]   ;;  %v9146_v10 = vld [vmem:[%s13743_s2 + $0xe8] sm:$0xff]   ;;  %s9123_s19 = smul.u32 600, %s10267_s29  ;;  %vm1977_vm7 = vcmask 1042432   ;;  %vm1978_vm8 = vcmask 1046532  }
  0x1d   : > { %v9139_v3 = vld [vmem:[%s13743_s2 + $0xb8] sm:$0xff]   ;;  %8795 = vmatprep.subr.bf16.mxu1 %v9138_v2  ;;  %8703 = vmatprep.subr.bf16.mxu0 %v9140_v4  ;;  %v9143_v7 = vld [vmem:[%s13743_s2 + $0xb0] sm:$0xff]   ;;  %v9147_v11 = vld [vmem:[%s13743_s2 + $0xa8] sm:$0xff]   ;;  %s10876_s17 = sld [smem:[#allocation5 + %s2656_s30]] }
  0x1e   : > { %8796 = vmatpush3.bf16.msra.mxu1 %v9139_v3  ;;  %v9148_v12 = vld [vmem:[%s13743_s2 + $0x60] sm:$0xff]   ;;  %v9152_v16 = vld [vmem:[%s13743_s2 + $0x58] sm:$0xff]   ;;  %v9156_v20 = vld [vmem:[%s13743_s2 + $0x50] sm:$0xff]   ;;  %s10297_s13 = scalar_lea.vmem %s13742_s1, %s9123_s19  ;;  %s2132_s19 = sadd.s32 1, %s10823_s18 }
  0x1f   : > { %8797 = vmatprep.subr.bf16.mxu1 %v9142_v6  ;;  %v9149_v13 = vld [vmem:[%s13743_s2 + $0x20] sm:$0xff]   ;;  %v9153_v17 = vld [vmem:[%s13743_s2 + $0x18] sm:$0xff]   ;;  %v9157_v21 = vld [vmem:[%s13743_s2 + $0x10] sm:$0xff]   ;;  %s10834_s0 = sld [smem:[#allocation5 + %s2132_s19]]  ;;  %s8021_s19 = sadd.s32 4294967295, %s10846_s23 }
  0x20   : > { %8704 = vmatpush3.bf16.msra.mxu0 %v9141_v5  ;;  %v9150_v14 = vld [vmem:[%s13743_s2 + $0xe0] sm:$0xff]   ;;  %v9154_v18 = vld [vmem:[%s13743_s2 + $0xd8] sm:$0xff]   ;;  %v9158_v22 = vld [vmem:[%s13743_s2 + $0xd0] sm:$0xff]   ;;  %s10887_s20 = sshll.u32 %s8021_s19, 3  ;;  %s8036_s23 = sadd.s32 4294967295, %s10861_s14 }
  0x21   : > { %8705 = vmatprep.subr.bf16.mxu0 %v9144_v8  ;;  %v9151_v15 = vld [vmem:[%s13743_s2 + $0xa0] sm:$0xff]   ;;  %v9155_v19 = vld [vmem:[%s13743_s2 + $0x98] sm:$0xff]   ;;  %v9159_v23 = vld [vmem:[%s13743_s2 + $0x90] sm:$0xff]   ;;  %s2397_s25 = sadd.s32 1, %s10861_s14 }
  0x22   : > { %8798 = vmatpush3.bf16.msra.mxu1 %v9143_v7  ;;  %v9160_v24 = vld [vmem:[%s13743_s2 + $0x48] sm:$0xff]   ;;  %v9164_v28 = vld [vmem:[%s13743_s2 + $0x40] sm:$0xff]   ;;  %v9171_v34 = vld [vmem:[%s13743_s2 + $0x178] sm:$0xff]  }
  0x23   : > { %8799 = vmatprep.subr.bf16.mxu1 %v9146_v10  ;;  %v9161_v25 = vld [vmem:[%s13743_s2 + $0x8] sm:$0xff]   ;;  %v9165_v29 = vld [vmem:[%s13743_s2] sm:$0xff]   ;;  %v9175_v37 = vld [vmem:[%s13743_s2 + $0x138] sm:$0xff]  }
  0x24   : > { %8706 = vmatpush3.bf16.msra.mxu0 %v9145_v9  ;;  %v9162_v26 = vld [vmem:[%s13743_s2 + $0xc8] sm:$0xff]   ;;  %v9166_v30 = vld [vmem:[%s13743_s2 + $0xc0] sm:$0xff]   ;;  %v9179_v39 = vld [vmem:[%s10297_s13 + $0x3c] ss:$24 sps:$4 sm:$0xff]  }
  0x25   : > { %8707 = vmatprep.subr.bf16.mxu0 %v9148_v12  ;;  %v9163_v27 = vld [vmem:[%s13743_s2 + $0x88] sm:$0xff]   ;;  %v9167_v31 = vld [vmem:[%s10297_s13] ss:$24 sps:$4 sm:$0xff]   ;;  %v9169_v32 = vld [vmem:[%s10297_s13 + $0x4] ss:$24 sps:$4 sm:$0xff]   ;;  %s8024_s21 = sadd.s32 4294967295, %s10834_s0 }
  0x26   : > { %8800 = vmatpush3.bf16.msra.mxu1 %v9147_v11  ;;  %v9170_v33 = vld [vmem:[%s13743_s2 + $0x80] sm:$0xff]   ;;  %1246 = vmatprep.mubr.bf16.mxu0 %v9169_v32  ;;  %v9176_v38 = vld [vmem:[%s10297_s13 + $0x34] ss:$24 sps:$4 sm:$0xff]   ;;  %v9178_v40 = vld [vmem:[%s10297_s13 + $0x30] ss:$24 sps:$4 sm:$0xff]   ;;  %s2222_s12 = sadd.s32 1, %s10834_s0 }
  0x27   : > { %8801 = vmatprep.subr.bf16.mxu1 %v9150_v14  ;;  %v9172_v35 = vld [vmem:[%s10297_s13 + $0x8] ss:$24 sps:$4 sm:$0xff]   ;;  %v9174_v36 = vld [vmem:[%s10297_s13 + $0xc] ss:$24 sps:$4 sm:$0xff]   ;;  %v9182_v41 = vld [vmem:[%s13743_s2 + $0x170] sm:$0xff]  }
  0x28   : > { %8708 = vmatpush3.bf16.msra.mxu0 %v9149_v13  ;;  %1382 = vmatprep.mubr.bf16.mxu1 %v9174_v36  ;;  %v9183_v42 = vld [vmem:[%s13743_s2 + $0x130] sm:$0xff]   ;;  %v9184_v44 = vld [vmem:[%s10297_s13 + $0x64] ss:$24 sps:$4 sm:$0xff]   ;;  %v9186_v46 = vld [vmem:[%s10297_s13 + $0x60] ss:$24 sps:$4 sm:$0xff]  }
  0x29   : > { %8709 = vmatprep.subr.bf16.mxu0 %v9152_v16  ;;  %v9181_v43 = vld [vmem:[%s10297_s13 + $0x38] ss:$24 sps:$4 sm:$0xff]   ;;  %v9187_v45 = vld [vmem:[%s10297_s13 + $0x6c] ss:$24 sps:$4 sm:$0xff]   ;;  %v9189_v50 = vld [vmem:[%s10297_s13 + $0x68] ss:$24 sps:$4 sm:$0xff]  }
  0x2a   : > { %8802 = vmatpush3.bf16.msra.mxu1 %v9151_v15  ;;  %v9190_v47 = vld [vmem:[%s10297_s13 + $0x94] ss:$24 sps:$4 sm:$0xff]   ;;  %v9206_v52 = vld [vmem:[%s13743_s2 + $0x160] sm:$0xff]   ;;  %v9192_v54 = vld [vmem:[%s10297_s13 + $0x90] ss:$24 sps:$4 sm:$0xff]  }
  0x2b   : > { %8803 = vmatprep.subr.bf16.mxu1 %v9154_v18  ;;  %v9196_v48 = vld [vmem:[%s13743_s2 + $0x168] sm:$0xff]   ;;  %v9193_v51 = vld [vmem:[%s10297_s13 + $0x9c] ss:$24 sps:$4 sm:$0xff]   ;;  %v9208_v53 = vld [vmem:[%s13743_s2 + $0x120] sm:$0xff]  }
  0x2c   : > { %8710 = vmatpush3.bf16.msra.mxu0 %v9153_v17  ;;  %v9197_v49 = vld [vmem:[%s13743_s2 + $0x128] sm:$0xff]   ;;  %v9198_v55 = vld [vmem:[%s10297_s13 + $0xc4] ss:$24 sps:$4 sm:$0xff]   ;;  %v9195_v56 = vld [vmem:[%s10297_s13 + $0x98] ss:$24 sps:$4 sm:$0xff]  }
  0x2d   : > { %8711 = vmatprep.subr.bf16.mxu0 %v9156_v20  ;;  %v9201_v57 = vld [vmem:[%s10297_s13 + $0xcc] ss:$24 sps:$4 sm:$0xff]   ;;  %v9218_v58 = vld [vmem:[%s13743_s2 + $0x158] sm:$0xff]   ;;  %v9203_v62 = vld [vmem:[%s10297_s13 + $0xc8] ss:$24 sps:$4 sm:$0xff]  }
  0x2e   : > { %8804 = vmatpush3.bf16.msra.mxu1 %v9155_v19  ;;  %v9219_v59 = vld [vmem:[%s13743_s2 + $0x118] sm:$0xff]   ;;  %v9204_v61 = vld [vmem:[%s10297_s13 + $0xf4] ss:$24 sps:$4 sm:$0xff]   ;;  %v9207_v2 = vld [vmem:[%s10297_s13 + $0xf0] ss:$24 sps:$4 sm:$0xff]  }
  0x2f   : > { %8805 = vmatprep.subr.bf16.mxu1 %v9158_v22  ;;  %v9200_v60 = vld [vmem:[%s10297_s13 + $0xc0] ss:$24 sps:$4 sm:$0xff]   ;;  %v9209_v63 = vld [vmem:[%s10297_s13 + $0xfc] ss:$24 sps:$4 sm:$0xff]   ;;  %v9240_v3 = vld [vmem:[%s13743_s2 + $0x148] sm:$0xff]  }
  0x30   : > { %8712 = vmatpush3.bf16.msra.mxu0 %v9157_v21  ;;  %v9231_v0 = vld [vmem:[%s13743_s2 + $0x150] sm:$0xff]   ;;  %v9212_v4 = vld [vmem:[%s10297_s13 + $0x124] ss:$24 sps:$4 sm:$0xff]   ;;  %v9243_v5 = vld [vmem:[%s13743_s2 + $0x108] sm:$0xff]  }
  0x31   : > { %8713 = vmatprep.subr.bf16.mxu0 %v9160_v24  ;;  %v9233_v1 = vld [vmem:[%s13743_s2 + $0x110] sm:$0xff]   ;;  %v9215_v7 = vld [vmem:[%s10297_s13 + $0x12c] ss:$24 sps:$4 sm:$0xff]   ;;  %v9214_v8 = vld [vmem:[%s10297_s13 + $0x120] ss:$24 sps:$4 sm:$0xff]  }
  0x32   : > { %8806 = vmatpush3.bf16.msra.mxu1 %v9159_v23  ;;  %v9211_v6 = vld [vmem:[%s10297_s13 + $0xf8] ss:$24 sps:$4 sm:$0xff]   ;;  %v9254_v9 = vld [vmem:[%s13743_s2 + $0x140] sm:$0xff]   ;;  %v9220_v11 = vld [vmem:[%s10297_s13 + $0x154] ss:$24 sps:$4 sm:$0xff]  }
  0x33   : > { %8807 = vmatprep.subr.bf16.mxu1 %v9162_v26  ;;  %v9255_v10 = vld [vmem:[%s13743_s2 + $0x100] sm:$0xff]   ;;  %v9223_v13 = vld [vmem:[%s10297_s13 + $0x15c] ss:$24 sps:$4 sm:$0xff]   ;;  %v9222_v14 = vld [vmem:[%s10297_s13 + $0x150] ss:$24 sps:$4 sm:$0xff]  }
  0x34   : > { %8714 = vmatpush3.bf16.msra.mxu0 %v9161_v25  ;;  %v9217_v12 = vld [vmem:[%s10297_s13 + $0x128] ss:$24 sps:$4 sm:$0xff]   ;;  %v9226_v15 = vld [vmem:[%s10297_s13 + $0x184] ss:$24 sps:$4 sm:$0xff]   ;;  %v9225_v16 = vld [vmem:[%s10297_s13 + $0x158] ss:$24 sps:$4 sm:$0xff]  }
  0x35   : > { %8715 = vmatprep.subr.bf16.mxu0 %v9164_v28  ;;  %v9229_v17 = vld [vmem:[%s10297_s13 + $0x18c] ss:$24 sps:$4 sm:$0xff]   ;;  %v9228_v18 = vld [vmem:[%s10297_s13 + $0x180] ss:$24 sps:$4 sm:$0xff]   ;;  %v9237_v21 = vld [vmem:[%s10297_s13 + $0x1bc] ss:$24 sps:$4 sm:$0xff]  }
  0x36   : > { %8808 = vmatpush3.bf16.msra.mxu1 %v9163_v27  ;;  %v9234_v19 = vld [vmem:[%s10297_s13 + $0x1b4] ss:$24 sps:$4 sm:$0xff]   ;;  %v9232_v20 = vld [vmem:[%s10297_s13 + $0x188] ss:$24 sps:$4 sm:$0xff]   ;;  %v9239_v23 = vld [vmem:[%s10297_s13 + $0x1b8] ss:$24 sps:$4 sm:$0xff]  }
  0x37   : > { %8809 = vmatprep.subr.bf16.mxu1 %v9166_v30  ;;  %v9236_v22 = vld [vmem:[%s10297_s13 + $0x1b0] ss:$24 sps:$4 sm:$0xff]   ;;  %v9241_v24 = vld [vmem:[%s10297_s13 + $0x1e4] ss:$24 sps:$4 sm:$0xff]   ;;  %v9244_v26 = vld [vmem:[%s10297_s13 + $0x1e0] ss:$24 sps:$4 sm:$0xff]  }
  0x38   : > { %8716 = vmatpush3.bf16.msra.mxu0 %v9165_v29  ;;  %v9245_v25 = vld [vmem:[%s10297_s13 + $0x1ec] ss:$24 sps:$4 sm:$0xff]   ;;  %v9247_v28 = vld [vmem:[%s10297_s13 + $0x1e8] ss:$24 sps:$4 sm:$0xff]   ;;  %v9251_v29 = vld [vmem:[%s10297_s13 + $0x21c] ss:$24 sps:$4 sm:$0xff]  }
  0x39   : > { %8889 = vmatprep.subr.bf16.mxu0 %v9171_v34  ;;  %v9248_v27 = vld [vmem:[%s10297_s13 + $0x214] ss:$24 sps:$4 sm:$0xff]   ;;  %v439_v30 = vld [vmem:[%s10297_s13 + $0x240] sm:$0x33]  ;;  %vm10663_vm3 = vmor %vm1939_vm1, %vm1940_vm2 }
  0x3a   : > { %8810 = vmatpush3.bf16.msra.mxu1 %v9170_v33  ;;  %v440_v32 = vld [vmem:[%s10297_s13 + $0x248] sm:$0x33]  ;;  %v9253_v33 = vld [vmem:[%s10297_s13 + $0x218] ss:$24 sps:$4 sm:$0xff]   ;;  %v7923_v34 = vcombine.high %v439_v30, %v439_v30  ;;  %vm10686_vm6 = vmor %vm1959_vm4, %vm1960_vm5 }
  0x3b   : > { %1247 = vmatmul.mubr.bf16.vlgmr.msra.gmra.mxu0 %v9167_v31  ;;  %v9250_v31 = vld [vmem:[%s10297_s13 + $0x210] ss:$24 sps:$4 sm:$0xff]   ;;  %v9262_v36 = vld [vmem:[%s10297_s13 + $0x14] ss:$24 sps:$4 sm:$0xff]   ;;  %vm10712_vm9 = vmor %vm1977_vm7, %vm1978_vm8 }
  0x3c   : > { %8890 = vmatpush3.bf16.msra.mxu0 %v9175_v37  ;;  %1254 = vmatprep.mubr.bf16.mxu0 %v9176_v38  ;;  %v7922_v37 = vcombine.low %v439_v30, %v439_v30  ;;  %v7924_v38 = vcombine.low %v440_v32, %v440_v32 }
  0x3d   : > { %1383 = vmatmul.mubr.bf16.vlgmr.msra.gmra.mxu1 %v9172_v35  ;;  %8891 = vmatprep.subr.bf16.mxu0 %v9182_v41  ;;  %v7925_v35 = vcombine.high %v440_v32, %v440_v32  ;;  %v9265_v41 = vld [vmem:[%s10297_s13 + $0x40] ss:$24 sps:$4 sm:$0xff]  }
  0x3e   : > { %1390 = vmatprep.mubr.bf16.mxu1 %v9179_v39  ;;  %v9260_v39 = vld [vmem:[%s10297_s13 + $0x10] ss:$24 sps:$4 sm:$0xff]  }
  0x40   : > { %8892 = vmatpush3.bf16.msra.mxu0 %v9183_v42  ;;  %v9266_v42 = vld [vmem:[%s10297_s13 + $0x74] ss:$24 sps:$4 sm:$0xff]  }
  0x41   : > { %8893 = vmatprep.subr.bf16.mxu0 %v9196_v48  ;;  %v10126_v48 = vmov 0.0  }
  0x42   : > { %9035 = vmatprep.subr.bf16.mxu1 %v10126_v48 }
  0x43   : > { %1255 = vmatmul.mubr.bf16.gmra.mxu0 %v9178_v40  ;;  %v9263_v40 = vld [vmem:[%s10297_s13 + $0x44] ss:$24 sps:$4 sm:$0xff]  }
  0x44   : > { %1262 = vmatprep.mubr.bf16.mxu0 %v9184_v44  ;;  %8894 = vmatpush3.bf16.msra.mxu0 %v9197_v49  ;;  %v9269_v44 = vld [vmem:[%s10297_s13 + $0xa4] ss:$24 sps:$4 sm:$0xff]   ;;  %v9274_v49 = vld [vmem:[%s10297_s13 + $0xd0] ss:$24 sps:$4 sm:$0xff]  }
  0x45   : > { %1391 = vmatmul.mubr.bf16.gmra.mxu1 %v9181_v43  ;;  %8895 = vmatprep.subr.bf16.mxu0 %v9206_v52  ;;  %v9268_v43 = vld [vmem:[%s10297_s13 + $0x70] ss:$24 sps:$4 sm:$0xff]   ;;  %v9277_v52 = vld [vmem:[%s10297_s13 + $0x100] ss:$24 sps:$4 sm:$0xff]  }
  0x46   : > { %1398 = vmatprep.mubr.bf16.mxu1 %v9187_v45  ;;  %v9271_v45 = vld [vmem:[%s10297_s13 + $0xa0] ss:$24 sps:$4 sm:$0xff]  }
  0x48   : > { %8896 = vmatpush3.bf16.msra.mxu0 %v9208_v53  ;;  %v9278_v53 = vld [vmem:[%s10297_s13 + $0x134] ss:$24 sps:$4 sm:$0xff]  }
  0x49   : > { %8897 = vmatprep.subr.bf16.mxu0 %v9218_v58  ;;  %v9284_v58 = vld [vmem:[%s10297_s13 + $0x194] ss:$24 sps:$4 sm:$0xff]  }
  0x4b   : > { %1263 = vmatmul.mubr.bf16.gmra.mxu0 %v9186_v46  ;;  %v9272_v46 = vld [vmem:[%s10297_s13 + $0xd4] ss:$24 sps:$4 sm:$0xff]  }
  0x4c   : > { %1270 = vmatprep.mubr.bf16.mxu0 %v9190_v47  ;;  %8898 = vmatpush3.bf16.msra.mxu0 %v9219_v59  ;;  %v9298_v47 = vld [vmem:[%s13745_s4 + $0x38] sm:$0xff]   ;;  %v9286_v59 = vld [vmem:[%s10297_s13 + $0x190] ss:$24 sps:$4 sm:$0xff]  }
  0x4d   : > { %1399 = vmatmul.mubr.bf16.gmra.mxu1 %v9189_v50  ;;  %8899 = vmatprep.subr.bf16.mxu0 %v9231_v0  ;;  %v9275_v50 = vld [vmem:[%s10297_s13 + $0x104] ss:$24 sps:$4 sm:$0xff]   ;;  %v9290_v0 = vld [vmem:[%s10297_s13 + $0x1f4] ss:$24 sps:$4 sm:$0xff]  }
  0x4e   : > { %1406 = vmatprep.mubr.bf16.mxu1 %v9193_v51  ;;  %9036 = vmatpush3.bf16.msra.mxu1 %v9298_v47  ;;  %v9299_v51 = vld [vmem:[%s13745_s4 + $0x30] sm:$0xff]  }
  0x4f   : > { %9037 = vmatprep.subr.bf16.mxu1 %v10126_v48 }
  0x50   : > { %8900 = vmatpush3.bf16.msra.mxu0 %v9233_v1  ;;  %v9303_v1 = vld [vmem:[%s13745_s4 + $0x10] sm:$0xff]  }
  0x51   : > { %8901 = vmatprep.subr.bf16.mxu0 %v9240_v3  ;;  %v9292_v3 = vld [vmem:[%s10297_s13 + $0x1f0] ss:$24 sps:$4 sm:$0xff]  }
  0x52   : > { %9038 = vmatpush3.bf16.msra.mxu1 %v9299_v51 }
  0x53   : > { %1271 = vmatmul.mubr.bf16.gmra.mxu0 %v9192_v54  ;;  %9039 = vmatprep.subr.bf16.mxu1 %v10126_v48  ;;  %v9280_v54 = vld [vmem:[%s10297_s13 + $0x130] ss:$24 sps:$4 sm:$0xff]  }
  0x54   : > { %1278 = vmatprep.mubr.bf16.mxu0 %v9198_v55  ;;  %8902 = vmatpush3.bf16.msra.mxu0 %v9243_v5  ;;  %v9281_v55 = vld [vmem:[%s10297_s13 + $0x164] ss:$24 sps:$4 sm:$0xff]  }
  0x55   : > { %1407 = vmatmul.mubr.bf16.gmra.mxu1 %v9195_v56  ;;  %8903 = vmatprep.subr.bf16.mxu0 %v9254_v9  ;;  %v9300_v56 = vld [vmem:[%s13745_s4 + $0x28] sm:$0xff]   ;;  %v9305_v5 = vld [vmem:[%s13745_s4] sm:$0xff]  }
  0x56   : > { %1414 = vmatprep.mubr.bf16.mxu1 %v9201_v57  ;;  %9040 = vmatpush3.bf16.msra.mxu1 %v9300_v56  ;;  %v9283_v57 = vld [vmem:[%s10297_s13 + $0x160] ss:$24 sps:$4 sm:$0xff]  }
  0x57   : > { %9041 = vmatprep.subr.bf16.mxu1 %v10126_v48 }
  0x58   : > { %8904 = vmatpush3.bf16.msra.mxu0 %v9255_v10  ;;  %v10468_v10 = vld [vmem:[%s13744_s3] ss:$0 sm:$0xff] }
  0x5b   : > { %1279 = vmatmul.mubr.bf16.gmra.mxu0 %v9200_v60  ;;  %v9287_v60 = vld [vmem:[%s10297_s13 + $0x1c4] ss:$24 sps:$4 sm:$0xff]  }
  0x5c   : > { %1286 = vmatprep.mubr.bf16.mxu0 %v9204_v61  ;;  %v9301_v61 = vld [vmem:[%s13745_s4 + $0x20] sm:$0xff]  }
  0x5d   : > { %1415 = vmatmul.mubr.bf16.gmra.mxu1 %v9203_v62  ;;  %v9302_v62 = vld [vmem:[%s13745_s4 + $0x18] sm:$0xff]  }
  0x5e   : > { %1422 = vmatprep.mubr.bf16.mxu1 %v9209_v63  ;;  %9042 = vmatpush3.bf16.msra.mxu1 %v9301_v61  ;;  %v9289_v63 = vld [vmem:[%s10297_s13 + $0x1c0] ss:$24 sps:$4 sm:$0xff]  }
  0x5f   : > { %9043 = vmatprep.subr.bf16.mxu1 %v10126_v48 }
  0x62   : > { %9044 = vmatpush3.bf16.msra.mxu1 %v9302_v62 }
  0x63   : > { %1287 = vmatmul.mubr.bf16.gmra.mxu0 %v9207_v2  ;;  %9045 = vmatprep.subr.bf16.mxu1 %v10126_v48  ;;  %v9304_v2 = vld [vmem:[%s13745_s4 + $0x8] sm:$0xff]  }
  0x64   : > { %1294 = vmatprep.mubr.bf16.mxu0 %v9212_v4  ;;  %v9293_v4 = vld [vmem:[%s10297_s13 + $0x224] ss:$24 sps:$4 sm:$0xff]  }
  0x65   : > { %1423 = vmatmul.mubr.bf16.gmra.mxu1 %v9211_v6  ;;  %v9295_v6 = vld [vmem:[%s10297_s13 + $0x220] ss:$24 sps:$4 sm:$0xff]  }
  0x66   : > { %1430 = vmatprep.mubr.bf16.mxu1 %v9215_v7  ;;  %9046 = vmatpush3.bf16.msra.mxu1 %v9303_v1  ;;  %v441_v7 = vld [vmem:[%s10297_s13 + $0x250] sm:$0x33]  ;;  %s8677_s13 = sadd.s32 4, %s10823_s18 }
  0x67   : > { %9047 = vmatprep.subr.bf16.mxu1 %v10126_v48  ;;  %s2484_s26 = sadd.s32 1, %s8677_s13 }
  0x68   : > { %s10868_s15 = sld [smem:[#allocation5 + %s2484_s26]] }
  0x6a   : > { %9048 = vmatpush3.bf16.msra.mxu1 %v9304_v2 }
  0x6b   : > { %1295 = vmatmul.mubr.bf16.gmra.mxu0 %v9214_v8  ;;  %9049 = vmatprep.subr.bf16.mxu1 %v10126_v48  ;;  %v7927_v8 = vcombine.high %v441_v7, %v441_v7 }
  0x6c   : > { %1302 = vmatprep.mubr.bf16.mxu0 %v9220_v11 }
  0x6d   : > { %1431 = vmatmul.mubr.bf16.gmra.mxu1 %v9217_v12 }
  0x6e   : > { %1438 = vmatprep.mubr.bf16.mxu1 %v9223_v13  ;;  %9050 = vmatpush3.bf16.msra.mxu1 %v9305_v5  ;;  %s8047_s26 = sadd.s32 4294967295, %s10868_s15  ;;  %s2569_s30 = sadd.s32 1, %s10868_s15 }
  0x73   : > { %1303 = vmatmul.mubr.bf16.gmra.mxu0 %v9222_v14 }
  0x74   : > { %1310 = vmatprep.mubr.bf16.mxu0 %v9226_v15  ;;  %v7926_v15 = vcombine.low %v441_v7, %v441_v7 }
  0x75   : > { %1439 = vmatmul.mubr.bf16.gmra.mxu1 %v9225_v16 }
  0x76   : > { %1446 = vmatprep.mubr.bf16.mxu1 %v9229_v17 }
  0x7b   : > { %1311 = vmatmul.mubr.bf16.gmra.mxu0 %v9228_v18 }
  0x7c   : > { %1318 = vmatprep.mubr.bf16.mxu0 %v9234_v19 }
  0x7d   : > { %1447 = vmatmul.mubr.bf16.gmra.mxu1 %v9232_v20 }
  0x7e   : > { %1454 = vmatprep.mubr.bf16.mxu1 %v9237_v21 }
  0x83   : > { %1319 = vmatmul.mubr.bf16.gmra.mxu0 %v9236_v22 }
  0x84   : > { %1326 = vmatprep.mubr.bf16.mxu0 %v9241_v24 }
  0x85   : > { %1455 = vmatmul.mubr.bf16.gmra.mxu1 %v9239_v23 }
  0x86   : > { %1462 = vmatprep.mubr.bf16.mxu1 %v9245_v25 }
  0x8b   : > { %1327 = vmatmul.mubr.bf16.gmra.mxu0 %v9244_v26 }
  0x8c   : > { %1334 = vmatprep.mubr.bf16.mxu0 %v9248_v27 }
  0x8d   : > { %1463 = vmatmul.mubr.bf16.gmra.mxu1 %v9247_v28 }
  0x8e   : > { %1470 = vmatprep.mubr.bf16.mxu1 %v9251_v29 }
  0x93   : > { %1335 = vmatmul.mubr.bf16.gmra.mxu0 %v9250_v31 }
  0x94   : > { %1342 = vmatprep.mubr.bf16.mxu0 %v7923_v34 }
  0x95   : > { %1471 = vmatmul.mubr.bf16.gmra.mxu1 %v9253_v33 }
  0x96   : > { %1478 = vmatprep.mubr.bf16.mxu1 %v7925_v35 }
  0x9b   : > { %1343 = vmatmul.mubr.bf16.gmra.mxu0 %v7922_v37 }
  0x9c   : > { %1518 = vmatprep.mubr.bf16.mxu0 %v9262_v36 }
  0x9d   : > { %1479 = vmatmul.mubr.bf16.gmra.mxu1 %v7924_v38 }
  0x9e   : > { %9051 = vmatprep.mubr.msk.bf16.mxu1 %vm10127_vm0, %v10126_v48 }
  0xa3   : > { %1519 = vmatmul.mubr.bf16.vlgmr.msra.gmra.mxu0 %v9260_v39 }
  0xa4   : > { %1526 = vmatprep.mubr.bf16.mxu0 %v9263_v40 }
  0xab   : > { %1527 = vmatmul.mubr.bf16.gmra.mxu0 %v9265_v41 }
  0xac   : > { %1534 = vmatprep.mubr.bf16.mxu0 %v9266_v42 }
  0xb3   : > { %1535 = vmatmul.mubr.bf16.gmra.mxu0 %v9268_v43 }
  0xb4   : > { %1542 = vmatprep.mubr.bf16.mxu0 %v9269_v44 }
  0xbb   : > { %1543 = vmatmul.mubr.bf16.gmra.mxu0 %v9271_v45 }
  0xbc   : > { %1550 = vmatprep.mubr.bf16.mxu0 %v9272_v46 }
  0xc3   : > { %1551 = vmatmul.mubr.bf16.gmra.mxu0 %v9274_v49 }
  0xc4   : > { %1558 = vmatprep.mubr.bf16.mxu0 %v9275_v50 }
  0xcb   : > { %1559 = vmatmul.mubr.bf16.gmra.mxu0 %v9277_v52 }
  0xcc   : > { %1566 = vmatprep.mubr.bf16.mxu0 %v9278_v53 }
  0xd3   : > { %1567 = vmatmul.mubr.bf16.gmra.mxu0 %v9280_v54 }
  0xd4   : > { %1574 = vmatprep.mubr.bf16.mxu0 %v9281_v55 }
  0xdb   : > { %1575 = vmatmul.mubr.bf16.gmra.mxu0 %v9283_v57 }
  0xdc   : > { %1582 = vmatprep.mubr.bf16.mxu0 %v9284_v58 }
  0xe3   : > { %1583 = vmatmul.mubr.bf16.gmra.mxu0 %v9286_v59 }
  0xe4   : > { %1590 = vmatprep.mubr.bf16.mxu0 %v9287_v60 }
  0xeb   : > { %1591 = vmatmul.mubr.bf16.gmra.mxu0 %v9289_v63 }
  0xec   : > { %1598 = vmatprep.mubr.bf16.mxu0 %v9290_v0 }
  0xf3   : > { %1599 = vmatmul.mubr.bf16.gmra.mxu0 %v9292_v3 }
  0xf4   : > { %1606 = vmatprep.mubr.bf16.mxu0 %v9293_v4 }
  0xfb   : > { %v8717_v9 = vpop.f32.mrf.mxu0  ;;  %1607 = vmatmul.mubr.bf16.gmra.mxu0 %v9295_v6 }
  0xfc   : > { %1614 = vmatprep.mubr.bf16.mxu0 %v7927_v8 }
  0xfd   : > { %v8718_v11 = vpop.f32.mrf.mxu0  ;;  %v8811_v13 = vpop.f32.mrf.mxu1 }
  0xfe   : > { %v8719_v12 = vadd.f32 %v8718_v11, %v8717_v9 }
  0xff   : > { %v8720_v14 = vpop.f32.mrf.mxu0  ;;  %v8812_v17 = vpop.f32.mrf.mxu1 }
 0x100   : > { %v1249_v16 = vadd.f32 %v8719_v12, %v10468_v10  ;;  %v8813_v18 = vadd.f32 %v8812_v17, %v8811_v13 }
 0x101   : > { %v8721_v19 = vpop.f32.mrf.mxu0  ;;  %v8814_v21 = vpop.f32.mrf.mxu1 }
 0x102   : > { %v8722_v20 = vadd.f32 %v8721_v19, %v8720_v14  ;;  %v10471_v22 = vadd.f32 %v8813_v18, %v1249_v16 }
 0x103   : > { %v8723_v23 = vpop.f32.mrf.mxu0  ;;  %1615 = vmatmul.mubr.bf16.gmra.mxu0 %v7926_v15  ;;  %v8815_v25 = vpop.f32.mrf.mxu1 }
 0x104   : > { %v1252_v24 = vadd.f32 %v8722_v20, %v10468_v10  ;;  %v8816_v26 = vadd.f32 %v8815_v25, %v8814_v21 }
 0x105   : > { %v8724_v27 = vpop.f32.mrf.mxu0  ;;  %v8817_v29 = vpop.f32.mrf.mxu1 }
 0x106   : > { %v8725_v28 = vadd.f32 %v8724_v27, %v8723_v23  ;;  %v10474_v30 = vadd.f32 %v8816_v26, %v1252_v24 }
 0x107   : > { %v8726_v31 = vpop.f32.mrf.mxu0  ;;  %v8818_v33 = vpop.f32.mrf.mxu1 }
 0x108   : > { %v1257_v32 = vadd.f32 %v8725_v28, %v10468_v10  ;;  %v8819_v34 = vadd.f32 %v8818_v33, %v8817_v29 }
 0x109   : > { %v8727_v35 = vpop.f32.mrf.mxu0  ;;  %v8820_v37 = vpop.f32.mrf.mxu1 }
 0x10a   : > { %v8728_v36 = vadd.f32 %v8727_v35, %v8726_v31  ;;  %v10477_v38 = vadd.f32 %v8819_v34, %v1257_v32  ;;  %v9306_v34 = vld [vmem:[%s13747_s6 + $0x70] ss:$8 sps:$4 sm:$0xff]   ;;  %v9308_v35 = vld [vmem:[%s13747_s6 + $0x74] ss:$8 sps:$4 sm:$0xff]  }
 0x10b   : > { %v8729_v39 = vpop.f32.mrf.mxu0  ;;  %v8821_v41 = vpop.f32.mrf.mxu1  ;;  %6833 = vmatprep.subr.bf16.mxu0 %v9308_v35 }
 0x10c   : > { %v1260_v40 = vadd.f32 %v8728_v36, %v10468_v10  ;;  %v8822_v42 = vadd.f32 %v8821_v41, %v8820_v37  ;;  %v9314_v41 = vld [vmem:[%s13747_s6 + $0x64] ss:$8 sps:$4 sm:$0xff]   ;;  %6834 = vmatpush1.bf16.msra.mxu0 %v9306_v34 }
 0x10d   : > { %v8730_v43 = vpop.f32.mrf.mxu0  ;;  %v8823_v45 = vpop.f32.mrf.mxu1  ;;  %6835 = vmatprep.subr.bf16.mxu0 %v9314_v41 }
 0x10e   : > { %v8731_v44 = vadd.f32 %v8730_v43, %v8729_v39  ;;  %v10480_v46 = vadd.f32 %v8822_v42, %v1260_v40  ;;  %v9311_v39 = vld [vmem:[%s13747_s6 + $0x174] ss:$8 sps:$4 sm:$0xff]   ;;  %v9312_v40 = vld [vmem:[%s13747_s6 + $0x60] ss:$8 sps:$4 sm:$0xff]  }
 0x10f   : > { %v8732_v47 = vpop.f32.mrf.mxu0  ;;  %v8824_v50 = vpop.f32.mrf.mxu1  ;;  %6874 = vmatprep.subr.bf16.mxu1 %v9311_v39  ;;  %v9332_v39 = vld [vmem:[%s13747_s6 + $0x34] ss:$8 sps:$4 sm:$0xff]  }
 0x110   : > { %v1265_v49 = vadd.f32 %v8731_v44, %v10468_v10  ;;  %v8825_v51 = vadd.f32 %v8824_v50, %v8823_v45  ;;  %6836 = vmatpush1.bf16.msra.mxu0 %v9312_v40 }
 0x111   : > { %v8733_v52 = vpop.f32.mrf.mxu0  ;;  %v8826_v54 = vpop.f32.mrf.mxu1 }
 0x112   : > { %v8734_v53 = vadd.f32 %v8733_v52, %v8732_v47  ;;  %v10483_v55 = vadd.f32 %v8825_v51, %v1265_v49 }
 0x113   : > { %v8735_v56 = vpop.f32.mrf.mxu0  ;;  %v8827_v58 = vpop.f32.mrf.mxu1 }
 0x114   : > { %v1268_v57 = vadd.f32 %v8734_v53, %v10468_v10  ;;  %v8828_v59 = vadd.f32 %v8827_v58, %v8826_v54 }
 0x115   : > { %v8736_v60 = vpop.f32.mrf.mxu0  ;;  %v8829_v62 = vpop.f32.mrf.mxu1 }
 0x116   : > { %v8737_v61 = vadd.f32 %v8736_v60, %v8735_v56  ;;  %v10486_v63 = vadd.f32 %v8828_v59, %v1268_v57 }
 0x117   : > { %v8738_v0 = vpop.f32.mrf.mxu0  ;;  %v8830_v2 = vpop.f32.mrf.mxu1 }
 0x118   : > { %v1273_v1 = vadd.f32 %v8737_v61, %v10468_v10  ;;  %v8831_v3 = vadd.f32 %v8830_v2, %v8829_v62  ;;  %v9318_v2 = vld [vmem:[%s13747_s6 + $0x50] ss:$8 sps:$4 sm:$0xff]  }
 0x119   : > { %v8739_v4 = vpop.f32.mrf.mxu0  ;;  %v8832_v6 = vpop.f32.mrf.mxu1 }
 0x11a   : > { %v8740_v5 = vadd.f32 %v8739_v4, %v8738_v0  ;;  %v10489_v7 = vadd.f32 %v8831_v3, %v1273_v1  ;;  %v9320_v3 = vld [vmem:[%s13747_s6 + $0x54] ss:$8 sps:$4 sm:$0xff]  }
 0x11b   : > { %v8741_v8 = vpop.f32.mrf.mxu0  ;;  %v8833_v11 = vpop.f32.mrf.mxu1  ;;  %6837 = vmatprep.subr.bf16.mxu0 %v9320_v3  ;;  %v9344_v3 = vld [vmem:[%s13747_s6 + $0x14] ss:$8 sps:$4 sm:$0xff]  }
 0x11c   : > { %v1276_v9 = vadd.f32 %v8740_v5, %v10468_v10  ;;  %v8834_v12 = vadd.f32 %v8833_v11, %v8832_v6  ;;  %6838 = vmatpush1.bf16.msra.mxu0 %v9318_v2  ;;  %v9342_v2 = vld [vmem:[%s13747_s6 + $0x10] ss:$8 sps:$4 sm:$0xff]  }
 0x11d   : > { %v8742_v13 = vpop.f32.mrf.mxu0  ;;  %v8835_v15 = vpop.f32.mrf.mxu1 }
 0x11e   : > { %v8743_v14 = vadd.f32 %v8742_v13, %v8741_v8  ;;  %v10492_v16 = vadd.f32 %v8834_v12, %v1276_v9 }
 0x11f   : > { %v8744_v17 = vpop.f32.mrf.mxu0  ;;  %v8836_v19 = vpop.f32.mrf.mxu1 }
 0x120   : > { %v1281_v18 = vadd.f32 %v8743_v14, %v10468_v10  ;;  %v8837_v20 = vadd.f32 %v8836_v19, %v8835_v15 }
 0x121   : > { %v8745_v21 = vpop.f32.mrf.mxu0  ;;  %v8838_v24 = vpop.f32.mrf.mxu1 }
 0x122   : > { %v8746_v23 = vadd.f32 %v8745_v21, %v8744_v17  ;;  %v10495_v25 = vadd.f32 %v8837_v20, %v1281_v18 }
 0x123   : > { %v8747_v26 = vpop.f32.mrf.mxu0  ;;  %v8839_v28 = vpop.f32.mrf.mxu1 }
 0x124   : > { %v1284_v27 = vadd.f32 %v8746_v23, %v10468_v10  ;;  %v8840_v29 = vadd.f32 %v8839_v28, %v8838_v24  ;;  %v9324_v24 = vld [vmem:[%s13747_s6 + $0x40] ss:$8 sps:$4 sm:$0xff]  }
 0x125   : > { %v8748_v31 = vpop.f32.mrf.mxu0  ;;  %v8841_v33 = vpop.f32.mrf.mxu1 }
 0x126   : > { %v8749_v32 = vadd.f32 %v8748_v31, %v8747_v26  ;;  %v10504_v36 = vadd.f32 %v8840_v29, %v1284_v27  ;;  %v9326_v26 = vld [vmem:[%s13747_s6 + $0x44] ss:$8 sps:$4 sm:$0xff]  }
 0x127   : > { %v8750_v37 = vpop.f32.mrf.mxu0  ;;  %v8842_v43 = vpop.f32.mrf.mxu1  ;;  %6839 = vmatprep.subr.bf16.mxu0 %v9326_v26 }
 0x128   : > { %v1289_v42 = vadd.f32 %v8749_v32, %v10468_v10  ;;  %v8843_v44 = vadd.f32 %v8842_v43, %v8841_v33  ;;  %6840 = vmatpush1.bf16.msra.mxu0 %v9324_v24 }
 0x129   : > { %v8751_v45 = vpop.f32.mrf.mxu0  ;;  %v8844_v49 = vpop.f32.mrf.mxu1  ;;  %6841 = vmatprep.subr.bf16.mxu0 %v9332_v39 }
 0x12a   : > { %v8752_v47 = vadd.f32 %v8751_v45, %v8750_v37  ;;  %v10516_v50 = vadd.f32 %v8843_v44, %v1289_v42  ;;  %v9330_v37 = vld [vmem:[%s13747_s6 + $0x30] ss:$8 sps:$4 sm:$0xff]  }
 0x12b   : > { %v8753_v51 = vpop.f32.mrf.mxu0  ;;  %v8845_v53 = vpop.f32.mrf.mxu1 }
 0x12c   : > { %v1292_v52 = vadd.f32 %v8752_v47, %v10468_v10  ;;  %v8846_v54 = vadd.f32 %v8845_v53, %v8844_v49  ;;  %6842 = vmatpush1.bf16.msra.mxu0 %v9330_v37  ;;  %v9336_v53 = vld [vmem:[%s13747_s6 + $0x20] ss:$8 sps:$4 sm:$0xff]   ;;  %v9350_v37 = vld [vmem:[%s13747_s6 + $0x4] ss:$8 sps:$4 sm:$0xff]  }
 0x12d   : > { %v8754_v56 = vpop.f32.mrf.mxu0  ;;  %v8847_v58 = vpop.f32.mrf.mxu1 }
 0x12e   : > { %v8755_v57 = vadd.f32 %v8754_v56, %v8753_v51  ;;  %v10519_v59 = vadd.f32 %v8846_v54, %v1292_v52 }
 0x12f   : > { %v8756_v60 = vpop.f32.mrf.mxu0  ;;  %v8848_v62 = vpop.f32.mrf.mxu1 }
 0x130   : > { %v1297_v61 = vadd.f32 %v8755_v57, %v10468_v10  ;;  %v8849_v0 = vadd.f32 %v8848_v62, %v8847_v58  ;;  %v9338_v57 = vld [vmem:[%s13747_s6 + $0x24] ss:$8 sps:$4 sm:$0xff]  }
 0x131   : > { %v8757_v1 = vpop.f32.mrf.mxu0  ;;  %v8850_v5 = vpop.f32.mrf.mxu1  ;;  %6843 = vmatprep.subr.bf16.mxu0 %v9338_v57 }
 0x132   : > { %v8758_v4 = vadd.f32 %v8757_v1, %v8756_v60  ;;  %v10528_v6 = vadd.f32 %v8849_v0, %v1297_v61  ;;  %6844 = vmatpush1.bf16.msra.mxu0 %v9336_v53  ;;  %v9362_v53 = vld [vmem:[%s13747_s6 + $0xe4] ss:$8 sps:$4 sm:$0xff]  }
 0x133   : > { %v8759_v8 = vpop.f32.mrf.mxu0  ;;  %v8851_v11 = vpop.f32.mrf.mxu1  ;;  %6845 = vmatprep.subr.bf16.mxu0 %v9344_v3  ;;  %v9368_v3 = vld [vmem:[%s13747_s6 + $0xd4] ss:$8 sps:$4 sm:$0xff]  }
 0x134   : > { %v1300_v9 = vadd.f32 %v8758_v4, %v10468_v10  ;;  %v8852_v12 = vadd.f32 %v8851_v11, %v8850_v5 }
 0x135   : > { %v8760_v13 = vpop.f32.mrf.mxu0  ;;  %v8853_v15 = vpop.f32.mrf.mxu1 }
 0x136   : > { %v8761_v14 = vadd.f32 %v8760_v13, %v8759_v8  ;;  %v10531_v17 = vadd.f32 %v8852_v12, %v1300_v9  ;;  %6846 = vmatpush1.bf16.msra.mxu0 %v9342_v2 }
 0x137   : > { %v8762_v18 = vpop.f32.mrf.mxu0  ;;  %v8854_v20 = vpop.f32.mrf.mxu1  ;;  %6847 = vmatprep.subr.bf16.mxu0 %v9350_v37 }
 0x138   : > { %v1305_v19 = vadd.f32 %v8761_v14, %v10468_v10  ;;  %v8855_v21 = vadd.f32 %v8854_v20, %v8853_v15 }
 0x139   : > { %v8763_v23 = vpop.f32.mrf.mxu0  ;;  %v8856_v28 = vpop.f32.mrf.mxu1 }
 0x13a   : > { %v8764_v27 = vadd.f32 %v8763_v23, %v8762_v18  ;;  %v10540_v29 = vadd.f32 %v8855_v21, %v1305_v19 }
 0x13b   : > { %v8765_v31 = vpop.f32.mrf.mxu0  ;;  %v8857_v33 = vpop.f32.mrf.mxu1 }
 0x13c   : > { %v1308_v32 = vadd.f32 %v8764_v27, %v10468_v10  ;;  %v8858_v34 = vadd.f32 %v8857_v33, %v8856_v28 }
 0x13d   : > { %v8766_v35 = vpop.f32.mrf.mxu0  ;;  %v8859_v41 = vpop.f32.mrf.mxu1 }
 0x13e   : > { %v8767_v40 = vadd.f32 %v8766_v35, %v8765_v31  ;;  %v10549_v42 = vadd.f32 %v8858_v34, %v1308_v32  ;;  %v9348_v35 = vld [vmem:[%s13747_s6] ss:$8 sps:$4 sm:$0xff]  }
 0x13f   : > { %v8768_v43 = vpop.f32.mrf.mxu0  ;;  %v8860_v45 = vpop.f32.mrf.mxu1  ;;  %6848 = vmatpush1.bf16.msra.mxu0 %v9348_v35  ;;  %v9380_v35 = vld [vmem:[%s13747_s6 + $0xb4] ss:$8 sps:$4 sm:$0xff]  }
 0x140   : > { %v1313_v44 = vadd.f32 %v8767_v40, %v10468_v10  ;;  %v8861_v47 = vadd.f32 %v8860_v45, %v8859_v41  ;;  %v9356_v41 = vld [vmem:[%s13747_s6 + $0xf4] ss:$8 sps:$4 sm:$0xff]  }
 0x141   : > { %v8769_v49 = vpop.f32.mrf.mxu0  ;;  %v8862_v52 = vpop.f32.mrf.mxu1  ;;  %6849 = vmatprep.subr.bf16.mxu0 %v9356_v41 }
 0x142   : > { %v8770_v51 = vadd.f32 %v8769_v49, %v8768_v43  ;;  %v10555_v54 = vadd.f32 %v8861_v47, %v1313_v44  ;;  %v9354_v49 = vld [vmem:[%s13747_s6 + $0xf0] ss:$8 sps:$4 sm:$0xff]  }
 0x143   : > { %v8771_v56 = vpop.f32.mrf.mxu0  ;;  %v8863_v60 = vpop.f32.mrf.mxu1  ;;  %6850 = vmatpush2.bf16.msra.mxu0 %v9354_v49 }
 0x144   : > { %v1316_v58 = vadd.f32 %v8770_v51, %v10468_v10  ;;  %v8864_v61 = vadd.f32 %v8863_v60, %v8862_v52  ;;  %6851 = vmatprep.subr.bf16.mxu0 %v9362_v53 }
 0x145   : > { %v8772_v62 = vpop.f32.mrf.mxu0  ;;  %v8865_v1 = vpop.f32.mrf.mxu1 }
 0x146   : > { %v8773_v0 = vadd.f32 %v8772_v62, %v8771_v56  ;;  %v10567_v4 = vadd.f32 %v8864_v61, %v1316_v58 }
 0x147   : > { %v8774_v5 = vpop.f32.mrf.mxu0  ;;  %v8866_v9 = vpop.f32.mrf.mxu1 }
 0x148   : > { %v1321_v8 = vadd.f32 %v8773_v0, %v10468_v10  ;;  %v8867_v11 = vadd.f32 %v8866_v9, %v8865_v1  ;;  %v9360_v0 = vld [vmem:[%s13747_s6 + $0xe0] ss:$8 sps:$4 sm:$0xff]  }
 0x149   : > { %v8775_v12 = vpop.f32.mrf.mxu0  ;;  %v8868_v14 = vpop.f32.mrf.mxu1  ;;  %6852 = vmatpush2.bf16.msra.mxu0 %v9360_v0 }
 0x14a   : > { %v8776_v13 = vadd.f32 %v8775_v12, %v8774_v5  ;;  %v10570_v15 = vadd.f32 %v8867_v11, %v1321_v8  ;;  %6853 = vmatprep.subr.bf16.mxu0 %v9368_v3 }
 0x14b   : > { %v8777_v18 = vpop.f32.mrf.mxu0  ;;  %v8869_v20 = vpop.f32.mrf.mxu1 }
 0x14c   : > { %v1324_v19 = vadd.f32 %v8776_v13, %v10468_v10  ;;  %v8870_v21 = vadd.f32 %v8869_v20, %v8868_v14  ;;  %v9366_v14 = vld [vmem:[%s13747_s6 + $0xd0] ss:$8 sps:$4 sm:$0xff]   ;;  %v9374_v20 = vld [vmem:[%s13747_s6 + $0xc4] ss:$8 sps:$4 sm:$0xff]  }
 0x14d   : > { %v8778_v23 = vpop.f32.mrf.mxu0  ;;  %v8871_v26 = vpop.f32.mrf.mxu1  ;;  %6854 = vmatpush2.bf16.msra.mxu0 %v9366_v14  ;;  %v9317_v14 = vld [vmem:[%s13747_s6 + $0x164] ss:$8 sps:$4 sm:$0xff]  }
 0x14e   : > { %v8779_v24 = vadd.f32 %v8778_v23, %v8777_v18  ;;  %v10573_v27 = vadd.f32 %v8870_v21, %v1324_v19  ;;  %6855 = vmatprep.subr.bf16.mxu0 %v9374_v20 }
 0x14f   : > { %v8780_v28 = vpop.f32.mrf.mxu0  ;;  %v8872_v32 = vpop.f32.mrf.mxu1 }
 0x150   : > { %v1329_v31 = vadd.f32 %v8779_v24, %v10468_v10  ;;  %v8873_v33 = vadd.f32 %v8872_v32, %v8871_v26  ;;  %v9372_v32 = vld [vmem:[%s13747_s6 + $0xc0] ss:$8 sps:$4 sm:$0xff]  }
 0x151   : > { %v8781_v34 = vpop.f32.mrf.mxu0  ;;  %v8874_v40 = vpop.f32.mrf.mxu1  ;;  %6856 = vmatpush2.bf16.msra.mxu0 %v9372_v32  ;;  %v10128_v32 = vmov 1966171168  }
 0x152   : > { %v8782_v39 = vadd.f32 %v8781_v34, %v8780_v28  ;;  %v10585_v43 = vadd.f32 %v8873_v33, %v1329_v31  ;;  %6857 = vmatprep.subr.bf16.mxu0 %v9380_v35 }
 0x153   : > { %v8783_v44 = vpop.f32.mrf.mxu0  ;;  %v8875_v47 = vpop.f32.mrf.mxu1 }
 0x154   : > { %v1332_v45 = vadd.f32 %v8782_v39, %v10468_v10  ;;  %v8876_v51 = vadd.f32 %v8875_v47, %v8874_v40 }
 0x155   : > { %v8784_v52 = vpop.f32.mrf.mxu0  ;;  %v8877_v57 = vpop.f32.mrf.mxu1 }
 0x156   : > { %v8785_v56 = vadd.f32 %v8784_v52, %v8783_v44  ;;  %v10594_v58 = vadd.f32 %v8876_v51, %v1332_v45  ;;  %v9386_v45 = vld [vmem:[%s13747_s6 + $0xa4] ss:$8 sps:$4 sm:$0xff]   ;;  %v9384_v52 = vld [vmem:[%s13747_s6 + $0xa0] ss:$8 sps:$4 sm:$0xff]  }
 0x157   : > { %v8786_v60 = vpop.f32.mrf.mxu0  ;;  %v8878_v62 = vpop.f32.mrf.mxu1 }
 0x158   : > { %v1337_v61 = vadd.f32 %v8785_v56, %v10468_v10  ;;  %v8879_v1 = vadd.f32 %v8878_v62, %v8877_v57  ;;  %v9392_v56 = vld [vmem:[%s13747_s6 + $0x94] ss:$8 sps:$4 sm:$0xff]  }
 0x159   : > { %v8787_v2 = vpop.f32.mrf.mxu0  ;;  %v8880_v8 = vpop.f32.mrf.mxu1 }
 0x15a   : > { %v8788_v5 = vadd.f32 %v8787_v2, %v8786_v60  ;;  %v10603_v9 = vadd.f32 %v8879_v1, %v1337_v61  ;;  %v9398_v2 = vld [vmem:[%s13747_s6 + $0x84] ss:$8 sps:$4 sm:$0xff]  }
 0x15b   : > { %v8789_v11 = vpop.f32.mrf.mxu0  ;;  %v8881_v13 = vpop.f32.mrf.mxu1 }
 0x15c   : > { %v1340_v12 = vadd.f32 %v8788_v5, %v10468_v10  ;;  %v8882_v18 = vadd.f32 %v8881_v13, %v8880_v8 }
 0x15d   : > { %v8790_v19 = vpop.f32.mrf.mxu0  ;;  %v8883_v23 = vpop.f32.mrf.mxu1 }
 0x15e   : > { %v8791_v21 = vadd.f32 %v8790_v19, %v8789_v11  ;;  %v10612_v24 = vadd.f32 %v8882_v18, %v1340_v12  ;;  %v9309_v11 = vld [vmem:[%s13747_s6 + $0x170] ss:$8 sps:$4 sm:$0xff]   ;;  %v9396_v18 = vld [vmem:[%s13747_s6 + $0x80] ss:$8 sps:$4 sm:$0xff]  }
 0x15f   : > { %v8792_v26 = vpop.f32.mrf.mxu0  ;;  %v8884_v31 = vpop.f32.mrf.mxu1 }
 0x160   : > { %v1345_v28 = vadd.f32 %v8791_v21, %v10468_v10  ;;  %v8885_v33 = vadd.f32 %v8884_v31, %v8883_v23  ;;  %v9378_v10 = vld [vmem:[%s13747_s6 + $0xb0] ss:$8 sps:$4 sm:$0xff]   ;;  %v9323_v31 = vld [vmem:[%s13747_s6 + $0x154] ss:$8 sps:$4 sm:$0xff]  }
 0x161   : > { %v8793_v34 = vpop.f32.mrf.mxu0  ;;  %v8886_v37 = vpop.f32.mrf.mxu1  ;;  %6858 = vmatpush2.bf16.msra.mxu0 %v9378_v10 }
 0x162   : > { %v10621_v39 = vadd.f32 %v8885_v33, %v1345_v28  ;;  %6859 = vmatprep.subr.bf16.mxu0 %v9386_v45  ;;  %v9321_v45 = vld [vmem:[%s13747_s6 + $0x150] ss:$8 sps:$4 sm:$0xff]  }
 0x163   : > { %v8905_v40 = vpop.f32.mrf.mxu0  ;;  %v8887_v41 = vpop.f32.mrf.mxu1 }
 0x165   : > { %v8906_v44 = vpop.f32.mrf.mxu0  ;;  %6860 = vmatpush2.bf16.msra.mxu0 %v9384_v52 }
 0x166   : > { %v8907_v47 = vadd.f32 %v8906_v44, %v8905_v40  ;;  %6861 = vmatprep.subr.bf16.mxu0 %v9392_v56 }
 0x167   : > { %v8908_v49 = vpop.f32.mrf.mxu0 }
 0x168   : > { %v1521_v51 = vadd.f32 %v8907_v47, %v10471_v22  ;;  %v9390_v22 = vld [vmem:[%s13747_s6 + $0x90] ss:$8 sps:$4 sm:$0xff]  }
 0x169   : > { %v8909_v53 = vpop.f32.mrf.mxu0  ;;  %6862 = vmatpush2.bf16.msra.mxu0 %v9390_v22 }
 0x16a   : > { %v1622_v57 = vmax.f32 %v1521_v51, 0.0  ;;  %v8910_v60 = vadd.f32 %v8909_v53, %v8908_v49  ;;  %6863 = vmatprep.subr.bf16.mxu0 %v9398_v2  ;;  %v9329_v51 = vld [vmem:[%s13747_s6 + $0x144] ss:$8 sps:$4 sm:$0xff]  }
 0x16b   : > { %v8911_v61 = vpop.f32.mrf.mxu0 }
 0x16c   : > { %v8647_v62 = vpack.c.bf16 %v1622_v57, %v1622_v57  ;;  %v1524_v0 = vadd.f32 %v8910_v60, %v10474_v30 }
 0x16d   : > { %v8912_v1 = vpop.f32.mrf.mxu0  ;;  %6864 = vmatpush2.bf16.msra.mxu0 %v9396_v18 }
 0x16e   : > { %1932 = vst [vmem:[#allocation2] sm:$0xf] %v8647_v62  ;;  %v1623_v3 = vmax.f32 %v1524_v0, 0.0  ;;  %v8913_v5 = vadd.f32 %v8912_v1, %v8911_v61  ;;  %v9327_v0 = vld [vmem:[%s13747_s6 + $0x140] ss:$8 sps:$4 sm:$0xff]  }
 0x16f   : > { %v8914_v8 = vpop.f32.mrf.mxu0 }
 0x170   : > { %v1647_v30 = vpack.c.bf16 %v1623_v3, %v1622_v57  ;;  %v8648_v12 = vpack.c.bf16 %v1623_v3, %v1623_v3  ;;  %v1529_v13 = vadd.f32 %v8913_v5, %v10477_v38  ;;  %v9315_v38 = vld [vmem:[%s13747_s6 + $0x160] ss:$8 sps:$4 sm:$0xff]  }
 0x171   : > { %v8915_v19 = vpop.f32.mrf.mxu0 }
 0x172   : > { %1933 = vst [vmem:[#allocation2 + $0x4] sm:$0x7] %v8648_v12  ;;  %v1624_v20 = vmax.f32 %v1529_v13, 0.0  ;;  %v8916_v21 = vadd.f32 %v8915_v19, %v8914_v8  ;;  %9052 = vmatmul.mubr.bf16.vlgmr.msra.gmra.mxu1 %v1647_v30  ;;  %v7989_v34 = vrot.slane %v8648_v12, 11 }
 0x173   : > { %v8917_v23 = vpop.f32.mrf.mxu0  ;;  %9055 = vmatprep.mubr.msk.bf16.mxu1 %vm10127_vm0, %v10126_v48  ;;  %6875 = vmatpush1.bf16.msra.mxu1 %v9309_v11 }
 0x174   : > { %v8649_v26 = vpack.c.bf16 %v1624_v20, %v1624_v20  ;;  %v1532_v28 = vadd.f32 %v8916_v21, %v10480_v46  ;;  %6876 = vmatprep.subr.bf16.mxu1 %v9317_v14  ;;  %v9333_v14 = vld [vmem:[%s13747_s6 + $0x130] ss:$8 sps:$4 sm:$0xff]  }
 0x175   : > { %v8918_v33 = vpop.f32.mrf.mxu0 }
 0x176   : > { %v1944_v35 = vrot.slane %v8649_v26, 7  ;;  %v1625_v37 = vmax.f32 %v1532_v28, 0.0  ;;  %v8919_v40 = vadd.f32 %v8918_v33, %v8917_v23 }
 0x177   : > { %v8920_v41 = vpop.f32.mrf.mxu0  ;;  %6877 = vmatpush1.bf16.msra.mxu1 %v9315_v38 }
 0x178   : > { %v1945_v46 = vsel %vm10663_vm3, %v7989_v34, %v1944_v35  ;;  %v8650_v10 = vpack.c.bf16 %v1625_v37, %v1625_v37  ;;  %v1537_v44 = vadd.f32 %v8919_v40, %v10483_v55  ;;  %6878 = vmatprep.subr.bf16.mxu1 %v9323_v31  ;;  %v1648_v49 = vpack.c.bf16 %v1625_v37, %v1624_v20  ;;  %v9341_v20 = vld [vmem:[%s13747_s6 + $0x124] ss:$8 sps:$4 sm:$0xff]   ;;  %v9339_v34 = vld [vmem:[%s13747_s6 + $0x120] ss:$8 sps:$4 sm:$0xff]  }
 0x179   : > { %1952 = vst [vmem:[#allocation2 + $0x8] sm:$0xf] %v1945_v46  ;;  %v8921_v47 = vpop.f32.mrf.mxu0  ;;  %v1946_v52 = vrot.slane %v1944_v35, 4  ;;  %v2144_v35 = vlaneseq }
 0x17a   : > { %v1947_v53 = vrot.slane %v8650_v10, 7  ;;  %v1626_v56 = vmax.f32 %v1537_v44, 0.0  ;;  %v8922_v57 = vadd.f32 %v8921_v47, %v8920_v41  ;;  %9056 = vmatmul.mubr.bf16.gmra.mxu1 %v1648_v49  ;;  %v7992_v2 = vrot.slane %v8650_v10, 10 }
 0x17b   : > { %v8923_v55 = vpop.f32.mrf.mxu0  ;;  %9059 = vmatprep.mubr.msk.bf16.mxu1 %vm10127_vm0, %v10126_v48  ;;  %6879 = vmatpush1.bf16.msra.mxu1 %v9321_v45 }
 0x17c   : > { %v1948_v60 = vsel %vm10663_vm3, %v1946_v52, %v1947_v53  ;;  %v8651_v61 = vpack.c.bf16 %v1626_v56, %v1626_v56  ;;  %v1540_v62 = vadd.f32 %v8922_v57, %v10486_v63  ;;  %6880 = vmatprep.subr.bf16.mxu1 %v9329_v51  ;;  %v9335_v63 = vld [vmem:[%s13747_s6 + $0x134] ss:$8 sps:$4 sm:$0xff]   ;;  %v9345_v52 = vld [vmem:[%s13747_s6 + $0x110] ss:$8 sps:$4 sm:$0xff]   ;;  %v9353_v57 = vld [vmem:[%s13747_s6 + $0x104] ss:$8 sps:$4 sm:$0xff]  }
 0x17d   : > { %1953 = vst [vmem:[#allocation2 + $0xc] sm:$0x7] %v1948_v60  ;;  %v8924_v1 = vpop.f32.mrf.mxu0 }
 0x17e   : > { %v1964_v3 = vrot.slane %v8651_v61, 6  ;;  %v1627_v5 = vmax.f32 %v1540_v62, 0.0  ;;  %v8925_v8 = vadd.f32 %v8924_v1, %v8923_v55 }
 0x17f   : > { %v8926_v11 = vpop.f32.mrf.mxu0  ;;  %6881 = vmatpush1.bf16.msra.mxu1 %v9327_v0  ;;  %v9351_v0 = vld [vmem:[%s13747_s6 + $0x100] ss:$8 sps:$4 sm:$0xff]  }
 0x180   : > { %v1965_v30 = vsel %vm10686_vm6, %v7992_v2, %v1964_v3  ;;  %v8652_v12 = vpack.c.bf16 %v1627_v5, %v1627_v5  ;;  %v1545_v13 = vadd.f32 %v8925_v8, %v10489_v7  ;;  %v1649_v19 = vpack.c.bf16 %v1627_v5, %v1626_v56  ;;  %6882 = vmatprep.subr.bf16.mxu1 %v9335_v63  ;;  %v9359_v63 = vld [vmem:[%s13747_s6 + $0x1f4] ss:$8 sps:$4 sm:$0xff]  }
 0x181   : > { %1972 = vst [vmem:[#allocation2 + $0x10] sm:$0xf] %v1965_v30  ;;  %v8927_v18 = vpop.f32.mrf.mxu0  ;;  %v1966_v21 = vrot.slane %v1964_v3, 4  ;;  %v9357_v30 = vld [vmem:[%s13747_s6 + $0x1f0] ss:$8 sps:$4 sm:$0xff]  }
 0x182   : > { %v1967_v23 = vrot.slane %v8652_v12, 6  ;;  %v1628_v38 = vmax.f32 %v1545_v13, 0.0  ;;  %v8928_v26 = vadd.f32 %v8927_v18, %v8926_v11  ;;  %9060 = vmatmul.mubr.bf16.gmra.mxu1 %v1649_v19  ;;  %v7994_v40 = vrot.slane %v8652_v12, 9  ;;  %v9365_v13 = vld [vmem:[%s13747_s6 + $0x1e4] ss:$8 sps:$4 sm:$0xff]  }
 0x183   : > { %v8929_v7 = vpop.f32.mrf.mxu0  ;;  %9063 = vmatprep.mubr.msk.bf16.mxu1 %vm10127_vm0, %v10126_v48  ;;  %6883 = vmatpush1.bf16.msra.mxu1 %v9333_v14 }
 0x184   : > { %v1968_v28 = vsel %vm10686_vm6, %v1966_v21, %v1967_v23  ;;  %v8653_v31 = vpack.c.bf16 %v1628_v38, %v1628_v38  ;;  %v1548_v33 = vadd.f32 %v8928_v26, %v10492_v16  ;;  %6884 = vmatprep.subr.bf16.mxu1 %v9341_v20  ;;  %v9347_v16 = vld [vmem:[%s13747_s6 + $0x114] ss:$8 sps:$4 sm:$0xff]   ;;  %v9363_v26 = vld [vmem:[%s13747_s6 + $0x1e0] ss:$8 sps:$4 sm:$0xff]  }
 0x185   : > { %1973 = vst [vmem:[#allocation2 + $0x14] sm:$0x7] %v1968_v28  ;;  %v8930_v37 = vpop.f32.mrf.mxu0  ;;  %v9371_v28 = vld [vmem:[%s13747_s6 + $0x1d4] ss:$8 sps:$4 sm:$0xff]  }
 0x186   : > { %v1982_v41 = vrot.slane %v8653_v31, 5  ;;  %v1629_v46 = vmax.f32 %v1548_v33, 0.0  ;;  %v8931_v10 = vadd.f32 %v8930_v37, %v8929_v7 }
 0x187   : > { %v8932_v44 = vpop.f32.mrf.mxu0  ;;  %6885 = vmatpush1.bf16.msra.mxu1 %v9339_v34 }
 0x188   : > { %v1983_v45 = vsel %vm10712_vm9, %v7994_v40, %v1982_v41  ;;  %v1984_v47 = vrot.slane %v1982_v41, 4  ;;  %v8654_v49 = vpack.c.bf16 %v1629_v46, %v1629_v46  ;;  %v1553_v51 = vadd.f32 %v8931_v10, %v10495_v25  ;;  %6886 = vmatprep.subr.bf16.mxu1 %v9347_v16  ;;  %v9369_v10 = vld [vmem:[%s13747_s6 + $0x1d0] ss:$8 sps:$4 sm:$0xff]  }
 0x189   : > { %1988 = vst [vmem:[#allocation2 + $0x18] sm:$0xf] %v1983_v45  ;;  %v8933_v53 = vpop.f32.mrf.mxu0  ;;  %v1650_v56 = vpack.c.bf16 %v1629_v46, %v1628_v38  ;;  %v9377_v45 = vld [vmem:[%s13747_s6 + $0x1c4] ss:$8 sps:$4 sm:$0xff]  }
 0x18a   : > { %1989 = vst [vmem:[#allocation2 + $0x1c] sm:$0x7] %v1984_v47  ;;  %1998 = vst [vmem:[#allocation2 + $0x20] sm:$0xf] %v8654_v49  ;;  %v1630_v55 = vmax.f32 %v1553_v51, 0.0  ;;  %v8934_v60 = vadd.f32 %v8933_v53, %v8932_v44 }
 0x18b   : > { %9064 = vmatmul.mubr.bf16.gmra.mxu1 %v1650_v56  ;;  %v8935_v61 = vpop.f32.mrf.mxu0 }
 0x18c   : > { %v8655_v25 = vpack.c.bf16 %v1630_v55, %v1630_v55  ;;  %v1556_v62 = vadd.f32 %v8934_v60, %v10504_v36  ;;  %9067 = vmatprep.mubr.msk.bf16.mxu1 %vm10127_vm0, %v10126_v48  ;;  %6887 = vmatpush1.bf16.msra.mxu1 %v9345_v52 }
 0x18d   : > { %v8936_v1 = vpop.f32.mrf.mxu0  ;;  %6888 = vmatprep.subr.bf16.mxu1 %v9353_v57 }
 0x18e   : > { %1999 = vst [vmem:[#allocation2 + $0x24] sm:$0x7] %v8655_v25  ;;  %v1631_v2 = vmax.f32 %v1556_v62, 0.0  ;;  %v8937_v3 = vadd.f32 %v8936_v1, %v8935_v61  ;;  %v7999_v14 = vrot.slane %v8655_v25, 11  ;;  %v9383_v61 = vld [vmem:[%s13747_s6 + $0x1b4] ss:$8 sps:$4 sm:$0xff]  }
 0x18f   : > { %v8938_v5 = vpop.f32.mrf.mxu0 }
 0x190   : > { %v8656_v8 = vpack.c.bf16 %v1631_v2, %v1631_v2  ;;  %v1561_v36 = vadd.f32 %v8937_v3, %v10516_v50  ;;  %v1651_v11 = vpack.c.bf16 %v1631_v2, %v1630_v55  ;;  %6889 = vmatpush1.bf16.msra.mxu1 %v9351_v0  ;;  %v9375_v55 = vld [vmem:[%s13747_s6 + $0x1c0] ss:$8 sps:$4 sm:$0xff]  }
 0x191   : > { %v8939_v12 = vpop.f32.mrf.mxu0  ;;  %6890 = vmatprep.subr.bf16.mxu1 %v9359_v63  ;;  %v9404_v63 = vld [vmem:[%s13747_s6 + $0x274] ss:$8 sps:$4 sm:$0xff]  }
 0x192   : > { %v2007_v18 = vrot.slane %v8656_v8, 7  ;;  %v1632_v19 = vmax.f32 %v1561_v36, 0.0  ;;  %v8940_v20 = vadd.f32 %v8939_v12, %v8938_v5  ;;  %v9381_v36 = vld [vmem:[%s13747_s6 + $0x1b0] ss:$8 sps:$4 sm:$0xff]   ;;  %6915 = vmatprep.subr.bf16.mxu0 %v9404_v63 }
 0x193   : > { %9068 = vmatmul.mubr.bf16.gmra.mxu1 %v1651_v11  ;;  %v8941_v21 = vpop.f32.mrf.mxu0 }
 0x194   : > { %v2008_v50 = vsel %vm10663_vm3, %v7999_v14, %v2007_v18  ;;  %v8657_v23 = vpack.c.bf16 %v1632_v19, %v1632_v19  ;;  %v1564_v38 = vadd.f32 %v8940_v20, %v10519_v59  ;;  %9071 = vmatprep.mubr.msk.bf16.mxu1 %vm10127_vm0, %v10126_v48  ;;  %6891 = vmatpush2.bf16.msra.mxu1 %v9357_v30  ;;  %v2009_v31 = vrot.slane %v2007_v18, 4  ;;  %v9389_v30 = vld [vmem:[%s13747_s6 + $0x1a4] ss:$8 sps:$4 sm:$0xff]  }
 0x195   : > { %2015 = vst [vmem:[#allocation2 + $0x28] sm:$0xf] %v2008_v50  ;;  %v8942_v7 = vpop.f32.mrf.mxu0  ;;  %6892 = vmatprep.subr.bf16.mxu1 %v9365_v13 }
 0x196   : > { %v2010_v33 = vrot.slane %v8657_v23, 7  ;;  %v1633_v34 = vmax.f32 %v1564_v38, 0.0  ;;  %v8943_v37 = vadd.f32 %v8942_v7, %v8941_v21  ;;  %v8002_v47 = vrot.slane %v8657_v23, 10  ;;  %v9387_v23 = vld [vmem:[%s13747_s6 + $0x1a0] ss:$8 sps:$4 sm:$0xff]  }
 0x197   : > { %v8944_v59 = vpop.f32.mrf.mxu0 }
 0x198   : > { %v2011_v16 = vsel %vm10663_vm3, %v2009_v31, %v2010_v33  ;;  %v8658_v40 = vpack.c.bf16 %v1633_v34, %v1633_v34  ;;  %v1569_v41 = vadd.f32 %v8943_v37, %v10528_v6  ;;  %v1652_v46 = vpack.c.bf16 %v1633_v34, %v1632_v19  ;;  %6893 = vmatpush2.bf16.msra.mxu1 %v9363_v26  ;;  %v9395_v26 = vld [vmem:[%s13747_s6 + $0x194] ss:$8 sps:$4 sm:$0xff]   ;;  %v9393_v37 = vld [vmem:[%s13747_s6 + $0x190] ss:$8 sps:$4 sm:$0xff]  }
 0x199   : > { %2016 = vst [vmem:[#allocation2 + $0x2c] sm:$0x7] %v2011_v16  ;;  %v8945_v44 = vpop.f32.mrf.mxu0  ;;  %6894 = vmatprep.subr.bf16.mxu1 %v9371_v28  ;;  %v9401_v16 = vld [vmem:[%s13747_s6 + $0x184] ss:$8 sps:$4 sm:$0xff]  }
 0x19a   : > { %v2024_v49 = vrot.slane %v8658_v40, 6  ;;  %v1634_v51 = vmax.f32 %v1569_v41, 0.0  ;;  %v8946_v52 = vadd.f32 %v8945_v44, %v8944_v59  ;;  %v9399_v44 = vld [vmem:[%s13747_s6 + $0x180] ss:$8 sps:$4 sm:$0xff]  }
 0x19b   : > { %9072 = vmatmul.mubr.bf16.gmra.mxu1 %v1652_v46  ;;  %v8947_v53 = vpop.f32.mrf.mxu0 }
 0x19c   : > { %v2025_v6 = vsel %vm10686_vm6, %v8002_v47, %v2024_v49  ;;  %v8659_v56 = vpack.c.bf16 %v1634_v51, %v1634_v51  ;;  %v1572_v57 = vadd.f32 %v8946_v52, %v10531_v17  ;;  %9075 = vmatprep.mubr.msk.bf16.mxu1 %vm10127_vm0, %v10126_v48  ;;  %6895 = vmatpush2.bf16.msra.mxu1 %v9369_v10  ;;  %v2026_v25 = vrot.slane %v2024_v49, 4  ;;  %v9408_v47 = vld [vmem:[%s13747_s6 + $0x374] ss:$8 sps:$4 sm:$0xff]  }
 0x19d   : > { %2032 = vst [vmem:[#allocation2 + $0x30] sm:$0xf] %v2025_v6  ;;  %v8948_v60 = vpop.f32.mrf.mxu0  ;;  %6896 = vmatprep.subr.bf16.mxu1 %v9377_v45 }
 0x19e   : > { %v2027_v62 = vrot.slane %v8659_v56, 6  ;;  %v1635_v0 = vmax.f32 %v1572_v57, 0.0  ;;  %v8949_v1 = vadd.f32 %v8948_v60, %v8947_v53  ;;  %v8004_v12 = vrot.slane %v8659_v56, 9 }
 0x19f   : > { %v8950_v17 = vpop.f32.mrf.mxu0 }
 0x1a0   : > { %v2028_v2 = vsel %vm10686_vm6, %v2026_v25, %v2027_v62  ;;  %v8660_v3 = vpack.c.bf16 %v1635_v0, %v1635_v0  ;;  %v1577_v5 = vadd.f32 %v8949_v1, %v10540_v29  ;;  %v1653_v8 = vpack.c.bf16 %v1635_v0, %v1634_v51  ;;  %6897 = vmatpush2.bf16.msra.mxu1 %v9375_v55 }
 0x1a1   : > { %2033 = vst [vmem:[#allocation2 + $0x34] sm:$0x7] %v2028_v2  ;;  %v8951_v11 = vpop.f32.mrf.mxu0  ;;  %6898 = vmatprep.subr.bf16.mxu1 %v9383_v61 }
 0x1a2   : > { %v2038_v13 = vrot.slane %v8660_v3, 5  ;;  %v1636_v14 = vmax.f32 %v1577_v5, 0.0  ;;  %v8952_v18 = vadd.f32 %v8951_v11, %v8950_v17 }
 0x1a3   : > { %9076 = vmatmul.mubr.bf16.gmra.mxu1 %v1653_v8  ;;  %v8953_v29 = vpop.f32.mrf.mxu0 }
 0x1a4   : > { %v2039_v19 = vsel %vm10712_vm9, %v8004_v12, %v2038_v13  ;;  %v2040_v20 = vrot.slane %v2038_v13, 4  ;;  %v8661_v21 = vpack.c.bf16 %v1636_v14, %v1636_v14  ;;  %v1580_v50 = vadd.f32 %v8952_v18, %v10549_v42  ;;  %9079 = vmatprep.mubr.msk.bf16.mxu1 %vm10127_vm0, %v10126_v48  ;;  %6899 = vmatpush2.bf16.msra.mxu1 %v9381_v36 }
 0x1a5   : > { %2044 = vst [vmem:[#allocation2 + $0x38] sm:$0xf] %v2039_v19  ;;  %v8954_v38 = vpop.f32.mrf.mxu0  ;;  %6900 = vmatprep.subr.bf16.mxu1 %v9389_v30 }
 0x1a6   : > { %2045 = vst [vmem:[#allocation2 + $0x3c] sm:$0x7] %v2040_v20  ;;  %2054 = vst [vmem:[#allocation2 + $0x40] sm:$0xf] %v8661_v21  ;;  %v1637_v7 = vmax.f32 %v1580_v50, 0.0  ;;  %v8955_v28 = vadd.f32 %v8954_v38, %v8953_v29 }
 0x1a7   : > { %v8956_v42 = vpop.f32.mrf.mxu0 }
 0x1a8   : > { %v8662_v31 = vpack.c.bf16 %v1637_v7, %v1637_v7  ;;  %v1585_v33 = vadd.f32 %v8955_v28, %v10555_v54  ;;  %v1654_v34 = vpack.c.bf16 %v1637_v7, %v1636_v14  ;;  %6901 = vmatpush2.bf16.msra.mxu1 %v9387_v23 }
 0x1a9   : > { %v8957_v59 = vpop.f32.mrf.mxu0  ;;  %6902 = vmatprep.subr.bf16.mxu1 %v9395_v26 }
 0x1aa   : > { %2055 = vst [vmem:[#allocation2 + $0x44] sm:$0x7] %v8662_v31  ;;  %v1638_v40 = vmax.f32 %v1585_v33, 0.0  ;;  %v8958_v41 = vadd.f32 %v8957_v59, %v8956_v42  ;;  %v8009_v49 = vrot.slane %v8662_v31, 11 }
 0x1ab   : > { %9080 = vmatmul.mubr.bf16.gmra.mxu1 %v1654_v34  ;;  %v8959_v46 = vpop.f32.mrf.mxu0 }
 0x1ac   : > { %v8663_v10 = vpack.c.bf16 %v1638_v40, %v1638_v40  ;;  %v1588_v54 = vadd.f32 %v8958_v41, %v10567_v4  ;;  %9083 = vmatprep.mubr.msk.bf16.mxu1 %vm10127_vm0, %v10126_v48  ;;  %6903 = vmatpush2.bf16.msra.mxu1 %v9393_v37 }
 0x1ad   : > { %v8960_v45 = vpop.f32.mrf.mxu0  ;;  %6904 = vmatprep.subr.bf16.mxu1 %v9401_v16 }
 0x1ae   : > { %v2063_v51 = vrot.slane %v8663_v10, 7  ;;  %v1639_v52 = vmax.f32 %v1588_v54, 0.0  ;;  %v8961_v53 = vadd.f32 %v8960_v45, %v8959_v46 }
 0x1af   : > { %v8962_v6 = vpop.f32.mrf.mxu0 }
 0x1b0   : > { %v2064_v4 = vsel %vm10663_vm3, %v8009_v49, %v2063_v51  ;;  %v8664_v56 = vpack.c.bf16 %v1639_v52, %v1639_v52  ;;  %v1593_v57 = vadd.f32 %v8961_v53, %v10570_v15  ;;  %6905 = vmatpush2.bf16.msra.mxu1 %v9399_v44  ;;  %v1655_v60 = vpack.c.bf16 %v1639_v52, %v1638_v40 }
 0x1b1   : > { %2071 = vst [vmem:[#allocation2 + $0x48] sm:$0xf] %v2064_v4  ;;  %v8963_v55 = vpop.f32.mrf.mxu0  ;;  %6956 = vmatprep.subr.bf16.mxu1 %v9408_v47  ;;  %v2065_v61 = vrot.slane %v2063_v51, 4  ;;  %v10849_v47 = vshrl.u32 %v2144_v35, 7  ;;  %v2148_v53 = vstv %s8024_s21  ;;  %s8033_s21 = sadd.s32 4294967295, %s10856_s28  ;;  %s2741_s28 = sadd.s32 1, %s10876_s17 }
 0x1b2   : > { %v2066_v25 = vrot.slane %v8664_v56, 7  ;;  %v1640_v62 = vmax.f32 %v1593_v57, 0.0  ;;  %v8964_v0 = vadd.f32 %v8963_v55, %v8962_v6  ;;  %v8012_v3 = vrot.slane %v8664_v56, 10  ;;  %s10923_s19 = sshll.u32 %s8033_s21, 3 }
 0x1b3   : > { %9084 = vmatmul.mubr.bf16.gmra.mxu1 %v1655_v60  ;;  %v8965_v1 = vpop.f32.mrf.mxu0  ;;  %vm2149_vm10 = vcmp.ge.s32.totalorder %v10849_v47, %v2148_v53 }
 0x1b4   : > { %v2067_v17 = vsel %vm10663_vm3, %v2065_v61, %v2066_v25  ;;  %v8665_v63 = vpack.c.bf16 %v1640_v62, %v1640_v62  ;;  %v1596_v2 = vadd.f32 %v8964_v0, %v10573_v27  ;;  %9087 = vmatprep.mubr.msk.bf16.mxu1 %vm10127_vm0, %v10126_v48  ;;  %v2223_v61 = vstv %s2222_s12  ;;  %s8058_s12 = sadd.s32 4294967295, %s10876_s17 }
 0x1b5   : > { %2072 = vst [vmem:[#allocation2 + $0x4c] sm:$0x7] %v2067_v17  ;;  %v8966_v15 = vpop.f32.mrf.mxu0  ;;  %vm2224_vm2 = vcmp.le.s32.totalorder %v10849_v47, %v2223_v61  ;;  %v4036_v17 = vunpack.c.l.s4 %v10128_v32 }
 0x1b6   : > { %v2080_v5 = vrot.slane %v8665_v63, 6  ;;  %v1641_v8 = vmax.f32 %v1596_v2, 0.0  ;;  %v8967_v36 = vadd.f32 %v8966_v15, %v8965_v1  ;;  %v10906_v2 = vstv %s10861_s14  ;;  %s2137_s14 = scalar_lea.vmem [#allocation2], %s10887_s20 }
 0x1b7   : > { %v8968_v11 = vpop.f32.mrf.mxu0  ;;  %v4037_v15 = vunpack.c.0.s8 %v4036_v17 }
 0x1b8   : > { %v2081_v30 = vsel %vm10686_vm6, %v8012_v3, %v2080_v5  ;;  %v8666_v12 = vpack.c.bf16 %v1641_v8, %v1641_v8  ;;  %v1601_v13 = vadd.f32 %v8967_v36, %v10585_v43  ;;  %v1656_v14 = vpack.c.bf16 %v1641_v8, %v1640_v62 }
 0x1b9   : > { %2088 = vst [vmem:[#allocation2 + $0x50] sm:$0xf] %v2081_v30  ;;  %v8969_v27 = vpop.f32.mrf.mxu0  ;;  %v2082_v18 = vrot.slane %v2080_v5, 4  ;;  %v2325_v5 = vstv %s8036_s23  ;;  %v10913_v8 = vstv %s2397_s25  ;;  %v10916_v36 = vstv %s10868_s15  ;;  %s10998_s15 = scalar_lea.vmem [#allocation2], %s10923_s19  ;;  %s11221_s23 = sld [smem:[#allocation5 + %s8680_s24]] }
 0x1ba   : > { %v2083_v29 = vrot.slane %v8666_v12, 6  ;;  %v1642_v19 = vmax.f32 %v1601_v13, 0.0  ;;  %v8970_v20 = vadd.f32 %v8969_v27, %v8968_v11  ;;  %v8014_v26 = vrot.slane %v8666_v12, 9 }
 0x1bb   : > { %9088 = vmatmul.mubr.bf16.gmra.mxu1 %v1656_v14  ;;  %v8971_v21 = vpop.f32.mrf.mxu0  ;;  %v10925_v30 = vstv %s8047_s26  ;;  %v10927_v12 = vstv %s2569_s30  ;;  %v10929_v13 = vstv %s8058_s12  ;;  %v10932_v27 = vstv %s10876_s17  ;;  %s11044_s17 = sld [smem:[#allocation5 + %s8677_s13]] }
 0x1bc   : > { %v2084_v50 = vsel %vm10686_vm6, %v2082_v18, %v2083_v29  ;;  %v8667_v23 = vpack.c.bf16 %v1642_v19, %v1642_v19  ;;  %v1604_v38 = vadd.f32 %v8970_v20, %v10594_v58  ;;  %9091 = vmatprep.mubr.msk.bf16.mxu1 %vm10127_vm0, %v10126_v48  ;;  %s11392_s30 = sld [smem:[#allocation5 + %s8683_s27]] }
 0x1bd   : > { %2089 = vst [vmem:[#allocation2 + $0x54] sm:$0x7] %v2084_v50  ;;  %v8972_v43 = vpop.f32.mrf.mxu0 }
 0x1be   : > { %v2095_v7 = vrot.slane %v8667_v23, 5  ;;  %v1643_v28 = vmax.f32 %v1604_v38, 0.0  ;;  %v8973_v42 = vadd.f32 %v8972_v43, %v8971_v21  ;;  %v10944_v23 = vsub.s32 %v4037_v15, %v10849_v47 }
 0x1bf   : > { %v8974_v31 = vpop.f32.mrf.mxu0  ;;  %s8055_s24 = sadd.s32 4294967295, %s11221_s23 }
 0x1c0   : > { %v2096_v33 = vsel %vm10712_vm9, %v8014_v26, %v2095_v7  ;;  %v2097_v22 = vrot.slane %v2095_v7, 4  ;;  %v8668_v34 = vpack.c.bf16 %v1643_v28, %v1643_v28  ;;  %v1609_v58 = vadd.f32 %v8973_v42, %v10603_v9  ;;  %s8681_s25 = sshll.u32 %s8055_s24, 3 }
 0x1c1   : > { %2101 = vst [vmem:[#allocation2 + $0x58] sm:$0xf] %v2096_v33  ;;  %v8975_v37 = vpop.f32.mrf.mxu0  ;;  %v1657_v59 = vpack.c.bf16 %v1643_v28, %v1642_v19  ;;  %v10939_v19 = vstv %s2741_s28  ;;  %s8044_s13 = sadd.s32 4294967295, %s11044_s17  ;;  %s11325_s26 = scalar_lea.vmem [#allocation2], %s8681_s25 }
 0x1c2   : > { %2102 = vst [vmem:[#allocation2 + $0x5c] sm:$0x7] %v2097_v22  ;;  %2111 = vst [vmem:[#allocation2 + $0x60] sm:$0xf] %v8668_v34  ;;  %v1644_v16 = vmax.f32 %v1609_v58, 0.0  ;;  %v8976_v40 = vadd.f32 %v8975_v37, %v8974_v31  ;;  %s11108_s20 = sshll.u32 %s8044_s13, 3 }
 0x1c3   : > { %9092 = vmatmul.mubr.bf16.gmra.mxu1 %v1657_v59  ;;  %v8977_v41 = vpop.f32.mrf.mxu0  ;;  %s11150_s21 = scalar_lea.vmem [#allocation2], %s11108_s20  ;;  %s8686_s20 = sadd.s32 10, %s10823_s18 }
 0x1c4   : > { %v8669_v46 = vpack.c.bf16 %v1644_v16, %v1644_v16  ;;  %v1612_v10 = vadd.f32 %v8976_v40, %v10612_v24  ;;  %9095 = vmatprep.mubr.msk.bf16.mxu1 %vm10127_vm0, %v10126_v48  ;;  %v2151_v24 = vstv %s10834_s0  ;;  %s10879_s0 = sld [smem:[#allocation5 + %s2828_s16]] }
 0x1c5   : > { %v8978_v9 = vpop.f32.mrf.mxu0  ;;  %vm2152_vm11 = vcmp.le.s32.totalorder %v10849_v47, %v2151_v24  ;;  %vm2220_vm15 = vcmp.ge.s32.totalorder %v10849_v47, %v2151_v24  ;;  %s11734_s28 = sld [smem:[#allocation5 + %s8686_s20]] }
 0x1c6   : > { %2112 = vst [vmem:[#allocation2 + $0x64] sm:$0x7] %v8669_v46  ;;  %v1645_v54 = vmax.f32 %v1612_v10, 0.0  ;;  %v8979_v44 = vadd.f32 %v8978_v9, %v8977_v41  ;;  %v8019_v4 = vrot.slane %v8669_v46, 11  ;;  %vm2154_vm12 = vmand %vm2149_vm10, %vm2152_vm11  ;;  %vm2179_vm10 = vcmask 1046528  }
 0x1c7   : > { %v8980_v45 = vpop.f32.mrf.mxu0  ;;  %vm10889_vm4 = vmpackc.low %vm2154_vm12, %vm2154_vm12 }
 0x1c8   : > { %v8670_v49 = vpack.c.bf16 %v1645_v54, %v1645_v54  ;;  %v1617_v51 = vadd.f32 %v8979_v44, %v10621_v39  ;;  %v1658_v52 = vpack.c.bf16 %v1645_v54, %v1644_v16  ;;  %v10864_v39 = vadd.s32 8, %v10849_v47  ;;  %vm2226_vm7 = vmand %vm2220_vm15, %vm2224_vm2 }
 0x1c9   : > { %v8981_v6 = vpop.f32.mrf.mxu0  ;;  %vm10909_vm11 = vmpackc.low %vm2226_vm7, %vm2226_vm7  ;;  %vm2326_vm15 = vcmp.ge.s32.totalorder %v10849_v47, %v2325_v5  ;;  %vm2395_vm7 = vcmp.ge.s32.totalorder %v10849_v47, %v10906_v2 }
 0x1ca   : > { %v2120_v56 = vrot.slane %v8670_v49, 7  ;;  %v1646_v57 = vmax.f32 %v1617_v51, 0.0  ;;  %vm2150_vm13 = vcmp.ge.s32.totalorder %v10864_v39, %v2148_v53  ;;  %vm2153_vm14 = vcmp.le.s32.totalorder %v10864_v39, %v2151_v24  ;;  %s8069_s16 = sadd.s32 4294967295, %s10879_s0  ;;  %s2913_s13 = sadd.s32 1, %s10879_s0 }
 0x1cb   : > { %9096 = vmatmul.mubr.bf16.gmra.mxu1 %v1658_v52  ;;  %vm2221_vm5 = vcmp.ge.s32.totalorder %v10864_v39, %v2151_v24  ;;  %vm2225_vm6 = vcmp.le.s32.totalorder %v10864_v39, %v2223_v61  ;;  %vm2327_vm2 = vcmp.ge.s32.totalorder %v10864_v39, %v2325_v5  ;;  %v10946_v38 = vstv %s8069_s16  ;;  %s8077_s19 = sadd.s32 4294967295, %s11734_s28 }
 0x1cc   : > { %v2121_v55 = vsel %vm10663_vm3, %v8019_v4, %v2120_v56  ;;  %v1659_v60 = vpack.c.bf16 %v1646_v57, %v1646_v57  ;;  %9099 = vmatprep.mubr.msk.bf16.mxu1 %vm10127_vm0, %v10126_v48  ;;  %v2122_v25 = vrot.slane %v2120_v56, 4  ;;  %vm2227_vm8 = vmand %vm2221_vm5, %vm2225_vm6  ;;  %v10955_v28 = vstv %s10879_s0  ;;  %s3000_s0 = sadd.s32 1, %s8686_s20  ;;  %s8689_s20 = sadd.s32 12, %s10823_s18 }
 0x1cd   : > { %2128 = vst [vmem:[#allocation2 + $0x68] sm:$0xf] %v2121_v55  ;;  %vm10919_vm12 = vmpackc.low %vm2227_vm8, %vm2227_vm8  ;;  %vm2399_vm8 = vcmp.le.s32.totalorder %v10849_v47, %v10913_v8  ;;  %s11807_s23 = sshll.u32 %s8077_s19, 3  ;;  %s3172_s24 = sadd.s32 1, %s8689_s20 }
 0x1ce   : > { %v2123_v62 = vrot.slane %v1659_v60, 7  ;;  %s11846_s19 = sld [smem:[#allocation5 + %s3172_s24]]  ;;  %s11874_s25 = scalar_lea.vmem [#allocation2], %s11807_s23 }
 0x1d0   : > { %v2124_v0 = vsel %vm10663_vm3, %v2122_v25, %v2123_v62  ;;  %vm2155_vm3 = vmand %vm2150_vm13, %vm2153_vm14  ;;  %vm2329_vm13 = vcmp.le.s32.totalorder %v10849_v47, %v10906_v2  ;;  %vm2330_vm14 = vcmp.le.s32.totalorder %v10864_v39, %v10906_v2 }
 0x1d1   : > { %2129 = vst [vmem:[#allocation2 + $0x6c] sm:$0x7] %v2124_v0  ;;  %vm10901_vm9 = vmpackc.low %vm2155_vm3, %vm2155_vm3 }
 0x1d2   : > { %vm10992_vm5 = vmand %vm2327_vm2, %vm2330_vm14  ;;  %vm2501_vm14 = vcmp.le.s32.totalorder %v10849_v47, %v10916_v36  ;;  %vm2499_vm2 = vcmp.ge.s32.totalorder %v10864_v39, %v10925_v30 }
 0x1d3   : > { %9100 = vmatmul.mubr.bf16.gmra.mxu1 %v1659_v60  ;;  %vm11017_vm3 = vmpackc.low %vm10992_vm5, %vm10992_vm5 }
 0x1d8   : > { %v2138_v14 = vld [vmem:[%s2137_s14] sm:$0xf]  ;;  %v2139_v18 = vld [vmem:[%s2137_s14 + $0x4] sm:$0x7]  ;;  %v2140_v29 = vld [vmem:[%s2137_s14 + $0x8] sm:$0xf] }
 0x1d9   : > { %v2141_v20 = vld [vmem:[%s2137_s14 + $0xc] sm:$0x7]  ;;  %v2142_v21 = vld [vmem:[%s2137_s14 + $0x10] sm:$0xf]  ;;  %v2143_v50 = vld [vmem:[%s2137_s14 + $0x14] sm:$0x7] }
 0x1da   : > { %v2158_v43 = vsel %vm10889_vm4, %v2138_v14, 4286644096  ;;  %v2159_v26 = vsel %vm10901_vm9, %v2139_v18, 4286644096  ;;  %v2160_v7 = vsel %vm10889_vm4, %v2140_v29, 4286644096 }
 0x1db   : > { %v2161_v42 = vsel %vm10901_vm9, %v2141_v20, 4286644096  ;;  %v2162_v31 = vsel %vm10889_vm4, %v2142_v21, 4286644096  ;;  %v2163_v33 = vsel %vm10901_vm9, %v2143_v50, 4286644096  ;;  %v8025_v22 = vcombine.low %v2158_v43, %v2159_v26  ;;  %vm10979_vm4 = vmand %vm2326_vm15, %vm2329_vm13 }
 0x1dc   : > { %v8026_v34 = vcombine.low %v2160_v7, %v2161_v42  ;;  %v8027_v58 = vcombine.low %v2162_v31, %v2163_v33  ;;  %v2230_v37 = vsel %vm10909_vm11, %v2138_v14, 4286644096  ;;  %v2231_v59 = vsel %vm10919_vm12, %v2139_v18, 4286644096  ;;  %v11001_v25 = vld [vmem:[%s10998_s15] sm:$0xf]  ;;  %vm11006_vm6 = vmpackc.low %vm10979_vm4, %vm10979_vm4 }
 0x1dd   : > { %v2182_v16 = vsel %vm2179_vm10, %v8025_v22, 4286644096  ;;  %v2232_v40 = vsel %vm10909_vm11, %v2140_v29, 4286644096  ;;  %v2233_v41 = vsel %vm10919_vm12, %v2141_v20, 4286644096  ;;  %v8028_v35 = vcombine.low %v2230_v37, %v2231_v59  ;;  %vm11075_vm15 = vmand %vm2395_vm7, %vm2399_vm8 }
 0x1de   : > { %v2184_v46 = vunpack.i.l.bf16 %v2182_v16  ;;  %v2185_v10 = vunpack.i.h.bf16 %v2182_v16  ;;  %v2195_v9 = vsel %vm2179_vm10, %v8026_v34, 4286644096  ;;  %v2208_v54 = vsel %vm2179_vm10, %v8027_v58, 4286644096  ;;  %v11012_v11 = vld [vmem:[%s10998_s15 + $0x4] sm:$0x7] }
 0x1df   : > { %v2197_v45 = vunpack.i.l.bf16 %v2195_v9  ;;  %v2198_v24 = vunpack.i.h.bf16 %v2195_v9  ;;  %v2210_v49 = vunpack.i.l.bf16 %v2208_v54  ;;  %v2211_v51 = vunpack.i.h.bf16 %v2208_v54  ;;  %v11037_v31 = vld [vmem:[%s10998_s15 + $0xc] sm:$0x7]  ;;  %v11040_v33 = vld [vmem:[%s10998_s15 + $0x10] sm:$0xf]  ;;  %v11047_v37 = vld [vmem:[%s10998_s15 + $0x14] sm:$0x7] }
 0x1e0   : > { %v2186_v52 = vmax.f32 %v2184_v46, %v2185_v10  ;;  %v2234_v53 = vsel %vm10909_vm11, %v2142_v21, 4286644096  ;;  %v2235_v6 = vsel %vm10919_vm12, %v2143_v50, 4286644096  ;;  %v8029_v4 = vcombine.low %v2232_v40, %v2233_v41  ;;  %v11027_v21 = vld [vmem:[%s10998_s15 + $0x8] sm:$0xf] }
 0x1e1   : > { %v2199_v57 = vmax.f32 %v2197_v45, %v2198_v24  ;;  %v2212_v55 = vmax.f32 %v2210_v49, %v2211_v51  ;;  %v8030_v60 = vcombine.low %v2234_v53, %v2235_v6  ;;  %v2252_v61 = vsel %vm2179_vm10, %v8028_v35, 4286644096  ;;  %s11695_s15 = sld [smem:[#allocation5 + %s3000_s0]] }
 0x1e2   : > { %v2187_v0 = vrot.slane %v2186_v52, 4  ;;  %v2254_v1 = vunpack.i.l.bf16 %v2252_v61  ;;  %v2255_v32 = vunpack.i.h.bf16 %v2252_v61  ;;  %v2265_v17 = vsel %vm2179_vm10, %v8029_v4, 4286644096 }
 0x1e3   : > { %v2200_v63 = vrot.slane %v2199_v57, 4  ;;  %v2213_v15 = vrot.slane %v2212_v55, 4  ;;  %v2267_v3 = vunpack.i.l.bf16 %v2265_v17  ;;  %v2268_v5 = vunpack.i.h.bf16 %v2265_v17 }
 0x1e4   : > { %v2188_v18 = vmax.f32 %v2186_v52, %v2187_v0  ;;  %v2256_v29 = vmax.f32 %v2254_v1, %v2255_v32  ;;  %v2278_v20 = vsel %vm2179_vm10, %v8030_v60, 4286644096  ;;  %v2335_v50 = vsel %vm11006_vm6, %v11001_v25, 4286644096 }
 0x1e5   : > { %vm2396_vm9 = vcmp.ge.s32.totalorder %v10864_v39, %v10906_v2  ;;  %vm2400_vm11 = vcmp.le.s32.totalorder %v10864_v39, %v10913_v8  ;;  %vm2291_vm12 = vsmask.f32 256  ;;  %v2201_v43 = vmax.f32 %v2199_v57, %v2200_v63 }
 0x1e6   : > { %v2214_v26 = vmax.f32 %v2212_v55, %v2213_v15  ;;  %v2269_v7 = vmax.f32 %v2267_v3, %v2268_v5  ;;  %v2280_v42 = vunpack.i.l.bf16 %v2278_v20  ;;  %v2189_v22 = vrot.slane %v2188_v18, 2  ;;  %vm11090_vm5 = vmand %vm2396_vm9, %vm2400_vm11 }
 0x1e7   : > { %v2257_v34 = vrot.slane %v2256_v29, 4  ;;  %v2281_v58 = vunpack.i.h.bf16 %v2278_v20  ;;  %v2336_v59 = vsel %vm11017_vm3, %v11012_v11, 4286644096  ;;  %v2202_v16 = vrot.slane %v2201_v43, 2  ;;  %s3085_s24 = sadd.s32 1, %s11695_s15 }
 0x1e8   : > { %v2215_v40 = vrot.slane %v2214_v26, 2  ;;  %v2270_v41 = vrot.slane %v2269_v7, 4  ;;  %v2337_v35 = vsel %vm11006_vm6, %v11027_v21, 4286644096  ;;  %v2190_v46 = vmax.f32 %v2188_v18, %v2189_v22 }
 0x1e9   : > { %v2258_v10 = vmax.f32 %v2256_v29, %v2257_v34  ;;  %v2282_v9 = vmax.f32 %v2280_v42, %v2281_v58  ;;  %v2338_v54 = vsel %vm11017_vm3, %v11037_v31, 4286644096  ;;  %v2203_v44 = vmax.f32 %v2201_v43, %v2202_v16  ;;  %v2293_v34 = vld [vmem:[#allocation3] sm:$0x1]  ;;  %v2301_v58 = vld [vmem:[#allocation3 + $0x2] sm:$0x1] }
 0x1ea   : > { %v2216_v45 = vmax.f32 %v2214_v26, %v2215_v40  ;;  %v2271_v24 = vmax.f32 %v2269_v7, %v2270_v41  ;;  %v2339_v49 = vsel %vm11006_vm6, %v11040_v33, 4286644096  ;;  %vm2498_vm13 = vcmp.ge.s32.totalorder %v10849_v47, %v10925_v30  ;;  %vm11096_vm6 = vmand %vm1939_vm1, %vm2291_vm12  ;;  %v9667_v7 = vld [vmem:[%s13747_s6 + $0x7c4] ss:$8 sps:$4 sm:$0xff]  }
 0x1eb   : > { %v2191_v51 = vrot.slane %v2190_v46, 1  ;;  %v2259_v52 = vrot.slane %v2258_v10, 2  ;;  %v2283_v53 = vrot.slane %v2282_v9, 4  ;;  %v2340_v6 = vsel %vm11017_vm3, %v11047_v37, 4286644096  ;;  %vm11104_vm3 = vmpackc.low %vm11075_vm15, %vm11075_vm15 }
 0x1ec   : > { %v2204_v4 = vrot.slane %v2203_v44, 1  ;;  %v2217_v56 = vrot.slane %v2216_v45, 1  ;;  %v2272_v57 = vrot.slane %v2271_v24, 2  ;;  %v8037_v55 = vcombine.low %v2335_v50, %v2336_v59  ;;  %vm11113_vm1 = vmpackc.low %vm11090_vm5, %vm11090_vm5 }
 0x1ed   : > { %v2192_v60 = vmax.f32 %v2190_v46, %v2191_v51  ;;  %v2260_v61 = vmax.f32 %v2258_v10, %v2259_v52  ;;  %v2284_v62 = vmax.f32 %v2282_v9, %v2283_v53  ;;  %v8038_v0 = vcombine.low %v2337_v35, %v2338_v54  ;;  %v2297_v53 = vld [vmem:[#allocation3 + $0x1] sm:$0x1]  ;;  %vm11128_vm7 = vmand %vm2498_vm13, %vm2501_vm14  ;;  %v11192_v35 = vld [vmem:[%s11150_s21 + $0x4] sm:$0x7] }
 0x1ee   : > { %v2205_v1 = vmax.f32 %v2203_v44, %v2204_v4  ;;  %v2218_v32 = vmax.f32 %v2216_v45, %v2217_v56  ;;  %v2273_v17 = vmax.f32 %v2271_v24, %v2272_v57  ;;  %v8039_v63 = vcombine.low %v2339_v49, %v2340_v6  ;;  %vm11158_vm8 = vmpackc.low %vm11128_vm7, %vm11128_vm7  ;;  %v11211_v57 = vld [vmem:[%s11150_s21 + $0x14] sm:$0x7] }
 0x1ef   : > { %v2193_v15 = vpack.i.bf16 %v2192_v60, %v2192_v60  ;;  %v2261_v3 = vrot.slane %v2260_v61, 1  ;;  %v2285_v5 = vrot.slane %v2284_v62, 2  ;;  %v2357_v18 = vsel %vm2179_vm10, %v8037_v55, 4286644096 }
 0x1f0   : > { %vm2502_vm4 = vcmp.le.s32.totalorder %v10864_v39, %v10916_v36  ;;  %v2206_v29 = vpack.i.bf16 %v2205_v1, %v2205_v1  ;;  %v2219_v20 = vpack.i.bf16 %v2218_v32, %v2218_v32  ;;  %v2274_v50 = vrot.slane %v2273_v17, 1  ;;  %v2305_v1 = vld [vmem:[#allocation3 + $0x3] sm:$0x1] }
 0x1f1   : > { %v2359_v43 = vunpack.i.l.bf16 %v2357_v18  ;;  %v2262_v42 = vmax.f32 %v2260_v61, %v2261_v3  ;;  %v2286_v22 = vmax.f32 %v2284_v62, %v2285_v5  ;;  %v2360_v59 = vunpack.i.h.bf16 %v2357_v18  ;;  %v11153_v5 = vld [vmem:[%s11150_s21] sm:$0xf]  ;;  %vm11171_vm9 = vmand %vm2499_vm2, %vm2502_vm4 }
 0x1f2   : > { %v2370_v8 = vsel %vm2179_vm10, %v8038_v0, 4286644096  ;;  %v2275_v16 = vmax.f32 %v2273_v17, %v2274_v50  ;;  %v2290_v40 = vmax.bf16 %v2206_v29, %v2193_v15  ;;  %v2300_v2 = vmax.bf16 %v2219_v20, %v2206_v29  ;;  %vm11200_vm15 = vmpackc.low %vm11171_vm9, %vm11171_vm9 }
 0x1f3   : > { %v2372_v41 = vunpack.i.l.bf16 %v2370_v8  ;;  %v2263_v46 = vpack.i.bf16 %v2262_v42, %v2262_v42  ;;  %v2287_v10 = vrot.slane %v2286_v22, 1  ;;  %v2361_v9 = vmax.f32 %v2359_v43, %v2360_v59 }
 0x1f4   : > { %v2373_v54 = vunpack.i.h.bf16 %v2370_v8  ;;  %v2276_v45 = vpack.i.bf16 %v2275_v16, %v2275_v16  ;;  %v2294_v24 = vsel %vm11096_vm6, %v2290_v40, %v2293_v34  ;;  %v2302_v49 = vsel %vm11096_vm6, %v2300_v2, %v2301_v58 }
 0x1f5   : > { %v2383_v51 = vsel %vm2179_vm10, %v8039_v63, 4286644096  ;;  %v2288_v52 = vmax.f32 %v2286_v22, %v2287_v10  ;;  %2295 = vst [vmem:[#allocation3] sm:$0x1] %v2294_v24  ;;  %2303 = vst [vmem:[#allocation3 + $0x2] sm:$0x1] %v2302_v49  ;;  %vm2567_vm11 = vcmp.ge.s32.totalorder %v10849_v47, %v10916_v36  ;;  %vm2571_vm12 = vcmp.le.s32.totalorder %v10849_v47, %v10927_v12 }
 0x1f6   : > { %v2362_v6 = vrot.slane %v2361_v9, 4  ;;  %v2374_v4 = vmax.f32 %v2372_v41, %v2373_v54  ;;  %v2385_v56 = vunpack.i.l.bf16 %v2383_v51  ;;  %v2296_v55 = vmax.bf16 %v2276_v45, %v2263_v46  ;;  %v11195_v46 = vld [vmem:[%s11150_s21 + $0x8] sm:$0xf]  ;;  %vm11238_vm2 = vmand %vm2567_vm11, %vm2571_vm12 }
 0x1f7   : > { %v2386_v60 = vunpack.i.h.bf16 %v2383_v51  ;;  %v2405_v61 = vsel %vm11104_vm3, %v11001_v25, 4286644096  ;;  %v2406_v62 = vsel %vm11113_vm1, %v11012_v11, 4286644096  ;;  %v2289_v0 = vpack.i.bf16 %v2288_v52, %v2288_v52 }
 0x1f8   : > { %v2363_v32 = vmax.f32 %v2361_v9, %v2362_v6  ;;  %v2375_v17 = vrot.slane %v2374_v4, 4  ;;  %v2407_v63 = vsel %vm11104_vm3, %v11027_v21, 4286644096  ;;  %v2298_v15 = vsel %vm11096_vm6, %v2296_v55, %v2297_v53  ;;  %v11205_v53 = vld [vmem:[%s11150_s21 + $0xc] sm:$0x7] }
 0x1f9   : > { %v2387_v3 = vmax.f32 %v2385_v56, %v2386_v60  ;;  %v2408_v25 = vsel %vm11113_vm1, %v11037_v31, 4286644096  ;;  %v2409_v11 = vsel %vm11104_vm3, %v11040_v33, 4286644096  ;;  %2299 = vst [vmem:[#allocation3 + $0x1] sm:$0x1] %v2298_v15  ;;  %v2304_v18 = vmax.bf16 %v2289_v0, %v2276_v45 }
 0x1fa   : > { %v2364_v14 = vrot.slane %v2363_v32, 2  ;;  %v2376_v31 = vmax.f32 %v2374_v4, %v2375_v17  ;;  %v2410_v33 = vsel %vm11113_vm1, %v11047_v37, 4286644096  ;;  %v8040_v20 = vcombine.low %v2405_v61, %v2406_v62  ;;  %v11208_v6 = vld [vmem:[%s11150_s21 + $0x10] sm:$0xf]  ;;  %s8692_s21 = sadd.s32 14, %s10823_s18 }
 0x1fb   : > { %v2388_v29 = vrot.slane %v2387_v3, 4  ;;  %v8041_v50 = vcombine.low %v2407_v63, %v2408_v25  ;;  %v8042_v43 = vcombine.low %v2409_v11, %v2410_v33  ;;  %v2306_v37 = vsel %vm11096_vm6, %v2304_v18, %v2305_v1  ;;  %v2466_v33 = vld [vmem:[#allocation3 + $0x4] sm:$0x1]  ;;  %s3344_s27 = sadd.s32 1, %s8692_s21 }
 0x1fc   : > { %v2365_v42 = vmax.f32 %v2363_v32, %v2364_v14  ;;  %v2377_v22 = vrot.slane %v2376_v31, 2  ;;  %v2507_v30 = vsel %vm11158_vm8, %v11153_v5, 4286644096  ;;  %vm2568_vm13 = vcmp.ge.s32.totalorder %v10864_v39, %v10916_v36  ;;  %2307 = vst [vmem:[#allocation3 + $0x3] sm:$0x1] %v2306_v37  ;;  %s12266_s28 = sld [smem:[#allocation5 + %s3344_s27]] }
 0x1fd   : > { %vm2572_vm14 = vcmp.le.s32.totalorder %v10864_v39, %v10927_v12  ;;  %v2389_v34 = vmax.f32 %v2387_v3, %v2388_v29  ;;  %v2427_v58 = vsel %vm2179_vm10, %v8040_v20, 4286644096  ;;  %v2440_v59 = vsel %vm2179_vm10, %v8041_v50, 4286644096 }
 0x1fe   : > { %v2453_v8 = vsel %vm2179_vm10, %v8042_v43, 4286644096  ;;  %v2366_v16 = vrot.slane %v2365_v42, 1  ;;  %v2378_v40 = vmax.f32 %v2376_v31, %v2377_v22  ;;  %v2429_v2 = vunpack.i.l.bf16 %v2427_v58  ;;  %vm11250_vm4 = vmand %vm2568_vm13, %vm2572_vm14 }
 0x1ff   : > { %v2430_v41 = vunpack.i.h.bf16 %v2427_v58  ;;  %v2390_v9 = vrot.slane %v2389_v34, 2  ;;  %v2442_v54 = vunpack.i.l.bf16 %v2440_v59  ;;  %v2443_v44 = vunpack.i.h.bf16 %v2440_v59  ;;  %vm11275_vm9 = vmpackc.low %vm11250_vm4, %vm11250_vm4 }
 0x200   : > { %v2455_v45 = vunpack.i.l.bf16 %v2453_v8  ;;  %v2367_v24 = vmax.f32 %v2365_v42, %v2366_v16  ;;  %v2379_v49 = vrot.slane %v2378_v40, 1  ;;  %v2456_v52 = vunpack.i.h.bf16 %v2453_v8 }
 0x201   : > { %v2431_v51 = vmax.f32 %v2429_v2, %v2430_v41  ;;  %v2391_v4 = vmax.f32 %v2389_v34, %v2390_v9  ;;  %v2444_v56 = vmax.f32 %v2442_v54, %v2443_v44  ;;  %v2508_v55 = vsel %vm11200_vm15, %v11192_v35, 4286644096 }
 0x202   : > { %v2509_v60 = vsel %vm11158_vm8, %v11195_v46, 4286644096  ;;  %v2368_v61 = vpack.i.bf16 %v2367_v24, %v2367_v24  ;;  %v2380_v62 = vmax.f32 %v2378_v40, %v2379_v49  ;;  %v2457_v1 = vmax.f32 %v2455_v45, %v2456_v52  ;;  %v2474_v40 = vld [vmem:[#allocation3 + $0x6] sm:$0x1]  ;;  %v11340_v49 = vld [vmem:[%s11325_s26 + $0x4] sm:$0x7] }
 0x203   : > { %v2432_v0 = vrot.slane %v2431_v51, 4  ;;  %v2392_v32 = vrot.slane %v2391_v4, 1  ;;  %v2445_v17 = vrot.slane %v2444_v56, 4  ;;  %v2510_v63 = vsel %vm11200_vm15, %v11205_v53, 4286644096  ;;  %s8102_s12 = sadd.s32 4294967295, %s12266_s28 }
 0x204   : > { %v2511_v15 = vsel %vm11158_vm8, %v11208_v6, 4286644096  ;;  %v2381_v3 = vpack.i.bf16 %v2380_v62, %v2380_v62  ;;  %v2458_v11 = vrot.slane %v2457_v1, 4  ;;  %v2512_v18 = vsel %vm11200_vm15, %v11211_v57, 4286644096  ;;  %vm11267_vm8 = vmpackc.low %vm11238_vm2, %vm11238_vm2 }
 0x205   : > { %v2433_v25 = vmax.f32 %v2431_v51, %v2432_v0  ;;  %v2393_v14 = vmax.f32 %v2391_v4, %v2392_v32  ;;  %v2446_v31 = vmax.f32 %v2444_v56, %v2445_v17  ;;  %v8048_v29 = vcombine.low %v2507_v30, %v2508_v55 }
 0x206   : > { %v8049_v20 = vcombine.low %v2509_v60, %v2510_v63  ;;  %v2459_v43 = vmax.f32 %v2457_v1, %v2458_v11  ;;  %v2465_v26 = vmax.bf16 %v2381_v3, %v2368_v61  ;;  %v8050_v37 = vcombine.low %v2511_v15, %v2512_v18 }
 0x207   : > { %v2434_v50 = vrot.slane %v2433_v25, 2  ;;  %v2394_v42 = vpack.i.bf16 %v2393_v14, %v2393_v14  ;;  %v2447_v22 = vrot.slane %v2446_v31, 2  ;;  %v2529_v34 = vsel %vm2179_vm10, %v8048_v29, 4286644096 }
 0x208   : > { %v2542_v30 = vsel %vm2179_vm10, %v8049_v20, 4286644096  ;;  %vm2670_vm5 = vcmp.ge.s32.totalorder %v10849_v47, %v10929_v13  ;;  %vm2673_vm3 = vcmp.le.s32.totalorder %v10849_v47, %v10932_v27  ;;  %v2460_v8 = vrot.slane %v2459_v43, 2 }
 0x209   : > { %v2435_v59 = vmax.f32 %v2433_v25, %v2434_v50  ;;  %v2467_v16 = vsel %vm11096_vm6, %v2465_v26, %v2466_v33  ;;  %v2531_v12 = vunpack.i.l.bf16 %v2529_v34  ;;  %vm2671_vm1 = vcmp.ge.s32.totalorder %v10864_v39, %v10929_v13  ;;  %v2470_v33 = vld [vmem:[#allocation3 + $0x5] sm:$0x1]  ;;  %vm11306_vm11 = vmand %vm2670_vm5, %vm2673_vm3 }
 0x20a   : > { %vm2674_vm7 = vcmp.le.s32.totalorder %v10864_v39, %v10932_v27  ;;  %v2448_v36 = vmax.f32 %v2446_v31, %v2447_v22  ;;  %2468 = vst [vmem:[#allocation3 + $0x4] sm:$0x1] %v2467_v16  ;;  %v2473_v2 = vmax.bf16 %v2394_v42, %v2381_v3  ;;  %v2532_v41 = vunpack.i.h.bf16 %v2529_v34  ;;  %vm11335_vm13 = vmpackc.low %vm11306_vm11, %vm11306_vm11 }
 0x20b   : > { %v2544_v10 = vunpack.i.l.bf16 %v2542_v30  ;;  %v2436_v54 = vrot.slane %v2435_v59, 1  ;;  %v2461_v44 = vmax.f32 %v2459_v43, %v2460_v8  ;;  %v2545_v45 = vunpack.i.h.bf16 %v2542_v30  ;;  %v2478_v43 = vld [vmem:[#allocation3 + $0x7] sm:$0x1]  ;;  %vm11319_vm12 = vmand %vm2671_vm1, %vm2674_vm7 }
 0x20c   : > { %v2555_v24 = vsel %vm2179_vm10, %v8050_v37, 4286644096  ;;  %v2449_v51 = vrot.slane %v2448_v36, 1  ;;  %v2475_v52 = vsel %vm11096_vm6, %v2473_v2, %v2474_v40  ;;  %v2533_v4 = vmax.f32 %v2531_v12, %v2532_v41  ;;  %vm11345_vm14 = vmpackc.low %vm11319_vm12, %vm11319_vm12 }
 0x20d   : > { %v2557_v56 = vunpack.i.l.bf16 %v2555_v24  ;;  %v2437_v55 = vmax.f32 %v2435_v59, %v2436_v54  ;;  %v2462_v60 = vrot.slane %v2461_v44, 1  ;;  %2476 = vst [vmem:[#allocation3 + $0x6] sm:$0x1] %v2475_v52  ;;  %v2546_v61 = vmax.f32 %v2544_v10, %v2545_v45 }
 0x20e   : > { %v2558_v62 = vunpack.i.h.bf16 %v2555_v24  ;;  %v2450_v0 = vmax.f32 %v2448_v36, %v2449_v51  ;;  %v2534_v1 = vrot.slane %v2533_v4, 4  ;;  %v2577_v32 = vsel %vm11267_vm8, %v11153_v5, 4286644096  ;;  %v11328_v36 = vld [vmem:[%s11325_s26] sm:$0xf] }
 0x20f   : > { %v2578_v17 = vsel %vm11275_vm9, %v11192_v35, 4286644096  ;;  %v2438_v63 = vpack.i.bf16 %v2437_v55, %v2437_v55  ;;  %v2463_v15 = vmax.f32 %v2461_v44, %v2462_v60  ;;  %v2547_v3 = vrot.slane %v2546_v61, 4  ;;  %v11354_v60 = vld [vmem:[%s11325_s26 + $0x8] sm:$0xf] }
 0x210   : > { %v2559_v25 = vmax.f32 %v2557_v56, %v2558_v62  ;;  %v2451_v11 = vpack.i.bf16 %v2450_v0, %v2450_v0  ;;  %v2535_v18 = vmax.f32 %v2533_v4, %v2534_v1  ;;  %v2579_v14 = vsel %vm11267_vm8, %v11195_v46, 4286644096  ;;  %v9406_v51 = vld [vmem:[%s13747_s6 + $0x370] ss:$8 sps:$4 sm:$0xff]  }
 0x211   : > { %v2580_v31 = vsel %vm11275_vm9, %v11205_v53, 4286644096  ;;  %v2464_v5 = vpack.i.bf16 %v2463_v15, %v2463_v15  ;;  %v2548_v29 = vmax.f32 %v2546_v61, %v2547_v3  ;;  %v2581_v35 = vsel %vm11267_vm8, %v11208_v6, 4286644096  ;;  %v11357_v61 = vld [vmem:[%s11325_s26 + $0xc] sm:$0x7] }
 0x212   : > { %v2560_v20 = vrot.slane %v2559_v25, 4  ;;  %v2469_v50 = vmax.bf16 %v2451_v11, %v2438_v63  ;;  %v2536_v26 = vrot.slane %v2535_v18, 2  ;;  %v2582_v37 = vsel %vm11275_vm9, %v11211_v57, 4286644096 }
 0x213   : > { %v8051_v46 = vcombine.low %v2577_v32, %v2578_v17  ;;  %v2477_v21 = vmax.bf16 %v2464_v5, %v2451_v11  ;;  %v2549_v42 = vrot.slane %v2548_v29, 2  ;;  %v8052_v53 = vcombine.low %v2579_v14, %v2580_v31  ;;  %v11364_v32 = vld [vmem:[%s11325_s26 + $0x10] sm:$0xf]  ;;  %v2638_v5 = vld [vmem:[#allocation3 + $0x8] sm:$0x1] }
 0x214   : > { %v2561_v22 = vmax.f32 %v2559_v25, %v2560_v20  ;;  %v2471_v34 = vsel %vm11096_vm6, %v2469_v50, %v2470_v33  ;;  %v2537_v30 = vmax.f32 %v2535_v18, %v2536_v26  ;;  %v8053_v57 = vcombine.low %v2581_v35, %v2582_v37  ;;  %v11370_v25 = vld [vmem:[%s11325_s26 + $0x14] sm:$0x7]  ;;  %s8066_s26 = sadd.s32 4294967295, %s11392_s30 }
 0x215   : > { %v2599_v58 = vsel %vm2179_vm10, %v8051_v46, 4286644096  ;;  %2472 = vst [vmem:[#allocation3 + $0x5] sm:$0x1] %v2471_v34  ;;  %v2479_v8 = vsel %vm11096_vm6, %v2477_v21, %v2478_v43  ;;  %v2550_v16 = vmax.f32 %v2548_v29, %v2549_v42  ;;  %v2612_v41 = vsel %vm2179_vm10, %v8052_v53, 4286644096 }
 0x216   : > { %v2562_v40 = vrot.slane %v2561_v22, 2  ;;  %v2601_v12 = vunpack.i.l.bf16 %v2599_v58  ;;  %2480 = vst [vmem:[#allocation3 + $0x7] sm:$0x1] %v2479_v8  ;;  %v2538_v2 = vrot.slane %v2537_v30, 1  ;;  %v2602_v13 = vunpack.i.h.bf16 %v2599_v58  ;;  %v2646_v34 = vld [vmem:[#allocation3 + $0xa] sm:$0x1] }
 0x217   : > { %v2625_v10 = vsel %vm2179_vm10, %v8053_v57, 4286644096  ;;  %v2551_v54 = vrot.slane %v2550_v16, 1  ;;  %v2614_v45 = vunpack.i.l.bf16 %v2612_v41  ;;  %v2615_v24 = vunpack.i.h.bf16 %v2612_v41  ;;  %s11486_s30 = sshll.u32 %s8066_s26, 3 }
 0x218   : > { %v2563_v44 = vmax.f32 %v2561_v22, %v2562_v40  ;;  %vm2739_vm15 = vcmp.ge.s32.totalorder %v10849_v47, %v10932_v27  ;;  %vm2743_vm2 = vcmp.le.s32.totalorder %v10849_v47, %v10939_v19  ;;  %v2539_v52 = vmax.f32 %v2537_v30, %v2538_v2  ;;  %s11562_s17 = scalar_lea.vmem [#allocation2], %s11486_s30  ;;  %s3429_s30 = sadd.s32 1, %s12266_s28 }
 0x219   : > { %v2603_v4 = vmax.f32 %v2601_v12, %v2602_v13  ;;  %v2627_v56 = vunpack.i.l.bf16 %v2625_v10  ;;  %v2628_v55 = vunpack.i.h.bf16 %v2625_v10  ;;  %vm2740_vm4 = vcmp.ge.s32.totalorder %v10864_v39, %v10932_v27  ;;  %vm11412_vm3 = vmand %vm2739_vm15, %vm2743_vm2 }
 0x21a   : > { %vm2744_vm5 = vcmp.le.s32.totalorder %v10864_v39, %v10939_v19  ;;  %v2552_v62 = vmax.f32 %v2550_v16, %v2551_v54  ;;  %v2564_v0 = vrot.slane %v2563_v44, 1  ;;  %v2616_v1 = vmax.f32 %v2614_v45, %v2615_v24  ;;  %v9402_v54 = vld [vmem:[%s13747_s6 + $0x270] ss:$8 sps:$4 sm:$0xff]   ;;  %v9411_v19 = vld [vmem:[%s13747_s6 + $0x264] ss:$8 sps:$4 sm:$0xff]   ;;  %vm11449_vm12 = vmpackc.low %vm11412_vm3, %vm11412_vm3 }
 0x21b   : > { %v2679_v17 = vsel %vm11335_vm13, %v11328_v36, 4286644096  ;;  %v2540_v63 = vpack.i.bf16 %v2539_v52, %v2539_v52  ;;  %v2604_v15 = vrot.slane %v2603_v4, 4  ;;  %v2629_v3 = vmax.f32 %v2627_v56, %v2628_v55  ;;  %vm11425_vm1 = vmand %vm2740_vm4, %vm2744_vm5 }
 0x21c   : > { %v2680_v11 = vsel %vm11345_vm14, %v11340_v49, 4286644096  ;;  %v2553_v18 = vpack.i.bf16 %v2552_v62, %v2552_v62  ;;  %v2565_v14 = vmax.f32 %v2563_v44, %v2564_v0  ;;  %v2617_v31 = vrot.slane %v2616_v1, 4  ;;  %v9421_v62 = vld [vmem:[%s13747_s6 + $0x240] ss:$8 sps:$4 sm:$0xff]  }
 0x21d   : > { %v2681_v33 = vsel %vm11335_vm13, %v11354_v60, 4286644096  ;;  %v2605_v29 = vmax.f32 %v2603_v4, %v2604_v15  ;;  %v2630_v20 = vrot.slane %v2629_v3, 4  ;;  %v2682_v35 = vsel %vm11345_vm14, %v11357_v61, 4286644096  ;;  %v3513_v43 = vld [vmem:[#allocation3] sm:$0xff] }
 0x21e   : > { %v2683_v50 = vsel %vm11335_vm13, %v11364_v32, 4286644096  ;;  %v2566_v26 = vpack.i.bf16 %v2565_v14, %v2565_v14  ;;  %v2618_v37 = vmax.f32 %v2616_v1, %v2617_v31  ;;  %v2637_v46 = vmax.bf16 %v2553_v18, %v2540_v63  ;;  %v9414_v63 = vld [vmem:[%s13747_s6 + $0x364] ss:$8 sps:$4 sm:$0xff]   ;;  %v9409_v31 = vld [vmem:[%s13747_s6 + $0x260] ss:$8 sps:$4 sm:$0xff]   ;;  %vm11462_vm13 = vmpackc.low %vm11425_vm1, %vm11425_vm1 }
 0x21f   : > { %v2684_v21 = vsel %vm11345_vm14, %v11370_v25, 4286644096  ;;  %v4041_v42 = vrot.slane %v3513_v43, %v10944_v23  ;;  %v4034_v22 = vcombine.high %v3513_v43, %v3513_v43  ;;  %v2606_v53 = vrot.slane %v2605_v29, 2  ;;  %v9417_v43 = vld [vmem:[%s13747_s6 + $0x254] ss:$8 sps:$4 sm:$0xff]  }
 0x220   : > { %v2631_v6 = vmax.f32 %v2629_v3, %v2630_v20  ;;  %v2619_v30 = vrot.slane %v2618_v37, 2  ;;  %v2639_v57 = vsel %vm11096_vm6, %v2637_v46, %v2638_v5  ;;  %v2645_v58 = vmax.bf16 %v2566_v26, %v2553_v18 }
 0x221   : > { %v8059_v59 = vcombine.low %v2679_v17, %v2680_v11  ;;  %v4049_v8 = vcombine.high %v4041_v42, %v4041_v42  ;;  %v4057_v16 = vrot.slane %v4041_v42, %v10944_v23  ;;  %v11396_v40 = vrot.slane %v4034_v22, %v10944_v23  ;;  %2640 = vst [vmem:[#allocation3 + $0x8] sm:$0x1] %v2639_v57  ;;  %v9415_v42 = vld [vmem:[%s13747_s6 + $0x250] ss:$8 sps:$4 sm:$0xff]   ;;  %v9420_v22 = vld [vmem:[%s13747_s6 + $0x354] ss:$8 sps:$4 sm:$0xff]  }
 0x222   : > { %v2607_v12 = vmax.f32 %v2605_v29, %v2606_v53  ;;  %v2620_v2 = vmax.f32 %v2618_v37, %v2619_v30  ;;  %v2632_v13 = vrot.slane %v2631_v6, 2  ;;  %v2647_v41 = vsel %vm11096_vm6, %v2645_v58, %v2646_v34  ;;  %v2642_v53 = vld [vmem:[#allocation3 + $0x9] sm:$0x1] }
 0x223   : > { %v8060_v10 = vcombine.low %v2681_v33, %v2682_v35  ;;  %v4071_v9 = vrot.slane %v4049_v8, %v10944_v23  ;;  %v4050_v44 = vcombine.high %v11396_v40, %v11396_v40  ;;  %v4079_v45 = vcombine.high %v4057_v16, %v4057_v16  ;;  %2648 = vst [vmem:[#allocation3 + $0xa] sm:$0x1] %v2647_v41  ;;  %v9412_v33 = vld [vmem:[%s13747_s6 + $0x360] ss:$8 sps:$4 sm:$0xff]   ;;  %v2650_v8 = vld [vmem:[#allocation3 + $0xb] sm:$0x1] }
 0x224   : > { %v2608_v52 = vrot.slane %v2607_v12, 1  ;;  %v2621_v4 = vrot.slane %v2620_v2, 1  ;;  %v2633_v56 = vmax.f32 %v2631_v6, %v2632_v13  ;;  %v8061_v55 = vcombine.low %v2683_v50, %v2684_v21 }
 0x225   : > { %vm2842_vm7 = vcmp.ge.s32.totalorder %v10849_v47, %v10946_v38  ;;  %vm2845_vm8 = vcmp.le.s32.totalorder %v10849_v47, %v10955_v28  ;;  %6865 = vmatprep.mubr.bf16.mxu0 %v4071_v9  ;;  %v4081_v0 = vcombine.high %v4071_v9, %v4071_v9  ;;  %v4078_v1 = vrot.slane %v4050_v44, %v10944_v23 }
 0x226   : > { %v2701_v27 = vsel %vm2179_vm10, %v8059_v59, 4286644096  ;;  %v2714_v17 = vsel %vm2179_vm10, %v8060_v10, 4286644096  ;;  %vm2843_vm9 = vcmp.ge.s32.totalorder %v10864_v39, %v10946_v38  ;;  %vm2846_vm11 = vcmp.le.s32.totalorder %v10864_v39, %v10955_v28  ;;  %6866 = vmatmul.mubr.bf16.vlgmr.msra.gmra.mxu0 %v4057_v16  ;;  %vm11523_vm14 = vmand %vm2842_vm7, %vm2845_vm8  ;;  %v9427_v38 = vld [vmem:[%s13747_s6 + $0x230] ss:$8 sps:$4 sm:$0xff]  }
 0x227   : > { %v2609_v15 = vmax.f32 %v2607_v12, %v2608_v52  ;;  %v2622_v3 = vmax.f32 %v2620_v2, %v2621_v4  ;;  %v2634_v11 = vrot.slane %v2633_v56, 1  ;;  %v2703_v18 = vunpack.i.l.bf16 %v2701_v27  ;;  %6916 = vmatpush1.bf16.msra.mxu0 %v9402_v54  ;;  %6906 = vmatprep.mubr.bf16.mxu1 %v4081_v0  ;;  %vm11536_vm15 = vmand %vm2843_vm9, %vm2846_vm11 }
 0x228   : > { %v4082_v5 = vcombine.high %v4078_v1, %v4078_v1  ;;  %v2704_v29 = vunpack.i.h.bf16 %v2701_v27  ;;  %v2716_v20 = vunpack.i.l.bf16 %v2714_v17  ;;  %v2717_v35 = vunpack.i.h.bf16 %v2714_v17  ;;  %6947 = vmatprep.mubr.bf16.mxu0 %v4078_v1  ;;  %6907 = vmatmul.mubr.bf16.vlgmr.msra.gmra.mxu1 %v4079_v45  ;;  %vm11554_vm2 = vmpackc.low %vm11523_vm14, %vm11523_vm14  ;;  %v9444_v27 = vld [vmem:[%s13747_s6 + $0x314] ss:$8 sps:$4 sm:$0xff]  }
 0x229   : > { %v2610_v26 = vpack.i.bf16 %v2609_v15, %v2609_v15  ;;  %v2623_v37 = vpack.i.bf16 %v2622_v3, %v2622_v3  ;;  %v2635_v46 = vmax.f32 %v2633_v56, %v2634_v11  ;;  %v2727_v21 = vsel %vm2179_vm10, %v8061_v55, 4286644096  ;;  %6957 = vmatpush1.bf16.msra.mxu1 %v9406_v51  ;;  %6917 = vmatprep.subr.bf16.mxu0 %v9411_v19  ;;  %vm11573_vm4 = vmpackc.low %vm11536_vm15, %vm11536_vm15 }
 0x22a   : > { %v2705_v6 = vmax.f32 %v2703_v18, %v2704_v29  ;;  %v2718_v34 = vmax.f32 %v2716_v20, %v2717_v35  ;;  %v2729_v30 = vunpack.i.l.bf16 %v2727_v21  ;;  %v2730_v57 = vunpack.i.h.bf16 %v2727_v21  ;;  %6988 = vmatprep.mubr.bf16.mxu1 %v4082_v5  ;;  %6958 = vmatprep.subr.bf16.mxu1 %v9414_v63  ;;  %v9424_v18 = vld [vmem:[%s13747_s6 + $0x340] ss:$8 sps:$4 sm:$0xff]   ;;  %v9432_v29 = vld [vmem:[%s13747_s6 + $0x334] ss:$8 sps:$4 sm:$0xff]  }
 0x22b   : > { %v2636_v58 = vpack.i.bf16 %v2635_v46, %v2635_v46  ;;  %v2641_v59 = vmax.bf16 %v2623_v37, %v2610_v26  ;;  %v2749_v16 = vsel %vm11449_vm12, %v11328_v36, 4286644096  ;;  %v2750_v12 = vsel %vm11462_vm13, %v11340_v49, 4286644096  ;;  %6918 = vmatpush1.bf16.msra.mxu0 %v9409_v31  ;;  %v9423_v36 = vld [vmem:[%s13747_s6 + $0x244] ss:$8 sps:$4 sm:$0xff]  }
 0x22c   : > { %v2706_v2 = vrot.slane %v2705_v6, 4  ;;  %v2719_v13 = vrot.slane %v2718_v34, 4  ;;  %v2731_v41 = vmax.f32 %v2729_v30, %v2730_v57  ;;  %v2751_v10 = vsel %vm11449_vm12, %v11354_v60, 4286644096  ;;  %6919 = vmatprep.subr.bf16.mxu0 %v9417_v43  ;;  %v9418_v60 = vld [vmem:[%s13747_s6 + $0x350] ss:$8 sps:$4 sm:$0xff]  }
 0x22d   : > { %v2643_v9 = vsel %vm11096_vm6, %v2641_v59, %v2642_v53  ;;  %v2649_v49 = vmax.bf16 %v2636_v58, %v2623_v37  ;;  %v2752_v54 = vsel %vm11462_vm13, %v11357_v61, 4286644096  ;;  %v2753_v44 = vsel %vm11449_vm12, %v11364_v32, 4286644096  ;;  %6959 = vmatpush1.bf16.msra.mxu1 %v9412_v33  ;;  %v9426_v61 = vld [vmem:[%s13747_s6 + $0x344] ss:$8 sps:$4 sm:$0xff]  }
 0x22e   : > { %2644 = vst [vmem:[#allocation3 + $0x9] sm:$0x1] %v2643_v9  ;;  %v2707_v45 = vmax.f32 %v2705_v6, %v2706_v2  ;;  %v2720_v24 = vmax.f32 %v2718_v34, %v2719_v13  ;;  %v2732_v51 = vrot.slane %v2731_v41, 4  ;;  %v2754_v52 = vsel %vm11462_vm13, %v11370_v25, 4286644096  ;;  %6960 = vmatprep.subr.bf16.mxu1 %v9420_v22 }
 0x22f   : > { %v2651_v32 = vsel %vm11096_vm6, %v2649_v49, %v2650_v8  ;;  %v8062_v4 = vcombine.low %v2749_v16, %v2750_v12  ;;  %v8063_v56 = vcombine.low %v2751_v10, %v2752_v54  ;;  %v8064_v55 = vcombine.low %v2753_v44, %v2754_v52  ;;  %6920 = vmatpush1.bf16.msra.mxu0 %v9415_v42  ;;  %v9429_v25 = vld [vmem:[%s13747_s6 + $0x234] ss:$8 sps:$4 sm:$0xff]   ;;  %v9430_v37 = vld [vmem:[%s13747_s6 + $0x330] ss:$8 sps:$4 sm:$0xff]   ;;  %v11565_v53 = vld [vmem:[%s11562_s17] sm:$0xf] }
 0x230   : > { %2652 = vst [vmem:[#allocation3 + $0xb] sm:$0x1] %v2651_v32  ;;  %v2708_v0 = vrot.slane %v2707_v45, 2  ;;  %v2721_v1 = vrot.slane %v2720_v24, 2  ;;  %v2733_v19 = vmax.f32 %v2731_v41, %v2732_v51  ;;  %6921 = vmatprep.subr.bf16.mxu0 %v9423_v36  ;;  %v11540_v11 = vstv %s2913_s13  ;;  %v11568_v6 = vld [vmem:[%s11562_s17 + $0x4] sm:$0x7] }
 0x231   : > { %v2771_v17 = vsel %vm2179_vm10, %v8062_v4, 4286644096  ;;  %v2784_v63 = vsel %vm2179_vm10, %v8063_v56, 4286644096  ;;  %v2797_v15 = vsel %vm2179_vm10, %v8064_v55, 4286644096  ;;  %6961 = vmatpush1.bf16.msra.mxu1 %v9418_v60  ;;  %vm2911_vm5 = vcmp.ge.s32.totalorder %v10849_v47, %v10955_v28 }
 0x232   : > { %v2709_v14 = vmax.f32 %v2707_v45, %v2708_v0  ;;  %v2722_v31 = vmax.f32 %v2720_v24, %v2721_v1  ;;  %v2734_v5 = vrot.slane %v2733_v19, 2  ;;  %v2773_v33 = vunpack.i.l.bf16 %v2771_v17  ;;  %6962 = vmatprep.subr.bf16.mxu1 %v9426_v61  ;;  %v9435_v30 = vld [vmem:[%s13747_s6 + $0x224] ss:$8 sps:$4 sm:$0xff]   ;;  %v11584_v8 = vld [vmem:[%s11562_s17 + $0x8] sm:$0xf]  ;;  %v1765_v49 = vpop.f32.mrf.mxu1  ;;  %s8080_s13 = sadd.s32 4294967295, %s11695_s15 }
 0x233   : > { %v2774_v20 = vunpack.i.h.bf16 %v2771_v17  ;;  %v2786_v35 = vunpack.i.l.bf16 %v2784_v63  ;;  %v2787_v50 = vunpack.i.h.bf16 %v2784_v63  ;;  %v2799_v43 = vunpack.i.l.bf16 %v2797_v15  ;;  %6922 = vmatpush1.bf16.msra.mxu0 %v9421_v62  ;;  %v9438_v57 = vld [vmem:[%s13747_s6 + $0x324] ss:$8 sps:$4 sm:$0xff]   ;;  %v9433_v16 = vld [vmem:[%s13747_s6 + $0x220] ss:$8 sps:$4 sm:$0xff]   ;;  %v9441_v9 = vld [vmem:[%s13747_s6 + $0x214] ss:$8 sps:$4 sm:$0xff]  }
 0x234   : > { %v2710_v46 = vrot.slane %v2709_v14, 1  ;;  %v2723_v21 = vrot.slane %v2722_v31, 1  ;;  %v2735_v42 = vmax.f32 %v2733_v19, %v2734_v5  ;;  %v2800_v22 = vunpack.i.h.bf16 %v2797_v15  ;;  %6923 = vmatprep.subr.bf16.mxu0 %v9429_v25  ;;  %v11592_v12 = vld [vmem:[%s13746_s5] ss:$0 sm:$0xff]  ;;  %v11595_v36 = vld [vmem:[%s11562_s17 + $0xc] sm:$0x7]  ;;  %v9053_v56 = vpop.f32.mrf.mxu1 }
 0x235   : > { %v2775_v58 = vmax.f32 %v2773_v33, %v2774_v20  ;;  %v2788_v59 = vmax.f32 %v2786_v35, %v2787_v50  ;;  %6963 = vmatpush1.bf16.msra.mxu1 %v9424_v18  ;;  %v2851_v60 = vsel %vm11554_vm2, %v11565_v53, 4286644096  ;;  %v2852_v45 = vsel %vm11573_vm4, %v11568_v6, 4286644096  ;;  %v2810_v61 = vld [vmem:[#allocation3 + $0xc] sm:$0x1] }
 0x236   : > { %v2711_v2 = vmax.f32 %v2709_v14, %v2710_v46  ;;  %v2724_v13 = vmax.f32 %v2722_v31, %v2723_v21  ;;  %v2736_v41 = vrot.slane %v2735_v42, 1  ;;  %v2801_v10 = vmax.f32 %v2799_v43, %v2800_v22  ;;  %6964 = vmatprep.subr.bf16.mxu1 %v9432_v29  ;;  %v11611_v32 = vld [vmem:[%s11562_s17 + $0x10] sm:$0xf]  ;;  %v11621_v0 = vld [vmem:[%s11562_s17 + $0x14] sm:$0x7]  ;;  %v1768_v18 = vpop.f32.mrf.mxu1 }
 0x237   : > { %v2776_v54 = vrot.slane %v2775_v58, 4  ;;  %v2789_v44 = vrot.slane %v2788_v59, 4  ;;  %vm2915_vm3 = vcmp.le.s32.totalorder %v10849_v47, %v11540_v11  ;;  %6924 = vmatpush1.bf16.msra.mxu0 %v9427_v38  ;;  %v2853_v4 = vsel %vm11554_vm2, %v11584_v8, 4286644096  ;;  %v9436_v19 = vld [vmem:[%s13747_s6 + $0x320] ss:$8 sps:$4 sm:$0xff]  }
 0x238   : > { %v2712_v24 = vpack.i.bf16 %v2711_v2, %v2711_v2  ;;  %v2725_v51 = vpack.i.bf16 %v2724_v13, %v2724_v13  ;;  %v2737_v52 = vmax.f32 %v2735_v42, %v2736_v41  ;;  %vm2912_vm1 = vcmp.ge.s32.totalorder %v10864_v39, %v10955_v28  ;;  %6925 = vmatprep.subr.bf16.mxu0 %v9435_v30  ;;  %v2818_v33 = vld [vmem:[#allocation3 + $0xe] sm:$0x1]  ;;  %v9439_v29 = vld [vmem:[%s13747_s6 + $0x210] ss:$8 sps:$4 sm:$0xff]   ;;  %v9447_v26 = vld [vmem:[%s13747_s6 + $0x204] ss:$8 sps:$4 sm:$0xff]  }
 0x239   : > { %vm2916_vm7 = vcmp.le.s32.totalorder %v10864_v39, %v11540_v11  ;;  %v2777_v55 = vmax.f32 %v2775_v58, %v2776_v54  ;;  %v2790_v62 = vmax.f32 %v2788_v59, %v2789_v44  ;;  %v2802_v25 = vrot.slane %v2801_v10, 4  ;;  %6965 = vmatpush1.bf16.msra.mxu1 %v9430_v37  ;;  %v9054_v37 = vpop.f32.mrf.mxu1  ;;  %v9442_v30 = vld [vmem:[%s13747_s6 + $0x310] ss:$8 sps:$4 sm:$0xff]   ;;  %v9448_v56 = vld [vmem:[%s13747_s6 + $0x300] ss:$8 sps:$4 sm:$0xff]   ;;  %vm11678_vm8 = vmand %vm2911_vm5, %vm2915_vm3 }
 0x23a   : > { %v2854_v1 = vsel %vm11573_vm4, %v11595_v36, 4286644096  ;;  %v1766_v17 = vadd.f32 %v11592_v12, %v1765_v49  ;;  %v2738_v63 = vpack.i.bf16 %v2737_v52, %v2737_v52  ;;  %v2809_v15 = vmax.bf16 %v2725_v51, %v2712_v24  ;;  %6966 = vmatprep.subr.bf16.mxu1 %v9438_v57  ;;  %v9453_v24 = vld [vmem:[%s13747_s6 + $0x2f4] ss:$8 sps:$4 sm:$0xff]   ;;  %vm11691_vm9 = vmand %vm2912_vm1, %vm2916_vm7  ;;  %v9459_v28 = vld [vmem:[%s13747_s6 + $0x2e4] ss:$8 sps:$4 sm:$0xff]  }
 0x23b   : > { %v8070_v3 = vcombine.low %v2851_v60, %v2852_v45  ;;  %v2778_v14 = vrot.slane %v2777_v55, 2  ;;  %v2791_v31 = vrot.slane %v2790_v62, 2  ;;  %v2803_v5 = vmax.f32 %v2801_v10, %v2802_v25  ;;  %6926 = vmatpush1.bf16.msra.mxu0 %v9433_v16  ;;  %v9450_v16 = vld [vmem:[%s13747_s6 + $0x304] ss:$8 sps:$4 sm:$0xff]   ;;  %v1773_v54 = vpop.f32.mrf.mxu1  ;;  %vm11707_vm11 = vmpackc.low %vm11678_vm8, %vm11678_vm8 }
 0x23c   : > { %v2855_v38 = vsel %vm11554_vm2, %v11611_v32, 4286644096  ;;  %v1769_v20 = vadd.f32 %v11592_v12, %v1768_v18  ;;  %v2811_v35 = vsel %vm11096_vm6, %v2809_v15, %v2810_v61  ;;  %v2817_v50 = vmax.bf16 %v2738_v63, %v2725_v51  ;;  %6927 = vmatprep.subr.bf16.mxu0 %v9441_v9  ;;  %v9445_v9 = vld [vmem:[%s13747_s6 + $0x200] ss:$8 sps:$4 sm:$0xff]   ;;  %vm11717_vm12 = vmpackc.low %vm11691_vm9, %vm11691_vm9 }
 0x23d   : > { %v2856_v43 = vsel %vm11573_vm4, %v11621_v0, 4286644096  ;;  %v2779_v46 = vmax.f32 %v2777_v55, %v2778_v14  ;;  %v2792_v21 = vmax.f32 %v2790_v62, %v2791_v31  ;;  %v2804_v42 = vrot.slane %v2803_v5, 2  ;;  %2812 = vst [vmem:[#allocation3 + $0xc] sm:$0x1] %v2811_v35  ;;  %6967 = vmatpush1.bf16.msra.mxu1 %v9436_v19  ;;  %v9057_v55 = vpop.f32.mrf.mxu1 }
 0x23e   : > { %v8071_v22 = vcombine.low %v2853_v4, %v2854_v1  ;;  %v1867_v57 = vmax.f32 %v1766_v17, 0.0  ;;  %v1868_v34 = vmax.f32 %v1769_v20, 0.0  ;;  %v2819_v58 = vsel %vm11096_vm6, %v2817_v50, %v2818_v33  ;;  %6968 = vmatprep.subr.bf16.mxu1 %v9444_v27  ;;  %v9456_v17 = vld [vmem:[%s13747_s6 + $0x3f4] ss:$8 sps:$4 sm:$0xff]   ;;  %v9451_v31 = vld [vmem:[%s13747_s6 + $0x2f0] ss:$8 sps:$4 sm:$0xff]  }
 0x23f   : > { %v8072_v59 = vcombine.low %v2855_v38, %v2856_v43  ;;  %v2780_v2 = vrot.slane %v2779_v46, 1  ;;  %v2793_v13 = vrot.slane %v2792_v21, 1  ;;  %v2805_v41 = vmax.f32 %v2803_v5, %v2804_v42  ;;  %2820 = vst [vmem:[#allocation3 + $0xe] sm:$0x1] %v2819_v58  ;;  %6928 = vmatpush1.bf16.msra.mxu0 %v9439_v29  ;;  %v1776_v5 = vpop.f32.mrf.mxu1  ;;  %v2814_v33 = vld [vmem:[#allocation3 + $0xd] sm:$0x1] }
 0x240   : > { %v2873_v10 = vsel %vm2179_vm10, %v8070_v3, 4286644096  ;;  %v1892_v49 = vadd.f32 %v1868_v34, %v1867_v57  ;;  %v2886_v45 = vsel %vm2179_vm10, %v8071_v22, 4286644096  ;;  %6929 = vmatprep.subr.bf16.mxu0 %v9447_v26  ;;  %v1774_v51 = vadd.f32 %v11592_v12, %v1773_v54  ;;  %v2822_v42 = vld [vmem:[#allocation3 + $0xf] sm:$0x1] }
 0x241   : > { %v2875_v44 = vunpack.i.l.bf16 %v2873_v10  ;;  %v2876_v60 = vunpack.i.h.bf16 %v2873_v10  ;;  %v2781_v52 = vmax.f32 %v2779_v46, %v2780_v2  ;;  %v2794_v61 = vmax.f32 %v2792_v21, %v2793_v13  ;;  %6969 = vmatpush1.bf16.msra.mxu1 %v9442_v30  ;;  %v9454_v46 = vld [vmem:[%s13747_s6 + $0x3f0] ss:$8 sps:$4 sm:$0xff]   ;;  %v9058_v21 = vpop.f32.mrf.mxu1  ;;  %v9457_v58 = vld [vmem:[%s13747_s6 + $0x2e0] ss:$8 sps:$4 sm:$0xff]  }
 0x242   : > { %v2806_v4 = vrot.slane %v2805_v41, 1  ;;  %v2888_v25 = vunpack.i.l.bf16 %v2886_v45  ;;  %v2889_v1 = vunpack.i.h.bf16 %v2886_v45  ;;  %v2899_v19 = vsel %vm2179_vm10, %v8072_v59, 4286644096  ;;  %6970 = vmatprep.subr.bf16.mxu1 %v9450_v16  ;;  %v9462_v59 = vld [vmem:[%s13747_s6 + $0x3e4] ss:$8 sps:$4 sm:$0xff]  }
 0x243   : > { %v2877_v62 = vmax.f32 %v2875_v44, %v2876_v60  ;;  %v1869_v63 = vmax.f32 %v1774_v51, 0.0  ;;  %v2782_v15 = vpack.i.bf16 %v2781_v52, %v2781_v52  ;;  %v2795_v3 = vpack.i.bf16 %v2794_v61, %v2794_v61  ;;  %6930 = vmatpush1.bf16.msra.mxu0 %v9445_v9  ;;  %v9465_v44 = vld [vmem:[%s13747_s6 + $0x2d4] ss:$8 sps:$4 sm:$0xff]  }
 0x244   : > { %v2807_v18 = vmax.f32 %v2805_v41, %v2806_v4  ;;  %v2890_v29 = vmax.f32 %v2888_v25, %v2889_v1  ;;  %v2901_v20 = vunpack.i.l.bf16 %v2899_v19  ;;  %v2902_v11 = vunpack.i.h.bf16 %v2899_v19  ;;  %6931 = vmatprep.subr.bf16.mxu0 %v9453_v24  ;;  %v1781_v41 = vpop.f32.mrf.mxu1  ;;  %v9468_v52 = vld [vmem:[%s13747_s6 + $0x3d4] ss:$8 sps:$4 sm:$0xff]   ;;  %v9463_v19 = vld [vmem:[%s13747_s6 + $0x2d0] ss:$8 sps:$4 sm:$0xff]  }
 0x245   : > { %v2878_v38 = vrot.slane %v2877_v62, 4  ;;  %v1893_v35 = vadd.f32 %v1892_v49, %v1869_v63  ;;  %v1777_v50 = vadd.f32 %v11592_v12, %v1776_v5  ;;  %v2813_v26 = vmax.bf16 %v2795_v3, %v2782_v15  ;;  %6971 = vmatpush1.bf16.msra.mxu1 %v9448_v56  ;;  %v9466_v5 = vld [vmem:[%s13747_s6 + $0x3d0] ss:$8 sps:$4 sm:$0xff]  }
 0x246   : > { %v2808_v43 = vpack.i.bf16 %v2807_v18, %v2807_v18  ;;  %v2891_v30 = vrot.slane %v2890_v29, 4  ;;  %v2903_v57 = vmax.f32 %v2901_v20, %v2902_v11  ;;  %6972 = vmatprep.subr.bf16.mxu1 %v9456_v17  ;;  %v2921_v54 = vsel %vm11707_vm11, %v11565_v53, 4286644096  ;;  %v9460_v53 = vld [vmem:[%s13747_s6 + $0x3e0] ss:$8 sps:$4 sm:$0xff]   ;;  %v9061_v61 = vpop.f32.mrf.mxu1 }
 0x247   : > { %v2879_v22 = vmax.f32 %v2877_v62, %v2878_v38  ;;  %v1870_v16 = vmax.f32 %v1777_v50, 0.0  ;;  %v2815_v2 = vsel %vm11096_vm6, %v2813_v26, %v2814_v33  ;;  %6932 = vmatpush2.bf16.msra.mxu0 %v9451_v31  ;;  %v1782_v24 = vadd.f32 %v11592_v12, %v1781_v41  ;;  %v9474_v33 = vld [vmem:[%s13747_s6 + $0x3c4] ss:$8 sps:$4 sm:$0xff]  }
 0x248   : > { %v2821_v13 = vmax.bf16 %v2808_v43, %v2795_v3  ;;  %2816 = vst [vmem:[#allocation3 + $0xd] sm:$0x1] %v2815_v2  ;;  %v2892_v9 = vmax.f32 %v2890_v29, %v2891_v30  ;;  %v2904_v49 = vrot.slane %v2903_v57, 4  ;;  %6933 = vmatprep.subr.bf16.mxu0 %v9459_v28  ;;  %v2922_v51 = vsel %vm11717_vm12, %v11568_v6, 4286644096  ;;  %v1784_v27 = vpop.f32.mrf.mxu1 }
 0x249   : > { %v2880_v10 = vrot.slane %v2879_v22, 2  ;;  %v1894_v60 = vadd.f32 %v1893_v35, %v1870_v16  ;;  %6973 = vmatpush2.bf16.msra.mxu1 %v9454_v46  ;;  %v1871_v62 = vmax.f32 %v1782_v24, 0.0  ;;  %v2923_v6 = vsel %vm11707_vm11, %v11584_v8, 4286644096  ;;  %v9471_v8 = vld [vmem:[%s13747_s6 + $0x2c4] ss:$8 sps:$4 sm:$0xff]  }
 0x24a   : > { %v2823_v45 = vsel %vm11096_vm6, %v2821_v13, %v2822_v42  ;;  %v2893_v56 = vrot.slane %v2892_v9, 2  ;;  %v2905_v55 = vmax.f32 %v2903_v57, %v2904_v49  ;;  %6974 = vmatprep.subr.bf16.mxu1 %v9462_v59  ;;  %v2924_v25 = vsel %vm11717_vm12, %v11595_v36, 4286644096  ;;  %v9062_v38 = vpop.f32.mrf.mxu1  ;;  %v9469_v43 = vld [vmem:[%s13747_s6 + $0x2c0] ss:$8 sps:$4 sm:$0xff]  }
 0x24b   : > { %2824 = vst [vmem:[#allocation3 + $0xf] sm:$0x1] %v2823_v45  ;;  %v2881_v4 = vmax.f32 %v2879_v22, %v2880_v10  ;;  %v8073_v1 = vcombine.low %v2921_v54, %v2922_v51  ;;  %6934 = vmatpush2.bf16.msra.mxu0 %v9457_v58  ;;  %v8074_v3 = vcombine.low %v2923_v6, %v2924_v25  ;;  %v2925_v14 = vsel %vm11707_vm11, %v11611_v32, 4286644096  ;;  %v9477_v22 = vld [vmem:[%s13747_s6 + $0x2b4] ss:$8 sps:$4 sm:$0xff]  }
 0x24c   : > { %v2894_v63 = vmax.f32 %v2892_v9, %v2893_v56  ;;  %v2906_v15 = vrot.slane %v2905_v55, 2  ;;  %6935 = vmatprep.subr.bf16.mxu0 %v9465_v44  ;;  %v1895_v18 = vadd.f32 %v1894_v60, %v1871_v62  ;;  %v1785_v36 = vadd.f32 %v11592_v12, %v1784_v27  ;;  %v1789_v26 = vpop.f32.mrf.mxu1  ;;  %v9472_v59 = vld [vmem:[%s13747_s6 + $0x3c0] ss:$8 sps:$4 sm:$0xff]   ;;  %v9480_v13 = vld [vmem:[%s13747_s6 + $0x3b4] ss:$8 sps:$4 sm:$0xff]  }
 0x24d   : > { %v2882_v17 = vrot.slane %v2881_v4, 1  ;;  %v2926_v31 = vsel %vm11717_vm12, %v11621_v0, 4286644096  ;;  %6975 = vmatpush2.bf16.msra.mxu1 %v9460_v53  ;;  %v11777_v11 = vstv %s8080_s13  ;;  %v11780_v32 = vstv %s11695_s15  ;;  %v9475_v49 = vld [vmem:[%s13747_s6 + $0x2b0] ss:$8 sps:$4 sm:$0xff]   ;;  %s8091_s15 = sadd.s32 4294967295, %s11846_s19 }
 0x24e   : > { %v2895_v29 = vrot.slane %v2894_v63, 1  ;;  %v2907_v20 = vmax.f32 %v2905_v55, %v2906_v15  ;;  %6976 = vmatprep.subr.bf16.mxu1 %v9468_v52  ;;  %v1872_v0 = vmax.f32 %v1785_v36, 0.0  ;;  %v2943_v35 = vsel %vm2179_vm10, %v8073_v1, 4286644096  ;;  %v9065_v16 = vpop.f32.mrf.mxu1  ;;  %v9483_v24 = vld [vmem:[%s13747_s6 + $0x2a4] ss:$8 sps:$4 sm:$0xff]  }
 0x24f   : > { %v11782_v28 = vmax.f32 %v2881_v4, %v2882_v17  ;;  %v2956_v50 = vsel %vm2179_vm10, %v8074_v3, 4286644096  ;;  %6936 = vmatpush2.bf16.msra.mxu0 %v9463_v19  ;;  %v8075_v21 = vcombine.low %v2925_v14, %v2926_v31  ;;  %v2945_v42 = vunpack.i.l.bf16 %v2943_v35  ;;  %v9478_v56 = vld [vmem:[%s13747_s6 + $0x3b0] ss:$8 sps:$4 sm:$0xff]   ;;  %v9481_v15 = vld [vmem:[%s13747_s6 + $0x2a0] ss:$8 sps:$4 sm:$0xff]  }
 0x250   : > { %v2896_v37 = vmax.f32 %v2894_v63, %v2895_v29  ;;  %v2908_v46 = vrot.slane %v2907_v20, 1  ;;  %6937 = vmatprep.subr.bf16.mxu0 %v9471_v8  ;;  %v1896_v30 = vadd.f32 %v1895_v18, %v1872_v0  ;;  %v1790_v57 = vadd.f32 %v11592_v12, %v1789_v26  ;;  %v1792_v54 = vpop.f32.mrf.mxu1  ;;  %v2982_v63 = vld [vmem:[#allocation3 + $0x10] sm:$0x1]  ;;  %v9489_v3 = vld [vmem:[%s13747_s6 + $0x294] ss:$8 sps:$4 sm:$0xff]  }
 0x251   : > { %v2946_v34 = vunpack.i.h.bf16 %v2943_v35  ;;  %v2958_v58 = vunpack.i.l.bf16 %v2956_v50  ;;  %6977 = vmatpush2.bf16.msra.mxu1 %v9466_v5  ;;  %vm3017_vm13 = vcmp.le.s32.totalorder %v10849_v47, %v11780_v32  ;;  %vm3018_vm14 = vcmp.le.s32.totalorder %v10864_v39, %v11780_v32  ;;  %v11877_v0 = vld [vmem:[%s11874_s25] sm:$0xf]  ;;  %v9487_v35 = vld [vmem:[%s13747_s6 + $0x290] ss:$8 sps:$4 sm:$0xff]   ;;  %v11943_v25 = vld [vmem:[%s11874_s25 + $0xc] sm:$0x7] }
 0x252   : > { %v11798_v2 = vmax.f32 %v2907_v20, %v2908_v46  ;;  %6978 = vmatprep.subr.bf16.mxu1 %v9474_v33  ;;  %v1873_v41 = vmax.f32 %v1790_v57, 0.0  ;;  %v2959_v9 = vunpack.i.h.bf16 %v2956_v50  ;;  %vm3014_vm15 = vcmp.ge.s32.totalorder %v10849_v47, %v11777_v11  ;;  %v11824_v51 = vld [vmem:[#allocation3 + $0x8] sm:$0xff]  ;;  %v9066_v62 = vpop.f32.mrf.mxu1  ;;  %v2990_v20 = vld [vmem:[#allocation3 + $0x12] sm:$0x1]  ;;  %v11900_v57 = vld [vmem:[%s11874_s25 + $0x4] sm:$0x7] }
 0x253   : > { %v2947_v10 = vmax.f32 %v2945_v42, %v2946_v34  ;;  %6938 = vmatpush2.bf16.msra.mxu0 %v9469_v43  ;;  %v2884_v44 = vpack.i.bf16 %v11782_v28, %v11782_v28  ;;  %v2897_v60 = vpack.i.bf16 %v2896_v37, %v2896_v37  ;;  %v2969_v45 = vsel %vm2179_vm10, %v8075_v21, 4286644096  ;;  %vm11842_vm4 = vmand %vm3014_vm15, %vm3017_vm13  ;;  %v9484_v28 = vld [vmem:[%s13747_s6 + $0x3a0] ss:$8 sps:$4 sm:$0xff]   ;;  %v9492_v21 = vld [vmem:[%s13747_s6 + $0x394] ss:$8 sps:$4 sm:$0xff]  }
 0x254   : > { %vm3015_vm2 = vcmp.ge.s32.totalorder %v10864_v39, %v11777_v11  ;;  %6939 = vmatprep.subr.bf16.mxu0 %v9477_v22  ;;  %v1897_v53 = vadd.f32 %v1896_v30, %v1873_v41  ;;  %v1793_v52 = vadd.f32 %v11592_v12, %v1792_v54  ;;  %v2960_v4 = vmax.f32 %v2958_v58, %v2959_v9  ;;  %v1797_v18 = vpop.f32.mrf.mxu1  ;;  %vm11882_vm3 = vmpackc.low %vm11842_vm4, %vm11842_vm4  ;;  %v9495_v9 = vld [vmem:[%s13747_s6 + $0x284] ss:$8 sps:$4 sm:$0xff]  }
 0x255   : > { %v2948_v61 = vrot.slane %v2947_v10, 4  ;;  %6979 = vmatpush2.bf16.msra.mxu1 %v9472_v59  ;;  %v11832_v55 = vrot.slane %v11396_v40, %v10944_v23  ;;  %v2910_v6 = vpack.i.bf16 %v11798_v2, %v11798_v2  ;;  %v9486_v40 = vld [vmem:[%s13747_s6 + $0x3a4] ss:$8 sps:$4 sm:$0xff]   ;;  %v2971_v17 = vunpack.i.l.bf16 %v2969_v45  ;;  %vm11867_vm5 = vmand %vm3015_vm2, %vm3018_vm14  ;;  %v9490_v59 = vld [vmem:[%s13747_s6 + $0x390] ss:$8 sps:$4 sm:$0xff]  }
 0x256   : > { %6980 = vmatprep.subr.bf16.mxu1 %v9480_v13  ;;  %v1874_v1 = vmax.f32 %v1793_v52, 0.0  ;;  %v2961_v27 = vrot.slane %v2960_v4, 4  ;;  %v11859_v8 = vrot.slane %v11824_v51, %v10944_v23  ;;  %v2972_v36 = vunpack.i.h.bf16 %v2969_v45  ;;  %v9069_v43 = vpop.f32.mrf.mxu1  ;;  %vm11905_vm1 = vmpackc.low %vm11867_vm5, %vm11867_vm5  ;;  %v11926_v45 = vld [vmem:[%s11874_s25 + $0x8] sm:$0xf]  ;;  %v9507_v34 = vld [vmem:[%s13747_s6 + $0x464] ss:$8 sps:$4 sm:$0xff]  }
 0x257   : > { %v2949_v19 = vmax.f32 %v2947_v10, %v2948_v61  ;;  %6940 = vmatpush2.bf16.msra.mxu0 %v9475_v49  ;;  %v2981_v14 = vmax.bf16 %v2897_v60, %v2884_v44  ;;  %v1798_v33 = vadd.f32 %v11592_v12, %v1797_v18  ;;  %v4080_v50 = vcombine.high %v11832_v55, %v11832_v55 }
 0x258   : > { %6941 = vmatprep.subr.bf16.mxu0 %v9483_v24  ;;  %v1898_v5 = vadd.f32 %v1897_v53, %v1874_v1  ;;  %v2962_v29 = vmax.f32 %v2960_v4, %v2961_v27  ;;  %v2973_v26 = vmax.f32 %v2971_v17, %v2972_v36  ;;  %v2989_v46 = vmax.bf16 %v2910_v6, %v2897_v60  ;;  %v1800_v2 = vpop.f32.mrf.mxu1  ;;  %v9493_v24 = vld [vmem:[%s13747_s6 + $0x280] ss:$8 sps:$4 sm:$0xff]   ;;  %v9498_v53 = vld [vmem:[%s13747_s6 + $0x384] ss:$8 sps:$4 sm:$0xff]   ;;  %v11954_v17 = vld [vmem:[%s11874_s25 + $0x14] sm:$0x7] }
 0x259   : > { %v2950_v38 = vrot.slane %v2949_v19, 2  ;;  %6981 = vmatpush2.bf16.msra.mxu1 %v9478_v56  ;;  %v2983_v37 = vsel %vm11096_vm6, %v2981_v14, %v2982_v63  ;;  %v1875_v42 = vmax.f32 %v1798_v33, 0.0  ;;  %v11909_v58 = vstv %s3085_s24  ;;  %v9504_v33 = vld [vmem:[%s13747_s6 + $0x574] ss:$8 sps:$4 sm:$0xff]  }
 0x25a   : > { %6982 = vmatprep.subr.bf16.mxu1 %v9486_v40  ;;  %v2963_v30 = vrot.slane %v2962_v29, 2  ;;  %2984 = vst [vmem:[#allocation3 + $0x10] sm:$0x1] %v2983_v37  ;;  %v4098_v16 = vcombine.high %v11859_v8, %v11859_v8  ;;  %v2974_v13 = vrot.slane %v2973_v26, 4  ;;  %v2991_v41 = vsel %vm11096_vm6, %v2989_v46, %v2990_v20  ;;  %v9070_v52 = vpop.f32.mrf.mxu1  ;;  %v11946_v40 = vld [vmem:[%s11874_s25 + $0x10] sm:$0xf] }
 0x25b   : > { %v2951_v22 = vmax.f32 %v2949_v19, %v2950_v38  ;;  %6942 = vmatpush2.bf16.msra.mxu0 %v9481_v15  ;;  %v3023_v10 = vsel %vm11882_vm3, %v11877_v0, 4286644096  ;;  %v1899_v49 = vadd.f32 %v1898_v5, %v1875_v42  ;;  %v1801_v54 = vadd.f32 %v11592_v12, %v1800_v2  ;;  %2992 = vst [vmem:[#allocation3 + $0x12] sm:$0x1] %v2991_v41  ;;  %v9496_v5 = vld [vmem:[%s13747_s6 + $0x380] ss:$8 sps:$4 sm:$0xff]  }
 0x25c   : > { %6943 = vmatprep.subr.bf16.mxu0 %v9489_v3  ;;  %v2964_v60 = vmax.f32 %v2962_v29, %v2963_v30  ;;  %v2975_v61 = vmax.f32 %v2973_v26, %v2974_v13  ;;  %v3024_v4 = vsel %vm11905_vm1, %v11900_v57, 4286644096  ;;  %vm3083_vm7 = vcmp.ge.s32.totalorder %v10849_v47, %v11780_v32  ;;  %v1805_v19 = vpop.f32.mrf.mxu1  ;;  %v9501_v3 = vld [vmem:[%s13747_s6 + $0x474] ss:$8 sps:$4 sm:$0xff]   ;;  %v9499_v46 = vld [vmem:[%s13747_s6 + $0x470] ss:$8 sps:$4 sm:$0xff]  }
 0x25d   : > { %v2952_v44 = vrot.slane %v2951_v22, 1  ;;  %6983 = vmatpush2.bf16.msra.mxu1 %v9484_v28  ;;  %vm3084_vm8 = vcmp.ge.s32.totalorder %v10864_v39, %v11780_v32  ;;  %v1876_v56 = vmax.f32 %v1801_v54, 0.0  ;;  %vm3087_vm9 = vcmp.le.s32.totalorder %v10849_v47, %v11909_v58  ;;  %v2986_v30 = vld [vmem:[#allocation3 + $0x11] sm:$0x1]  ;;  %v9510_v32 = vld [vmem:[%s13747_s6 + $0x564] ss:$8 sps:$4 sm:$0xff]  }
 0x25e   : > { %6984 = vmatprep.subr.bf16.mxu1 %v9492_v21  ;;  %v2965_v6 = vrot.slane %v2964_v60, 1  ;;  %v11951_v1 = vrot.slane %v4098_v16, %v10944_v23  ;;  %v2976_v27 = vrot.slane %v2975_v61, 2  ;;  %v3025_v63 = vsel %vm11882_vm3, %v11926_v45, 4286644096  ;;  %v9073_v38 = vpop.f32.mrf.mxu1  ;;  %vm11993_vm12 = vmand %vm3083_vm7, %vm3087_vm9  ;;  %s3257_s25 = sadd.s32 1, %s11846_s19 }
 0x25f   : > { %v2953_v62 = vmax.f32 %v2951_v22, %v2952_v44  ;;  %6944 = vmatpush2.bf16.msra.mxu0 %v9487_v35  ;;  %v8081_v15 = vcombine.low %v3023_v10, %v3024_v4  ;;  %v1900_v18 = vadd.f32 %v1899_v49, %v1876_v56  ;;  %v1806_v36 = vadd.f32 %v11592_v12, %v1805_v19  ;;  %v9502_v49 = vld [vmem:[%s13747_s6 + $0x570] ss:$8 sps:$4 sm:$0xff]   ;;  %vm12025_vm14 = vmpackc.low %vm11993_vm12, %vm11993_vm12 }
 0x260   : > { %6945 = vmatprep.subr.bf16.mxu0 %v9495_v9  ;;  %v2966_v31 = vmax.f32 %v2964_v60, %v2965_v6  ;;  %v2977_v29 = vmax.f32 %v2975_v61, %v2976_v27  ;;  %v3026_v20 = vsel %vm11905_vm1, %v11943_v25, 4286644096  ;;  %vm3088_vm11 = vcmp.le.s32.totalorder %v10864_v39, %v11909_v58  ;;  %v1808_v42 = vpop.f32.mrf.mxu1 }
 0x261   : > { %v2954_v14 = vpack.i.bf16 %v2953_v62, %v2953_v62  ;;  %6985 = vmatpush2.bf16.msra.mxu1 %v9490_v59  ;;  %v11974_v28 = vstv %s8091_s15  ;;  %v1877_v35 = vmax.f32 %v1806_v36, 0.0  ;;  %v3027_v26 = vsel %vm11882_vm3, %v11946_v40, 4286644096  ;;  %vm12008_vm13 = vmand %vm3084_vm8, %vm3088_vm11  ;;  %s12031_s15 = sld [smem:[#allocation5 + %s8689_s20]]  ;;  %v9505_v62 = vld [vmem:[%s13747_s6 + $0x460] ss:$8 sps:$4 sm:$0xff]  }
 0x262   : > { %6986 = vmatprep.subr.bf16.mxu1 %v9498_v53  ;;  %v2967_v43 = vpack.i.bf16 %v2966_v31, %v2966_v31  ;;  %v3028_v37 = vsel %vm11905_vm1, %v11954_v17, 4286644096  ;;  %v4130_v21 = vcombine.high %v11951_v1, %v11951_v1  ;;  %v2978_v22 = vrot.slane %v2977_v29, 1  ;;  %v9074_v54 = vpop.f32.mrf.mxu1  ;;  %vm12044_vm15 = vmpackc.low %vm12008_vm13, %vm12008_vm13  ;;  %s12340_s20 = sld [smem:[#allocation5 + %s8692_s21]] }
 0x263   : > { %6946 = vmatpush2.bf16.msra.mxu0 %v9493_v24  ;;  %v8082_v59 = vcombine.low %v3025_v63, %v3026_v20  ;;  %v8083_v16 = vcombine.low %v3027_v26, %v3028_v37  ;;  %v1901_v2 = vadd.f32 %v1900_v18, %v1877_v35  ;;  %v1809_v13 = vadd.f32 %v11592_v12, %v1808_v42 }
 0x264   : > { %6997 = vmatprep.subr.bf16.mxu0 %v9501_v3  ;;  %v2985_v41 = vmax.bf16 %v2967_v43, %v2954_v14  ;;  %v3045_v10 = vsel %vm2179_vm10, %v8081_v15, 4286644096  ;;  %v2979_v44 = vmax.f32 %v2977_v29, %v2978_v22  ;;  %v12034_v56 = vstv %s11846_s19  ;;  %v1813_v6 = vpop.f32.mrf.mxu1  ;;  %v2994_v14 = vld [vmem:[#allocation3 + $0x13] sm:$0x1] }
 0x265   : > { %6987 = vmatpush2.bf16.msra.mxu1 %v9496_v5  ;;  %v3047_v60 = vunpack.i.l.bf16 %v3045_v10  ;;  %v3048_v24 = vunpack.i.h.bf16 %v3045_v10  ;;  %v3058_v58 = vsel %vm2179_vm10, %v8082_v59, 4286644096  ;;  %v1878_v53 = vmax.f32 %v1809_v13, 0.0  ;;  %v9508_v5 = vld [vmem:[%s13747_s6 + $0x560] ss:$8 sps:$4 sm:$0xff]  }
 0x266   : > { %6948 = vmatmul.mubr.bf16.vlgmr.msra.gmra.mxu0 %v11832_v55  ;;  %7038 = vmatprep.subr.bf16.mxu1 %v9504_v33  ;;  %v2987_v52 = vsel %vm11096_vm6, %v2985_v41, %v2986_v30  ;;  %v3060_v61 = vunpack.i.l.bf16 %v3058_v58  ;;  %v2980_v19 = vpack.i.bf16 %v2979_v44, %v2979_v44  ;;  %v3061_v63 = vunpack.i.h.bf16 %v3058_v58  ;;  %v9516_v55 = vld [vmem:[%s13747_s6 + $0x554] ss:$8 sps:$4 sm:$0xff]  }
 0x267   : > { %6998 = vmatpush1.bf16.msra.mxu0 %v9499_v46  ;;  %7029 = vmatprep.mubr.bf16.mxu0 %v11951_v1  ;;  %2988 = vst [vmem:[#allocation3 + $0x11] sm:$0x1] %v2987_v52  ;;  %v3049_v27 = vmax.f32 %v3047_v60, %v3048_v24  ;;  %v3071_v15 = vsel %vm2179_vm10, %v8083_v16, 4286644096  ;;  %v9513_v1 = vld [vmem:[%s13747_s6 + $0x454] ss:$8 sps:$4 sm:$0xff]   ;;  %v1902_v18 = vadd.f32 %v1901_v2, %v1878_v53 }
 0x268   : > { %6989 = vmatmul.mubr.bf16.vlgmr.msra.gmra.mxu1 %v4080_v50  ;;  %6999 = vmatprep.subr.bf16.mxu0 %v9507_v34  ;;  %v1814_v36 = vadd.f32 %v11592_v12, %v1813_v6  ;;  %v3073_v31 = vunpack.i.l.bf16 %v3071_v15  ;;  %v9077_v50 = vpop.f32.mrf.mxu1  ;;  %v2993_v33 = vmax.bf16 %v2980_v19, %v2967_v43  ;;  %v3062_v29 = vmax.f32 %v3060_v61, %v3061_v63  ;;  %v9511_v43 = vld [vmem:[%s13747_s6 + $0x450] ss:$8 sps:$4 sm:$0xff]   ;;  %s8088_s0 = sadd.s32 4294967295, %s12031_s15  ;;  %v9517_v60 = vld [vmem:[%s13747_s6 + $0x440] ss:$8 sps:$4 sm:$0xff]  }
 0x269   : > { %7039 = vmatpush1.bf16.msra.mxu1 %v9502_v49  ;;  %7070 = vmatprep.mubr.bf16.mxu1 %v4130_v21  ;;  %v3050_v38 = vrot.slane %v3049_v27, 4  ;;  %v3074_v20 = vunpack.i.h.bf16 %v3071_v15  ;;  %vm3186_vm2 = vcmp.ge.s32.totalorder %v10849_v47, %v11974_v28  ;;  %vm3189_vm4 = vcmp.le.s32.totalorder %v10849_v47, %v12034_v56  ;;  %v9514_v34 = vld [vmem:[%s13747_s6 + $0x550] ss:$8 sps:$4 sm:$0xff]   ;;  %v9525_v52 = vld [vmem:[%s13747_s6 + $0x434] ss:$8 sps:$4 sm:$0xff]   ;;  %s12115_s16 = sshll.u32 %s8088_s0, 3 }
 0x26a   : > { %7040 = vmatprep.subr.bf16.mxu1 %v9510_v32  ;;  %v1879_v35 = vmax.f32 %v1814_v36, 0.0  ;;  %v3093_v26 = vsel %vm12025_vm14, %v11877_v0, 4286644096  ;;  %v3094_v37 = vsel %vm12044_vm15, %v11900_v57, 4286644096  ;;  %vm3187_vm5 = vcmp.ge.s32.totalorder %v10864_v39, %v11974_v28  ;;  %v1816_v46 = vpop.f32.mrf.mxu1  ;;  %vm12134_vm1 = vmand %vm3186_vm2, %vm3189_vm4  ;;  %s12165_s13 = scalar_lea.vmem [#allocation2], %s12115_s16 }
 0x26b   : > { %vm3190_vm3 = vcmp.le.s32.totalorder %v10864_v39, %v12034_v56  ;;  %7000 = vmatpush1.bf16.msra.mxu0 %v9505_v62  ;;  %v2995_v21 = vsel %vm11096_vm6, %v2993_v33, %v2994_v14  ;;  %v3051_v0 = vmax.f32 %v3049_v27, %v3050_v38  ;;  %v3063_v42 = vrot.slane %v3062_v29, 4  ;;  %v9519_v57 = vld [vmem:[%s13747_s6 + $0x444] ss:$8 sps:$4 sm:$0xff]   ;;  %v9520_v6 = vld [vmem:[%s13747_s6 + $0x540] ss:$8 sps:$4 sm:$0xff]   ;;  %vm12173_vm8 = vmpackc.low %vm12134_vm1, %vm12134_vm1  ;;  %s8099_s0 = sadd.s32 4294967295, %s12340_s20 }
 0x26c   : > { %v3075_v22 = vmax.f32 %v3073_v31, %v3074_v20  ;;  %7001 = vmatprep.subr.bf16.mxu0 %v9513_v1  ;;  %v1903_v30 = vadd.f32 %v1902_v18, %v1879_v35  ;;  %v1817_v59 = vadd.f32 %v11592_v12, %v1816_v46  ;;  %2996 = vst [vmem:[#allocation3 + $0x13] sm:$0x1] %v2995_v21  ;;  %v3095_v16 = vsel %vm12025_vm14, %v11926_v45, 4286644096  ;;  %v9078_v2 = vpop.f32.mrf.mxu1  ;;  %v9522_v45 = vld [vmem:[%s13747_s6 + $0x544] ss:$8 sps:$4 sm:$0xff]   ;;  %vm12150_vm7 = vmand %vm3187_vm5, %vm3190_vm3 }
 0x26d   : > { %v3096_v11 = vsel %vm12044_vm15, %v11943_v25, 4286644096  ;;  %7041 = vmatpush1.bf16.msra.mxu1 %v9508_v5  ;;  %v3052_v13 = vrot.slane %v3051_v0, 2  ;;  %v3064_v41 = vmax.f32 %v3062_v29, %v3063_v42  ;;  %v3097_v9 = vsel %vm12025_vm14, %v11946_v40, 4286644096  ;;  %vm12184_vm9 = vmpackc.low %vm12150_vm7, %vm12150_vm7  ;;  %s12408_s15 = sshll.u32 %s8099_s0, 3 }
 0x26e   : > { %v3076_v10 = vrot.slane %v3075_v22, 4  ;;  %7042 = vmatprep.subr.bf16.mxu1 %v9516_v55  ;;  %v1880_v49 = vmax.f32 %v1817_v59, 0.0  ;;  %v3098_v25 = vsel %vm12044_vm15, %v11954_v17, 4286644096  ;;  %v8084_v54 = vcombine.low %v3093_v26, %v3094_v37  ;;  %v1821_v24 = vpop.f32.mrf.mxu1  ;;  %v9528_v1 = vld [vmem:[%s13747_s6 + $0x534] ss:$8 sps:$4 sm:$0xff]  }
 0x26f   : > { %v8085_v44 = vcombine.low %v3095_v16, %v3096_v11  ;;  %7002 = vmatpush1.bf16.msra.mxu0 %v9511_v43  ;;  %v3053_v40 = vmax.f32 %v3051_v0, %v3052_v13  ;;  %v3065_v58 = vrot.slane %v3064_v41, 2  ;;  %v8086_v53 = vcombine.low %v3097_v9, %v3098_v25  ;;  %v9523_v5 = vld [vmem:[%s13747_s6 + $0x430] ss:$8 sps:$4 sm:$0xff]   ;;  %v9531_v20 = vld [vmem:[%s13747_s6 + $0x424] ss:$8 sps:$4 sm:$0xff]   ;;  %s12480_s27 = scalar_lea.vmem [#allocation2], %s12408_s15 }
 0x270   : > { %v3077_v32 = vmax.f32 %v3075_v22, %v3076_v10  ;;  %7003 = vmatprep.subr.bf16.mxu0 %v9519_v57  ;;  %v1904_v61 = vadd.f32 %v1903_v30, %v1880_v49  ;;  %v1822_v17 = vadd.f32 %v11592_v12, %v1821_v24  ;;  %v3115_v4 = vsel %vm2179_vm10, %v8084_v54, 4286644096  ;;  %v9081_v19 = vpop.f32.mrf.mxu1  ;;  %v9526_v21 = vld [vmem:[%s13747_s6 + $0x530] ss:$8 sps:$4 sm:$0xff]   ;;  %v9529_v0 = vld [vmem:[%s13747_s6 + $0x420] ss:$8 sps:$4 sm:$0xff]  }
 0x271   : > { %v3128_v62 = vsel %vm2179_vm10, %v8085_v44, 4286644096  ;;  %7043 = vmatpush1.bf16.msra.mxu1 %v9514_v34  ;;  %v3054_v27 = vrot.slane %v3053_v40, 1  ;;  %v3066_v63 = vmax.f32 %v3064_v41, %v3065_v58  ;;  %v3117_v3 = vunpack.i.l.bf16 %v3115_v4  ;;  %v9534_v11 = vld [vmem:[%s13747_s6 + $0x524] ss:$8 sps:$4 sm:$0xff]  }
 0x272   : > { %v3078_v15 = vrot.slane %v3077_v32, 2  ;;  %7044 = vmatprep.subr.bf16.mxu1 %v9522_v45  ;;  %v1881_v18 = vmax.f32 %v1822_v17, 0.0  ;;  %v3118_v36 = vunpack.i.h.bf16 %v3115_v4  ;;  %v3130_v14 = vunpack.i.l.bf16 %v3128_v62  ;;  %v1824_v55 = vpop.f32.mrf.mxu1  ;;  %v9532_v10 = vld [vmem:[%s13747_s6 + $0x520] ss:$8 sps:$4 sm:$0xff]   ;;  %v9537_v28 = vld [vmem:[%s13747_s6 + $0x414] ss:$8 sps:$4 sm:$0xff]  }
 0x273   : > { %v3131_v31 = vunpack.i.h.bf16 %v3128_v62  ;;  %7004 = vmatpush1.bf16.msra.mxu0 %v9517_v60  ;;  %v3055_v50 = vmax.f32 %v3053_v40, %v3054_v27  ;;  %v3067_v33 = vrot.slane %v3066_v63, 1  ;;  %v3141_v29 = vsel %vm2179_vm10, %v8086_v53, 4286644096  ;;  %v12168_v25 = vld [vmem:[%s12165_s13] sm:$0xf] }
 0x274   : > { %v3079_v38 = vmax.f32 %v3077_v32, %v3078_v15  ;;  %7005 = vmatprep.subr.bf16.mxu0 %v9525_v52  ;;  %v1905_v35 = vadd.f32 %v1904_v61, %v1881_v18  ;;  %v1825_v26 = vadd.f32 %v11592_v12, %v1824_v55  ;;  %v3119_v37 = vmax.f32 %v3117_v3, %v3118_v36  ;;  %v9082_v42 = vpop.f32.mrf.mxu1  ;;  %v3154_v58 = vld [vmem:[#allocation3 + $0x14] sm:$0x1]  ;;  %v9540_v52 = vld [vmem:[%s13747_s6 + $0x514] ss:$8 sps:$4 sm:$0xff]   ;;  %v12197_v19 = vld [vmem:[%s12165_s13 + $0x8] sm:$0xf] }
 0x275   : > { %v3132_v43 = vmax.f32 %v3130_v14, %v3131_v31  ;;  %7045 = vmatpush1.bf16.msra.mxu1 %v9520_v6  ;;  %v3056_v22 = vpack.i.bf16 %v3055_v50, %v3055_v50  ;;  %v3068_v57 = vmax.f32 %v3066_v63, %v3067_v33  ;;  %v3143_v59 = vunpack.i.l.bf16 %v3141_v29  ;;  %v12179_v32 = vld [vmem:[%s12165_s13 + $0x4] sm:$0x7]  ;;  %v9538_v50 = vld [vmem:[%s13747_s6 + $0x510] ss:$8 sps:$4 sm:$0xff]   ;;  %v12234_v42 = vld [vmem:[%s12165_s13 + $0x14] sm:$0x7] }
 0x276   : > { %v3080_v30 = vrot.slane %v3079_v38, 1  ;;  %7046 = vmatprep.subr.bf16.mxu1 %v9528_v1  ;;  %v1882_v34 = vmax.f32 %v1825_v26, 0.0  ;;  %v3120_v2 = vrot.slane %v3119_v37, 4  ;;  %v3144_v41 = vunpack.i.h.bf16 %v3141_v29  ;;  %v1829_v9 = vpop.f32.mrf.mxu1  ;;  %v3162_v6 = vld [vmem:[#allocation3 + $0x16] sm:$0x1] }
 0x277   : > { %v3133_v13 = vrot.slane %v3132_v43, 4  ;;  %7006 = vmatpush1.bf16.msra.mxu0 %v9523_v5  ;;  %v3069_v45 = vpack.i.bf16 %v3068_v57, %v3068_v57  ;;  %v1830_v60 = vadd.f32 %v11592_v12, %v1829_v9  ;;  %vm3255_vm11 = vcmp.ge.s32.totalorder %v10849_v47, %v12034_v56  ;;  %v9535_v12 = vld [vmem:[%s13747_s6 + $0x410] ss:$8 sps:$4 sm:$0xff]   ;;  %v12207_v5 = vld [vmem:[%s12165_s13 + $0xc] sm:$0x7] }
 0x278   : > { %v3081_v49 = vmax.f32 %v3079_v38, %v3080_v30  ;;  %7007 = vmatprep.subr.bf16.mxu0 %v9531_v20  ;;  %v1906_v44 = vadd.f32 %v1905_v35, %v1882_v34  ;;  %v3121_v24 = vmax.f32 %v3119_v37, %v3120_v2  ;;  %v9085_v61 = vpop.f32.mrf.mxu1  ;;  %v3145_v4 = vmax.f32 %v3143_v59, %v3144_v41  ;;  %v9543_v33 = vld [vmem:[%s13747_s6 + $0x404] ss:$8 sps:$4 sm:$0xff]   ;;  %v12222_v29 = vld [vmem:[%s13746_s5] ss:$0 sm:$0xff]  ;;  %v12226_v37 = vld [vmem:[%s12165_s13 + $0x10] sm:$0xf] }
 0x279   : > { %v3134_v40 = vmax.f32 %v3132_v43, %v3133_v13  ;;  %7047 = vmatpush1.bf16.msra.mxu1 %v9526_v21  ;;  %v3153_v62 = vmax.bf16 %v3069_v45, %v3056_v22  ;;  %v12199_v27 = vstv %s3257_s25  ;;  %v1883_v63 = vmax.f32 %v1830_v60, 0.0  ;;  %v9546_v43 = vld [vmem:[%s13747_s6 + $0x504] ss:$8 sps:$4 sm:$0xff]   ;;  %v9544_v54 = vld [vmem:[%s13747_s6 + $0x500] ss:$8 sps:$4 sm:$0xff]  }
 0x27a   : > { %v3082_v17 = vpack.i.bf16 %v3081_v49, %v3081_v49  ;;  %7048 = vmatprep.subr.bf16.mxu1 %v9534_v11  ;;  %v3122_v15 = vrot.slane %v3121_v24, 2  ;;  %v3195_v1 = vsel %vm12173_vm8, %v12168_v25, 4286644096  ;;  %v1832_v18 = vpop.f32.mrf.mxu1  ;;  %v3146_v36 = vrot.slane %v3145_v4, 4  ;;  %v9541_v11 = vld [vmem:[%s13747_s6 + $0x400] ss:$8 sps:$4 sm:$0xff]  }
 0x27b   : > { %v3135_v3 = vrot.slane %v3134_v40, 2  ;;  %7008 = vmatpush1.bf16.msra.mxu0 %v9529_v0  ;;  %v3155_v14 = vsel %vm11096_vm6, %v3153_v62, %v3154_v58  ;;  %v3196_v55 = vsel %vm12184_vm9, %v12179_v32, 4286644096  ;;  %v1907_v38 = vadd.f32 %v1906_v44, %v1883_v63  ;;  %v9552_v58 = vld [vmem:[%s13747_s6 + $0x5f4] ss:$8 sps:$4 sm:$0xff]  }
 0x27c   : > { %v3161_v31 = vmax.bf16 %v3082_v17, %v3069_v45  ;;  %7009 = vmatprep.subr.bf16.mxu0 %v9537_v28  ;;  %v1833_v20 = vadd.f32 %v12222_v29, %v1832_v18  ;;  %v3123_v35 = vmax.f32 %v3121_v24, %v3122_v15  ;;  %3156 = vst [vmem:[#allocation3 + $0x14] sm:$0x1] %v3155_v14  ;;  %v9086_v46 = vpop.f32.mrf.mxu1  ;;  %v3197_v22 = vsel %vm12173_vm8, %v12197_v19, 4286644096  ;;  %v9547_v53 = vld [vmem:[%s13747_s6 + $0x4f0] ss:$8 sps:$4 sm:$0xff]  }
 0x27d   : > { %v3136_v26 = vmax.f32 %v3134_v40, %v3135_v3  ;;  %7049 = vmatpush1.bf16.msra.mxu1 %v9532_v10  ;;  %v3147_v21 = vmax.f32 %v3145_v4, %v3146_v36  ;;  %vm3256_vm12 = vcmp.ge.s32.totalorder %v10864_v39, %v12034_v56  ;;  %v3198_v16 = vsel %vm12184_vm9, %v12207_v5, 4286644096  ;;  %v9549_v10 = vld [vmem:[%s13747_s6 + $0x4f4] ss:$8 sps:$4 sm:$0xff]   ;;  %v3158_v62 = vld [vmem:[#allocation3 + $0x15] sm:$0x1] }
 0x27e   : > { %v3163_v0 = vsel %vm11096_vm6, %v3161_v31, %v3162_v6  ;;  %7050 = vmatprep.subr.bf16.mxu1 %v9540_v52  ;;  %v1884_v57 = vmax.f32 %v1833_v20, 0.0  ;;  %v3124_v30 = vrot.slane %v3123_v35, 1  ;;  %v1837_v34 = vpop.f32.mrf.mxu1  ;;  %v3199_v13 = vsel %vm12173_vm8, %v12226_v37, 4286644096  ;;  %v9555_v15 = vld [vmem:[%s13747_s6 + $0x4e4] ss:$8 sps:$4 sm:$0xff]  }
 0x27f   : > { %v3137_v59 = vrot.slane %v3136_v26, 1  ;;  %3164 = vst [vmem:[#allocation3 + $0x16] sm:$0x1] %v3163_v0  ;;  %7010 = vmatpush1.bf16.msra.mxu0 %v9535_v12  ;;  %v3148_v2 = vrot.slane %v3147_v21, 2  ;;  %v8092_v41 = vcombine.low %v3195_v1, %v3196_v55  ;;  %vm3259_vm13 = vcmp.le.s32.totalorder %v10849_v47, %v12199_v27  ;;  %v9550_v31 = vld [vmem:[%s13747_s6 + $0x5f0] ss:$8 sps:$4 sm:$0xff]  }
 0x280   : > { %7011 = vmatprep.subr.bf16.mxu0 %v9543_v33  ;;  %v1908_v28 = vadd.f32 %v1907_v38, %v1884_v57  ;;  %v1838_v9 = vadd.f32 %v12222_v29, %v1837_v34  ;;  %v3125_v45 = vmax.f32 %v3123_v35, %v3124_v30  ;;  %v9089_v44 = vpop.f32.mrf.mxu1  ;;  %v3200_v24 = vsel %vm12184_vm9, %v12234_v42, 4286644096  ;;  %vm12280_vm15 = vmand %vm3255_vm11, %vm3259_vm13  ;;  %v9558_v56 = vld [vmem:[%s13747_s6 + $0x5e4] ss:$8 sps:$4 sm:$0xff]  }
 0x281   : > { %v3138_v49 = vmax.f32 %v3136_v26, %v3137_v59  ;;  %7051 = vmatpush1.bf16.msra.mxu1 %v9538_v50  ;;  %v3149_v60 = vmax.f32 %v3147_v21, %v3148_v2  ;;  %v8093_v40 = vcombine.low %v3197_v22, %v3198_v16  ;;  %vm3260_vm14 = vcmp.le.s32.totalorder %v10864_v39, %v12199_v27  ;;  %vm12311_vm4 = vmpackc.low %vm12280_vm15, %vm12280_vm15  ;;  %v9553_v21 = vld [vmem:[%s13747_s6 + $0x4e0] ss:$8 sps:$4 sm:$0xff]   ;;  %v9570_v14 = vld [vmem:[%s13747_s6 + $0x5c4] ss:$8 sps:$4 sm:$0xff]  }
 0x282   : > { %7052 = vmatprep.subr.bf16.mxu1 %v9546_v43  ;;  %v1885_v12 = vmax.f32 %v1838_v9, 0.0  ;;  %v3126_v52 = vpack.i.bf16 %v3125_v45, %v3125_v45  ;;  %v1840_v17 = vpop.f32.mrf.mxu1  ;;  %v8094_v6 = vcombine.low %v3199_v13, %v3200_v24  ;;  %v3217_v36 = vsel %vm2179_vm10, %v8092_v41, 4286644096  ;;  %vm12295_vm2 = vmand %vm3256_vm12, %vm3260_vm14  ;;  %v9556_v16 = vld [vmem:[%s13747_s6 + $0x5e0] ss:$8 sps:$4 sm:$0xff]  }
 0x283   : > { %v3139_v61 = vpack.i.bf16 %v3138_v49, %v3138_v49  ;;  %7012 = vmatpush1.bf16.msra.mxu0 %v9541_v11  ;;  %v3150_v4 = vrot.slane %v3149_v60, 1  ;;  %v1841_v1 = vadd.f32 %v12222_v29, %v1840_v17  ;;  %v3219_v33 = vunpack.i.l.bf16 %v3217_v36  ;;  %vm12322_vm5 = vmpackc.low %vm12295_vm2, %vm12295_vm2  ;;  %v9561_v11 = vld [vmem:[%s13747_s6 + $0x4d4] ss:$8 sps:$4 sm:$0xff]   ;;  %v3166_v13 = vld [vmem:[#allocation3 + $0x17] sm:$0x1] }
 0x284   : > { %7013 = vmatprep.subr.bf16.mxu0 %v9549_v10  ;;  %v1909_v3 = vadd.f32 %v1908_v28, %v1885_v12  ;;  %v9090_v55 = vpop.f32.mrf.mxu1  ;;  %v3220_v38 = vunpack.i.h.bf16 %v3217_v36  ;;  %v3230_v20 = vsel %vm2179_vm10, %v8093_v40, 4286644096  ;;  %v3243_v30 = vsel %vm2179_vm10, %v8094_v6, 4286644096  ;;  %v9564_v28 = vld [vmem:[%s13747_s6 + $0x5d4] ss:$8 sps:$4 sm:$0xff]  }
 0x285   : > { %v3157_v18 = vmax.bf16 %v3139_v61, %v3126_v52  ;;  %7053 = vmatpush1.bf16.msra.mxu1 %v9544_v54  ;;  %v3151_v50 = vmax.f32 %v3149_v60, %v3150_v4  ;;  %v1886_v27 = vmax.f32 %v1841_v1, 0.0  ;;  %v3232_v26 = vunpack.i.l.bf16 %v3230_v20  ;;  %v9559_v12 = vld [vmem:[%s13747_s6 + $0x4d0] ss:$8 sps:$4 sm:$0xff]  }
 0x286   : > { %7054 = vmatprep.subr.bf16.mxu1 %v9552_v58  ;;  %v3233_v43 = vunpack.i.h.bf16 %v3230_v20  ;;  %v1845_v0 = vpop.f32.mrf.mxu1  ;;  %v3221_v57 = vmax.f32 %v3219_v33, %v3220_v38  ;;  %v3245_v10 = vunpack.i.l.bf16 %v3243_v30  ;;  %v4083_v9 = vcombine.high %v11824_v51, %v11824_v51  ;;  %v9565_v33 = vld [vmem:[%s13747_s6 + $0x4c0] ss:$8 sps:$4 sm:$0xff]  }
 0x287   : > { %v3159_v35 = vsel %vm11096_vm6, %v3157_v18, %v3158_v62  ;;  %7014 = vmatpush2.bf16.msra.mxu0 %v9547_v53  ;;  %v3152_v22 = vpack.i.bf16 %v3151_v50, %v3151_v50  ;;  %v1910_v34 = vadd.f32 %v1909_v3, %v1886_v27  ;;  %v1846_v2 = vadd.f32 %v12222_v29, %v1845_v0 }
 0x288   : > { %3160 = vst [vmem:[#allocation3 + $0x15] sm:$0x1] %v3159_v35  ;;  %7015 = vmatprep.subr.bf16.mxu0 %v9555_v15  ;;  %v3234_v41 = vmax.f32 %v3232_v26, %v3233_v43  ;;  %v9093_v45 = vpop.f32.mrf.mxu1  ;;  %v3222_v54 = vrot.slane %v3221_v57, 4  ;;  %v3246_v44 = vunpack.i.h.bf16 %v3243_v30  ;;  %v3265_v40 = vsel %vm12311_vm4, %v12168_v25, 4286644096 }
 0x289   : > { %7055 = vmatpush2.bf16.msra.mxu1 %v9550_v31  ;;  %v3165_v49 = vmax.bf16 %v3152_v22, %v3139_v61  ;;  %v1887_v60 = vmax.f32 %v1846_v2, 0.0  ;;  %v3266_v58 = vsel %vm12322_vm5, %v12179_v32, 4286644096  ;;  %v3267_v4 = vsel %vm12311_vm4, %v12197_v19, 4286644096 }
 0x28a   : > { %7056 = vmatprep.subr.bf16.mxu1 %v9558_v56  ;;  %v3235_v24 = vrot.slane %v3234_v41, 4  ;;  %v1848_v52 = vpop.f32.mrf.mxu1  ;;  %v3223_v53 = vmax.f32 %v3221_v57, %v3222_v54  ;;  %v3247_v17 = vmax.f32 %v3245_v10, %v3246_v44  ;;  %v9567_v25 = vld [vmem:[%s13747_s6 + $0x4c4] ss:$8 sps:$4 sm:$0xff]   ;;  %v3268_v63 = vsel %vm12322_vm5, %v12207_v5, 4286644096 }
 0x28b   : > { %7016 = vmatpush2.bf16.msra.mxu0 %v9553_v21  ;;  %v3167_v61 = vsel %vm11096_vm6, %v3165_v49, %v3166_v13  ;;  %v1911_v32 = vadd.f32 %v1910_v34, %v1887_v60  ;;  %v1849_v62 = vadd.f32 %v12222_v29, %v1848_v52  ;;  %v9562_v19 = vld [vmem:[%s13747_s6 + $0x5d0] ss:$8 sps:$4 sm:$0xff]   ;;  %v8095_v18 = vcombine.low %v3265_v40, %v3266_v58  ;;  %v9568_v26 = vld [vmem:[%s13747_s6 + $0x5c0] ss:$8 sps:$4 sm:$0xff]   ;;  %v9573_v43 = vld [vmem:[%s13747_s6 + $0x4b4] ss:$8 sps:$4 sm:$0xff]  }
 0x28c   : > { %7017 = vmatprep.subr.bf16.mxu0 %v9561_v11  ;;  %3168 = vst [vmem:[#allocation3 + $0x17] sm:$0x1] %v3167_v61  ;;  %v3236_v6 = vmax.f32 %v3234_v41, %v3235_v24  ;;  %v9094_v15 = vpop.f32.mrf.mxu1  ;;  %v3224_v3 = vrot.slane %v3223_v53, 2  ;;  %v3248_v1 = vrot.slane %v3247_v17, 4  ;;  %v12367_v36 = vstv %s8102_s12  ;;  %v9576_v34 = vld [vmem:[%s13747_s6 + $0x5b4] ss:$8 sps:$4 sm:$0xff]  }
 0x28d   : > { %7057 = vmatpush2.bf16.msra.mxu1 %v9556_v16  ;;  %v1888_v31 = vmax.f32 %v1849_v62, 0.0  ;;  %v8096_v50 = vcombine.low %v3267_v4, %v3268_v63  ;;  %v12373_v5 = vstv %s12266_s28  ;;  %v3269_v27 = vsel %vm12311_vm4, %v12226_v37, 4286644096  ;;  %v9579_v49 = vld [vmem:[%s13747_s6 + $0x4a4] ss:$8 sps:$4 sm:$0xff]  }
 0x28e   : > { %7058 = vmatprep.subr.bf16.mxu1 %v9564_v28  ;;  %v3237_v55 = vrot.slane %v3236_v6, 2  ;;  %v1853_v38 = vpop.f32.mrf.mxu1  ;;  %v3225_v20 = vmax.f32 %v3223_v53, %v3224_v3  ;;  %v3249_v56 = vmax.f32 %v3247_v17, %v3248_v1  ;;  %v3287_v35 = vsel %vm2179_vm10, %v8095_v18, 4286644096  ;;  %v9574_v24 = vld [vmem:[%s13747_s6 + $0x5b0] ss:$8 sps:$4 sm:$0xff]  }
 0x28f   : > { %7018 = vmatpush2.bf16.msra.mxu0 %v9559_v12  ;;  %v1912_v21 = vadd.f32 %v1911_v32, %v1888_v31  ;;  %v1854_v0 = vadd.f32 %v12222_v29, %v1853_v38  ;;  %v3289_v57 = vunpack.i.l.bf16 %v3287_v35  ;;  %v3270_v16 = vsel %vm12322_vm5, %v12234_v42, 4286644096  ;;  %v9571_v42 = vld [vmem:[%s13747_s6 + $0x4b0] ss:$8 sps:$4 sm:$0xff]   ;;  %v9582_v61 = vld [vmem:[%s13747_s6 + $0x5a4] ss:$8 sps:$4 sm:$0xff]  }
 0x290   : > { %7019 = vmatprep.subr.bf16.mxu0 %v9567_v25  ;;  %v3238_v22 = vmax.f32 %v3236_v6, %v3237_v55  ;;  %v9097_v46 = vpop.f32.mrf.mxu1  ;;  %v3226_v30 = vrot.slane %v3225_v20, 1  ;;  %v3250_v37 = vrot.slane %v3249_v56, 2  ;;  %v3290_v11 = vunpack.i.h.bf16 %v3287_v35  ;;  %v9577_v32 = vld [vmem:[%s13747_s6 + $0x4a0] ss:$8 sps:$4 sm:$0xff]   ;;  %v9585_v3 = vld [vmem:[%s13747_s6 + $0x494] ss:$8 sps:$4 sm:$0xff]  }
 0x291   : > { %7059 = vmatpush2.bf16.msra.mxu1 %v9562_v19  ;;  %v1889_v2 = vmax.f32 %v1854_v0, 0.0  ;;  %vm3358_vm3 = vcmp.ge.s32.totalorder %v10849_v47, %v12367_v36  ;;  %vm3359_vm1 = vcmp.ge.s32.totalorder %v10864_v39, %v12367_v36  ;;  %v3300_v45 = vsel %vm2179_vm10, %v8096_v50, 4286644096  ;;  %v9583_v55 = vld [vmem:[%s13747_s6 + $0x490] ss:$8 sps:$4 sm:$0xff]  }
 0x292   : > { %7060 = vmatprep.subr.bf16.mxu1 %v9570_v14  ;;  %v3239_v13 = vrot.slane %v3238_v22, 1  ;;  %v1856_v59 = vpop.f32.mrf.mxu1  ;;  %v3227_v41 = vmax.f32 %v3225_v20, %v3226_v30  ;;  %v3251_v10 = vmax.f32 %v3249_v56, %v3250_v37  ;;  %v3291_v28 = vmax.f32 %v3289_v57, %v3290_v11  ;;  %v3326_v35 = vld [vmem:[#allocation3 + $0x18] sm:$0x1]  ;;  %v12483_v30 = vld [vmem:[%s12480_s27] sm:$0xf] }
 0x293   : > { %7020 = vmatpush2.bf16.msra.mxu0 %v9565_v33  ;;  %v1913_v54 = vadd.f32 %v1912_v21, %v1889_v2  ;;  %v1857_v44 = vadd.f32 %v12222_v29, %v1856_v59  ;;  %v8097_v60 = vcombine.low %v3269_v27, %v3270_v16  ;;  %vm3361_vm7 = vcmp.le.s32.totalorder %v10849_v47, %v12373_v5  ;;  %v12486_v37 = vld [vmem:[%s12480_s27 + $0x4] sm:$0x7]  ;;  %v9589_v59 = vld [vmem:[%s13747_s6 + $0x480] ss:$8 sps:$4 sm:$0xff]  }
 0x294   : > { %7021 = vmatprep.subr.bf16.mxu0 %v9573_v43  ;;  %v9098_v40 = vpop.f32.mrf.mxu1  ;;  %v3240_v58 = vmax.f32 %v3238_v22, %v3239_v13  ;;  %v3252_v12 = vrot.slane %v3251_v10, 1  ;;  %v3292_v52 = vrot.slane %v3291_v28, 4  ;;  %vm3362_vm8 = vcmp.le.s32.totalorder %v10864_v39, %v12373_v5  ;;  %vm12435_vm9 = vmand %vm3358_vm3, %vm3361_vm7  ;;  %v9591_v11 = vld [vmem:[%s13747_s6 + $0x484] ss:$8 sps:$4 sm:$0xff]  }
 0x295   : > { %7061 = vmatpush2.bf16.msra.mxu1 %v9568_v26  ;;  %v12424_v53 = vrot.slane %v4083_v9, %v10944_v23  ;;  %v1890_v17 = vmax.f32 %v1857_v44, 0.0  ;;  %v3228_v4 = vpack.i.bf16 %v3227_v41, %v3227_v41  ;;  %v3302_v25 = vunpack.i.l.bf16 %v3300_v45  ;;  %v9580_v9 = vld [vmem:[%s13747_s6 + $0x5a0] ss:$8 sps:$4 sm:$0xff]   ;;  %vm12453_vm11 = vmand %vm3359_vm1, %vm3362_vm8  ;;  %v12513_v44 = vld [vmem:[%s12480_s27 + $0xc] sm:$0x7] }
 0x296   : > { %7062 = vmatprep.subr.bf16.mxu1 %v9576_v34  ;;  %v1861_v62 = vpop.f32.mrf.mxu1  ;;  %v3241_v6 = vpack.i.bf16 %v3240_v58, %v3240_v58  ;;  %v3253_v63 = vmax.f32 %v3251_v10, %v3252_v12  ;;  %v3293_v19 = vmax.f32 %v3291_v28, %v3292_v52  ;;  %v3303_v15 = vunpack.i.h.bf16 %v3300_v45  ;;  %v3334_v26 = vld [vmem:[#allocation3 + $0x1a] sm:$0x1]  ;;  %vm12472_vm13 = vmpackc.low %vm12435_vm9, %vm12435_vm9  ;;  %v9594_v34 = vld [vmem:[%s13747_s6 + $0x584] ss:$8 sps:$4 sm:$0xff]  }
 0x297   : > { %7022 = vmatpush2.bf16.msra.mxu0 %v9571_v42  ;;  %v1914_v1 = vadd.f32 %v1913_v54, %v1890_v17  ;;  %v1862_v18 = vadd.f32 %v12222_v29, %v1861_v62  ;;  %v3313_v14 = vsel %vm2179_vm10, %v8097_v60, 4286644096  ;;  %v9588_v29 = vld [vmem:[%s13747_s6 + $0x594] ss:$8 sps:$4 sm:$0xff]   ;;  %vm1915_vm12 = vcmask 1043456   ;;  %vm12491_vm14 = vmpackc.low %vm12453_vm11, %vm12453_vm11 }
 0x298   : > { %7023 = vmatprep.subr.bf16.mxu0 %v9579_v49  ;;  %v9101_v50 = vpop.f32.mrf.mxu1  ;;  %v3254_v33 = vpack.i.bf16 %v3253_v63, %v3253_v63  ;;  %v3294_v38 = vrot.slane %v3293_v19, 2  ;;  %v12465_v36 = vrot.slane %v11859_v8, %v10944_v23  ;;  %v4099_v20 = vcombine.high %v12424_v53, %v12424_v53  ;;  %v9586_v8 = vld [vmem:[%s13747_s6 + $0x590] ss:$8 sps:$4 sm:$0xff]   ;;  %v12510_v54 = vld [vmem:[%s12480_s27 + $0x8] sm:$0xf] }
 0x299   : > { %7063 = vmatpush2.bf16.msra.mxu1 %v9574_v24  ;;  %v1891_v56 = vmax.f32 %v1862_v18, 0.0  ;;  %v3304_v27 = vmax.f32 %v3302_v25, %v3303_v15  ;;  %v3315_v22 = vunpack.i.l.bf16 %v3313_v14  ;;  %v3316_v57 = vunpack.i.h.bf16 %v3313_v14  ;;  %v12519_v40 = vld [vmem:[%s12480_s27 + $0x10] sm:$0xf]  ;;  %v9597_v52 = vld [vmem:[%s13747_s6 + $0x674] ss:$8 sps:$4 sm:$0xff]  }
 0x29a   : > { %7064 = vmatprep.subr.bf16.mxu1 %v9582_v61  ;;  %v1864_v21 = vpop.f32.mrf.mxu1  ;;  %v3295_v0 = vmax.f32 %v3293_v19, %v3294_v38  ;;  %v3325_v46 = vmax.bf16 %v3241_v6, %v3228_v4  ;;  %v3333_v42 = vmax.bf16 %v3254_v33, %v3241_v6  ;;  %v3367_v58 = vsel %vm12472_vm13, %v12483_v30, 4286644096  ;;  %v12536_v25 = vld [vmem:[%s12480_s27 + $0x14] sm:$0x7]  ;;  %v9592_v15 = vld [vmem:[%s13747_s6 + $0x580] ss:$8 sps:$4 sm:$0xff]  }
 0x29b   : > { %7024 = vmatpush2.bf16.msra.mxu0 %v9577_v32  ;;  %v1916_v2 = vsel %vm1915_vm12, %v1891_v56, 0.0  ;;  %v3305_v13 = vrot.slane %v3304_v27, 4  ;;  %v3317_v45 = vmax.f32 %v3315_v22, %v3316_v57  ;;  %v3368_v12 = vsel %vm12491_vm14, %v12486_v37, 4286644096  ;;  %v9607_v22 = vld [vmem:[%s13747_s6 + $0x764] ss:$8 sps:$4 sm:$0xff]  }
 0x29c   : > { %7025 = vmatprep.subr.bf16.mxu0 %v9585_v3  ;;  %v12505_v41 = vadd.f32 %v1916_v2, %v1914_v1  ;;  %v9102_v10 = vpop.f32.mrf.mxu1  ;;  %v3296_v28 = vrot.slane %v3295_v0, 1  ;;  %v3327_v49 = vsel %vm11096_vm6, %v3325_v46, %v3326_v35  ;;  %v3335_v24 = vsel %vm11096_vm6, %v3333_v42, %v3334_v26  ;;  %v9601_v1 = vld [vmem:[%s13747_s6 + $0x774] ss:$8 sps:$4 sm:$0xff]   ;;  %v9599_v26 = vld [vmem:[%s13747_s6 + $0x770] ss:$8 sps:$4 sm:$0xff]   ;;  %s7848_s27 = sshll.u32 %s10267_s29, 3 }
 0x29d   : > { %7065 = vmatpush2.bf16.msra.mxu1 %v9580_v9  ;;  %v3306_v60 = vmax.f32 %v3304_v27, %v3305_v13  ;;  %3328 = vst [vmem:[#allocation3 + $0x18] sm:$0x1] %v3327_v49  ;;  %v12531_v61 = vrot.slane %v4099_v20, %v10944_v23  ;;  %v4128_v17 = vcombine.high %v12465_v36, %v12465_v36  ;;  %v3318_v4 = vrot.slane %v3317_v45, 4  ;;  %v9604_v20 = vld [vmem:[%s13747_s6 + $0x664] ss:$8 sps:$4 sm:$0xff]   ;;  %s364_s17 = scalar_lea.vmem %s13752_s11, %s7848_s27 }
 0x29e   : > { %7066 = vmatprep.subr.bf16.mxu1 %v9588_v29  ;;  %3336 = vst [vmem:[#allocation3 + $0x1a] sm:$0x1] %v3335_v24  ;;  %v8103_v32 = vcombine.low %v3367_v58, %v3368_v12  ;;  %v3369_v6 = vsel %vm12472_vm13, %v12510_v54, 4286644096  ;;  %v3370_v63 = vsel %vm12491_vm14, %v12513_v44, 4286644096  ;;  %v3430_v19 = vstv %s3429_s30 }
 0x29f   : > { %7026 = vmatpush2.bf16.msra.mxu0 %v9583_v55  ;;  %v3307_v62 = vrot.slane %v3306_v60, 2  ;;  %v3297_v51 = vmax.f32 %v3295_v0, %v3296_v28  ;;  %v3319_v9 = vmax.f32 %v3317_v45, %v3318_v4  ;;  %v3371_v3 = vsel %vm12472_vm13, %v12519_v40, 4286644096  ;;  %v9595_v29 = vld [vmem:[%s13747_s6 + $0x670] ss:$8 sps:$4 sm:$0xff]  }
 0x2a0   : > { %7027 = vmatprep.subr.bf16.mxu0 %v9591_v11  ;;  %vm3427_vm15 = vcmp.ge.s32.totalorder %v10849_v47, %v12373_v5  ;;  %v3372_v14 = vsel %vm12491_vm14, %v12536_v25, 4286644096  ;;  %v8104_v31 = vcombine.low %v3369_v6, %v3370_v63  ;;  %v3389_v55 = vsel %vm2179_vm10, %v8103_v32, 4286644096  ;;  %v9610_v10 = vld [vmem:[%s13747_s6 + $0x654] ss:$8 sps:$4 sm:$0xff]  }
 0x2a1   : > { %7067 = vmatpush2.bf16.msra.mxu1 %v9586_v8  ;;  %v3308_v18 = vmax.f32 %v3306_v60, %v3307_v62  ;;  %v3320_v50 = vrot.slane %v3319_v9, 2  ;;  %v8105_v33 = vcombine.low %v3371_v3, %v3372_v14  ;;  %v3391_v38 = vunpack.i.l.bf16 %v3389_v55  ;;  %v9613_v12 = vld [vmem:[%s13747_s6 + $0x754] ss:$8 sps:$4 sm:$0xff]   ;;  %v9608_v32 = vld [vmem:[%s13747_s6 + $0x650] ss:$8 sps:$4 sm:$0xff]  }
 0x2a2   : > { %7068 = vmatprep.subr.bf16.mxu1 %v9594_v34  ;;  %vm3428_vm2 = vcmp.ge.s32.totalorder %v10864_v39, %v12373_v5  ;;  %v3392_v27 = vunpack.i.h.bf16 %v3389_v55  ;;  %v3402_v35 = vsel %vm2179_vm10, %v8104_v31, 4286644096  ;;  %vm3431_vm4 = vcmp.le.s32.totalorder %v10849_v47, %v3430_v19  ;;  %v9602_v34 = vld [vmem:[%s13747_s6 + $0x660] ss:$8 sps:$4 sm:$0xff]   ;;  %v9619_v14 = vld [vmem:[%s13747_s6 + $0x744] ss:$8 sps:$4 sm:$0xff]  }
 0x2a3   : > { %7028 = vmatpush2.bf16.msra.mxu0 %v9589_v59  ;;  %v3309_v56 = vrot.slane %v3308_v18, 1  ;;  %v3298_v43 = vpack.i.bf16 %v3297_v51, %v3297_v51  ;;  %v3321_v8 = vmax.f32 %v3319_v9, %v3320_v50  ;;  %v3404_v21 = vunpack.i.l.bf16 %v3402_v35  ;;  %vm3433_vm5 = vmand %vm3427_vm15, %vm3431_vm4  ;;  %v9605_v59 = vld [vmem:[%s13747_s6 + $0x760] ss:$8 sps:$4 sm:$0xff]  }
 0x2a4   : > { %7079 = vmatprep.subr.bf16.mxu0 %v9597_v52  ;;  %v3405_v0 = vunpack.i.h.bf16 %v3402_v35  ;;  %v3393_v46 = vmax.f32 %v3391_v38, %v3392_v27  ;;  %v3415_v16 = vsel %vm2179_vm10, %v8105_v33, 4286644096  ;;  %vm3432_vm3 = vcmp.le.s32.totalorder %v10864_v39, %v3430_v19  ;;  %vm12581_vm1 = vmpackc.low %vm3433_vm5, %vm3433_vm5  ;;  %v3330_v5 = vld [vmem:[#allocation3 + $0x19] sm:$0x1]  ;;  %v3338_v19 = vld [vmem:[#allocation3 + $0x1b] sm:$0x1] }
 0x2a5   : > { %7069 = vmatpush2.bf16.msra.mxu1 %v9592_v15  ;;  %v3310_v57 = vmax.f32 %v3308_v18, %v3309_v56  ;;  %v3322_v2 = vrot.slane %v3321_v8, 1  ;;  %v3417_v42 = vunpack.i.l.bf16 %v3415_v16  ;;  %vm3434_vm7 = vmand %vm3428_vm2, %vm3432_vm3  ;;  %v3418_v49 = vunpack.i.h.bf16 %v3415_v16  ;;  %v9614_v50 = vld [vmem:[%s13747_s6 + $0x640] ss:$8 sps:$4 sm:$0xff]   ;;  %v9620_v16 = vld [vmem:[%s13747_s6 + $0x630] ss:$8 sps:$4 sm:$0xff]  }
 0x2a6   : > { %7030 = vmatmul.mubr.bf16.vlgmr.msra.gmra.mxu0 %v12465_v36  ;;  %7120 = vmatprep.subr.bf16.mxu1 %v9601_v1  ;;  %v4131_v36 = vcombine.high %v12531_v61, %v12531_v61  ;;  %v3406_v13 = vmax.f32 %v3404_v21, %v3405_v0  ;;  %v3394_v45 = vrot.slane %v3393_v46, 4  ;;  %vm12600_vm8 = vmpackc.low %vm3434_vm7, %vm3434_vm7  ;;  %v3437_v58 = vsel %vm12581_vm1, %v12483_v30, 4286644096  ;;  %v9616_v30 = vld [vmem:[%s13747_s6 + $0x644] ss:$8 sps:$4 sm:$0xff]  }
 0x2a7   : > { %7080 = vmatpush1.bf16.msra.mxu0 %v9595_v29  ;;  %7111 = vmatprep.mubr.bf16.mxu0 %v12531_v61  ;;  %v3311_v28 = vpack.i.bf16 %v3310_v57, %v3310_v57  ;;  %v3323_v39 = vmax.f32 %v3321_v8, %v3322_v2  ;;  %v3438_v4 = vsel %vm12600_vm8, %v12486_v37, 4286644096  ;;  %v9611_v37 = vld [vmem:[%s13747_s6 + $0x750] ss:$8 sps:$4 sm:$0xff]   ;;  %v3439_v18 = vsel %vm12581_vm1, %v12510_v54, 4286644096 }
 0x2a8   : > { %7071 = vmatmul.mubr.bf16.vlgmr.msra.gmra.mxu1 %v4128_v17  ;;  %7081 = vmatprep.subr.bf16.mxu0 %v9604_v20  ;;  %v3407_v24 = vrot.slane %v3406_v13, 4  ;;  %v3395_v61 = vmax.f32 %v3393_v46, %v3394_v45  ;;  %v3419_v17 = vmax.f32 %v3417_v42, %v3418_v49  ;;  %v8106_v9 = vcombine.low %v3437_v58, %v3438_v4  ;;  %v9622_v54 = vld [vmem:[%s13747_s6 + $0x634] ss:$8 sps:$4 sm:$0xff]  }
 0x2a9   : > { %7121 = vmatpush1.bf16.msra.mxu1 %v9599_v26  ;;  %7152 = vmatprep.mubr.bf16.mxu1 %v4131_v36  ;;  %v3329_v52 = vmax.bf16 %v3311_v28, %v3298_v43  ;;  %v3324_v62 = vpack.i.bf16 %v3323_v39, %v3323_v39  ;;  %v3440_v29 = vsel %vm12600_vm8, %v12513_v44, 4286644096  ;;  %v3441_v20 = vsel %vm12581_vm1, %v12519_v40, 4286644096  ;;  %v9617_v43 = vld [vmem:[%s13747_s6 + $0x740] ss:$8 sps:$4 sm:$0xff]  }
 0x2aa   : > { %7122 = vmatprep.subr.bf16.mxu1 %v9607_v22  ;;  %v3408_v6 = vmax.f32 %v3406_v13, %v3407_v24  ;;  %v3396_v15 = vrot.slane %v3395_v61, 2  ;;  %v3420_v51 = vrot.slane %v3419_v17, 4  ;;  %v8107_v56 = vcombine.low %v3439_v18, %v3440_v29  ;;  %v9625_v22 = vld [vmem:[%s13747_s6 + $0x734] ss:$8 sps:$4 sm:$0xff]   ;;  %v9628_v13 = vld [vmem:[%s13747_s6 + $0x624] ss:$8 sps:$4 sm:$0xff]  }
 0x2ab   : > { %7082 = vmatpush1.bf16.msra.mxu0 %v9602_v34  ;;  %v3331_v63 = vsel %vm11096_vm6, %v3329_v52, %v3330_v5  ;;  %v3337_v3 = vmax.bf16 %v3324_v62, %v3311_v28  ;;  %v3442_v35 = vsel %vm12600_vm8, %v12536_v25, 4286644096  ;;  %v3459_v26 = vsel %vm2179_vm10, %v8106_v9, 4286644096  ;;  %v9623_v28 = vld [vmem:[%s13747_s6 + $0x730] ss:$8 sps:$4 sm:$0xff]  }
 0x2ac   : > { %7083 = vmatprep.subr.bf16.mxu0 %v9610_v10  ;;  %3332 = vst [vmem:[#allocation3 + $0x19] sm:$0x1] %v3331_v63  ;;  %v3409_v1 = vrot.slane %v3408_v6, 2  ;;  %v3397_v31 = vmax.f32 %v3395_v61, %v3396_v15  ;;  %v3421_v55 = vmax.f32 %v3419_v17, %v3420_v51  ;;  %v8108_v21 = vcombine.low %v3441_v20, %v3442_v35  ;;  %v9631_v5 = vld [vmem:[%s13747_s6 + $0x724] ss:$8 sps:$4 sm:$0xff]  }
 0x2ad   : > { %7123 = vmatpush1.bf16.msra.mxu1 %v9605_v59  ;;  %v3339_v33 = vsel %vm11096_vm6, %v3337_v3, %v3338_v19  ;;  %v3461_v0 = vunpack.i.l.bf16 %v3459_v26  ;;  %v3462_v40 = vunpack.i.h.bf16 %v3459_v26  ;;  %v3472_v25 = vsel %vm2179_vm10, %v8107_v56, 4286644096  ;;  %v9626_v52 = vld [vmem:[%s13747_s6 + $0x620] ss:$8 sps:$4 sm:$0xff]   ;;  %v3506_v51 = vld [vmem:[#allocation3 + $0x1e] sm:$0x1] }
 0x2ae   : > { %7124 = vmatprep.subr.bf16.mxu1 %v9613_v12  ;;  %v3410_v38 = vmax.f32 %v3408_v6, %v3409_v1  ;;  %3340 = vst [vmem:[#allocation3 + $0x1b] sm:$0x1] %v3339_v33  ;;  %v3398_v44 = vrot.slane %v3397_v31, 1  ;;  %v3422_v27 = vrot.slane %v3421_v55, 2  ;;  %v3474_v34 = vunpack.i.l.bf16 %v3472_v25  ;;  %v3498_v12 = vld [vmem:[#allocation3 + $0x1c] sm:$0x1] }
 0x2af   : > { %7084 = vmatpush1.bf16.msra.mxu0 %v9608_v32  ;;  %v3463_v36 = vmax.f32 %v3461_v0, %v3462_v40  ;;  %v3475_v2 = vunpack.i.h.bf16 %v3472_v25  ;;  %v3485_v10 = vsel %vm2179_vm10, %v8108_v21, 4286644096  ;;  %v9634_v32 = vld [vmem:[%s13747_s6 + $0x614] ss:$8 sps:$4 sm:$0xff]   ;;  %v9632_v1 = vld [vmem:[%s13747_s6 + $0x610] ss:$8 sps:$4 sm:$0xff]  }
 0x2b0   : > { %7085 = vmatprep.subr.bf16.mxu0 %v9616_v30  ;;  %v3411_v8 = vrot.slane %v3410_v38, 1  ;;  %v3399_v57 = vmax.f32 %v3397_v31, %v3398_v44  ;;  %v3423_v46 = vmax.f32 %v3421_v55, %v3422_v27  ;;  %v3487_v39 = vunpack.i.l.bf16 %v3485_v10  ;;  %v9629_v30 = vld [vmem:[%s13747_s6 + $0x720] ss:$8 sps:$4 sm:$0xff]   ;;  %v9637_v9 = vld [vmem:[%s13747_s6 + $0x714] ss:$8 sps:$4 sm:$0xff]  }
 0x2b1   : > { %7125 = vmatpush1.bf16.msra.mxu1 %v9611_v37  ;;  %v3464_v49 = vrot.slane %v3463_v36, 4  ;;  %v3476_v60 = vmax.f32 %v3474_v34, %v3475_v2  ;;  %v3488_v58 = vunpack.i.h.bf16 %v3485_v10  ;;  %v9640_v31 = vld [vmem:[%s13747_s6 + $0x604] ss:$8 sps:$4 sm:$0xff]   ;;  %v9638_v56 = vld [vmem:[%s13747_s6 + $0x600] ss:$8 sps:$4 sm:$0xff]  }
 0x2b2   : > { %7126 = vmatprep.subr.bf16.mxu1 %v9619_v14  ;;  %v3412_v11 = vmax.f32 %v3410_v38, %v3411_v8  ;;  %v3400_v42 = vpack.i.bf16 %v3399_v57, %v3399_v57  ;;  %v3424_v59 = vrot.slane %v3423_v46, 1  ;;  %v9643_v38 = vld [vmem:[%s13747_s6 + $0x704] ss:$8 sps:$4 sm:$0xff]   ;;  %v9646_v35 = vld [vmem:[%s13747_s6 + $0x6f4] ss:$8 sps:$4 sm:$0xff]  }
 0x2b3   : > { %7086 = vmatpush1.bf16.msra.mxu0 %v9614_v50  ;;  %v3465_v61 = vmax.f32 %v3463_v36, %v3464_v49  ;;  %v3477_v17 = vrot.slane %v3476_v60, 4  ;;  %v3489_v6 = vmax.f32 %v3487_v39, %v3488_v58  ;;  %v9635_v50 = vld [vmem:[%s13747_s6 + $0x710] ss:$8 sps:$4 sm:$0xff]   ;;  %v9649_v0 = vld [vmem:[%s13747_s6 + $0x7f4] ss:$8 sps:$4 sm:$0xff]  }
 0x2b4   : > { %7087 = vmatprep.subr.bf16.mxu0 %v9622_v54  ;;  %v3413_v45 = vpack.i.bf16 %v3412_v11, %v3412_v11  ;;  %v3425_v24 = vmax.f32 %v3423_v46, %v3424_v59  ;;  %v9652_v46 = vld [vmem:[%s13747_s6 + $0x6e4] ss:$8 sps:$4 sm:$0xff]   ;;  %v9647_v11 = vld [vmem:[%s13747_s6 + $0x7f0] ss:$8 sps:$4 sm:$0xff]   ;;  %v9658_v10 = vld [vmem:[%s13747_s6 + $0x6d4] ss:$8 sps:$4 sm:$0xff]  }
 0x2b5   : > { %7127 = vmatpush1.bf16.msra.mxu1 %v9617_v43  ;;  %v3466_v63 = vrot.slane %v3465_v61, 2  ;;  %v3478_v19 = vmax.f32 %v3476_v60, %v3477_v17  ;;  %v3490_v37 = vrot.slane %v3489_v6, 4  ;;  %v9641_v43 = vld [vmem:[%s13747_s6 + $0x700] ss:$8 sps:$4 sm:$0xff]   ;;  %v9655_v34 = vld [vmem:[%s13747_s6 + $0x7e4] ss:$8 sps:$4 sm:$0xff]  }
 0x2b6   : > { %7128 = vmatprep.subr.bf16.mxu1 %v9625_v22  ;;  %v3497_v4 = vmax.bf16 %v3413_v45, %v3400_v42  ;;  %v3426_v62 = vpack.i.bf16 %v3425_v24, %v3425_v24  ;;  %v9644_v22 = vld [vmem:[%s13747_s6 + $0x6f0] ss:$8 sps:$4 sm:$0xff]   ;;  %v3510_v59 = vld [vmem:[#allocation3 + $0x1f] sm:$0x1]  ;;  %v9661_v49 = vld [vmem:[%s13747_s6 + $0x7d4] ss:$8 sps:$4 sm:$0xff]  }
 0x2b7   : > { %7088 = vmatpush1.bf16.msra.mxu0 %v9620_v16  ;;  %v3467_v18 = vmax.f32 %v3465_v61, %v3466_v63  ;;  %v3479_v14 = vrot.slane %v3478_v19, 2  ;;  %v3491_v55 = vmax.f32 %v3489_v6, %v3490_v37  ;;  %v3502_v16 = vld [vmem:[#allocation3 + $0x1d] sm:$0x1]  ;;  %v9656_v39 = vld [vmem:[%s13747_s6 + $0x6d0] ss:$8 sps:$4 sm:$0xff]   ;;  %v12778_v63 = vld [vmem:[#allocation3 + $0x10] sm:$0xff] }
 0x2b8   : > { %7089 = vmatprep.subr.bf16.mxu0 %v9628_v13  ;;  %v3499_v15 = vsel %vm11096_vm6, %v3497_v4, %v3498_v12  ;;  %v3505_v3 = vmax.bf16 %v3426_v62, %v3413_v45  ;;  %v9650_v13 = vld [vmem:[%s13747_s6 + $0x6e0] ss:$8 sps:$4 sm:$0xff]   ;;  %v9659_v24 = vld [vmem:[%s13747_s6 + $0x7d0] ss:$8 sps:$4 sm:$0xff]   ;;  %v9670_v12 = vld [vmem:[%s13747_s6 + $0x6b4] ss:$8 sps:$4 sm:$0xff]  }
 0x2b9   : > { %7129 = vmatpush1.bf16.msra.mxu1 %v9623_v28  ;;  %3500 = vst [vmem:[#allocation3 + $0x1c] sm:$0x1] %v3499_v15  ;;  %v3468_v54 = vrot.slane %v3467_v18, 1  ;;  %v3480_v33 = vmax.f32 %v3478_v19, %v3479_v14  ;;  %v3492_v20 = vrot.slane %v3491_v55, 2  ;;  %v9653_v45 = vld [vmem:[%s13747_s6 + $0x7e0] ss:$8 sps:$4 sm:$0xff]  }
 0x2ba   : > { %7130 = vmatprep.subr.bf16.mxu1 %v9631_v5  ;;  %v3507_v29 = vsel %vm11096_vm6, %v3505_v3, %v3506_v51  ;;  %v9664_v5 = vld [vmem:[%s13747_s6 + $0x6c4] ss:$8 sps:$4 sm:$0xff]   ;;  %v9662_v58 = vld [vmem:[%s13747_s6 + $0x6c0] ss:$8 sps:$4 sm:$0xff]   ;;  %v9673_v61 = vld [vmem:[%s13747_s6 + $0x7b4] ss:$8 sps:$4 sm:$0xff]  }
 0x2bb   : > { %7090 = vmatpush1.bf16.msra.mxu0 %v9626_v52  ;;  %3508 = vst [vmem:[#allocation3 + $0x1e] sm:$0x1] %v3507_v29  ;;  %v3469_v44 = vmax.f32 %v3467_v18, %v3468_v54  ;;  %v3481_v27 = vrot.slane %v3480_v33, 1  ;;  %v3493_v26 = vmax.f32 %v3491_v55, %v3492_v20  ;;  %v9665_v52 = vld [vmem:[%s13747_s6 + $0x7c0] ss:$8 sps:$4 sm:$0xff]   ;;  %v6825_v14 = vsub.s32 0, %v10849_v47 }
 0x2bc   : > { %7091 = vmatprep.subr.bf16.mxu0 %v9634_v32  ;;  %v9668_v17 = vld [vmem:[%s13747_s6 + $0x6b0] ss:$8 sps:$4 sm:$0xff]   ;;  %v9676_v4 = vld [vmem:[%s13747_s6 + $0x6a4] ss:$8 sps:$4 sm:$0xff]   ;;  %v9674_v6 = vld [vmem:[%s13747_s6 + $0x6a0] ss:$8 sps:$4 sm:$0xff]  }
 0x2bd   : > { %7131 = vmatpush1.bf16.msra.mxu1 %v9629_v30  ;;  %v3470_v8 = vpack.i.bf16 %v3469_v44, %v3469_v44  ;;  %v3482_v21 = vmax.f32 %v3480_v33, %v3481_v27  ;;  %v3494_v40 = vrot.slane %v3493_v26, 1  ;;  %v9671_v32 = vld [vmem:[%s13747_s6 + $0x7b0] ss:$8 sps:$4 sm:$0xff]   ;;  %v9679_v62 = vld [vmem:[%s13747_s6 + $0x7a4] ss:$8 sps:$4 sm:$0xff]   ;;  %v6829_v54 = vsub.s32 1, %v10849_v47 }
 0x2be   : > { %7132 = vmatprep.subr.bf16.mxu1 %v9637_v9  ;;  %v9682_v30 = vld [vmem:[%s13747_s6 + $0x694] ss:$8 sps:$4 sm:$0xff]   ;;  %v9677_v19 = vld [vmem:[%s13747_s6 + $0x7a0] ss:$8 sps:$4 sm:$0xff]   ;;  %v9680_v51 = vld [vmem:[%s13747_s6 + $0x690] ss:$8 sps:$4 sm:$0xff]   ;;  %v12791_v9 = vrot.slane %v12778_v63, %v10944_v23  ;;  %v4113_v33 = vrot.slane %v12424_v53, %v10944_v23 }
 0x2bf   : > { %7092 = vmatpush1.bf16.msra.mxu0 %v9632_v1  ;;  %v3483_v57 = vpack.i.bf16 %v3482_v21, %v3482_v21  ;;  %v3495_v25 = vmax.f32 %v3493_v26, %v3494_v40  ;;  %v9685_v15 = vld [vmem:[%s13747_s6 + $0x794] ss:$8 sps:$4 sm:$0xff]   ;;  %v9688_v37 = vld [vmem:[%s13747_s6 + $0x684] ss:$8 sps:$4 sm:$0xff]   ;;  %v9683_v3 = vld [vmem:[%s13747_s6 + $0x790] ss:$8 sps:$4 sm:$0xff]  }
 0x2c0   : > { %7093 = vmatprep.subr.bf16.mxu0 %v9640_v31  ;;  %v9691_v1 = vld [vmem:[%s13747_s6 + $0x784] ss:$8 sps:$4 sm:$0xff]   ;;  %v9686_v18 = vld [vmem:[%s13747_s6 + $0x680] ss:$8 sps:$4 sm:$0xff]   ;;  %v4147_v31 = vcombine.high %v12791_v9, %v12791_v9  ;;  %v9694_v55 = vld [vmem:[%s13747_s6 + $0x874] ss:$8 sps:$4 sm:$0xff]  }
 0x2c1   : > { %7133 = vmatpush1.bf16.msra.mxu1 %v9635_v50  ;;  %v3501_v36 = vmax.bf16 %v3483_v57, %v3470_v8  ;;  %v3496_v2 = vpack.i.bf16 %v3495_v25, %v3495_v25  ;;  %v4029_v29 = vld [vmem:[%s13748_s7] sm:$0x3]  ;;  %v9692_v20 = vld [vmem:[%s13747_s6 + $0x870] ss:$8 sps:$4 sm:$0xff]   ;;  %v9700_v53 = vld [vmem:[%s13747_s6 + $0x864] ss:$8 sps:$4 sm:$0xff]  }
 0x2c2   : > { %7134 = vmatprep.subr.bf16.mxu1 %v9643_v38  ;;  %v9689_v50 = vld [vmem:[%s13747_s6 + $0x780] ss:$8 sps:$4 sm:$0xff]   ;;  %v9697_v38 = vld [vmem:[%s13747_s6 + $0x974] ss:$8 sps:$4 sm:$0xff]   ;;  %v4169_v44 = vrot.slane %v4147_v31, %v10944_v23  ;;  %v9695_v27 = vld [vmem:[%s13747_s6 + $0x970] ss:$8 sps:$4 sm:$0xff]  }
 0x2c3   : > { %7094 = vmatpush1.bf16.msra.mxu0 %v9638_v56  ;;  %v3503_v42 = vsel %vm11096_vm6, %v3501_v36, %v3502_v16  ;;  %v3509_v28 = vmax.bf16 %v3496_v2, %v3483_v57  ;;  %v6826_v56 = vrot.slane %v4029_v29, %v6825_v14  ;;  %v9703_v8 = vld [vmem:[%s13747_s6 + $0x964] ss:$8 sps:$4 sm:$0xff]   ;;  %v9698_v40 = vld [vmem:[%s13747_s6 + $0x860] ss:$8 sps:$4 sm:$0xff]   ;;  %v9709_v2 = vld [vmem:[%s13747_s6 + $0x954] ss:$8 sps:$4 sm:$0xff]  }
 0x2c4   : > { %7095 = vmatprep.subr.bf16.mxu0 %v9646_v35  ;;  %3504 = vst [vmem:[#allocation3 + $0x1d] sm:$0x1] %v3503_v42  ;;  %v6830_v35 = vrot.slane %v4029_v29, %v6829_v54  ;;  %v9704_v42 = vld [vmem:[%s13747_s6 + $0x850] ss:$8 sps:$4 sm:$0xff]   ;;  %v9748_v31 = vld [vmem:[%s13747_s6 + $0x8e4] ss:$8 sps:$4 sm:$0xff]  }
 0x2c5   : > { %7135 = vmatpush1.bf16.msra.mxu1 %v9641_v43  ;;  %v3511_v60 = vsel %vm11096_vm6, %v3509_v28, %v3510_v59  ;;  %v4129_v43 = vcombine.high %v4113_v33, %v4113_v33  ;;  %v9712_v28 = vld [vmem:[%s13747_s6 + $0x844] ss:$8 sps:$4 sm:$0xff]   ;;  %v9754_v54 = vld [vmem:[%s13747_s6 + $0x8d4] ss:$8 sps:$4 sm:$0xff]  }
 0x2c6   : > { %7136 = vmatprep.subr.bf16.mxu1 %v9649_v0  ;;  %3512 = vst [vmem:[#allocation3 + $0x1f] sm:$0x1] %v3511_v60  ;;  %v4179_v0 = vcombine.high %v4169_v44, %v4169_v44  ;;  %v9715_v60 = vld [vmem:[%s13747_s6 + $0x944] ss:$8 sps:$4 sm:$0xff]  }
 0x2c7   : > { %7096 = vmatpush2.bf16.msra.mxu0 %v9644_v22  ;;  %v9751_v29 = vld [vmem:[%s13747_s6 + $0x9e4] ss:$8 sps:$4 sm:$0xff]  }
 0x2c8   : > { %7097 = vmatprep.subr.bf16.mxu0 %v9652_v46  ;;  %v9706_v46 = vld [vmem:[%s13747_s6 + $0x854] ss:$8 sps:$4 sm:$0xff]  }
 0x2c9   : > { %7137 = vmatpush2.bf16.msra.mxu1 %v9647_v11  ;;  %v9701_v11 = vld [vmem:[%s13747_s6 + $0x960] ss:$8 sps:$4 sm:$0xff]  }
 0x2ca   : > { %7138 = vmatprep.subr.bf16.mxu1 %v9655_v34 }
 0x2cb   : > { %7098 = vmatpush2.bf16.msra.mxu0 %v9650_v13 }
 0x2cc   : > { %7099 = vmatprep.subr.bf16.mxu0 %v9658_v10 }
 0x2cd   : > { %7139 = vmatpush2.bf16.msra.mxu1 %v9653_v45  ;;  %v9707_v45 = vld [vmem:[%s13747_s6 + $0x950] ss:$8 sps:$4 sm:$0xff]  }
 0x2ce   : > { %7140 = vmatprep.subr.bf16.mxu1 %v9661_v49 }
 0x2cf   : > { %7100 = vmatpush2.bf16.msra.mxu0 %v9656_v39  ;;  %v9710_v39 = vld [vmem:[%s13747_s6 + $0x840] ss:$8 sps:$4 sm:$0xff]  }
 0x2d0   : > { %7101 = vmatprep.subr.bf16.mxu0 %v9664_v5  ;;  %v9718_v5 = vld [vmem:[%s13747_s6 + $0x834] ss:$8 sps:$4 sm:$0xff]  }
 0x2d1   : > { %7141 = vmatpush2.bf16.msra.mxu1 %v9659_v24  ;;  %v9713_v24 = vld [vmem:[%s13747_s6 + $0x940] ss:$8 sps:$4 sm:$0xff]  }
 0x2d2   : > { %7142 = vmatprep.subr.bf16.mxu1 %v9667_v7  ;;  %v9721_v7 = vld [vmem:[%s13747_s6 + $0x934] ss:$8 sps:$4 sm:$0xff]  }
 0x2d3   : > { %7102 = vmatpush2.bf16.msra.mxu0 %v9662_v58  ;;  %v9716_v58 = vld [vmem:[%s13747_s6 + $0x830] ss:$8 sps:$4 sm:$0xff]  }
 0x2d4   : > { %7103 = vmatprep.subr.bf16.mxu0 %v9670_v12  ;;  %v9724_v12 = vld [vmem:[%s13747_s6 + $0x824] ss:$8 sps:$4 sm:$0xff]  }
 0x2d5   : > { %7143 = vmatpush2.bf16.msra.mxu1 %v9665_v52  ;;  %v9719_v52 = vld [vmem:[%s13747_s6 + $0x930] ss:$8 sps:$4 sm:$0xff]  }
 0x2d6   : > { %7144 = vmatprep.subr.bf16.mxu1 %v9673_v61  ;;  %v9727_v61 = vld [vmem:[%s13747_s6 + $0x924] ss:$8 sps:$4 sm:$0xff]  }
 0x2d7   : > { %7104 = vmatpush2.bf16.msra.mxu0 %v9668_v17  ;;  %v9722_v17 = vld [vmem:[%s13747_s6 + $0x820] ss:$8 sps:$4 sm:$0xff]  }
 0x2d8   : > { %7105 = vmatprep.subr.bf16.mxu0 %v9676_v4  ;;  %v9730_v4 = vld [vmem:[%s13747_s6 + $0x814] ss:$8 sps:$4 sm:$0xff]  }
 0x2d9   : > { %7145 = vmatpush2.bf16.msra.mxu1 %v9671_v32  ;;  %v9725_v32 = vld [vmem:[%s13747_s6 + $0x920] ss:$8 sps:$4 sm:$0xff]  }
 0x2da   : > { %7146 = vmatprep.subr.bf16.mxu1 %v9679_v62  ;;  %v9733_v62 = vld [vmem:[%s13747_s6 + $0x914] ss:$8 sps:$4 sm:$0xff]  }
 0x2db   : > { %7106 = vmatpush2.bf16.msra.mxu0 %v9674_v6  ;;  %v9728_v6 = vld [vmem:[%s13747_s6 + $0x810] ss:$8 sps:$4 sm:$0xff]  }
 0x2dc   : > { %7107 = vmatprep.subr.bf16.mxu0 %v9682_v30  ;;  %v9736_v30 = vld [vmem:[%s13747_s6 + $0x804] ss:$8 sps:$4 sm:$0xff]  }
 0x2dd   : > { %7147 = vmatpush2.bf16.msra.mxu1 %v9677_v19  ;;  %v9731_v19 = vld [vmem:[%s13747_s6 + $0x910] ss:$8 sps:$4 sm:$0xff]  }
 0x2de   : > { %7148 = vmatprep.subr.bf16.mxu1 %v9685_v15  ;;  %v9739_v15 = vld [vmem:[%s13747_s6 + $0x904] ss:$8 sps:$4 sm:$0xff]  }
 0x2df   : > { %7108 = vmatpush2.bf16.msra.mxu0 %v9680_v51  ;;  %v9734_v51 = vld [vmem:[%s13747_s6 + $0x800] ss:$8 sps:$4 sm:$0xff]  }
 0x2e0   : > { %7109 = vmatprep.subr.bf16.mxu0 %v9688_v37  ;;  %v9742_v37 = vld [vmem:[%s13747_s6 + $0x8f4] ss:$8 sps:$4 sm:$0xff]  }
 0x2e1   : > { %7149 = vmatpush2.bf16.msra.mxu1 %v9683_v3  ;;  %v9737_v3 = vld [vmem:[%s13747_s6 + $0x900] ss:$8 sps:$4 sm:$0xff]  }
 0x2e2   : > { %7150 = vmatprep.subr.bf16.mxu1 %v9691_v1  ;;  %v9745_v1 = vld [vmem:[%s13747_s6 + $0x9f4] ss:$8 sps:$4 sm:$0xff]  }
 0x2e3   : > { %7110 = vmatpush2.bf16.msra.mxu0 %v9686_v18  ;;  %v9740_v18 = vld [vmem:[%s13747_s6 + $0x8f0] ss:$8 sps:$4 sm:$0xff]  }
 0x2e4   : > { %7161 = vmatprep.subr.bf16.mxu0 %v9694_v55  ;;  %v9743_v55 = vld [vmem:[%s13747_s6 + $0x9f0] ss:$8 sps:$4 sm:$0xff]  }
 0x2e5   : > { %7151 = vmatpush2.bf16.msra.mxu1 %v9689_v50  ;;  %v9746_v50 = vld [vmem:[%s13747_s6 + $0x8e0] ss:$8 sps:$4 sm:$0xff]  }
 0x2e6   : > { %7112 = vmatmul.mubr.bf16.vlgmr.msra.gmra.mxu0 %v4113_v33  ;;  %v6867_v26 = vpop.f32.mrf.mxu0  ;;  %7202 = vmatprep.subr.bf16.mxu1 %v9697_v38  ;;  %v9749_v33 = vld [vmem:[%s13747_s6 + $0x9e0] ss:$8 sps:$4 sm:$0xff]   ;;  %v9757_v38 = vld [vmem:[%s13747_s6 + $0x9d4] ss:$8 sps:$4 sm:$0xff]  }
 0x2e7   : > { %v6868_v21 = vadd.f32 %v6867_v26, %v6826_v56  ;;  %7162 = vmatpush1.bf16.msra.mxu0 %v9692_v20  ;;  %7193 = vmatprep.mubr.bf16.mxu0 %v4169_v44  ;;  %v9752_v20 = vld [vmem:[%s13747_s6 + $0x8d0] ss:$8 sps:$4 sm:$0xff]   ;;  %v9760_v56 = vld [vmem:[%s13747_s6 + $0x8c4] ss:$8 sps:$4 sm:$0xff]   ;;  %v9761_v26 = vld [vmem:[%s13747_s6 + $0x9c0] ss:$8 sps:$4 sm:$0xff]  }
 0x2e8   : > { %7153 = vmatmul.mubr.bf16.vlgmr.msra.gmra.mxu1 %v4129_v43  ;;  %v6869_v22 = vpop.f32.mrf.mxu0  ;;  %v6908_v57 = vpop.f32.mrf.mxu1  ;;  %7163 = vmatprep.subr.bf16.mxu0 %v9700_v53  ;;  %v9755_v44 = vld [vmem:[%s13747_s6 + $0x9d0] ss:$8 sps:$4 sm:$0xff]   ;;  %v9763_v53 = vld [vmem:[%s13747_s6 + $0x9c4] ss:$8 sps:$4 sm:$0xff]   ;;  %v9769_v43 = vld [vmem:[%s13747_s6 + $0x9b4] ss:$8 sps:$4 sm:$0xff]  }
 0x2e9   : > { %v6870_v25 = vadd.f32 %v6869_v22, %v6830_v35  ;;  %v12844_v16 = vadd.f32 %v6908_v57, %v6868_v21  ;;  %7203 = vmatpush1.bf16.msra.mxu1 %v9695_v27  ;;  %7234 = vmatprep.mubr.bf16.mxu1 %v4179_v0  ;;  %v9758_v27 = vld [vmem:[%s13747_s6 + $0x8c0] ss:$8 sps:$4 sm:$0xff]   ;;  %v9766_v35 = vld [vmem:[%s13747_s6 + $0x8b4] ss:$8 sps:$4 sm:$0xff]   ;;  %v9772_v21 = vld [vmem:[%s13747_s6 + $0x8a4] ss:$8 sps:$4 sm:$0xff]   ;;  %v4132_v57 = vcombine.high %v12778_v63, %v12778_v63 }
 0x2ea   : > { %v6871_v36 = vpop.f32.mrf.mxu0  ;;  %v6910_v34 = vpop.f32.mrf.mxu1  ;;  %7204 = vmatprep.subr.bf16.mxu1 %v9703_v8  ;;  %v9764_v8 = vld [vmem:[%s13747_s6 + $0x8b0] ss:$8 sps:$4 sm:$0xff]   ;;  %v9770_v22 = vld [vmem:[%s13747_s6 + $0x8a0] ss:$8 sps:$4 sm:$0xff]  }
 0x2eb   : > { %v12852_v13 = vadd.f32 %v6910_v34, %v6870_v25  ;;  %7164 = vmatpush1.bf16.msra.mxu0 %v9698_v40  ;;  %v9767_v0 = vld [vmem:[%s13747_s6 + $0x9b0] ss:$8 sps:$4 sm:$0xff]   ;;  %v9775_v40 = vld [vmem:[%s13747_s6 + $0x9a4] ss:$8 sps:$4 sm:$0xff]   ;;  %v9773_v25 = vld [vmem:[%s13747_s6 + $0x9a0] ss:$8 sps:$4 sm:$0xff]   ;;  %v13004_v36 = vrot.slane %v4132_v57, %v10944_v23 }
 0x2ec   : > { %v6872_v59 = vpop.f32.mrf.mxu0  ;;  %v6912_v10 = vpop.f32.mrf.mxu1  ;;  %7165 = vmatprep.subr.bf16.mxu0 %v9706_v46  ;;  %v9778_v46 = vld [vmem:[%s13747_s6 + $0x894] ss:$8 sps:$4 sm:$0xff]   ;;  %v9776_v63 = vld [vmem:[%s13747_s6 + $0x890] ss:$8 sps:$4 sm:$0xff]   ;;  %v9784_v34 = vld [vmem:[%s13747_s6 + $0x884] ss:$8 sps:$4 sm:$0xff]  }
 0x2ed   : > { %7205 = vmatpush1.bf16.msra.mxu1 %v9701_v11  ;;  %v9781_v11 = vld [vmem:[%s13747_s6 + $0x994] ss:$8 sps:$4 sm:$0xff]   ;;  %v9782_v59 = vld [vmem:[%s13747_s6 + $0x880] ss:$8 sps:$4 sm:$0xff]   ;;  %v4148_v10 = vcombine.high %v13004_v36, %v13004_v36 }
 0x2ee   : > { %v6913_v49 = vpop.f32.mrf.mxu1  ;;  %7206 = vmatprep.subr.bf16.mxu1 %v9709_v2  ;;  %v9779_v2 = vld [vmem:[%s13747_s6 + $0x990] ss:$8 sps:$4 sm:$0xff]   ;;  %v9839_v57 = vld [vmem:[%s13747_s6 + $0xaf4] ss:$8 sps:$4 sm:$0xff]  }
 0x2ef   : > { %7166 = vmatpush1.bf16.msra.mxu0 %v9704_v42  ;;  %v9787_v42 = vld [vmem:[%s13747_s6 + $0x984] ss:$8 sps:$4 sm:$0xff]   ;;  %v4155_v49 = vrot.slane %v12791_v9, %v10944_v23  ;;  %v9792_v9 = vld [vmem:[%s13747_s6 + $0xb70] ss:$8 sps:$4 sm:$0xff]  }
 0x2f0   : > { %7167 = vmatprep.subr.bf16.mxu0 %v9712_v28  ;;  %v9790_v28 = vld [vmem:[%s13747_s6 + $0xa74] ss:$8 sps:$4 sm:$0xff]  }
 0x2f1   : > { %7207 = vmatpush1.bf16.msra.mxu1 %v9707_v45  ;;  %v9785_v45 = vld [vmem:[%s13747_s6 + $0x980] ss:$8 sps:$4 sm:$0xff]  }
 0x2f2   : > { %7208 = vmatprep.subr.bf16.mxu1 %v9715_v60  ;;  %v9794_v60 = vld [vmem:[%s13747_s6 + $0xb74] ss:$8 sps:$4 sm:$0xff]  }
 0x2f3   : > { %7168 = vmatpush1.bf16.msra.mxu0 %v9710_v39  ;;  %v9788_v39 = vld [vmem:[%s13747_s6 + $0xa70] ss:$8 sps:$4 sm:$0xff]  }
 0x2f4   : > { %7169 = vmatprep.subr.bf16.mxu0 %v9718_v5  ;;  %v4176_v5 = vrot.slane %v4148_v10, %v10944_v23  ;;  %v9846_v10 = vld [vmem:[%s13747_s6 + $0xbe0] ss:$8 sps:$4 sm:$0xff]  }
 0x2f5   : > { %7209 = vmatpush1.bf16.msra.mxu1 %v9713_v24  ;;  %v9797_v24 = vld [vmem:[%s13747_s6 + $0xa64] ss:$8 sps:$4 sm:$0xff]  }
 0x2f6   : > { %7210 = vmatprep.subr.bf16.mxu1 %v9721_v7 }
 0x2f7   : > { %7170 = vmatpush1.bf16.msra.mxu0 %v9716_v58  ;;  %v4177_v58 = vcombine.high %v4155_v49, %v4155_v49 }
 0x2f8   : > { %7171 = vmatprep.subr.bf16.mxu0 %v9724_v12  ;;  %v9800_v12 = vld [vmem:[%s13747_s6 + $0xb64] ss:$8 sps:$4 sm:$0xff]  }
 0x2f9   : > { %7211 = vmatpush1.bf16.msra.mxu1 %v9719_v52 }
 0x2fa   : > { %7212 = vmatprep.subr.bf16.mxu1 %v9727_v61  ;;  %v4180_v61 = vcombine.high %v4176_v5, %v4176_v5 }
 0x2fb   : > { %7172 = vmatpush1.bf16.msra.mxu0 %v9722_v17  ;;  %v9795_v17 = vld [vmem:[%s13747_s6 + $0xa60] ss:$8 sps:$4 sm:$0xff]  }
 0x2fc   : > { %7173 = vmatprep.subr.bf16.mxu0 %v9730_v4 }
 0x2fd   : > { %7213 = vmatpush1.bf16.msra.mxu1 %v9725_v32 }
 0x2fe   : > { %7214 = vmatprep.subr.bf16.mxu1 %v9733_v62  ;;  %v9803_v62 = vld [vmem:[%s13747_s6 + $0xa54] ss:$8 sps:$4 sm:$0xff]  }
 0x2ff   : > { %7174 = vmatpush1.bf16.msra.mxu0 %v9728_v6 }
 0x300   : > { %7175 = vmatprep.subr.bf16.mxu0 %v9736_v30 }
 0x301   : > { %7215 = vmatpush1.bf16.msra.mxu1 %v9731_v19 }
 0x302   : > { %7216 = vmatprep.subr.bf16.mxu1 %v9739_v15 }
 0x303   : > { %7176 = vmatpush1.bf16.msra.mxu0 %v9734_v51  ;;  %v9806_v51 = vld [vmem:[%s13747_s6 + $0xb54] ss:$8 sps:$4 sm:$0xff]  }
 0x304   : > { %7177 = vmatprep.subr.bf16.mxu0 %v9742_v37 }
 0x305   : > { %7217 = vmatpush1.bf16.msra.mxu1 %v9737_v3 }
 0x306   : > { %7218 = vmatprep.subr.bf16.mxu1 %v9745_v1 }
 0x307   : > { %7178 = vmatpush2.bf16.msra.mxu0 %v9740_v18  ;;  %v9809_v18 = vld [vmem:[%s13747_s6 + $0xa44] ss:$8 sps:$4 sm:$0xff]  }
 0x308   : > { %7179 = vmatprep.subr.bf16.mxu0 %v9748_v31  ;;  %v9804_v31 = vld [vmem:[%s13747_s6 + $0xb50] ss:$8 sps:$4 sm:$0xff]  }
 0x309   : > { %7219 = vmatpush2.bf16.msra.mxu1 %v9743_v55 }
 0x30a   : > { %7220 = vmatprep.subr.bf16.mxu1 %v9751_v29  ;;  %v9812_v29 = vld [vmem:[%s13747_s6 + $0xb44] ss:$8 sps:$4 sm:$0xff]  }
 0x30b   : > { %7180 = vmatpush2.bf16.msra.mxu0 %v9746_v50  ;;  %v9807_v50 = vld [vmem:[%s13747_s6 + $0xa40] ss:$8 sps:$4 sm:$0xff]  }
 0x30c   : > { %7181 = vmatprep.subr.bf16.mxu0 %v9754_v54  ;;  %v9815_v54 = vld [vmem:[%s13747_s6 + $0xa34] ss:$8 sps:$4 sm:$0xff]  }
 0x30d   : > { %7221 = vmatpush2.bf16.msra.mxu1 %v9749_v33  ;;  %v9810_v33 = vld [vmem:[%s13747_s6 + $0xb40] ss:$8 sps:$4 sm:$0xff]  }
 0x30e   : > { %7222 = vmatprep.subr.bf16.mxu1 %v9757_v38  ;;  %v9818_v38 = vld [vmem:[%s13747_s6 + $0xb34] ss:$8 sps:$4 sm:$0xff]  }
 0x30f   : > { %7182 = vmatpush2.bf16.msra.mxu0 %v9752_v20  ;;  %v9813_v20 = vld [vmem:[%s13747_s6 + $0xa30] ss:$8 sps:$4 sm:$0xff]  }
 0x310   : > { %7183 = vmatprep.subr.bf16.mxu0 %v9760_v56  ;;  %v9821_v56 = vld [vmem:[%s13747_s6 + $0xa24] ss:$8 sps:$4 sm:$0xff]  }
 0x311   : > { %7223 = vmatpush2.bf16.msra.mxu1 %v9755_v44  ;;  %v9816_v44 = vld [vmem:[%s13747_s6 + $0xb30] ss:$8 sps:$4 sm:$0xff]  }
 0x312   : > { %7224 = vmatprep.subr.bf16.mxu1 %v9763_v53  ;;  %v9824_v53 = vld [vmem:[%s13747_s6 + $0xb24] ss:$8 sps:$4 sm:$0xff]  }
 0x313   : > { %7184 = vmatpush2.bf16.msra.mxu0 %v9758_v27  ;;  %v9819_v27 = vld [vmem:[%s13747_s6 + $0xa20] ss:$8 sps:$4 sm:$0xff]  }
 0x314   : > { %7185 = vmatprep.subr.bf16.mxu0 %v9766_v35  ;;  %v9827_v35 = vld [vmem:[%s13747_s6 + $0xa14] ss:$8 sps:$4 sm:$0xff]  }
 0x315   : > { %7225 = vmatpush2.bf16.msra.mxu1 %v9761_v26  ;;  %v9822_v26 = vld [vmem:[%s13747_s6 + $0xb20] ss:$8 sps:$4 sm:$0xff]  }
 0x316   : > { %7226 = vmatprep.subr.bf16.mxu1 %v9769_v43  ;;  %v9830_v43 = vld [vmem:[%s13747_s6 + $0xb14] ss:$8 sps:$4 sm:$0xff]  }
 0x317   : > { %7186 = vmatpush2.bf16.msra.mxu0 %v9764_v8  ;;  %v9825_v8 = vld [vmem:[%s13747_s6 + $0xa10] ss:$8 sps:$4 sm:$0xff]  }
 0x318   : > { %7187 = vmatprep.subr.bf16.mxu0 %v9772_v21  ;;  %v9833_v21 = vld [vmem:[%s13747_s6 + $0xa04] ss:$8 sps:$4 sm:$0xff]  }
 0x319   : > { %7227 = vmatpush2.bf16.msra.mxu1 %v9767_v0  ;;  %v9828_v0 = vld [vmem:[%s13747_s6 + $0xb10] ss:$8 sps:$4 sm:$0xff]  }
 0x31a   : > { %7228 = vmatprep.subr.bf16.mxu1 %v9775_v40  ;;  %v9836_v40 = vld [vmem:[%s13747_s6 + $0xb04] ss:$8 sps:$4 sm:$0xff]  }
 0x31b   : > { %7188 = vmatpush2.bf16.msra.mxu0 %v9770_v22  ;;  %v9831_v22 = vld [vmem:[%s13747_s6 + $0xa00] ss:$8 sps:$4 sm:$0xff]  }
 0x31c   : > { %7189 = vmatprep.subr.bf16.mxu0 %v9778_v46  ;;  %v9834_v46 = vld [vmem:[%s13747_s6 + $0xb00] ss:$8 sps:$4 sm:$0xff]  }
 0x31d   : > { %7229 = vmatpush2.bf16.msra.mxu1 %v9773_v25  ;;  %v9842_v25 = vld [vmem:[%s13747_s6 + $0xbf4] ss:$8 sps:$4 sm:$0xff]  }
 0x31e   : > { %7230 = vmatprep.subr.bf16.mxu1 %v9781_v11  ;;  %v9837_v11 = vld [vmem:[%s13747_s6 + $0xaf0] ss:$8 sps:$4 sm:$0xff]  }
 0x31f   : > { %7190 = vmatpush2.bf16.msra.mxu0 %v9776_v63  ;;  %v9845_v63 = vld [vmem:[%s13747_s6 + $0xae4] ss:$8 sps:$4 sm:$0xff]  }
 0x320   : > { %7191 = vmatprep.subr.bf16.mxu0 %v9784_v34  ;;  %v9840_v34 = vld [vmem:[%s13747_s6 + $0xbf0] ss:$8 sps:$4 sm:$0xff]  }
 0x321   : > { %7231 = vmatpush2.bf16.msra.mxu1 %v9779_v2  ;;  %v9848_v2 = vld [vmem:[%s13747_s6 + $0xbe4] ss:$8 sps:$4 sm:$0xff]  }
 0x322   : > { %7232 = vmatprep.subr.bf16.mxu1 %v9787_v42  ;;  %v9843_v42 = vld [vmem:[%s13747_s6 + $0xae0] ss:$8 sps:$4 sm:$0xff]  }
 0x323   : > { %7192 = vmatpush2.bf16.msra.mxu0 %v9782_v59  ;;  %v9851_v59 = vld [vmem:[%s13747_s6 + $0xad4] ss:$8 sps:$4 sm:$0xff]  }
 0x324   : > { %7243 = vmatprep.subr.bf16.mxu0 %v9790_v28  ;;  %v9854_v28 = vld [vmem:[%s13747_s6 + $0xbd4] ss:$8 sps:$4 sm:$0xff]  }
 0x325   : > { %7233 = vmatpush2.bf16.msra.mxu1 %v9785_v45  ;;  %v9849_v45 = vld [vmem:[%s13747_s6 + $0xad0] ss:$8 sps:$4 sm:$0xff]  }
 0x326   : > { %v6949_v7 = vpop.f32.mrf.mxu0  ;;  %7194 = vmatmul.mubr.bf16.vlgmr.msra.gmra.mxu0 %v4155_v49  ;;  %7284 = vmatprep.subr.bf16.mxu1 %v9794_v60  ;;  %v9857_v49 = vld [vmem:[%s13747_s6 + $0xac4] ss:$8 sps:$4 sm:$0xff]   ;;  %v9852_v60 = vld [vmem:[%s13747_s6 + $0xbd0] ss:$8 sps:$4 sm:$0xff]  }
 0x327   : > { %v6950_v52 = vadd.f32 %v6949_v7, %v12844_v16  ;;  %7244 = vmatpush1.bf16.msra.mxu0 %v9788_v39  ;;  %7275 = vmatprep.mubr.bf16.mxu0 %v4176_v5  ;;  %v9798_v16 = vld [vmem:[%s13747_s6 + $0xb60] ss:$8 sps:$4 sm:$0xff]   ;;  %v9860_v39 = vld [vmem:[%s13747_s6 + $0xbc4] ss:$8 sps:$4 sm:$0xff]   ;;  %v9866_v7 = vld [vmem:[%s13747_s6 + $0xbb4] ss:$8 sps:$4 sm:$0xff]  }
 0x328   : > { %v6951_v4 = vpop.f32.mrf.mxu0  ;;  %v6990_v32 = vpop.f32.mrf.mxu1  ;;  %7235 = vmatmul.mubr.bf16.vlgmr.msra.gmra.mxu1 %v4177_v58  ;;  %7245 = vmatprep.subr.bf16.mxu0 %v9797_v24  ;;  %v9855_v5 = vld [vmem:[%s13747_s6 + $0xac0] ss:$8 sps:$4 sm:$0xff]   ;;  %v9863_v24 = vld [vmem:[%s13747_s6 + $0xab4] ss:$8 sps:$4 sm:$0xff]   ;;  %v9861_v58 = vld [vmem:[%s13747_s6 + $0xab0] ss:$8 sps:$4 sm:$0xff]  }
 0x329   : > { %v6952_v6 = vadd.f32 %v6951_v4, %v12852_v13  ;;  %v13052_v30 = vadd.f32 %v6990_v32, %v6950_v52  ;;  %7285 = vmatpush1.bf16.msra.mxu1 %v9792_v9  ;;  %7316 = vmatprep.mubr.bf16.mxu1 %v4180_v61  ;;  %v9801_v13 = vld [vmem:[%s13747_s6 + $0xa50] ss:$8 sps:$4 sm:$0xff]   ;;  %v9858_v9 = vld [vmem:[%s13747_s6 + $0xbc0] ss:$8 sps:$4 sm:$0xff]   ;;  %v9872_v61 = vld [vmem:[%s13747_s6 + $0xba4] ss:$8 sps:$4 sm:$0xff]  }
 0x32a   : > { %v6953_v19 = vpop.f32.mrf.mxu0  ;;  %v6992_v15 = vpop.f32.mrf.mxu1  ;;  %7286 = vmatprep.subr.bf16.mxu1 %v9800_v12  ;;  %v9869_v12 = vld [vmem:[%s13747_s6 + $0xaa4] ss:$8 sps:$4 sm:$0xff]   ;;  %v9864_v52 = vld [vmem:[%s13747_s6 + $0xbb0] ss:$8 sps:$4 sm:$0xff]   ;;  %v9875_v4 = vld [vmem:[%s13747_s6 + $0xa94] ss:$8 sps:$4 sm:$0xff]  }
 0x32b   : > { %v13060_v37 = vadd.f32 %v6992_v15, %v6952_v6  ;;  %7246 = vmatpush1.bf16.msra.mxu0 %v9795_v17  ;;  %v9867_v17 = vld [vmem:[%s13747_s6 + $0xaa0] ss:$8 sps:$4 sm:$0xff]   ;;  %v9878_v6 = vld [vmem:[%s13747_s6 + $0xb94] ss:$8 sps:$4 sm:$0xff]   ;;  %v9881_v15 = vld [vmem:[%s13747_s6 + $0xa84] ss:$8 sps:$4 sm:$0xff]  }
 0x32c   : > { %v6954_v3 = vpop.f32.mrf.mxu0  ;;  %v6994_v1 = vpop.f32.mrf.mxu1  ;;  %7247 = vmatprep.subr.bf16.mxu0 %v9803_v62  ;;  %v13200_v32 = vld [vmem:[#allocation3 + $0x18] sm:$0xff] }
 0x32d   : > { %7287 = vmatpush1.bf16.msra.mxu1 %v9798_v16  ;;  %v9870_v62 = vld [vmem:[%s13747_s6 + $0xba0] ss:$8 sps:$4 sm:$0xff]   ;;  %v9873_v16 = vld [vmem:[%s13747_s6 + $0xa90] ss:$8 sps:$4 sm:$0xff]   ;;  %v13213_v19 = vrot.slane %v13200_v32, %v10944_v23 }
 0x32e   : > { %v6995_v55 = vpop.f32.mrf.mxu1  ;;  %7288 = vmatprep.subr.bf16.mxu1 %v9806_v51  ;;  %v9876_v51 = vld [vmem:[%s13747_s6 + $0xb90] ss:$8 sps:$4 sm:$0xff]   ;;  %v9879_v3 = vld [vmem:[%s13747_s6 + $0xa80] ss:$8 sps:$4 sm:$0xff]  }
 0x32f   : > { %7248 = vmatpush1.bf16.msra.mxu0 %v9801_v13  ;;  %v9884_v13 = vld [vmem:[%s13747_s6 + $0xb84] ss:$8 sps:$4 sm:$0xff]   ;;  %v4196_v1 = vcombine.high %v13213_v19, %v13213_v19  ;;  %v4162_v55 = vrot.slane %v13004_v36, %v10944_v23  ;;  %v9888_v36 = vld [vmem:[%s13747_s6 + $0xd70] ss:$8 sps:$4 sm:$0xff]  }
 0x330   : > { %7249 = vmatprep.subr.bf16.mxu0 %v9809_v18  ;;  %v9887_v18 = vld [vmem:[%s13747_s6 + $0xc74] ss:$8 sps:$4 sm:$0xff]  }
 0x331   : > { %7289 = vmatpush1.bf16.msra.mxu1 %v9804_v31  ;;  %v9882_v31 = vld [vmem:[%s13747_s6 + $0xb80] ss:$8 sps:$4 sm:$0xff]  }
 0x332   : > { %7290 = vmatprep.subr.bf16.mxu1 %v9812_v29  ;;  %v9890_v29 = vld [vmem:[%s13747_s6 + $0xd74] ss:$8 sps:$4 sm:$0xff]  }
 0x333   : > { %7250 = vmatpush1.bf16.msra.mxu0 %v9807_v50  ;;  %v9885_v50 = vld [vmem:[%s13747_s6 + $0xc70] ss:$8 sps:$4 sm:$0xff]  }
 0x334   : > { %7251 = vmatprep.subr.bf16.mxu0 %v9815_v54  ;;  %v4218_v54 = vrot.slane %v4196_v1, %v10944_v23  ;;  %v9947_v1 = vld [vmem:[%s13747_s6 + $0xcd4] ss:$8 sps:$4 sm:$0xff]  }
 0x335   : > { %7291 = vmatpush1.bf16.msra.mxu1 %v9810_v33  ;;  %v9893_v33 = vld [vmem:[%s13747_s6 + $0xc64] ss:$8 sps:$4 sm:$0xff]  }
 0x336   : > { %7292 = vmatprep.subr.bf16.mxu1 %v9818_v38 }
 0x337   : > { %7252 = vmatpush1.bf16.msra.mxu0 %v9813_v20  ;;  %v4178_v20 = vcombine.high %v4162_v55, %v4162_v55 }
 0x338   : > { %7253 = vmatprep.subr.bf16.mxu0 %v9821_v56  ;;  %v9896_v56 = vld [vmem:[%s13747_s6 + $0xd64] ss:$8 sps:$4 sm:$0xff]  }
 0x339   : > { %7293 = vmatpush1.bf16.msra.mxu1 %v9816_v44 }
 0x33a   : > { %7294 = vmatprep.subr.bf16.mxu1 %v9824_v53  ;;  %v4228_v53 = vcombine.high %v4218_v54, %v4218_v54 }
 0x33b   : > { %7254 = vmatpush1.bf16.msra.mxu0 %v9819_v27  ;;  %v9891_v27 = vld [vmem:[%s13747_s6 + $0xc60] ss:$8 sps:$4 sm:$0xff]  }
 0x33c   : > { %7255 = vmatprep.subr.bf16.mxu0 %v9827_v35 }
 0x33d   : > { %7295 = vmatpush1.bf16.msra.mxu1 %v9822_v26 }
 0x33e   : > { %7296 = vmatprep.subr.bf16.mxu1 %v9830_v43  ;;  %v9899_v43 = vld [vmem:[%s13747_s6 + $0xc54] ss:$8 sps:$4 sm:$0xff]  }
 0x33f   : > { %7256 = vmatpush1.bf16.msra.mxu0 %v9825_v8 }
 0x340   : > { %7257 = vmatprep.subr.bf16.mxu0 %v9833_v21 }
 0x341   : > { %7297 = vmatpush1.bf16.msra.mxu1 %v9828_v0 }
 0x342   : > { %7298 = vmatprep.subr.bf16.mxu1 %v9836_v40 }
 0x343   : > { %7258 = vmatpush1.bf16.msra.mxu0 %v9831_v22  ;;  %v9902_v22 = vld [vmem:[%s13747_s6 + $0xd54] ss:$8 sps:$4 sm:$0xff]  }
 0x344   : > { %7259 = vmatprep.subr.bf16.mxu0 %v9839_v57 }
 0x345   : > { %7299 = vmatpush1.bf16.msra.mxu1 %v9834_v46 }
 0x346   : > { %7300 = vmatprep.subr.bf16.mxu1 %v9842_v25 }
 0x347   : > { %7260 = vmatpush2.bf16.msra.mxu0 %v9837_v11  ;;  %v9905_v11 = vld [vmem:[%s13747_s6 + $0xc44] ss:$8 sps:$4 sm:$0xff]  }
 0x348   : > { %7261 = vmatprep.subr.bf16.mxu0 %v9845_v63  ;;  %v9900_v63 = vld [vmem:[%s13747_s6 + $0xd50] ss:$8 sps:$4 sm:$0xff]  }
 0x349   : > { %7301 = vmatpush2.bf16.msra.mxu1 %v9840_v34 }
 0x34a   : > { %7302 = vmatprep.subr.bf16.mxu1 %v9848_v2  ;;  %v9908_v2 = vld [vmem:[%s13747_s6 + $0xd44] ss:$8 sps:$4 sm:$0xff]  }
 0x34b   : > { %7262 = vmatpush2.bf16.msra.mxu0 %v9843_v42  ;;  %v9903_v42 = vld [vmem:[%s13747_s6 + $0xc40] ss:$8 sps:$4 sm:$0xff]  }
 0x34c   : > { %7263 = vmatprep.subr.bf16.mxu0 %v9851_v59  ;;  %v9911_v59 = vld [vmem:[%s13747_s6 + $0xc34] ss:$8 sps:$4 sm:$0xff]  }
 0x34d   : > { %7303 = vmatpush2.bf16.msra.mxu1 %v9846_v10  ;;  %v9906_v10 = vld [vmem:[%s13747_s6 + $0xd40] ss:$8 sps:$4 sm:$0xff]  }
 0x34e   : > { %7304 = vmatprep.subr.bf16.mxu1 %v9854_v28  ;;  %v9914_v28 = vld [vmem:[%s13747_s6 + $0xd34] ss:$8 sps:$4 sm:$0xff]  }
 0x34f   : > { %7264 = vmatpush2.bf16.msra.mxu0 %v9849_v45  ;;  %v9909_v45 = vld [vmem:[%s13747_s6 + $0xc30] ss:$8 sps:$4 sm:$0xff]  }
 0x350   : > { %7265 = vmatprep.subr.bf16.mxu0 %v9857_v49  ;;  %v9917_v49 = vld [vmem:[%s13747_s6 + $0xc24] ss:$8 sps:$4 sm:$0xff]  }
 0x351   : > { %7305 = vmatpush2.bf16.msra.mxu1 %v9852_v60  ;;  %v9912_v60 = vld [vmem:[%s13747_s6 + $0xd30] ss:$8 sps:$4 sm:$0xff]  }
 0x352   : > { %7306 = vmatprep.subr.bf16.mxu1 %v9860_v39  ;;  %v9920_v39 = vld [vmem:[%s13747_s6 + $0xd24] ss:$8 sps:$4 sm:$0xff]  }
 0x353   : > { %7266 = vmatpush2.bf16.msra.mxu0 %v9855_v5  ;;  %v9915_v5 = vld [vmem:[%s13747_s6 + $0xc20] ss:$8 sps:$4 sm:$0xff]  }
 0x354   : > { %7267 = vmatprep.subr.bf16.mxu0 %v9863_v24  ;;  %v9923_v24 = vld [vmem:[%s13747_s6 + $0xc14] ss:$8 sps:$4 sm:$0xff]  }
 0x355   : > { %7307 = vmatpush2.bf16.msra.mxu1 %v9858_v9  ;;  %v9918_v9 = vld [vmem:[%s13747_s6 + $0xd20] ss:$8 sps:$4 sm:$0xff]  }
 0x356   : > { %7308 = vmatprep.subr.bf16.mxu1 %v9866_v7  ;;  %v9926_v7 = vld [vmem:[%s13747_s6 + $0xd14] ss:$8 sps:$4 sm:$0xff]  }
 0x357   : > { %7268 = vmatpush2.bf16.msra.mxu0 %v9861_v58  ;;  %v9921_v58 = vld [vmem:[%s13747_s6 + $0xc10] ss:$8 sps:$4 sm:$0xff]  }
 0x358   : > { %7269 = vmatprep.subr.bf16.mxu0 %v9869_v12  ;;  %v9929_v12 = vld [vmem:[%s13747_s6 + $0xc04] ss:$8 sps:$4 sm:$0xff]  }
 0x359   : > { %7309 = vmatpush2.bf16.msra.mxu1 %v9864_v52  ;;  %v9924_v52 = vld [vmem:[%s13747_s6 + $0xd10] ss:$8 sps:$4 sm:$0xff]  }
 0x35a   : > { %7310 = vmatprep.subr.bf16.mxu1 %v9872_v61  ;;  %v9932_v61 = vld [vmem:[%s13747_s6 + $0xd04] ss:$8 sps:$4 sm:$0xff]  }
 0x35b   : > { %7270 = vmatpush2.bf16.msra.mxu0 %v9867_v17  ;;  %v9927_v17 = vld [vmem:[%s13747_s6 + $0xc00] ss:$8 sps:$4 sm:$0xff]  }
 0x35c   : > { %7271 = vmatprep.subr.bf16.mxu0 %v9875_v4  ;;  %v9935_v4 = vld [vmem:[%s13747_s6 + $0xcf4] ss:$8 sps:$4 sm:$0xff]  }
 0x35d   : > { %7311 = vmatpush2.bf16.msra.mxu1 %v9870_v62  ;;  %v9930_v62 = vld [vmem:[%s13747_s6 + $0xd00] ss:$8 sps:$4 sm:$0xff]  }
 0x35e   : > { %7312 = vmatprep.subr.bf16.mxu1 %v9878_v6  ;;  %v9938_v6 = vld [vmem:[%s13747_s6 + $0xdf4] ss:$8 sps:$4 sm:$0xff]  }
 0x35f   : > { %7272 = vmatpush2.bf16.msra.mxu0 %v9873_v16  ;;  %v9933_v16 = vld [vmem:[%s13747_s6 + $0xcf0] ss:$8 sps:$4 sm:$0xff]  }
 0x360   : > { %7273 = vmatprep.subr.bf16.mxu0 %v9881_v15  ;;  %v9941_v15 = vld [vmem:[%s13747_s6 + $0xce4] ss:$8 sps:$4 sm:$0xff]  }
 0x361   : > { %7313 = vmatpush2.bf16.msra.mxu1 %v9876_v51  ;;  %v9936_v51 = vld [vmem:[%s13747_s6 + $0xdf0] ss:$8 sps:$4 sm:$0xff]  }
 0x362   : > { %7314 = vmatprep.subr.bf16.mxu1 %v9884_v13  ;;  %v9944_v13 = vld [vmem:[%s13747_s6 + $0xde4] ss:$8 sps:$4 sm:$0xff]  }
 0x363   : > { %7274 = vmatpush2.bf16.msra.mxu0 %v9879_v3  ;;  %v9939_v3 = vld [vmem:[%s13747_s6 + $0xce0] ss:$8 sps:$4 sm:$0xff]  }
 0x364   : > { %7325 = vmatprep.subr.bf16.mxu0 %v9887_v18  ;;  %v9942_v18 = vld [vmem:[%s13747_s6 + $0xde0] ss:$8 sps:$4 sm:$0xff]  }
 0x365   : > { %7315 = vmatpush2.bf16.msra.mxu1 %v9882_v31  ;;  %v9950_v31 = vld [vmem:[%s13747_s6 + $0xdd4] ss:$8 sps:$4 sm:$0xff]  }
 0x366   : > { %v7031_v38 = vpop.f32.mrf.mxu0  ;;  %7276 = vmatmul.mubr.bf16.vlgmr.msra.gmra.mxu0 %v4162_v55  ;;  %7366 = vmatprep.subr.bf16.mxu1 %v9890_v29  ;;  %v9945_v55 = vld [vmem:[%s13747_s6 + $0xcd0] ss:$8 sps:$4 sm:$0xff]   ;;  %v9953_v29 = vld [vmem:[%s13747_s6 + $0xcc4] ss:$8 sps:$4 sm:$0xff]  }
 0x367   : > { %v7032_v44 = vadd.f32 %v7031_v38, %v13052_v30  ;;  %7326 = vmatpush1.bf16.msra.mxu0 %v9885_v50  ;;  %7357 = vmatprep.mubr.bf16.mxu0 %v4218_v54  ;;  %v9894_v30 = vld [vmem:[%s13747_s6 + $0xd60] ss:$8 sps:$4 sm:$0xff]   ;;  %v9948_v50 = vld [vmem:[%s13747_s6 + $0xdd0] ss:$8 sps:$4 sm:$0xff]   ;;  %v9956_v54 = vld [vmem:[%s13747_s6 + $0xdc4] ss:$8 sps:$4 sm:$0xff]  }
 0x368   : > { %v7033_v35 = vpop.f32.mrf.mxu0  ;;  %v7072_v26 = vpop.f32.mrf.mxu1  ;;  %7317 = vmatmul.mubr.bf16.vlgmr.msra.gmra.mxu1 %v4178_v20  ;;  %7327 = vmatprep.subr.bf16.mxu0 %v9893_v33  ;;  %v9951_v33 = vld [vmem:[%s13747_s6 + $0xcc0] ss:$8 sps:$4 sm:$0xff]   ;;  %v9962_v20 = vld [vmem:[%s13747_s6 + $0xdb4] ss:$8 sps:$4 sm:$0xff]  }
 0x369   : > { %v7034_v8 = vadd.f32 %v7033_v35, %v13060_v37  ;;  %v13261_v21 = vadd.f32 %v7072_v26, %v7032_v44  ;;  %7367 = vmatpush1.bf16.msra.mxu1 %v9888_v36  ;;  %7398 = vmatprep.mubr.bf16.mxu1 %v4228_v53  ;;  %v9897_v37 = vld [vmem:[%s13747_s6 + $0xc50] ss:$8 sps:$4 sm:$0xff]   ;;  %v9959_v36 = vld [vmem:[%s13747_s6 + $0xcb4] ss:$8 sps:$4 sm:$0xff]   ;;  %v9954_v38 = vld [vmem:[%s13747_s6 + $0xdc0] ss:$8 sps:$4 sm:$0xff]   ;;  %v4181_v26 = vcombine.high %v13200_v32, %v13200_v32 }
 0x36a   : > { %v7035_v0 = vpop.f32.mrf.mxu0  ;;  %v7074_v40 = vpop.f32.mrf.mxu1  ;;  %7368 = vmatprep.subr.bf16.mxu1 %v9896_v56  ;;  %v9957_v56 = vld [vmem:[%s13747_s6 + $0xcb0] ss:$8 sps:$4 sm:$0xff]   ;;  %v9965_v44 = vld [vmem:[%s13747_s6 + $0xca4] ss:$8 sps:$4 sm:$0xff]   ;;  %v9963_v35 = vld [vmem:[%s13747_s6 + $0xca0] ss:$8 sps:$4 sm:$0xff]  }
 0x36b   : > { %v13269_v57 = vadd.f32 %v7074_v40, %v7034_v8  ;;  %7328 = vmatpush1.bf16.msra.mxu0 %v9891_v27  ;;  %v9960_v53 = vld [vmem:[%s13747_s6 + $0xdb0] ss:$8 sps:$4 sm:$0xff]   ;;  %v9968_v27 = vld [vmem:[%s13747_s6 + $0xda4] ss:$8 sps:$4 sm:$0xff]   ;;  %v9966_v8 = vld [vmem:[%s13747_s6 + $0xda0] ss:$8 sps:$4 sm:$0xff]   ;;  %v13421_v0 = vrot.slane %v4181_v26, %v10944_v23 }
 0x36c   : > { %v7036_v46 = vpop.f32.mrf.mxu0  ;;  %v7076_v25 = vpop.f32.mrf.mxu1  ;;  %7329 = vmatprep.subr.bf16.mxu0 %v9899_v43  ;;  %v9971_v43 = vld [vmem:[%s13747_s6 + $0xc94] ss:$8 sps:$4 sm:$0xff]   ;;  %v9969_v32 = vld [vmem:[%s13747_s6 + $0xc90] ss:$8 sps:$4 sm:$0xff]   ;;  %v9977_v40 = vld [vmem:[%s13747_s6 + $0xc84] ss:$8 sps:$4 sm:$0xff]  }
 0x36d   : > { %7369 = vmatpush1.bf16.msra.mxu1 %v9894_v30  ;;  %v9974_v30 = vld [vmem:[%s13747_s6 + $0xd94] ss:$8 sps:$4 sm:$0xff]   ;;  %v9975_v46 = vld [vmem:[%s13747_s6 + $0xc80] ss:$8 sps:$4 sm:$0xff]   ;;  %v4197_v25 = vcombine.high %v13421_v0, %v13421_v0 }
 0x36e   : > { %v7077_v34 = vpop.f32.mrf.mxu1  ;;  %7370 = vmatprep.subr.bf16.mxu1 %v9902_v22  ;;  %v9972_v22 = vld [vmem:[%s13747_s6 + $0xd90] ss:$8 sps:$4 sm:$0xff]   ;;  %v10032_v26 = vld [vmem:[%s13747_s6 + $0xef4] ss:$8 sps:$4 sm:$0xff]  }
 0x36f   : > { %7330 = vmatpush1.bf16.msra.mxu0 %v9897_v37  ;;  %v9980_v37 = vld [vmem:[%s13747_s6 + $0xd84] ss:$8 sps:$4 sm:$0xff]   ;;  %v4204_v34 = vrot.slane %v13213_v19, %v10944_v23  ;;  %v9985_v19 = vld [vmem:[%s13747_s6 + $0xf70] ss:$8 sps:$4 sm:$0xff]  }
 0x370   : > { %7331 = vmatprep.subr.bf16.mxu0 %v9905_v11  ;;  %v9983_v11 = vld [vmem:[%s13747_s6 + $0xe74] ss:$8 sps:$4 sm:$0xff]  }
 0x371   : > { %7371 = vmatpush1.bf16.msra.mxu1 %v9900_v63  ;;  %v9978_v63 = vld [vmem:[%s13747_s6 + $0xd80] ss:$8 sps:$4 sm:$0xff]  }
 0x372   : > { %7372 = vmatprep.subr.bf16.mxu1 %v9908_v2  ;;  %v9987_v2 = vld [vmem:[%s13747_s6 + $0xf74] ss:$8 sps:$4 sm:$0xff]  }
 0x373   : > { %7332 = vmatpush1.bf16.msra.mxu0 %v9903_v42  ;;  %v9981_v42 = vld [vmem:[%s13747_s6 + $0xe70] ss:$8 sps:$4 sm:$0xff]  }
 0x374   : > { %7333 = vmatprep.subr.bf16.mxu0 %v9911_v59  ;;  %v4225_v59 = vrot.slane %v4197_v25, %v10944_v23  ;;  %v10039_v25 = vld [vmem:[%s13747_s6 + $0xfe0] ss:$8 sps:$4 sm:$0xff]  }
 0x375   : > { %7373 = vmatpush1.bf16.msra.mxu1 %v9906_v10  ;;  %v9990_v10 = vld [vmem:[%s13747_s6 + $0xe64] ss:$8 sps:$4 sm:$0xff]  }
 0x376   : > { %7374 = vmatprep.subr.bf16.mxu1 %v9914_v28 }
 0x377   : > { %7334 = vmatpush1.bf16.msra.mxu0 %v9909_v45  ;;  %v4226_v45 = vcombine.high %v4204_v34, %v4204_v34 }
 0x378   : > { %7335 = vmatprep.subr.bf16.mxu0 %v9917_v49  ;;  %v9993_v49 = vld [vmem:[%s13747_s6 + $0xf64] ss:$8 sps:$4 sm:$0xff]  }
 0x379   : > { %7375 = vmatpush1.bf16.msra.mxu1 %v9912_v60 }
 0x37a   : > { %7376 = vmatprep.subr.bf16.mxu1 %v9920_v39  ;;  %v4229_v39 = vcombine.high %v4225_v59, %v4225_v59 }
 0x37b   : > { %7336 = vmatpush1.bf16.msra.mxu0 %v9915_v5  ;;  %v9988_v5 = vld [vmem:[%s13747_s6 + $0xe60] ss:$8 sps:$4 sm:$0xff]  }
 0x37c   : > { %7337 = vmatprep.subr.bf16.mxu0 %v9923_v24 }
 0x37d   : > { %7377 = vmatpush1.bf16.msra.mxu1 %v9918_v9 }
 0x37e   : > { %7378 = vmatprep.subr.bf16.mxu1 %v9926_v7  ;;  %v9996_v7 = vld [vmem:[%s13747_s6 + $0xe54] ss:$8 sps:$4 sm:$0xff]  }
 0x37f   : > { %7338 = vmatpush1.bf16.msra.mxu0 %v9921_v58 }
 0x380   : > { %7339 = vmatprep.subr.bf16.mxu0 %v9929_v12 }
 0x381   : > { %7379 = vmatpush1.bf16.msra.mxu1 %v9924_v52 }
 0x382   : > { %7380 = vmatprep.subr.bf16.mxu1 %v9932_v61 }
 0x383   : > { %7340 = vmatpush1.bf16.msra.mxu0 %v9927_v17  ;;  %v9999_v17 = vld [vmem:[%s13747_s6 + $0xf54] ss:$8 sps:$4 sm:$0xff]  }
 0x384   : > { %7341 = vmatprep.subr.bf16.mxu0 %v9935_v4 }
 0x385   : > { %7381 = vmatpush1.bf16.msra.mxu1 %v9930_v62 }
 0x386   : > { %7382 = vmatprep.subr.bf16.mxu1 %v9938_v6 }
 0x387   : > { %7342 = vmatpush2.bf16.msra.mxu0 %v9933_v16  ;;  %v10002_v16 = vld [vmem:[%s13747_s6 + $0xe44] ss:$8 sps:$4 sm:$0xff]  }
 0x388   : > { %7343 = vmatprep.subr.bf16.mxu0 %v9941_v15  ;;  %v9997_v15 = vld [vmem:[%s13747_s6 + $0xf50] ss:$8 sps:$4 sm:$0xff]  }
 0x389   : > { %7383 = vmatpush2.bf16.msra.mxu1 %v9936_v51 }
 0x38a   : > { %7384 = vmatprep.subr.bf16.mxu1 %v9944_v13  ;;  %v10005_v13 = vld [vmem:[%s13747_s6 + $0xf44] ss:$8 sps:$4 sm:$0xff]  }
 0x38b   : > { %7344 = vmatpush2.bf16.msra.mxu0 %v9939_v3  ;;  %v10000_v3 = vld [vmem:[%s13747_s6 + $0xe40] ss:$8 sps:$4 sm:$0xff]  }
 0x38c   : > { %7345 = vmatprep.subr.bf16.mxu0 %v9947_v1  ;;  %v10008_v1 = vld [vmem:[%s13747_s6 + $0xe34] ss:$8 sps:$4 sm:$0xff]  }
 0x38d   : > { %7385 = vmatpush2.bf16.msra.mxu1 %v9942_v18  ;;  %v10003_v18 = vld [vmem:[%s13747_s6 + $0xf40] ss:$8 sps:$4 sm:$0xff]  }
 0x38e   : > { %7386 = vmatprep.subr.bf16.mxu1 %v9950_v31  ;;  %v10011_v31 = vld [vmem:[%s13747_s6 + $0xf34] ss:$8 sps:$4 sm:$0xff]  }
 0x38f   : > { %7346 = vmatpush2.bf16.msra.mxu0 %v9945_v55  ;;  %v10006_v55 = vld [vmem:[%s13747_s6 + $0xe30] ss:$8 sps:$4 sm:$0xff]  }
 0x390   : > { %7347 = vmatprep.subr.bf16.mxu0 %v9953_v29  ;;  %v10014_v29 = vld [vmem:[%s13747_s6 + $0xe24] ss:$8 sps:$4 sm:$0xff]  }
 0x391   : > { %7387 = vmatpush2.bf16.msra.mxu1 %v9948_v50  ;;  %v10009_v50 = vld [vmem:[%s13747_s6 + $0xf30] ss:$8 sps:$4 sm:$0xff]  }
 0x392   : > { %7388 = vmatprep.subr.bf16.mxu1 %v9956_v54  ;;  %v10017_v54 = vld [vmem:[%s13747_s6 + $0xf24] ss:$8 sps:$4 sm:$0xff]  }
 0x393   : > { %7348 = vmatpush2.bf16.msra.mxu0 %v9951_v33  ;;  %v10012_v33 = vld [vmem:[%s13747_s6 + $0xe20] ss:$8 sps:$4 sm:$0xff]  }
 0x394   : > { %7349 = vmatprep.subr.bf16.mxu0 %v9959_v36  ;;  %v10020_v36 = vld [vmem:[%s13747_s6 + $0xe14] ss:$8 sps:$4 sm:$0xff]  }
 0x395   : > { %7389 = vmatpush2.bf16.msra.mxu1 %v9954_v38  ;;  %v10015_v38 = vld [vmem:[%s13747_s6 + $0xf20] ss:$8 sps:$4 sm:$0xff]  }
 0x396   : > { %7390 = vmatprep.subr.bf16.mxu1 %v9962_v20  ;;  %v10023_v20 = vld [vmem:[%s13747_s6 + $0xf14] ss:$8 sps:$4 sm:$0xff]  }
 0x397   : > { %7350 = vmatpush2.bf16.msra.mxu0 %v9957_v56  ;;  %v10018_v56 = vld [vmem:[%s13747_s6 + $0xe10] ss:$8 sps:$4 sm:$0xff]  }
 0x398   : > { %7351 = vmatprep.subr.bf16.mxu0 %v9965_v44  ;;  %v10026_v44 = vld [vmem:[%s13747_s6 + $0xe04] ss:$8 sps:$4 sm:$0xff]  }
 0x399   : > { %7391 = vmatpush2.bf16.msra.mxu1 %v9960_v53  ;;  %v10021_v53 = vld [vmem:[%s13747_s6 + $0xf10] ss:$8 sps:$4 sm:$0xff]  }
 0x39a   : > { %7392 = vmatprep.subr.bf16.mxu1 %v9968_v27  ;;  %v10029_v27 = vld [vmem:[%s13747_s6 + $0xf04] ss:$8 sps:$4 sm:$0xff]  }
 0x39b   : > { %7352 = vmatpush2.bf16.msra.mxu0 %v9963_v35  ;;  %v10024_v35 = vld [vmem:[%s13747_s6 + $0xe00] ss:$8 sps:$4 sm:$0xff]  }
 0x39c   : > { %7353 = vmatprep.subr.bf16.mxu0 %v9971_v43  ;;  %v10027_v43 = vld [vmem:[%s13747_s6 + $0xf00] ss:$8 sps:$4 sm:$0xff]  }
 0x39d   : > { %7393 = vmatpush2.bf16.msra.mxu1 %v9966_v8  ;;  %v10035_v8 = vld [vmem:[%s13747_s6 + $0xff4] ss:$8 sps:$4 sm:$0xff]  }
 0x39e   : > { %7394 = vmatprep.subr.bf16.mxu1 %v9974_v30  ;;  %v10030_v30 = vld [vmem:[%s13747_s6 + $0xef0] ss:$8 sps:$4 sm:$0xff]  }
 0x39f   : > { %7354 = vmatpush2.bf16.msra.mxu0 %v9969_v32  ;;  %v10038_v32 = vld [vmem:[%s13747_s6 + $0xee4] ss:$8 sps:$4 sm:$0xff]  }
 0x3a0   : > { %7355 = vmatprep.subr.bf16.mxu0 %v9977_v40  ;;  %v10033_v40 = vld [vmem:[%s13747_s6 + $0xff0] ss:$8 sps:$4 sm:$0xff]  }
 0x3a1   : > { %7395 = vmatpush2.bf16.msra.mxu1 %v9972_v22  ;;  %v10041_v22 = vld [vmem:[%s13747_s6 + $0xfe4] ss:$8 sps:$4 sm:$0xff]  }
 0x3a2   : > { %7396 = vmatprep.subr.bf16.mxu1 %v9980_v37  ;;  %v10036_v37 = vld [vmem:[%s13747_s6 + $0xee0] ss:$8 sps:$4 sm:$0xff]  }
 0x3a3   : > { %7356 = vmatpush2.bf16.msra.mxu0 %v9975_v46  ;;  %v10044_v46 = vld [vmem:[%s13747_s6 + $0xed4] ss:$8 sps:$4 sm:$0xff]  }
 0x3a4   : > { %7407 = vmatprep.subr.bf16.mxu0 %v9983_v11  ;;  %v10047_v11 = vld [vmem:[%s13747_s6 + $0xfd4] ss:$8 sps:$4 sm:$0xff]  }
 0x3a5   : > { %7397 = vmatpush2.bf16.msra.mxu1 %v9978_v63  ;;  %v10042_v63 = vld [vmem:[%s13747_s6 + $0xed0] ss:$8 sps:$4 sm:$0xff]  }
 0x3a6   : > { %v7113_v28 = vpop.f32.mrf.mxu0  ;;  %7358 = vmatmul.mubr.bf16.vlgmr.msra.gmra.mxu0 %v4204_v34  ;;  %7448 = vmatprep.subr.bf16.mxu1 %v9987_v2  ;;  %v10050_v34 = vld [vmem:[%s13747_s6 + $0xec4] ss:$8 sps:$4 sm:$0xff]   ;;  %v10045_v2 = vld [vmem:[%s13747_s6 + $0xfd0] ss:$8 sps:$4 sm:$0xff]  }
 0x3a7   : > { %v7114_v60 = vadd.f32 %v7113_v28, %v13261_v21  ;;  %7408 = vmatpush1.bf16.msra.mxu0 %v9981_v42  ;;  %7439 = vmatprep.mubr.bf16.mxu0 %v4225_v59  ;;  %v9991_v21 = vld [vmem:[%s13747_s6 + $0xf60] ss:$8 sps:$4 sm:$0xff]   ;;  %v10053_v42 = vld [vmem:[%s13747_s6 + $0xfc4] ss:$8 sps:$4 sm:$0xff]   ;;  %v10059_v28 = vld [vmem:[%s13747_s6 + $0xfb4] ss:$8 sps:$4 sm:$0xff]  }
 0x3a8   : > { %v7115_v24 = vpop.f32.mrf.mxu0  ;;  %v7154_v9 = vpop.f32.mrf.mxu1  ;;  %7399 = vmatmul.mubr.bf16.vlgmr.msra.gmra.mxu1 %v4226_v45  ;;  %7409 = vmatprep.subr.bf16.mxu0 %v9990_v10  ;;  %v10048_v59 = vld [vmem:[%s13747_s6 + $0xec0] ss:$8 sps:$4 sm:$0xff]   ;;  %v10056_v10 = vld [vmem:[%s13747_s6 + $0xeb4] ss:$8 sps:$4 sm:$0xff]   ;;  %v10054_v45 = vld [vmem:[%s13747_s6 + $0xeb0] ss:$8 sps:$4 sm:$0xff]  }
 0x3a9   : > { %v7116_v58 = vadd.f32 %v7115_v24, %v13269_v57  ;;  %v13469_v12 = vadd.f32 %v7154_v9, %v7114_v60  ;;  %7449 = vmatpush1.bf16.msra.mxu1 %v9985_v19  ;;  %7480 = vmatprep.mubr.bf16.mxu1 %v4229_v39  ;;  %v9994_v57 = vld [vmem:[%s13747_s6 + $0xe50] ss:$8 sps:$4 sm:$0xff]   ;;  %v10051_v19 = vld [vmem:[%s13747_s6 + $0xfc0] ss:$8 sps:$4 sm:$0xff]   ;;  %v10065_v39 = vld [vmem:[%s13747_s6 + $0xfa4] ss:$8 sps:$4 sm:$0xff]  }
 0x3aa   : > { %v7117_v52 = vpop.f32.mrf.mxu0  ;;  %v7156_v61 = vpop.f32.mrf.mxu1  ;;  %7450 = vmatprep.subr.bf16.mxu1 %v9993_v49  ;;  %v10062_v49 = vld [vmem:[%s13747_s6 + $0xea4] ss:$8 sps:$4 sm:$0xff]   ;;  %v10057_v60 = vld [vmem:[%s13747_s6 + $0xfb0] ss:$8 sps:$4 sm:$0xff]   ;;  %v10068_v24 = vld [vmem:[%s13747_s6 + $0xe94] ss:$8 sps:$4 sm:$0xff]  }
 0x3ab   : > { %v13477_v4 = vadd.f32 %v7156_v61, %v7116_v58  ;;  %7410 = vmatpush1.bf16.msra.mxu0 %v9988_v5  ;;  %v10060_v5 = vld [vmem:[%s13747_s6 + $0xea0] ss:$8 sps:$4 sm:$0xff]   ;;  %v10066_v58 = vld [vmem:[%s13747_s6 + $0xe90] ss:$8 sps:$4 sm:$0xff]   ;;  %v10077_v61 = vld [vmem:[%s13747_s6 + $0xf84] ss:$8 sps:$4 sm:$0xff]  }
 0x3ac   : > { %v7118_v62 = vpop.f32.mrf.mxu0  ;;  %v7158_v6 = vpop.f32.mrf.mxu1  ;;  %7411 = vmatprep.subr.bf16.mxu0 %v9996_v7  ;;  %v10063_v9 = vld [vmem:[%s13747_s6 + $0xfa0] ss:$8 sps:$4 sm:$0xff]   ;;  %v10071_v7 = vld [vmem:[%s13747_s6 + $0xf94] ss:$8 sps:$4 sm:$0xff]   ;;  %v10069_v52 = vld [vmem:[%s13747_s6 + $0xf90] ss:$8 sps:$4 sm:$0xff]  }
 0x3ad   : > { %7451 = vmatpush1.bf16.msra.mxu1 %v9991_v21  ;;  %v10074_v21 = vld [vmem:[%s13747_s6 + $0xe84] ss:$8 sps:$4 sm:$0xff]   ;;  %v4211_v62 = vrot.slane %v13421_v0, %v10944_v23  ;;  %v10078_v6 = vld [vmem:[%s13749_s8 + $0x38] sm:$0xff]   ;;  %v10079_v0 = vld [vmem:[%s13749_s8 + $0x30] sm:$0xff]  }
 0x3ae   : > { %v7159_v51 = vpop.f32.mrf.mxu1  ;;  %7452 = vmatprep.subr.bf16.mxu1 %v9999_v17  ;;  %v10072_v17 = vld [vmem:[%s13747_s6 + $0xe80] ss:$8 sps:$4 sm:$0xff]  }
 0x3af   : > { %7412 = vmatpush1.bf16.msra.mxu0 %v9994_v57  ;;  %v10075_v57 = vld [vmem:[%s13747_s6 + $0xf80] ss:$8 sps:$4 sm:$0xff]  }
 0x3b0   : > { %7413 = vmatprep.subr.bf16.mxu0 %v10002_v16 }
 0x3b1   : > { %7453 = vmatpush1.bf16.msra.mxu1 %v9997_v15  ;;  %v4227_v15 = vcombine.high %v4211_v62, %v4211_v62 }
 0x3b2   : > { %7454 = vmatprep.subr.bf16.mxu1 %v10005_v13 }
 0x3b3   : > { %7414 = vmatpush1.bf16.msra.mxu0 %v10000_v3 }
 0x3b4   : > { %7415 = vmatprep.subr.bf16.mxu0 %v10008_v1 }
 0x3b5   : > { %7455 = vmatpush1.bf16.msra.mxu1 %v10003_v18  ;;  %v1918_v18 = vrot.slane %v12505_v41, 4 }
 0x3b6   : > { %7456 = vmatprep.subr.bf16.mxu1 %v10011_v31 }
 0x3b7   : > { %7416 = vmatpush1.bf16.msra.mxu0 %v10006_v55 }
 0x3b8   : > { %7417 = vmatprep.subr.bf16.mxu0 %v10014_v29 }
 0x3b9   : > { %7457 = vmatpush1.bf16.msra.mxu1 %v10009_v50 }
 0x3ba   : > { %7458 = vmatprep.subr.bf16.mxu1 %v10017_v54  ;;  %v1919_v54 = vadd.f32 %v1918_v18, %v12505_v41  ;;  %v10081_v41 = vld [vmem:[%s13749_s8 + $0x20] sm:$0xff]  }
 0x3bb   : > { %7418 = vmatpush1.bf16.msra.mxu0 %v10012_v33 }
 0x3bc   : > { %7419 = vmatprep.subr.bf16.mxu0 %v10020_v36  ;;  %v10086_v36 = vld [vmem:[%s13750_s9 + $0x78] sm:$0xff]  }
 0x3bd   : > { %7459 = vmatpush1.bf16.msra.mxu1 %v10015_v38  ;;  %v10087_v38 = vld [vmem:[%s13750_s9 + $0x38] sm:$0xff]  }
 0x3be   : > { %7460 = vmatprep.subr.bf16.mxu1 %v10023_v20  ;;  %v10088_v20 = vld [vmem:[%s13750_s9 + $0x70] sm:$0xff]  }
 0x3bf   : > { %7420 = vmatpush1.bf16.msra.mxu0 %v10018_v56  ;;  %v10089_v56 = vld [vmem:[%s13750_s9 + $0x30] sm:$0xff]  }
 0x3c0   : > { %7421 = vmatprep.subr.bf16.mxu0 %v10026_v44  ;;  %v1920_v44 = vrot.slane %v1919_v54, 2 }
 0x3c1   : > { %7461 = vmatpush1.bf16.msra.mxu1 %v10021_v53  ;;  %v10090_v53 = vld [vmem:[%s13750_s9 + $0x68] sm:$0xff]  }
 0x3c2   : > { %7462 = vmatprep.subr.bf16.mxu1 %v10029_v27  ;;  %v10082_v27 = vld [vmem:[%s13749_s8 + $0x18] sm:$0xff]  }
 0x3c3   : > { %7422 = vmatpush1.bf16.msra.mxu0 %v10024_v35  ;;  %v10091_v35 = vld [vmem:[%s13750_s9 + $0x28] sm:$0xff]  }
 0x3c4   : > { %7423 = vmatprep.subr.bf16.mxu0 %v10032_v26  ;;  %v1921_v26 = vadd.f32 %v1920_v44, %v1919_v54 }
 0x3c5   : > { %7463 = vmatpush1.bf16.msra.mxu1 %v10027_v43  ;;  %v10092_v43 = vld [vmem:[%s13750_s9 + $0x60] sm:$0xff]  }
 0x3c6   : > { %7464 = vmatprep.subr.bf16.mxu1 %v10035_v8  ;;  %v10083_v8 = vld [vmem:[%s13749_s8 + $0x10] sm:$0xff]  }
 0x3c7   : > { %7424 = vmatpush2.bf16.msra.mxu0 %v10030_v30  ;;  %v10093_v30 = vld [vmem:[%s13750_s9 + $0x20] sm:$0xff]  }
 0x3c8   : > { %7425 = vmatprep.subr.bf16.mxu0 %v10038_v32  ;;  %v1922_v32 = vrot.slane %v1921_v26, 1 }
 0x3c9   : > { %7465 = vmatpush2.bf16.msra.mxu1 %v10033_v40  ;;  %v10094_v40 = vld [vmem:[%s13750_s9 + $0x58] sm:$0xff]  }
 0x3ca   : > { %7466 = vmatprep.subr.bf16.mxu1 %v10041_v22  ;;  %v10084_v22 = vld [vmem:[%s13749_s8 + $0x8] sm:$0xff]  }
 0x3cb   : > { %7426 = vmatpush2.bf16.msra.mxu0 %v10036_v37  ;;  %v10095_v37 = vld [vmem:[%s13750_s9 + $0x18] sm:$0xff]  }
 0x3cc   : > { %7427 = vmatprep.subr.bf16.mxu0 %v10044_v46  ;;  %v1923_v46 = vadd.f32 %v1922_v32, %v1921_v26 }
 0x3cd   : > { %7467 = vmatpush2.bf16.msra.mxu1 %v10039_v25  ;;  %v10085_v25 = vld [vmem:[%s13749_s8] sm:$0xff]  }
 0x3ce   : > { %7468 = vmatprep.subr.bf16.mxu1 %v10047_v11  ;;  %v1924_v11 = vmul.f32 0.0051020407, %v1923_v46 }
 0x3cf   : > { %7428 = vmatpush2.bf16.msra.mxu0 %v10042_v63 }
 0x3d0   : > { %7429 = vmatprep.subr.bf16.mxu0 %v10050_v34  ;;  %v7491_v63 = vpack.c.bf16 %v1924_v11, %v1924_v11 }
 0x3d1   : > { %7469 = vmatpush2.bf16.msra.mxu1 %v10045_v2 }
 0x3d2   : > { %7470 = vmatprep.subr.bf16.mxu1 %v10053_v42  ;;  %v10096_v42 = vld [vmem:[%s13750_s9 + $0x50] sm:$0xff]  }
 0x3d3   : > { %7430 = vmatpush2.bf16.msra.mxu0 %v10048_v59  ;;  %v10097_v59 = vld [vmem:[%s13750_s9 + $0x10] sm:$0xff]  }
 0x3d4   : > { %7431 = vmatprep.subr.bf16.mxu0 %v10056_v10 }
 0x3d5   : > { %7471 = vmatpush2.bf16.msra.mxu1 %v10051_v19 }
 0x3d6   : > { %7472 = vmatprep.subr.bf16.mxu1 %v10059_v28 }
 0x3d7   : > { %7432 = vmatpush2.bf16.msra.mxu0 %v10054_v45 }
 0x3d8   : > { %7433 = vmatprep.subr.bf16.mxu0 %v10062_v49 }
 0x3d9   : > { %7473 = vmatpush2.bf16.msra.mxu1 %v10057_v60 }
 0x3da   : > { %7474 = vmatprep.subr.bf16.mxu1 %v10065_v39 }
 0x3db   : > { %7434 = vmatpush2.bf16.msra.mxu0 %v10060_v5 }
 0x3dc   : > { %7435 = vmatprep.subr.bf16.mxu0 %v10068_v24 }
 0x3dd   : > { %7475 = vmatpush2.bf16.msra.mxu1 %v10063_v9  ;;  %v10098_v9 = vld [vmem:[%s13750_s9 + $0x48] sm:$0xff]  }
 0x3de   : > { %7476 = vmatprep.subr.bf16.mxu1 %v10071_v7  ;;  %v10099_v7 = vld [vmem:[%s13750_s9 + $0x8] sm:$0xff]  }
 0x3df   : > { %7436 = vmatpush2.bf16.msra.mxu0 %v10066_v58  ;;  %v10100_v58 = vld [vmem:[%s13750_s9 + $0x40] sm:$0xff]  }
 0x3e0   : > { %7437 = vmatprep.subr.bf16.mxu0 %v10074_v21  ;;  %v10101_v21 = vld [vmem:[%s13750_s9] sm:$0xff]  }
 0x3e1   : > { %7477 = vmatpush2.bf16.msra.mxu1 %v10069_v52 }
 0x3e2   : > { %7478 = vmatprep.subr.bf16.mxu1 %v10077_v61 }
 0x3e3   : > { %7438 = vmatpush2.bf16.msra.mxu0 %v10072_v17 }
 0x3e4   : > { %9004 = vmatprep.subr.bf16.mxu0 %v10086_v36 }
 0x3e5   : > { %7479 = vmatpush2.bf16.msra.mxu1 %v10075_v57 }
 0x3e6   : > { %v7195_v16 = vpop.f32.mrf.mxu0  ;;  %7440 = vmatmul.mubr.bf16.vlgmr.msra.gmra.mxu0 %v4211_v62  ;;  %9103 = vmatprep.subr.bf16.mxu1 %v10126_v48 }
 0x3e7   : > { %v7196_v51 = vadd.f32 %v7195_v16, %v13469_v12  ;;  %9005 = vmatpush3.bf16.msra.mxu0 %v10087_v38 }
 0x3e8   : > { %v7197_v13 = vpop.f32.mrf.mxu0  ;;  %v7236_v3 = vpop.f32.mrf.mxu1  ;;  %7481 = vmatmul.mubr.bf16.vlgmr.msra.gmra.mxu1 %v4227_v15  ;;  %9006 = vmatprep.subr.bf16.mxu0 %v10088_v20 }
 0x3e9   : > { %v7198_v1 = vadd.f32 %v7197_v13, %v13477_v4  ;;  %v7237_v23 = vadd.f32 %v7236_v3, %v7196_v51  ;;  %9104 = vmatpush3.bf16.msra.mxu1 %v10078_v6  ;;  %9119 = vmatprep.mubr.msk.bf16.mxu1 %vm10127_vm0, %v10126_v48  ;;  %v10080_v4 = vld [vmem:[%s13749_s8 + $0x28] sm:$0xff]  }
 0x3ea   : > { %v7199_v31 = vpop.f32.mrf.mxu0  ;;  %v7238_v55 = vpop.f32.mrf.mxu1  ;;  %9105 = vmatprep.subr.bf16.mxu1 %v10126_v48 }
 0x3eb   : > { %v7239_v12 = vadd.f32 %v7238_v55, %v7198_v1  ;;  %9007 = vmatpush3.bf16.msra.mxu0 %v10089_v56 }
 0x3ec   : > { %v7200_v29 = vpop.f32.mrf.mxu0  ;;  %v7240_v50 = vpop.f32.mrf.mxu1  ;;  %9008 = vmatprep.subr.bf16.mxu0 %v10090_v53 }
 0x3ed   : > { %9106 = vmatpush3.bf16.msra.mxu1 %v10079_v0 }
 0x3ee   : > { %v7241_v33 = vpop.f32.mrf.mxu1  ;;  %9107 = vmatprep.subr.bf16.mxu1 %v10126_v48 }
 0x3ef   : > { %9009 = vmatpush3.bf16.msra.mxu0 %v10091_v35 }
 0x3f0   : > { %9010 = vmatprep.subr.bf16.mxu0 %v10092_v43 }
 0x3f1   : > { %9108 = vmatpush3.bf16.msra.mxu1 %v10080_v4 }
 0x3f2   : > { %9109 = vmatprep.subr.bf16.mxu1 %v10126_v48 }
 0x3f3   : > { %9011 = vmatpush3.bf16.msra.mxu0 %v10093_v30  ;;  %v7766_v30 = vld [vmem:[%s13751_s10] sm:$0x1] }
 0x3f4   : > { %9012 = vmatprep.subr.bf16.mxu0 %v10094_v40 }
 0x3f5   : > { %9110 = vmatpush3.bf16.msra.mxu1 %v10081_v41 }
 0x3f6   : > { %9111 = vmatprep.subr.bf16.mxu1 %v10126_v48 }
 0x3f7   : > { %9013 = vmatpush3.bf16.msra.mxu0 %v10095_v37 }
 0x3f8   : > { %9014 = vmatprep.subr.bf16.mxu0 %v10096_v42 }
 0x3f9   : > { %9112 = vmatpush3.bf16.msra.mxu1 %v10082_v27 }
 0x3fa   : > { %9113 = vmatprep.subr.bf16.mxu1 %v10126_v48 }
 0x3fb   : > { %9015 = vmatpush3.bf16.msra.mxu0 %v10097_v59 }
 0x3fc   : > { %9016 = vmatprep.subr.bf16.mxu0 %v10098_v9 }
 0x3fd   : > { %9114 = vmatpush3.bf16.msra.mxu1 %v10083_v8 }
 0x3fe   : > { %9115 = vmatprep.subr.bf16.mxu1 %v10126_v48 }
 0x3ff   : > { %9017 = vmatpush3.bf16.msra.mxu0 %v10099_v7 }
 0x400   : > { %9018 = vmatprep.subr.bf16.mxu0 %v10100_v58 }
 0x401   : > { %9116 = vmatpush3.bf16.msra.mxu1 %v10084_v22 }
 0x402   : > { %9117 = vmatprep.subr.bf16.mxu1 %v10126_v48 }
 0x403   : > { %9019 = vmatpush3.bf16.msra.mxu0 %v10101_v21 }
 0x405   : > { %9118 = vmatpush3.bf16.msra.mxu1 %v10085_v25 }
 0x408   : > { %9120 = vmatmul.mubr.bf16.vlgmr.msra.gmra.mxu1 %v7491_v63 }
 0x426   : > { %v7277_v34 = vpop.f32.mrf.mxu0 }
 0x427   : > { %v7278_v2 = vadd.f32 %v7277_v34, %v7237_v23 }
 0x428   : > { %v7279_v10 = vpop.f32.mrf.mxu0  ;;  %v7318_v19 = vpop.f32.mrf.mxu1 }
 0x429   : > { %v7280_v28 = vadd.f32 %v7279_v10, %v7239_v12  ;;  %v7319_v45 = vadd.f32 %v7318_v19, %v7278_v2 }
 0x42a   : > { %v7281_v49 = vpop.f32.mrf.mxu0  ;;  %v7320_v48 = vpop.f32.mrf.mxu1 }
 0x42b   : > { %v7321_v60 = vadd.f32 %v7320_v48, %v7280_v28 }
 0x42c   : > { %v7282_v39 = vpop.f32.mrf.mxu0  ;;  %v7322_v5 = vpop.f32.mrf.mxu1 }
 0x42e   : > { %v7323_v24 = vpop.f32.mrf.mxu1 }
 0x466   : > { %v7359_v52 = vpop.f32.mrf.mxu0 }
 0x467   : > { %v7360_v51 = vadd.f32 %v7359_v52, %v7319_v45 }
 0x468   : > { %v7361_v61 = vpop.f32.mrf.mxu0  ;;  %v7400_v17 = vpop.f32.mrf.mxu1 }
 0x469   : > { %v7362_v13 = vadd.f32 %v7361_v61, %v7321_v60  ;;  %v7401_v3 = vadd.f32 %v7400_v17, %v7360_v51 }
 0x46a   : > { %v7363_v57 = vpop.f32.mrf.mxu0  ;;  %v7402_v62 = vpop.f32.mrf.mxu1 }
 0x46b   : > { %v7403_v23 = vadd.f32 %v7402_v62, %v7362_v13 }
 0x46c   : > { %v7364_v6 = vpop.f32.mrf.mxu0  ;;  %v7404_v16 = vpop.f32.mrf.mxu1 }
 0x46e   : > { %v7405_v15 = vpop.f32.mrf.mxu1 }
 0x4a6   : > { %v7441_v1 = vpop.f32.mrf.mxu0 }
 0x4a7   : > { %v7442_v0 = vadd.f32 %v7441_v1, %v7401_v3 }
 0x4a8   : > { %v7443_v18 = vpop.f32.mrf.mxu0  ;;  %v7482_v31 = vpop.f32.mrf.mxu1 }
 0x4a9   : > { %v7444_v55 = vadd.f32 %v7443_v18, %v7403_v23  ;;  %v7483_v12 = vadd.f32 %v7482_v31, %v7442_v0 }
 0x4aa   : > { %v7445_v29 = vpop.f32.mrf.mxu0  ;;  %v7484_v50 = vpop.f32.mrf.mxu1 }
 0x4ab   : > { %v7485_v4 = vadd.f32 %v7484_v50, %v7444_v55  ;;  %v7489_v54 = vmax.f32 %v7483_v12, 0.0 }
 0x4ac   : > { %v7446_v33 = vpop.f32.mrf.mxu0  ;;  %v7486_v36 = vpop.f32.mrf.mxu1 }
 0x4ad   : > { %v7490_v38 = vmax.f32 %v7485_v4, 0.0  ;;  %v7508_v56 = vpack.c.bf16 %v7489_v54, %v7489_v54 }
 0x4ae   : > { %v7487_v20 = vpop.f32.mrf.mxu1 }
 0x4af   : > { %v7509_v41 = vpack.c.bf16 %v7490_v38, %v7490_v38 }
 0x4b1   : > { %7670 = vmatprep.mubr.bf16.mxu0 %v7509_v41 }
 0x4b2   : > { %7671 = vmatmul.mubr.bf16.vlgmr.msra.gmra.mxu0 %v7508_v56 }
 0x4c8   : > { %v7760_v44 = vpop.f32.mrf.mxu1 }
 0x4ca   : > { %v9121_v53 = vpop.f32.mrf.mxu1 }
 0x4cc   : > { %v7763_v27 = vpop.f32.mrf.mxu1 }
 0x4ce   : > { %v9122_v35 = vpop.f32.mrf.mxu1 }
 0x572   : > { %v9020_v26 = vpop.f32.mrf.mxu0 }
 0x574   : > { %v9021_v43 = vpop.f32.mrf.mxu0 }
 0x575   : > { %v9022_v8 = vadd.f32 %v9021_v43, %v9020_v26 }
 0x576   : > { %v9023_v32 = vpop.f32.mrf.mxu0 }
 0x577   : > { %v7761_v40 = vadd.f32 %v9022_v8, %v7760_v44 }
 0x578   : > { %v9024_v22 = vpop.f32.mrf.mxu0 }
 0x579   : > { %v7767_v37 = vadd.f32 %v7766_v30, %v7761_v40 }
 0x57b   : > { %v7771_v46 = vrot.slane %v7767_v37, %v6825_v14 }
 0x57d   : > { %7772 = vst [vmem:[%s364_s17] sm:$0xff] %v7771_v46 }
 0x57e PF: > { %s27_s22 = sadd.s32 1, %s10123_s22  }
 0x57f   : > { %p24_p9 = scmp.ge.s32.totalorder %s27_s22, 4  }
 0x581   :  { %26 = sbr.rel (!%p24_p9) target bundleno = 16 (0x10), region = 111 }

</bundles_post_ra>
